<compile_context>
chip_gen: v6e
topology: v6e:2x2x1
jax: 0.10.0
libtpu: 0.0.40
codegen_flags: <defaults>
</compile_context>

<pallas_src>
import jax
import jax.numpy as jnp
from jax import lax
from jax.experimental import pallas as pl
from jax.experimental.pallas import tpu as pltpu

IN_FEATURES = 1024
OUT_FEATURES = 4

# Below this batch size, a plain XLA GEMV beats the pallas_call fixed overhead.
_MIN_PALLAS_BATCH = 512


def _round_up(n, m):
    return ((n + m - 1) // m) * m


def _pick_tile_rows():
    """Max batch-tile rows, sized to the generation's scoped-VMEM default."""
    try:
        kind = jax.devices()[0].device_kind.lower()
    except Exception:
        kind = ""
    # v2/v3/v4/v5*: 16 MiB scoped-VMEM default -> 4 MiB x tiles (8 MiB dbl-buf).
    if any(tag in kind for tag in ("v2", "v3", "v4", "v5")):
        return 1024
    # v6e / v7x: 32 MiB scoped default -> 8 MiB x tiles (16 MiB dbl-buf).
    return 2048


def _linear_kernel(x_ref, w_ref, b_ref, o_ref):
    # x_ref: (TB, 1024), w_ref: (4, 1024) lane-dense, b_ref: (4, 1), o_ref: (4, TB)
    acc = lax.dot_general(
        w_ref[...],
        x_ref[...],
        dimension_numbers=(((1,), (1,)), ((), ())),  # contract the 1024 axis of both
        preferred_element_type=jnp.float32,
    )  # -> (4, TB) == (x @ W^T)^T for this tile, lane-dense on TPU
    o_ref[...] = (acc + b_ref[...]).astype(o_ref.dtype)


def regression_forward(x, w, b):
    """Forward pass of Regression (nn.Linear(1024, 4)).

    x: (B, 1024) f32
    w: (4, 1024) f32  (PyTorch Linear weight layout; lane-dense on TPU)
    b: (4,)      f32
    returns (B, 4) f32
    """
    B = x.shape[0]

    # Small-batch fast path: launch overhead dominates, let XLA do the GEMV.
    if B < _MIN_PALLAS_BATCH:
        return x @ w.T + b.reshape(1, OUT_FEATURES)

    # Only pad (and copy) if B is not sublane-aligned; pad is <= 7 rows.
    Bp = _round_up(B, 8)
    x_p = jnp.pad(x, ((0, Bp - B), (0, 0))) if Bp != B else x

    # Large tile (multiple of 128 so the lane-dense output block stays aligned),
    # capped to the batch so a single ragged step doesn't over-allocate VMEM.
    tb = min(_pick_tile_rows(), _round_up(Bp, 128))
    grid = (pl.cdiv(Bp, tb),)

    b2 = b.reshape(OUT_FEATURES, 1)

    cost = pl.CostEstimate(
        flops=2 * B * IN_FEATURES * OUT_FEATURES,
        transcendentals=0,
        bytes_accessed=4 * (B * IN_FEATURES          # read x
                            + OUT_FEATURES * IN_FEATURES  # read W
                            + OUT_FEATURES                # read b
                            + B * OUT_FEATURES),          # write y
    )

    out_t = pl.pallas_call(
        _linear_kernel,
        out_shape=jax.ShapeDtypeStruct((OUT_FEATURES, Bp), x.dtype),
        grid_spec=pltpu.PrefetchScalarGridSpec(
            num_scalar_prefetch=0,
            grid=grid,
            in_specs=[
                # x: one batch tile per grid step (double-buffered by Pallas).
                pl.BlockSpec((tb, IN_FEATURES), lambda i: (i, 0)),
                # weight / bias: same block every step -> stay resident in VMEM.
                pl.BlockSpec((OUT_FEATURES, IN_FEATURES), lambda i: (0, 0)),
                pl.BlockSpec((OUT_FEATURES, 1), lambda i: (0, 0)),
            ],
            # Lane-dense (4, TB) output blocks -> unmasked dense stores.
            out_specs=pl.BlockSpec((OUT_FEATURES, tb), lambda i: (0, i)),
        ),
        compiler_params=pltpu.CompilerParams(
            # Batch tiles are independent -> megacore / dual-TC may split them.
            dimension_semantics=("parallel",),
        ),
        cost_estimate=cost,
    )(x_p, w, b2)

    # Tiny (4, B) -> (B, 4) transpose in the wrapper (negligible vs. x traffic).
    out_t = out_t[:, :B] if Bp != B else out_t
    return out_t.T


if __name__ == "__main__":
    key = jax.random.PRNGKey(0)
    k_x, k_w, k_b, k_x2 = jax.random.split(key, 4)

    # Deterministic parameter init (PyTorch Linear uses U(-1/sqrt(1024), 1/sqrt(1024))).
    bound = 1.0 / jnp.sqrt(float(IN_FEATURES))
    w = jax.random.uniform(k_w, (OUT_FEATURES, IN_FEATURES),
                           minval=-bound, maxval=bound, dtype=jnp.float32)
    b = jax.random.uniform(k_b, (OUT_FEATURES,),
                           minval=-bound, maxval=bound, dtype=jnp.float32)

    # Small demo batch consistent with the module: (B, 1024) -> (B, 4).
    B = 2
    x = jax.random.normal(k_x, (B, IN_FEATURES), dtype=jnp.float32)
    y = regression_forward(x, w, b)
    jax.block_until_ready(y)
    y_ref = x @ w.T + b
    assert y.shape == (B, OUT_FEATURES)
    assert jnp.allclose(y, y_ref, atol=1e-5, rtol=1e-5)

    # Larger batch that exercises the Pallas path: multiple grid steps plus a
    # ragged last tile, with no wrapper-side padding (2600 is a multiple of 8).
    B2 = 2600
    x2 = jax.random.normal(k_x2, (B2, IN_FEATURES), dtype=jnp.float32)
    y2 = regression_forward(x2, w, b)
    jax.block_until_ready(y2)
    y2_ref = x2 @ w.T + b
    assert y2.shape == (B2, OUT_FEATURES)
    assert jnp.allclose(y2, y2_ref, atol=1e-4, rtol=1e-5)

    print("KERNEL_OK")
</pallas_src>

<mosaic_0001>
module attributes {stable_mosaic.version = 11 : i64} {
  func.func @_linear_kernel(%arg0: i32, %arg1: memref<2048x1024xf32, #tpu.memory_space<vmem>>, %arg2: memref<4x1024xf32, #tpu.memory_space<vmem>>, %arg3: memref<4x1xf32, #tpu.memory_space<vmem>>, %arg4: memref<4x2048xf32, #tpu.memory_space<vmem>>) attributes {dimension_semantics = [#tpu.dimension_semantics<parallel>], iteration_bounds = array<i64: 2>, scalar_prefetch = 0 : i64, scratch_operands = 0 : i64, tpu.core_type = #tpu.core_type<tc>, window_params = [{transform_indices = @transform_0, window_bounds = array<i64: 2048, 1024>}, {pipeline_mode = #tpu.pipeline_mode<synchronous>, transform_indices = @transform_1, window_bounds = array<i64: 4, 1024>}, {pipeline_mode = #tpu.pipeline_mode<synchronous>, transform_indices = @transform_2, window_bounds = array<i64: 4, 1>}, {transform_indices = @transform_3, window_bounds = array<i64: 4, 2048>}]} {
    %c0 = arith.constant 0 : index
    %c0_0 = arith.constant 0 : index
    %0 = vector.load %arg2[%c0, %c0_0] : memref<4x1024xf32, #tpu.memory_space<vmem>>, vector<4x1024xf32>
    %c0_1 = arith.constant 0 : index
    %c0_2 = arith.constant 0 : index
    %1 = vector.load %arg1[%c0_1, %c0_2] : memref<2048x1024xf32, #tpu.memory_space<vmem>>, vector<2048x1024xf32>
    %cst = arith.constant dense<0.000000e+00> : vector<4x2048xf32>
    %2 = tpu.matmul %0, %1, %cst {dimension_numbers = #tpu.dot_dimension_numbers<[1], [1], [0], [0], [0, 0, 1, 0], [], []>} : vector<4x1024xf32>, vector<2048x1024xf32>, vector<4x2048xf32> -> vector<4x2048xf32>
    %c0_3 = arith.constant 0 : index
    %c0_4 = arith.constant 0 : index
    %3 = vector.load %arg3[%c0_3, %c0_4] : memref<4x1xf32, #tpu.memory_space<vmem>>, vector<4x1xf32>
    %4 = vector.broadcast %3 : vector<4x1xf32> to vector<4x2048xf32>
    %5 = arith.addf %2, %4 : vector<4x2048xf32>
    %c0_5 = arith.constant 0 : index
    %c0_6 = arith.constant 0 : index
    %6 = vector.load %arg4[%c0_5, %c0_6] : memref<4x2048xf32, #tpu.memory_space<vmem>>, vector<4x2048xf32>
    tpu.vector_store %arg4[%c0_5, %c0_6], %5 {strides = array<i32>} : memref<4x2048xf32, #tpu.memory_space<vmem>>, vector<4x2048xf32>,
    return
  }
  func.func @transform_0(%arg0: i32) -> (i32, i32) {
    %c0_i32 = arith.constant 0 : i32
    %c0_i32_0 = arith.constant 0 : i32
    return %arg0, %c0_i32 : i32, i32
  }
  func.func @transform_1(%arg0: i32) -> (i32, i32) {
    %c0_i32 = arith.constant 0 : i32
    %c0_i32_0 = arith.constant 0 : i32
    %c0_i32_1 = arith.constant 0 : i32
    return %c0_i32, %c0_i32_0 : i32, i32
  }
  func.func @transform_2(%arg0: i32) -> (i32, i32) {
    %c0_i32 = arith.constant 0 : i32
    %c0_i32_0 = arith.constant 0 : i32
    %c0_i32_1 = arith.constant 0 : i32
    return %c0_i32, %c0_i32_0 : i32, i32
  }
  func.func @transform_3(%arg0: i32) -> (i32, i32) {
    %c0_i32 = arith.constant 0 : i32
    %c0_i32_0 = arith.constant 0 : i32
    return %c0_i32, %arg0 : i32, i32
  }
}

</mosaic_0001>

<bundles_post_ra>
// kernel: tpu_custom_call.1
= control target key start
LH: loop header
LB: loop body
LE: loop exit
PB: predicated region body
PF: predicated region fallthrough
CT: control target
= control target key end

     0   :  { %8 = vsyncpa [#allocation3], 0  ;;  %s7292_s0 = inlined_call_operand.hbm [shape: f32[2600,1024], index: 0, kind: input, shape index: {}]   ;;  %s7293_s1 = inlined_call_operand.hbm [shape: f32[4,1024], index: 1, kind: input, shape index: {}]   ;;  %s7294_s2 = inlined_call_operand.vmem [shape: f32[4,1], index: 2, kind: input, shape index: {}]   ;;  %s7295_s3 = inlined_call_operand.hbm [shape: f32[4,2600], index: 3, kind: output, shape index: {}]  }
   0x1   :  { %10 = vsyncpa [#allocation3 + $0x1], 0 }
   0x2   :  { %11 = vsyncpa [#allocation6], 0 }
   0x3   :  { %12 = vsyncpa [#allocation4], 0 }
   0x4   :  { %14 = vsyncpa [#allocation4 + $0x1], 0  ;;  %s4968_s12 = smov 0   ;;  %s4970_s13 = smov 0  }
   0x5   :  { %s4972_s14 = smov 0   ;;  %s4974_s15 = smov 0  }
   0x6 LB: > { %s4989_s16 = sadd.s32 4294967295, %s4940_s15   ;;  %s4704_s17 = sadd.s32 4294967294, %s4940_s15   ;;  %s4940_s15 = sphi %s4974_s15, %s7310_s15   ;;  %s4936_s14 = sphi %s4972_s14, %s7309_s14   ;;  %s4932_s13 = sphi %s4970_s13, %s7308_s13   ;;  %s4928_s12 = sphi %s4968_s12, %s7307_s12  }
   0x7   : > { %s4993_s18 = sadd.s32 1, %s4940_s15   ;;  %s27_s19 = sadd.s32 1, %s4936_s14 }
   0x8   : > { %s24_s20 = ssub.s32 %s4940_s15, %s4993_s18  ;;  %p34_p0 = scmp.ne.s32.totalorder %s4936_s14, %s4932_s13 }
   0x9   : > { %p25_p1 = scmp.eq.s32.totalorder %s24_s20, 0  ;;  %p35_p2 = scmp.eq.s32.totalorder %s4940_s15, 0 }
   0xa   : > { %p40_p3 = scmp.ne.s32.totalorder %s4932_s13, %s4928_s12  ;;  %p41_p4 = scmp.eq.s32.totalorder %s4989_s16, 0 }
   0xb   : > { %s5005_s21 = scalar_select %p25_p1, %s4936_s14, %s27_s19  }
   0xc   : > { %p5007_p5 = por %p35_p2, %p34_p0  ;;  %p5013_p6 = por %p41_p4, %p40_p3 }
   0xd   : > { %p106_p7 = scmp.eq.s32.totalorder %s4989_s16, 1  ;;  %p112_p8 = scmp.eq.s32.totalorder %s4704_s17, 1 }
   0xe   : > { %s7299_s23 = scalar_select %p5013_p6, 1, 0 }
   0xf   : > { %p4705_p9 = scmp.ge.s32.totalorder %s4940_s15, 1  ;;  %p119_p10 = scmp.lt.s32.totalorder %s4940_s15, 3 }
  0x10   : > { %p5020_p11 = por %p106_p7, %p34_p0  ;;  %p5024_p12 = por %p112_p8, %p40_p3 }
  0x11   : > { %p5028_p13 = pnand %p4705_p9, %p119_p10  ;;  %s4942_s27 = smov [#allocation5]  }
  0x12   : > { %s7300_s24 = scalar_select %p5020_p11, 1, 0 }
  0x13   : > { %s7301_s25 = scalar_select %p5024_p12, 1, 0 }
  0x14   : > { %p4740_p1 = pneg %p5028_p13  ;;  %s132_s28 = sshll.u32 %s4942_s27, 4  ;;  %s133_s28 = int_to_ptr.vmem [resolvable:$true] %s132_s28 }
  0x15   : > { %s4831_s29 = scalar_lea.vmem %s133_s28, 512  ;;  %p4839_p8 = scmp.lt.s32.totalorder %s133_s28, %s133_s28 }
  0x16   : > { %p4741_p2 = pnand %p4740_p1, %p41_p4  ;;  %p4832_p7 = scmp.ne.s32.totalorder %s133_s28, %s4831_s29 }
  0x17   : > { %p4840_p6 = scmp.lt.s32.totalorder %s4831_s29, %s4831_s29 }
  0x18   : > { %p4822_p0 = pneg %p4741_p2 }
  0x19   : > { %p4841_p12 = por %p4840_p6, %p4839_p8 }
  0x1a   : > { %p4834_p11 = pnand %p4832_p7, %p4822_p0 }
  0x1c   : > { %p4835_p3 = pneg %p4834_p11 }
  0x1e   : > { %p4842_p9 = pnand %p4841_p12, %p4835_p3 }
  0x20   : > { %4845 = shalt.err (!%p4842_p9)
}
  0x21   : > { %4743 = dma.hbm_to_vmem [thread:$0]  (!%p4741_p2), %s7293_s1, 512, %s133_s28, [#allocation6]  }
  0x22   : > { %p7297_p10 = scmp.ge.s32.totalorder %s4940_s15, 2 }
  0x24   : > { %142 = sbr.rel (%p7297_p10) target bundleno = 73 (0x49), region = 24 }
  0x29   : > { %145 = sbr.rel (!%p5007_p5) target bundleno = 73 (0x49), region = 28  ;;  %s146_s5 = sand.u32 (%p5007_p5), 1, %s4936_s14  }
  0x2a   : > { %s4709_s6 = sshll.u32 (%p5007_p5), %s4940_s15, 8  ;;  %s4708_s7 = sshll.u32 (%p5007_p5), %s146_s5, 14 }
  0x2b   : > { %s152_s8 = ssub.s32 (%p5007_p5), 325, %s4709_s6  ;;  %s5049_s11 = scalar_lea.sflag (%p5007_p5), [#allocation3], %s146_s5 }
  0x2c   : > { %p153_p6 = scmp.lt.s32.totalorder (%p5007_p5), %s152_s8, 256  ;;  %s150_s17 = scalar_lea.vmem (%p5007_p5), [#allocation2], %s4708_s7 }
  0x2e   : > { %s7312_s8 = smov (!%p153_p6, %s152_s8), 256 }
  0x2f   : > { %s5046_s9 = sshll.u32 %s7312_s8, 10 }
  0x30   : > { %s158_s10 = ssub.s32 262144, %s5046_s9 }
  0x31   : > { %159 = vsyncadd %s5049_s11, %s158_s10  ;;  %p4712_p5 = scmp.ne.s32.totalorder %s5046_s9, 0  ;;  %s4732_s19 = sshll.u32 %s4940_s15, 18 }
  0x32   : > { %s5057_s27 = scalar_lea.hbm %s7292_s0, %s4732_s19  ;;  %s165_s28 = sshll.u32 %s150_s17, 4  ;;  %s5059_s28 = int_to_ptr.vmem [resolvable:$true] %s165_s28 }
  0x33   : > { %s4846_s29 = scalar_lea.hbm %s5057_s27, %s5046_s9  ;;  %s4850_s5 = scalar_lea.hbm %s7292_s0, 332800 }
  0x34   : > { %p4847_p11 = scmp.ne.s32.totalorder %s5057_s27, %s4846_s29  ;;  %p4851_p2 = scmp.lt.s32.totalorder %s5057_s27, %s7292_s0 }
  0x35   : > { %p4852_p0 = scmp.lt.s32.totalorder %s4850_s5, %s4846_s29 }
  0x36   : > { %p4848_p12 = pnand %p4847_p11, %p4712_p5 }
  0x37   : > { %p4853_p7 = por %p4852_p0, %p4851_p2 }
  0x38   : > { %p4849_p1 = pneg %p4848_p12 }
  0x3a   : > { %p4854_p3 = pnand %p4853_p7, %p4849_p1 }
  0x3c   : > { %4857 = shalt.err (!%p4854_p3)
}
  0x3d   : > { %s4858_s8 = scalar_lea.vmem %s5059_s28, %s5046_s9  ;;  %s4943_s10 = smov [#allocation2]  }
  0x3e   : > { %p4859_p8 = scmp.ne.s32.totalorder %s5059_s28, %s4858_s8  ;;  %s4862_s17 = sshll.u32 %s4943_s10, 4  ;;  %s4863_s17 = int_to_ptr.vmem [resolvable:$false] %s4862_s17 }
  0x3f   : > { %s4864_s19 = scalar_lea.vmem %s4863_s17, 524288  ;;  %p4865_p11 = scmp.lt.s32.totalorder %s5059_s28, %s4863_s17 }
  0x40   : > { %p4860_p9 = pnand %p4859_p8, %p4712_p5  ;;  %p4866_p12 = scmp.lt.s32.totalorder %s4864_s19, %s4858_s8 }
  0x42   : > { %p4861_p6 = pneg %p4860_p9  ;;  %p4867_p10 = por %p4866_p12, %p4865_p11 }
  0x44   : > { %p4868_p2 = pnand %p4867_p10, %p4861_p6 }
  0x46   : > { %4871 = shalt.err (!%p4868_p2)
}
  0x47   : > { %s4944_s20 = smov 1024   ;;  %s4945_s22 = smov 64  }
  0x48   : > { %171 = dma.hbm_to_vmem [thread:$0]  (%p4712_p5), %s5057_s27, %s5046_s9, %s5059_s28, %s5049_s11, %s4944_s20, %s4944_s20, %s4945_s22  }
  0x49 PF: > { %177 = sbr.rel (%p5028_p13) target bundleno = 2358 (0x936), region = 32  ;;  %s5088_s29 = sand.u32 (!%p5028_p13), 1, %s4932_s13  }
  0x4a   : > { %s4718_s30 = sshll.u32 (!%p5028_p13), %s5088_s29, 14  ;;  %s180_s4 = scalar_lea.sflag (!%p5028_p13), [#allocation3], %s5088_s29 }
  0x4b   : > { %s5092_s5 = scalar_lea.vmem (!%p5028_p13), [#allocation2], %s4718_s30  ;;  %p7303_p10 = scmp.ne.s32.totalorder (!%p5028_p13), %s7299_s23, 0 }
  0x4e   : > { %4915 = dma.done.wait (%p7303_p10), %s180_s4, 262144  }
  0x4f   : > { %4917 = vsyncadd (%p7303_p10), %s180_s4, 4294705152 }
  0x50   : > { %4919 = dma.done.wait (%p41_p4), [#allocation6], 512  }
  0x51   : > { %4921 = vsyncadd (%p41_p4), [#allocation6], 4294966784  ;;  %v346_v0 = vld [vmem:[%s5092_s5 + $0x3c8] sm:$0xff]  ;;  %v348_v1 = vld [vmem:[%s5092_s5 + $0x3d8] sm:$0xff]  ;;  %s4720_s9 = sshll.u32 %s5088_s29, 6  ;;  %s4604_s27 = scalar_lea.sflag [#allocation4], %s5088_s29 }
  0x52   : > { %v345_v2 = vld [vmem:[%s5092_s5 + $0x3c0] sm:$0xff]  ;;  %2291 = vmatprep.subr.mxu0 %v346_v0  ;;  %2362 = vmatprep.subr.mxu1 %v348_v1  ;;  %v347_v3 = vld [vmem:[%s5092_s5 + $0x3d0] sm:$0xff]  ;;  %v338_v4 = vld [vmem:[%s5092_s5 + $0x388] sm:$0xff]  ;;  %s5608_s11 = scalar_lea.vmem [#allocation7], %s4720_s9  ;;  %p7304_p4 = scmp.ne.s32.totalorder %s7300_s24, 0 }
  0x53   : > { %v340_v5 = vld [vmem:[%s5092_s5 + $0x398] sm:$0xff]  ;;  %2292 = vmatpush1.xpose.msra.mxu0 %v345_v2  ;;  %2363 = vmatpush1.xpose.msra.mxu1 %v347_v3  ;;  %v337_v6 = vld [vmem:[%s5092_s5 + $0x380] sm:$0xff]  ;;  %v339_v7 = vld [vmem:[%s5092_s5 + $0x390] sm:$0xff]  ;;  %s4722_s28 = sshll.u32 (%p7304_p4), %s4989_s16, 4 }
  0x54   : > { %2293 = vmatprep.subr.mxu0 %v338_v4  ;;  %2364 = vmatprep.subr.mxu1 %v340_v5  ;;  %v330_v8 = vld [vmem:[%s5092_s5 + $0x348] sm:$0xff]  ;;  %v332_v9 = vld [vmem:[%s5092_s5 + $0x358] sm:$0xff]  ;;  %v329_v10 = vld [vmem:[%s5092_s5 + $0x340] sm:$0xff]  ;;  %s4612_s6 = ssub.s32 (%p7304_p4), 21, %s4722_s28 }
  0x55   : > { %v331_v11 = vld [vmem:[%s5092_s5 + $0x350] sm:$0xff]  ;;  %v322_v12 = vld [vmem:[%s5092_s5 + $0x308] sm:$0xff]  ;;  %v324_v13 = vld [vmem:[%s5092_s5 + $0x318] sm:$0xff]  ;;  %p4613_p13 = scmp.lt.s32.totalorder (%p7304_p4), %s4612_s6, 16 }
  0x56   : > { %v321_v14 = vld [vmem:[%s5092_s5 + $0x300] sm:$0xff]  ;;  %v323_v15 = vld [vmem:[%s5092_s5 + $0x310] sm:$0xff]  ;;  %v314_v16 = vld [vmem:[%s5092_s5 + $0x2c8] sm:$0xff] }
  0x57   : > { %2294 = vmatpush1.xpose.msra.mxu0 %v337_v6  ;;  %2365 = vmatpush1.xpose.msra.mxu1 %v339_v7  ;;  %v316_v17 = vld [vmem:[%s5092_s5 + $0x2d8] sm:$0xff]  ;;  %v313_v18 = vld [vmem:[%s5092_s5 + $0x2c0] sm:$0xff]  ;;  %v315_v19 = vld [vmem:[%s5092_s5 + $0x2d0] sm:$0xff] }
  0x58   : > { %2295 = vmatprep.subr.mxu0 %v330_v8  ;;  %2366 = vmatprep.subr.mxu1 %v332_v9  ;;  %v306_v20 = vld [vmem:[%s5092_s5 + $0x288] sm:$0xff]  ;;  %v308_v21 = vld [vmem:[%s5092_s5 + $0x298] sm:$0xff]  ;;  %v305_v22 = vld [vmem:[%s5092_s5 + $0x280] sm:$0xff] }
  0x59   : > { %v307_v23 = vld [vmem:[%s5092_s5 + $0x290] sm:$0xff]  ;;  %v298_v24 = vld [vmem:[%s5092_s5 + $0x248] sm:$0xff]  ;;  %v300_v25 = vld [vmem:[%s5092_s5 + $0x258] sm:$0xff] }
  0x5a   : > { %v297_v26 = vld [vmem:[%s5092_s5 + $0x240] sm:$0xff]  ;;  %v299_v27 = vld [vmem:[%s5092_s5 + $0x250] sm:$0xff]  ;;  %v290_v28 = vld [vmem:[%s5092_s5 + $0x208] sm:$0xff] }
  0x5b   : > { %2296 = vmatpush1.xpose.msra.mxu0 %v329_v10  ;;  %2367 = vmatpush1.xpose.msra.mxu1 %v331_v11  ;;  %v292_v29 = vld [vmem:[%s5092_s5 + $0x218] sm:$0xff]  ;;  %v289_v30 = vld [vmem:[%s5092_s5 + $0x200] sm:$0xff]  ;;  %v291_v31 = vld [vmem:[%s5092_s5 + $0x210] sm:$0xff] }
  0x5c   : > { %2297 = vmatprep.subr.mxu0 %v322_v12  ;;  %2368 = vmatprep.subr.mxu1 %v324_v13  ;;  %v282_v32 = vld [vmem:[%s5092_s5 + $0x1c8] sm:$0xff]  ;;  %v284_v33 = vld [vmem:[%s5092_s5 + $0x1d8] sm:$0xff]  ;;  %v281_v34 = vld [vmem:[%s5092_s5 + $0x1c0] sm:$0xff] }
  0x5d   : > { %v283_v35 = vld [vmem:[%s5092_s5 + $0x1d0] sm:$0xff]  ;;  %v274_v36 = vld [vmem:[%s5092_s5 + $0x188] sm:$0xff]  ;;  %v276_v37 = vld [vmem:[%s5092_s5 + $0x198] sm:$0xff] }
  0x5e   : > { %v273_v38 = vld [vmem:[%s5092_s5 + $0x180] sm:$0xff]  ;;  %v275_v39 = vld [vmem:[%s5092_s5 + $0x190] sm:$0xff]  ;;  %v266_v40 = vld [vmem:[%s5092_s5 + $0x148] sm:$0xff] }
  0x5f   : > { %2298 = vmatpush1.xpose.msra.mxu0 %v321_v14  ;;  %2369 = vmatpush1.xpose.msra.mxu1 %v323_v15  ;;  %v268_v41 = vld [vmem:[%s5092_s5 + $0x158] sm:$0xff]  ;;  %v265_v42 = vld [vmem:[%s5092_s5 + $0x140] sm:$0xff]  ;;  %v267_v43 = vld [vmem:[%s5092_s5 + $0x150] sm:$0xff]  ;;  %v4946_v14 = vmov 0  }
  0x60   : > { %2299 = vmatprep.subr.mxu0 %v314_v16  ;;  %2370 = vmatprep.subr.mxu1 %v316_v17  ;;  %v258_v44 = vld [vmem:[%s5092_s5 + $0x108] sm:$0xff]  ;;  %v260_v45 = vld [vmem:[%s5092_s5 + $0x118] sm:$0xff]  ;;  %v5148_v46 = vld [vmem:[#allocation5] sm:$0xff] }
  0x61   : > { %v257_v47 = vld [vmem:[%s5092_s5 + $0x100] sm:$0xff]  ;;  %v259_v48 = vld [vmem:[%s5092_s5 + $0x110] sm:$0xff]  ;;  %v5154_v49 = vcombine.high %v5148_v46, %v5148_v46  ;;  %v5156_v50 = vld [vmem:[#allocation5 + $0x8] sm:$0xff]  ;;  %4787 = vset.pattern.permute.xlu0 %v4946_v14 }
  0x62   : > { %v250_v51 = vld [vmem:[%s5092_s5 + $0xc8] sm:$0xff]  ;;  %v252_v52 = vld [vmem:[%s5092_s5 + $0xd8] sm:$0xff]  ;;  %v5162_v53 = vcombine.high %v5156_v50, %v5156_v50  ;;  %v249_v54 = vld [vmem:[%s5092_s5 + $0xc0] sm:$0xff] }
  0x63   : > { %2300 = vmatpush1.xpose.msra.mxu0 %v313_v18  ;;  %2371 = vmatpush1.xpose.msra.mxu1 %v315_v19  ;;  %v251_v55 = vld [vmem:[%s5092_s5 + $0xd0] sm:$0xff]  ;;  %v242_v56 = vld [vmem:[%s5092_s5 + $0x88] sm:$0xff]  ;;  %v244_v57 = vld [vmem:[%s5092_s5 + $0x98] sm:$0xff] }
  0x64   : > { %2301 = vmatprep.subr.mxu0 %v306_v20  ;;  %2372 = vmatprep.subr.mxu1 %v308_v21  ;;  %v241_v58 = vld [vmem:[%s5092_s5 + $0x80] sm:$0xff]  ;;  %v243_v59 = vld [vmem:[%s5092_s5 + $0x90] sm:$0xff]  ;;  %v234_v60 = vld [vmem:[%s5092_s5 + $0x48] sm:$0xff] }
  0x65   : > { %2355 = vmatprep.mubr.f32.mxu0 %v5154_v49  ;;  %2426 = vmatprep.mubr.f32.mxu1 %v5162_v53  ;;  %v236_v61 = vld [vmem:[%s5092_s5 + $0x58] sm:$0xff]  ;;  %v233_v62 = vld [vmem:[%s5092_s5 + $0x40] sm:$0xff]  ;;  %v235_v63 = vld [vmem:[%s5092_s5 + $0x50] sm:$0xff] }
  0x66   : > { %v226_v0 = vld [vmem:[%s5092_s5 + $0x8] sm:$0xff]  ;;  %v228_v1 = vld [vmem:[%s5092_s5 + $0x18] sm:$0xff]  ;;  %v225_v2 = vld [vmem:[%s5092_s5] sm:$0xff] }
  0x67   : > { %2302 = vmatpush1.xpose.msra.mxu0 %v305_v22  ;;  %2373 = vmatpush1.xpose.msra.mxu1 %v307_v23  ;;  %v227_v3 = vld [vmem:[%s5092_s5 + $0x10] sm:$0xff]  ;;  %v474_v4 = vld [vmem:[%s5092_s5 + $0x7c8] sm:$0xff]  ;;  %v476_v5 = vld [vmem:[%s5092_s5 + $0x7d8] sm:$0xff] }
  0x68   : > { %2303 = vmatprep.subr.mxu0 %v298_v24  ;;  %2374 = vmatprep.subr.mxu1 %v300_v25  ;;  %v473_v6 = vld [vmem:[%s5092_s5 + $0x7c0] sm:$0xff]  ;;  %v475_v7 = vld [vmem:[%s5092_s5 + $0x7d0] sm:$0xff]  ;;  %v466_v8 = vld [vmem:[%s5092_s5 + $0x788] sm:$0xff] }
  0x69   : > { %v468_v9 = vld [vmem:[%s5092_s5 + $0x798] sm:$0xff]  ;;  %v465_v10 = vld [vmem:[%s5092_s5 + $0x780] sm:$0xff]  ;;  %v467_v11 = vld [vmem:[%s5092_s5 + $0x790] sm:$0xff] }
  0x6a   : > { %v458_v12 = vld [vmem:[%s5092_s5 + $0x748] sm:$0xff]  ;;  %v460_v13 = vld [vmem:[%s5092_s5 + $0x758] sm:$0xff]  ;;  %v2273_v15 = vld [vmem:[%s7294_s2] sm:$0xf] }
  0x6b   : > { %2304 = vmatpush1.xpose.msra.mxu0 %v297_v26  ;;  %2375 = vmatpush1.xpose.msra.mxu1 %v299_v27  ;;  %v457_v16 = vld [vmem:[%s5092_s5 + $0x740] sm:$0xff]  ;;  %v459_v17 = vld [vmem:[%s5092_s5 + $0x750] sm:$0xff]  ;;  %v450_v18 = vld [vmem:[%s5092_s5 + $0x708] sm:$0xff] }
  0x6c   : > { %2305 = vmatprep.subr.mxu0 %v290_v28  ;;  %2376 = vmatprep.subr.mxu1 %v292_v29  ;;  %v452_v19 = vld [vmem:[%s5092_s5 + $0x718] sm:$0xff]  ;;  %v449_v20 = vld [vmem:[%s5092_s5 + $0x700] sm:$0xff]  ;;  %v451_v21 = vld [vmem:[%s5092_s5 + $0x710] sm:$0xff] }
  0x6d   : > { %2276 = vperm.xlu0 %4787, %v2273_v15   ;;  %v442_v22 = vld [vmem:[%s5092_s5 + $0x6c8] sm:$0xff]  ;;  %v444_v23 = vld [vmem:[%s5092_s5 + $0x6d8] sm:$0xff]  ;;  %v441_v24 = vld [vmem:[%s5092_s5 + $0x6c0] sm:$0xff] }
  0x6e   : > { %v443_v25 = vld [vmem:[%s5092_s5 + $0x6d0] sm:$0xff]  ;;  %v434_v26 = vld [vmem:[%s5092_s5 + $0x688] sm:$0xff]  ;;  %v436_v27 = vld [vmem:[%s5092_s5 + $0x698] sm:$0xff] }
  0x6f   : > { %2306 = vmatpush1.xpose.msra.mxu0 %v289_v30  ;;  %2377 = vmatpush1.xpose.msra.mxu1 %v291_v31  ;;  %v433_v28 = vld [vmem:[%s5092_s5 + $0x680] sm:$0xff]  ;;  %v435_v29 = vld [vmem:[%s5092_s5 + $0x690] sm:$0xff]  ;;  %v426_v30 = vld [vmem:[%s5092_s5 + $0x648] sm:$0xff] }
  0x70   : > { %2307 = vmatprep.subr.mxu0 %v282_v32  ;;  %2378 = vmatprep.subr.mxu1 %v284_v33  ;;  %v428_v31 = vld [vmem:[%s5092_s5 + $0x658] sm:$0xff]  ;;  %v425_v32 = vld [vmem:[%s5092_s5 + $0x640] sm:$0xff]  ;;  %v427_v33 = vld [vmem:[%s5092_s5 + $0x650] sm:$0xff] }
  0x71   : > { %v349_v14 = vld [vmem:[%s5092_s5 + $0x3e0] sm:$0xff]  ;;  %v351_v15 = vld [vmem:[%s5092_s5 + $0x3f0] sm:$0xff] }
  0x73   : > { %2308 = vmatpush1.xpose.msra.mxu0 %v281_v34  ;;  %2379 = vmatpush1.xpose.msra.mxu1 %v283_v35  ;;  %v418_v34 = vld [vmem:[%s5092_s5 + $0x608] sm:$0xff]  ;;  %v420_v35 = vld [vmem:[%s5092_s5 + $0x618] sm:$0xff] }
  0x74   : > { %2309 = vmatprep.subr.mxu0 %v274_v36  ;;  %2380 = vmatprep.subr.mxu1 %v276_v37  ;;  %v417_v36 = vld [vmem:[%s5092_s5 + $0x600] sm:$0xff]  ;;  %v419_v37 = vld [vmem:[%s5092_s5 + $0x610] sm:$0xff] }
  0x77   : > { %2310 = vmatpush1.xpose.msra.mxu0 %v273_v38  ;;  %2381 = vmatpush1.xpose.msra.mxu1 %v275_v39  ;;  %v410_v38 = vld [vmem:[%s5092_s5 + $0x5c8] sm:$0xff]  ;;  %v412_v39 = vld [vmem:[%s5092_s5 + $0x5d8] sm:$0xff] }
  0x78   : > { %2311 = vmatprep.subr.mxu0 %v266_v40  ;;  %2382 = vmatprep.subr.mxu1 %v268_v41  ;;  %v409_v40 = vld [vmem:[%s5092_s5 + $0x5c0] sm:$0xff]  ;;  %v411_v41 = vld [vmem:[%s5092_s5 + $0x5d0] sm:$0xff] }
  0x7b   : > { %2312 = vmatpush1.xpose.msra.mxu0 %v265_v42  ;;  %2383 = vmatpush1.xpose.msra.mxu1 %v267_v43  ;;  %v402_v42 = vld [vmem:[%s5092_s5 + $0x588] sm:$0xff]  ;;  %v404_v43 = vld [vmem:[%s5092_s5 + $0x598] sm:$0xff] }
  0x7c   : > { %2313 = vmatprep.subr.mxu0 %v258_v44  ;;  %2384 = vmatprep.subr.mxu1 %v260_v45  ;;  %v401_v44 = vld [vmem:[%s5092_s5 + $0x580] sm:$0xff]  ;;  %v403_v45 = vld [vmem:[%s5092_s5 + $0x590] sm:$0xff] }
  0x7f   : > { %2314 = vmatpush1.xpose.msra.mxu0 %v257_v47  ;;  %2385 = vmatpush1.xpose.msra.mxu1 %v259_v48  ;;  %v394_v47 = vld [vmem:[%s5092_s5 + $0x548] sm:$0xff]  ;;  %v396_v48 = vld [vmem:[%s5092_s5 + $0x558] sm:$0xff] }
  0x80   : > { %2315 = vmatprep.subr.mxu0 %v250_v51  ;;  %2386 = vmatprep.subr.mxu1 %v252_v52  ;;  %v393_v51 = vld [vmem:[%s5092_s5 + $0x540] sm:$0xff]  ;;  %v395_v52 = vld [vmem:[%s5092_s5 + $0x550] sm:$0xff] }
  0x83   : > { %2316 = vmatpush1.xpose.msra.mxu0 %v249_v54  ;;  %2387 = vmatpush1.xpose.msra.mxu1 %v251_v55  ;;  %v386_v54 = vld [vmem:[%s5092_s5 + $0x508] sm:$0xff]  ;;  %v388_v55 = vld [vmem:[%s5092_s5 + $0x518] sm:$0xff] }
  0x84   : > { %2317 = vmatprep.subr.mxu0 %v242_v56  ;;  %2388 = vmatprep.subr.mxu1 %v244_v57  ;;  %v385_v56 = vld [vmem:[%s5092_s5 + $0x500] sm:$0xff]  ;;  %v387_v57 = vld [vmem:[%s5092_s5 + $0x510] sm:$0xff] }
  0x87   : > { %2318 = vmatpush1.xpose.msra.mxu0 %v241_v58  ;;  %2389 = vmatpush1.xpose.msra.mxu1 %v243_v59  ;;  %v378_v58 = vld [vmem:[%s5092_s5 + $0x4c8] sm:$0xff]  ;;  %v380_v59 = vld [vmem:[%s5092_s5 + $0x4d8] sm:$0xff] }
  0x88   : > { %2319 = vmatprep.subr.mxu0 %v234_v60  ;;  %2390 = vmatprep.subr.mxu1 %v236_v61  ;;  %v377_v60 = vld [vmem:[%s5092_s5 + $0x4c0] sm:$0xff]  ;;  %v379_v61 = vld [vmem:[%s5092_s5 + $0x4d0] sm:$0xff] }
  0x8b   : > { %2320 = vmatpush1.xpose.msra.mxu0 %v233_v62  ;;  %2391 = vmatpush1.xpose.msra.mxu1 %v235_v63  ;;  %v370_v62 = vld [vmem:[%s5092_s5 + $0x488] sm:$0xff]  ;;  %v372_v63 = vld [vmem:[%s5092_s5 + $0x498] sm:$0xff] }
  0x8c   : > { %2321 = vmatprep.subr.mxu0 %v226_v0  ;;  %2392 = vmatprep.subr.mxu1 %v228_v1  ;;  %v369_v0 = vld [vmem:[%s5092_s5 + $0x480] sm:$0xff]  ;;  %v371_v1 = vld [vmem:[%s5092_s5 + $0x490] sm:$0xff] }
  0x8f   : > { %2322 = vmatpush1.xpose.msra.mxu0 %v225_v2  ;;  %2393 = vmatpush1.xpose.msra.mxu1 %v227_v3  ;;  %v362_v2 = vld [vmem:[%s5092_s5 + $0x448] sm:$0xff]  ;;  %v364_v3 = vld [vmem:[%s5092_s5 + $0x458] sm:$0xff] }
  0x90   : > { %2323 = vmatprep.subr.mxu0 %v474_v4  ;;  %2394 = vmatprep.subr.mxu1 %v476_v5  ;;  %v361_v4 = vld [vmem:[%s5092_s5 + $0x440] sm:$0xff]  ;;  %v363_v5 = vld [vmem:[%s5092_s5 + $0x450] sm:$0xff] }
  0x93   : > { %2324 = vmatpush2.xpose.msra.mxu0 %v473_v6  ;;  %2395 = vmatpush2.xpose.msra.mxu1 %v475_v7  ;;  %v354_v6 = vld [vmem:[%s5092_s5 + $0x408] sm:$0xff]  ;;  %v356_v7 = vld [vmem:[%s5092_s5 + $0x418] sm:$0xff] }
  0x94   : > { %2325 = vmatprep.subr.mxu0 %v466_v8  ;;  %2396 = vmatprep.subr.mxu1 %v468_v9  ;;  %v353_v8 = vld [vmem:[%s5092_s5 + $0x400] sm:$0xff]  ;;  %v355_v9 = vld [vmem:[%s5092_s5 + $0x410] sm:$0xff] }
  0x97   : > { %2326 = vmatpush2.xpose.msra.mxu0 %v465_v10  ;;  %2397 = vmatpush2.xpose.msra.mxu1 %v467_v11  ;;  %v350_v10 = vld [vmem:[%s5092_s5 + $0x3e8] sm:$0xff]  ;;  %v352_v11 = vld [vmem:[%s5092_s5 + $0x3f8] sm:$0xff] }
  0x98   : > { %2327 = vmatprep.subr.mxu0 %v458_v12  ;;  %2398 = vmatprep.subr.mxu1 %v460_v13  ;;  %v5249_v12 = vld [vmem:[#allocation5 + $0x10] sm:$0xff]  ;;  %v5251_v13 = vld [vmem:[#allocation5 + $0x18] sm:$0xff] }
  0x9b   : > { %2328 = vmatpush2.xpose.msra.mxu0 %v457_v16  ;;  %2399 = vmatpush2.xpose.msra.mxu1 %v459_v17  ;;  %v342_v16 = vld [vmem:[%s5092_s5 + $0x3a8] sm:$0xff]  ;;  %v344_v17 = vld [vmem:[%s5092_s5 + $0x3b8] sm:$0xff] }
  0x9c   : > { %2329 = vmatprep.subr.mxu0 %v450_v18  ;;  %2400 = vmatprep.subr.mxu1 %v452_v19  ;;  %v5259_v18 = vcombine.high %v5249_v12, %v5249_v12  ;;  %v5263_v19 = vcombine.high %v5251_v13, %v5251_v13 }
  0x9f   : > { %2330 = vmatpush2.xpose.msra.mxu0 %v449_v20  ;;  %2401 = vmatpush2.xpose.msra.mxu1 %v451_v21  ;;  %v341_v20 = vld [vmem:[%s5092_s5 + $0x3a0] sm:$0xff]  ;;  %v343_v21 = vld [vmem:[%s5092_s5 + $0x3b0] sm:$0xff] }
  0xa0   : > { %2331 = vmatprep.subr.mxu0 %v442_v22  ;;  %2402 = vmatprep.subr.mxu1 %v444_v23  ;;  %v334_v22 = vld [vmem:[%s5092_s5 + $0x368] sm:$0xff]  ;;  %v336_v23 = vld [vmem:[%s5092_s5 + $0x378] sm:$0xff] }
  0xa3   : > { %2332 = vmatpush2.xpose.msra.mxu0 %v441_v24  ;;  %2403 = vmatpush2.xpose.msra.mxu1 %v443_v25  ;;  %v326_v24 = vld [vmem:[%s5092_s5 + $0x328] sm:$0xff]  ;;  %v328_v25 = vld [vmem:[%s5092_s5 + $0x338] sm:$0xff] }
  0xa4   : > { %2333 = vmatprep.subr.mxu0 %v434_v26  ;;  %2404 = vmatprep.subr.mxu1 %v436_v27  ;;  %v325_v26 = vld [vmem:[%s5092_s5 + $0x320] sm:$0xff]  ;;  %v327_v27 = vld [vmem:[%s5092_s5 + $0x330] sm:$0xff] }
  0xa7   : > { %2334 = vmatpush2.xpose.msra.mxu0 %v433_v28  ;;  %2405 = vmatpush2.xpose.msra.mxu1 %v435_v29  ;;  %v318_v28 = vld [vmem:[%s5092_s5 + $0x2e8] sm:$0xff]  ;;  %v320_v29 = vld [vmem:[%s5092_s5 + $0x2f8] sm:$0xff] }
  0xa8   : > { %2335 = vmatprep.subr.mxu0 %v426_v30  ;;  %2406 = vmatprep.subr.mxu1 %v428_v31  ;;  %v317_v30 = vld [vmem:[%s5092_s5 + $0x2e0] sm:$0xff]  ;;  %v319_v31 = vld [vmem:[%s5092_s5 + $0x2f0] sm:$0xff] }
  0xab   : > { %2336 = vmatpush2.xpose.msra.mxu0 %v425_v32  ;;  %2407 = vmatpush2.xpose.msra.mxu1 %v427_v33  ;;  %v310_v32 = vld [vmem:[%s5092_s5 + $0x2a8] sm:$0xff]  ;;  %v312_v33 = vld [vmem:[%s5092_s5 + $0x2b8] sm:$0xff] }
  0xac   : > { %2337 = vmatprep.subr.mxu0 %v418_v34  ;;  %2408 = vmatprep.subr.mxu1 %v420_v35  ;;  %v309_v34 = vld [vmem:[%s5092_s5 + $0x2a0] sm:$0xff]  ;;  %v311_v35 = vld [vmem:[%s5092_s5 + $0x2b0] sm:$0xff] }
  0xaf   : > { %2338 = vmatpush2.xpose.msra.mxu0 %v417_v36  ;;  %2409 = vmatpush2.xpose.msra.mxu1 %v419_v37  ;;  %v302_v36 = vld [vmem:[%s5092_s5 + $0x268] sm:$0xff]  ;;  %v304_v37 = vld [vmem:[%s5092_s5 + $0x278] sm:$0xff] }
  0xb0   : > { %2339 = vmatprep.subr.mxu0 %v410_v38  ;;  %2410 = vmatprep.subr.mxu1 %v412_v39  ;;  %v301_v38 = vld [vmem:[%s5092_s5 + $0x260] sm:$0xff]  ;;  %v303_v39 = vld [vmem:[%s5092_s5 + $0x270] sm:$0xff] }
  0xb3   : > { %2340 = vmatpush2.xpose.msra.mxu0 %v409_v40  ;;  %2411 = vmatpush2.xpose.msra.mxu1 %v411_v41  ;;  %v294_v40 = vld [vmem:[%s5092_s5 + $0x228] sm:$0xff]  ;;  %v296_v41 = vld [vmem:[%s5092_s5 + $0x238] sm:$0xff] }
  0xb4   : > { %2341 = vmatprep.subr.mxu0 %v402_v42  ;;  %2412 = vmatprep.subr.mxu1 %v404_v43  ;;  %v293_v42 = vld [vmem:[%s5092_s5 + $0x220] sm:$0xff]  ;;  %v295_v43 = vld [vmem:[%s5092_s5 + $0x230] sm:$0xff] }
  0xb7   : > { %2342 = vmatpush2.xpose.msra.mxu0 %v401_v44  ;;  %2413 = vmatpush2.xpose.msra.mxu1 %v403_v45  ;;  %v286_v44 = vld [vmem:[%s5092_s5 + $0x1e8] sm:$0xff]  ;;  %v288_v45 = vld [vmem:[%s5092_s5 + $0x1f8] sm:$0xff] }
  0xb8   : > { %2343 = vmatprep.subr.mxu0 %v394_v47  ;;  %2414 = vmatprep.subr.mxu1 %v396_v48  ;;  %v285_v47 = vld [vmem:[%s5092_s5 + $0x1e0] sm:$0xff]  ;;  %v287_v48 = vld [vmem:[%s5092_s5 + $0x1f0] sm:$0xff] }
  0xbb   : > { %2344 = vmatpush2.xpose.msra.mxu0 %v393_v51  ;;  %2415 = vmatpush2.xpose.msra.mxu1 %v395_v52  ;;  %v278_v51 = vld [vmem:[%s5092_s5 + $0x1a8] sm:$0xff]  ;;  %v280_v52 = vld [vmem:[%s5092_s5 + $0x1b8] sm:$0xff] }
  0xbc   : > { %2345 = vmatprep.subr.mxu0 %v386_v54  ;;  %2416 = vmatprep.subr.mxu1 %v388_v55  ;;  %v277_v54 = vld [vmem:[%s5092_s5 + $0x1a0] sm:$0xff]  ;;  %v279_v55 = vld [vmem:[%s5092_s5 + $0x1b0] sm:$0xff] }
  0xbf   : > { %2346 = vmatpush2.xpose.msra.mxu0 %v385_v56  ;;  %2417 = vmatpush2.xpose.msra.mxu1 %v387_v57  ;;  %v270_v56 = vld [vmem:[%s5092_s5 + $0x168] sm:$0xff]  ;;  %v272_v57 = vld [vmem:[%s5092_s5 + $0x178] sm:$0xff] }
  0xc0   : > { %2347 = vmatprep.subr.mxu0 %v378_v58  ;;  %2418 = vmatprep.subr.mxu1 %v380_v59  ;;  %v269_v58 = vld [vmem:[%s5092_s5 + $0x160] sm:$0xff]  ;;  %v271_v59 = vld [vmem:[%s5092_s5 + $0x170] sm:$0xff] }
  0xc3   : > { %2348 = vmatpush2.xpose.msra.mxu0 %v377_v60  ;;  %2419 = vmatpush2.xpose.msra.mxu1 %v379_v61  ;;  %v262_v60 = vld [vmem:[%s5092_s5 + $0x128] sm:$0xff]  ;;  %v264_v61 = vld [vmem:[%s5092_s5 + $0x138] sm:$0xff] }
  0xc4   : > { %2349 = vmatprep.subr.mxu0 %v370_v62  ;;  %2420 = vmatprep.subr.mxu1 %v372_v63  ;;  %v261_v62 = vld [vmem:[%s5092_s5 + $0x120] sm:$0xff]  ;;  %v263_v63 = vld [vmem:[%s5092_s5 + $0x130] sm:$0xff] }
  0xc7   : > { %2350 = vmatpush2.xpose.msra.mxu0 %v369_v0  ;;  %2421 = vmatpush2.xpose.msra.mxu1 %v371_v1  ;;  %v254_v0 = vld [vmem:[%s5092_s5 + $0xe8] sm:$0xff]  ;;  %v256_v1 = vld [vmem:[%s5092_s5 + $0xf8] sm:$0xff] }
  0xc8   : > { %2351 = vmatprep.subr.mxu0 %v362_v2  ;;  %2422 = vmatprep.subr.mxu1 %v364_v3  ;;  %v253_v2 = vld [vmem:[%s5092_s5 + $0xe0] sm:$0xff]  ;;  %v255_v3 = vld [vmem:[%s5092_s5 + $0xf0] sm:$0xff] }
  0xcb   : > { %2352 = vmatpush2.xpose.msra.mxu0 %v361_v4  ;;  %2423 = vmatpush2.xpose.msra.mxu1 %v363_v5  ;;  %v246_v4 = vld [vmem:[%s5092_s5 + $0xa8] sm:$0xff]  ;;  %v248_v5 = vld [vmem:[%s5092_s5 + $0xb8] sm:$0xff] }
  0xcc   : > { %2353 = vmatprep.subr.mxu0 %v354_v6  ;;  %2424 = vmatprep.subr.mxu1 %v356_v7  ;;  %v245_v6 = vld [vmem:[%s5092_s5 + $0xa0] sm:$0xff]  ;;  %v247_v7 = vld [vmem:[%s5092_s5 + $0xb0] sm:$0xff] }
  0xcf   : > { %2354 = vmatpush2.xpose.msra.mxu0 %v353_v8  ;;  %2425 = vmatpush2.xpose.msra.mxu1 %v355_v9  ;;  %v238_v8 = vld [vmem:[%s5092_s5 + $0x68] sm:$0xff]  ;;  %v240_v9 = vld [vmem:[%s5092_s5 + $0x78] sm:$0xff] }
  0xd0   : > { %2433 = vmatprep.subr.mxu0 %v350_v10  ;;  %2504 = vmatprep.subr.mxu1 %v352_v11  ;;  %v237_v10 = vld [vmem:[%s5092_s5 + $0x60] sm:$0xff]  ;;  %v239_v11 = vld [vmem:[%s5092_s5 + $0x70] sm:$0xff] }
  0xd2   : > { %2356 = vmatmul.mubr.f32.vlgmr.msra.gmra.mxu0 %v5148_v46  ;;  %2427 = vmatmul.mubr.f32.vlgmr.msra.gmra.mxu1 %v5156_v50  ;;  %v333_v46 = vld [vmem:[%s5092_s5 + $0x360] sm:$0xff]  ;;  %v335_v50 = vld [vmem:[%s5092_s5 + $0x370] sm:$0xff] }
  0xd3   : > { %2434 = vmatpush1.xpose.msra.mxu0 %v349_v14  ;;  %2505 = vmatpush1.xpose.msra.mxu1 %v351_v15  ;;  %v230_v14 = vld [vmem:[%s5092_s5 + $0x28] sm:$0xff]  ;;  %v232_v15 = vld [vmem:[%s5092_s5 + $0x38] sm:$0xff] }
  0xd4   : > { %2435 = vmatprep.subr.mxu0 %v342_v16  ;;  %2506 = vmatprep.subr.mxu1 %v344_v17  ;;  %v229_v16 = vld [vmem:[%s5092_s5 + $0x20] sm:$0xff]  ;;  %v231_v17 = vld [vmem:[%s5092_s5 + $0x30] sm:$0xff] }
  0xd5   : > { %2497 = vmatprep.mubr.f32.mxu0 %v5259_v18  ;;  %2568 = vmatprep.mubr.f32.mxu1 %v5263_v19 }
  0xd7   : > { %2436 = vmatpush1.xpose.msra.mxu0 %v341_v20  ;;  %2507 = vmatpush1.xpose.msra.mxu1 %v343_v21  ;;  %v478_v20 = vld [vmem:[%s5092_s5 + $0x7e8] sm:$0xff]  ;;  %v480_v21 = vld [vmem:[%s5092_s5 + $0x7f8] sm:$0xff] }
  0xd8   : > { %2437 = vmatprep.subr.mxu0 %v334_v22  ;;  %2508 = vmatprep.subr.mxu1 %v336_v23  ;;  %v477_v22 = vld [vmem:[%s5092_s5 + $0x7e0] sm:$0xff]  ;;  %v479_v23 = vld [vmem:[%s5092_s5 + $0x7f0] sm:$0xff] }
  0xdb   : > { %2438 = vmatpush1.xpose.msra.mxu0 %v333_v46  ;;  %2509 = vmatpush1.xpose.msra.mxu1 %v335_v50  ;;  %v470_v46 = vld [vmem:[%s5092_s5 + $0x7a8] sm:$0xff]  ;;  %v472_v50 = vld [vmem:[%s5092_s5 + $0x7b8] sm:$0xff] }
  0xdc   : > { %2439 = vmatprep.subr.mxu0 %v326_v24  ;;  %2510 = vmatprep.subr.mxu1 %v328_v25  ;;  %v469_v24 = vld [vmem:[%s5092_s5 + $0x7a0] sm:$0xff]  ;;  %v471_v25 = vld [vmem:[%s5092_s5 + $0x7b0] sm:$0xff] }
  0xdf   : > { %2440 = vmatpush1.xpose.msra.mxu0 %v325_v26  ;;  %2511 = vmatpush1.xpose.msra.mxu1 %v327_v27  ;;  %v462_v26 = vld [vmem:[%s5092_s5 + $0x768] sm:$0xff]  ;;  %v464_v27 = vld [vmem:[%s5092_s5 + $0x778] sm:$0xff] }
  0xe0   : > { %2441 = vmatprep.subr.mxu0 %v318_v28  ;;  %2512 = vmatprep.subr.mxu1 %v320_v29  ;;  %v461_v28 = vld [vmem:[%s5092_s5 + $0x760] sm:$0xff]  ;;  %v463_v29 = vld [vmem:[%s5092_s5 + $0x770] sm:$0xff] }
  0xe3   : > { %2442 = vmatpush1.xpose.msra.mxu0 %v317_v30  ;;  %2513 = vmatpush1.xpose.msra.mxu1 %v319_v31  ;;  %v454_v30 = vld [vmem:[%s5092_s5 + $0x728] sm:$0xff]  ;;  %v456_v31 = vld [vmem:[%s5092_s5 + $0x738] sm:$0xff] }
  0xe4   : > { %2443 = vmatprep.subr.mxu0 %v310_v32  ;;  %2514 = vmatprep.subr.mxu1 %v312_v33  ;;  %v453_v32 = vld [vmem:[%s5092_s5 + $0x720] sm:$0xff]  ;;  %v455_v33 = vld [vmem:[%s5092_s5 + $0x730] sm:$0xff] }
  0xe7   : > { %2444 = vmatpush1.xpose.msra.mxu0 %v309_v34  ;;  %2515 = vmatpush1.xpose.msra.mxu1 %v311_v35  ;;  %v446_v34 = vld [vmem:[%s5092_s5 + $0x6e8] sm:$0xff]  ;;  %v448_v35 = vld [vmem:[%s5092_s5 + $0x6f8] sm:$0xff] }
  0xe8   : > { %2445 = vmatprep.subr.mxu0 %v302_v36  ;;  %2516 = vmatprep.subr.mxu1 %v304_v37  ;;  %v445_v36 = vld [vmem:[%s5092_s5 + $0x6e0] sm:$0xff]  ;;  %v447_v37 = vld [vmem:[%s5092_s5 + $0x6f0] sm:$0xff] }
  0xeb   : > { %2446 = vmatpush1.xpose.msra.mxu0 %v301_v38  ;;  %2517 = vmatpush1.xpose.msra.mxu1 %v303_v39  ;;  %v438_v38 = vld [vmem:[%s5092_s5 + $0x6a8] sm:$0xff]  ;;  %v440_v39 = vld [vmem:[%s5092_s5 + $0x6b8] sm:$0xff] }
  0xec   : > { %2447 = vmatprep.subr.mxu0 %v294_v40  ;;  %2518 = vmatprep.subr.mxu1 %v296_v41  ;;  %v437_v40 = vld [vmem:[%s5092_s5 + $0x6a0] sm:$0xff]  ;;  %v439_v41 = vld [vmem:[%s5092_s5 + $0x6b0] sm:$0xff] }
  0xef   : > { %2448 = vmatpush1.xpose.msra.mxu0 %v293_v42  ;;  %2519 = vmatpush1.xpose.msra.mxu1 %v295_v43  ;;  %v430_v42 = vld [vmem:[%s5092_s5 + $0x668] sm:$0xff]  ;;  %v432_v43 = vld [vmem:[%s5092_s5 + $0x678] sm:$0xff] }
  0xf0   : > { %2449 = vmatprep.subr.mxu0 %v286_v44  ;;  %2520 = vmatprep.subr.mxu1 %v288_v45  ;;  %v429_v44 = vld [vmem:[%s5092_s5 + $0x660] sm:$0xff]  ;;  %v431_v45 = vld [vmem:[%s5092_s5 + $0x670] sm:$0xff] }
  0xf3   : > { %2450 = vmatpush1.xpose.msra.mxu0 %v285_v47  ;;  %2521 = vmatpush1.xpose.msra.mxu1 %v287_v48  ;;  %v422_v47 = vld [vmem:[%s5092_s5 + $0x628] sm:$0xff]  ;;  %v424_v48 = vld [vmem:[%s5092_s5 + $0x638] sm:$0xff] }
  0xf4   : > { %2451 = vmatprep.subr.mxu0 %v278_v51  ;;  %2522 = vmatprep.subr.mxu1 %v280_v52  ;;  %v421_v51 = vld [vmem:[%s5092_s5 + $0x620] sm:$0xff]  ;;  %v423_v52 = vld [vmem:[%s5092_s5 + $0x630] sm:$0xff] }
  0xf7   : > { %2452 = vmatpush1.xpose.msra.mxu0 %v277_v54  ;;  %2523 = vmatpush1.xpose.msra.mxu1 %v279_v55  ;;  %v414_v54 = vld [vmem:[%s5092_s5 + $0x5e8] sm:$0xff]  ;;  %v416_v55 = vld [vmem:[%s5092_s5 + $0x5f8] sm:$0xff] }
  0xf8   : > { %2453 = vmatprep.subr.mxu0 %v270_v56  ;;  %2524 = vmatprep.subr.mxu1 %v272_v57  ;;  %v413_v56 = vld [vmem:[%s5092_s5 + $0x5e0] sm:$0xff]  ;;  %v415_v57 = vld [vmem:[%s5092_s5 + $0x5f0] sm:$0xff] }
  0xfb   : > { %2454 = vmatpush1.xpose.msra.mxu0 %v269_v58  ;;  %2525 = vmatpush1.xpose.msra.mxu1 %v271_v59  ;;  %v406_v58 = vld [vmem:[%s5092_s5 + $0x5a8] sm:$0xff]  ;;  %v408_v59 = vld [vmem:[%s5092_s5 + $0x5b8] sm:$0xff] }
  0xfc   : > { %2455 = vmatprep.subr.mxu0 %v262_v60  ;;  %2526 = vmatprep.subr.mxu1 %v264_v61  ;;  %v405_v60 = vld [vmem:[%s5092_s5 + $0x5a0] sm:$0xff]  ;;  %v407_v61 = vld [vmem:[%s5092_s5 + $0x5b0] sm:$0xff] }
  0xff   : > { %2456 = vmatpush1.xpose.msra.mxu0 %v261_v62  ;;  %2527 = vmatpush1.xpose.msra.mxu1 %v263_v63  ;;  %v398_v62 = vld [vmem:[%s5092_s5 + $0x568] sm:$0xff]  ;;  %v400_v63 = vld [vmem:[%s5092_s5 + $0x578] sm:$0xff] }
 0x100   : > { %2457 = vmatprep.subr.mxu0 %v254_v0  ;;  %2528 = vmatprep.subr.mxu1 %v256_v1  ;;  %v397_v0 = vld [vmem:[%s5092_s5 + $0x560] sm:$0xff]  ;;  %v399_v1 = vld [vmem:[%s5092_s5 + $0x570] sm:$0xff] }
 0x103   : > { %2458 = vmatpush1.xpose.msra.mxu0 %v253_v2  ;;  %2529 = vmatpush1.xpose.msra.mxu1 %v255_v3  ;;  %v390_v2 = vld [vmem:[%s5092_s5 + $0x528] sm:$0xff]  ;;  %v392_v3 = vld [vmem:[%s5092_s5 + $0x538] sm:$0xff] }
 0x104   : > { %2459 = vmatprep.subr.mxu0 %v246_v4  ;;  %2530 = vmatprep.subr.mxu1 %v248_v5  ;;  %v389_v4 = vld [vmem:[%s5092_s5 + $0x520] sm:$0xff]  ;;  %v391_v5 = vld [vmem:[%s5092_s5 + $0x530] sm:$0xff] }
 0x107   : > { %2460 = vmatpush1.xpose.msra.mxu0 %v245_v6  ;;  %2531 = vmatpush1.xpose.msra.mxu1 %v247_v7  ;;  %v382_v6 = vld [vmem:[%s5092_s5 + $0x4e8] sm:$0xff]  ;;  %v384_v7 = vld [vmem:[%s5092_s5 + $0x4f8] sm:$0xff] }
 0x108   : > { %2461 = vmatprep.subr.mxu0 %v238_v8  ;;  %2532 = vmatprep.subr.mxu1 %v240_v9  ;;  %v381_v8 = vld [vmem:[%s5092_s5 + $0x4e0] sm:$0xff]  ;;  %v383_v9 = vld [vmem:[%s5092_s5 + $0x4f0] sm:$0xff] }
 0x10b   : > { %2462 = vmatpush1.xpose.msra.mxu0 %v237_v10  ;;  %2533 = vmatpush1.xpose.msra.mxu1 %v239_v11  ;;  %v374_v10 = vld [vmem:[%s5092_s5 + $0x4a8] sm:$0xff]  ;;  %v376_v11 = vld [vmem:[%s5092_s5 + $0x4b8] sm:$0xff] }
 0x10c   : > { %2463 = vmatprep.subr.mxu0 %v230_v14  ;;  %2534 = vmatprep.subr.mxu1 %v232_v15  ;;  %v373_v14 = vld [vmem:[%s5092_s5 + $0x4a0] sm:$0xff]  ;;  %v375_v15 = vld [vmem:[%s5092_s5 + $0x4b0] sm:$0xff] }
 0x10f   : > { %2464 = vmatpush1.xpose.msra.mxu0 %v229_v16  ;;  %2535 = vmatpush1.xpose.msra.mxu1 %v231_v17  ;;  %v366_v16 = vld [vmem:[%s5092_s5 + $0x468] sm:$0xff]  ;;  %v368_v17 = vld [vmem:[%s5092_s5 + $0x478] sm:$0xff] }
 0x110   : > { %2465 = vmatprep.subr.mxu0 %v478_v20  ;;  %2536 = vmatprep.subr.mxu1 %v480_v21  ;;  %v365_v20 = vld [vmem:[%s5092_s5 + $0x460] sm:$0xff]  ;;  %v367_v21 = vld [vmem:[%s5092_s5 + $0x470] sm:$0xff] }
 0x113   : > { %2466 = vmatpush2.xpose.msra.mxu0 %v477_v22  ;;  %2537 = vmatpush2.xpose.msra.mxu1 %v479_v23  ;;  %v358_v22 = vld [vmem:[%s5092_s5 + $0x428] sm:$0xff]  ;;  %v360_v23 = vld [vmem:[%s5092_s5 + $0x438] sm:$0xff] }
 0x114   : > { %2467 = vmatprep.subr.mxu0 %v470_v46  ;;  %2538 = vmatprep.subr.mxu1 %v472_v50  ;;  %v357_v46 = vld [vmem:[%s5092_s5 + $0x420] sm:$0xff]  ;;  %v359_v50 = vld [vmem:[%s5092_s5 + $0x430] sm:$0xff] }
 0x117   : > { %2468 = vmatpush2.xpose.msra.mxu0 %v469_v24  ;;  %2539 = vmatpush2.xpose.msra.mxu1 %v471_v25  ;;  %v602_v24 = vld [vmem:[%s5092_s5 + $0xbc8] sm:$0xff]  ;;  %v604_v25 = vld [vmem:[%s5092_s5 + $0xbd8] sm:$0xff] }
 0x118   : > { %2469 = vmatprep.subr.mxu0 %v462_v26  ;;  %2540 = vmatprep.subr.mxu1 %v464_v27  ;;  %v601_v26 = vld [vmem:[%s5092_s5 + $0xbc0] sm:$0xff]  ;;  %v603_v27 = vld [vmem:[%s5092_s5 + $0xbd0] sm:$0xff] }
 0x11b   : > { %2470 = vmatpush2.xpose.msra.mxu0 %v461_v28  ;;  %2541 = vmatpush2.xpose.msra.mxu1 %v463_v29  ;;  %v594_v28 = vld [vmem:[%s5092_s5 + $0xb88] sm:$0xff]  ;;  %v596_v29 = vld [vmem:[%s5092_s5 + $0xb98] sm:$0xff] }
 0x11c   : > { %2471 = vmatprep.subr.mxu0 %v454_v30  ;;  %2542 = vmatprep.subr.mxu1 %v456_v31  ;;  %v593_v30 = vld [vmem:[%s5092_s5 + $0xb80] sm:$0xff]  ;;  %v595_v31 = vld [vmem:[%s5092_s5 + $0xb90] sm:$0xff] }
 0x11f   : > { %2472 = vmatpush2.xpose.msra.mxu0 %v453_v32  ;;  %2543 = vmatpush2.xpose.msra.mxu1 %v455_v33  ;;  %v586_v32 = vld [vmem:[%s5092_s5 + $0xb48] sm:$0xff]  ;;  %v588_v33 = vld [vmem:[%s5092_s5 + $0xb58] sm:$0xff] }
 0x120   : > { %2473 = vmatprep.subr.mxu0 %v446_v34  ;;  %2544 = vmatprep.subr.mxu1 %v448_v35  ;;  %v578_v34 = vld [vmem:[%s5092_s5 + $0xb08] sm:$0xff]  ;;  %v580_v35 = vld [vmem:[%s5092_s5 + $0xb18] sm:$0xff] }
 0x123   : > { %2474 = vmatpush2.xpose.msra.mxu0 %v445_v36  ;;  %2545 = vmatpush2.xpose.msra.mxu1 %v447_v37  ;;  %v577_v36 = vld [vmem:[%s5092_s5 + $0xb00] sm:$0xff]  ;;  %v579_v37 = vld [vmem:[%s5092_s5 + $0xb10] sm:$0xff] }
 0x124   : > { %2475 = vmatprep.subr.mxu0 %v438_v38  ;;  %2546 = vmatprep.subr.mxu1 %v440_v39  ;;  %v570_v38 = vld [vmem:[%s5092_s5 + $0xac8] sm:$0xff]  ;;  %v572_v39 = vld [vmem:[%s5092_s5 + $0xad8] sm:$0xff] }
 0x127   : > { %2476 = vmatpush2.xpose.msra.mxu0 %v437_v40  ;;  %2547 = vmatpush2.xpose.msra.mxu1 %v439_v41  ;;  %v569_v40 = vld [vmem:[%s5092_s5 + $0xac0] sm:$0xff]  ;;  %v571_v41 = vld [vmem:[%s5092_s5 + $0xad0] sm:$0xff] }
 0x128   : > { %2477 = vmatprep.subr.mxu0 %v430_v42  ;;  %2548 = vmatprep.subr.mxu1 %v432_v43  ;;  %v562_v42 = vld [vmem:[%s5092_s5 + $0xa88] sm:$0xff]  ;;  %v564_v43 = vld [vmem:[%s5092_s5 + $0xa98] sm:$0xff] }
 0x12b   : > { %2478 = vmatpush2.xpose.msra.mxu0 %v429_v44  ;;  %2549 = vmatpush2.xpose.msra.mxu1 %v431_v45  ;;  %v561_v44 = vld [vmem:[%s5092_s5 + $0xa80] sm:$0xff]  ;;  %v563_v45 = vld [vmem:[%s5092_s5 + $0xa90] sm:$0xff] }
 0x12c   : > { %2479 = vmatprep.subr.mxu0 %v422_v47  ;;  %2550 = vmatprep.subr.mxu1 %v424_v48  ;;  %v554_v47 = vld [vmem:[%s5092_s5 + $0xa48] sm:$0xff]  ;;  %v556_v48 = vld [vmem:[%s5092_s5 + $0xa58] sm:$0xff] }
 0x12f   : > { %2480 = vmatpush2.xpose.msra.mxu0 %v421_v51  ;;  %2551 = vmatpush2.xpose.msra.mxu1 %v423_v52  ;;  %v553_v51 = vld [vmem:[%s5092_s5 + $0xa40] sm:$0xff]  ;;  %v555_v52 = vld [vmem:[%s5092_s5 + $0xa50] sm:$0xff] }
 0x130   : > { %2481 = vmatprep.subr.mxu0 %v414_v54  ;;  %2552 = vmatprep.subr.mxu1 %v416_v55  ;;  %v546_v54 = vld [vmem:[%s5092_s5 + $0xa08] sm:$0xff]  ;;  %v548_v55 = vld [vmem:[%s5092_s5 + $0xa18] sm:$0xff] }
 0x133   : > { %2482 = vmatpush2.xpose.msra.mxu0 %v413_v56  ;;  %2553 = vmatpush2.xpose.msra.mxu1 %v415_v57  ;;  %v545_v56 = vld [vmem:[%s5092_s5 + $0xa00] sm:$0xff]  ;;  %v547_v57 = vld [vmem:[%s5092_s5 + $0xa10] sm:$0xff] }
 0x134   : > { %2483 = vmatprep.subr.mxu0 %v406_v58  ;;  %2554 = vmatprep.subr.mxu1 %v408_v59  ;;  %v538_v58 = vld [vmem:[%s5092_s5 + $0x9c8] sm:$0xff]  ;;  %v540_v59 = vld [vmem:[%s5092_s5 + $0x9d8] sm:$0xff] }
 0x137   : > { %2484 = vmatpush2.xpose.msra.mxu0 %v405_v60  ;;  %2555 = vmatpush2.xpose.msra.mxu1 %v407_v61  ;;  %v537_v60 = vld [vmem:[%s5092_s5 + $0x9c0] sm:$0xff]  ;;  %v539_v61 = vld [vmem:[%s5092_s5 + $0x9d0] sm:$0xff] }
 0x138   : > { %2485 = vmatprep.subr.mxu0 %v398_v62  ;;  %2556 = vmatprep.subr.mxu1 %v400_v63  ;;  %v530_v62 = vld [vmem:[%s5092_s5 + $0x988] sm:$0xff]  ;;  %v532_v63 = vld [vmem:[%s5092_s5 + $0x998] sm:$0xff] }
 0x13b   : > { %2486 = vmatpush2.xpose.msra.mxu0 %v397_v0  ;;  %2557 = vmatpush2.xpose.msra.mxu1 %v399_v1  ;;  %v529_v0 = vld [vmem:[%s5092_s5 + $0x980] sm:$0xff]  ;;  %v531_v1 = vld [vmem:[%s5092_s5 + $0x990] sm:$0xff] }
 0x13c   : > { %2487 = vmatprep.subr.mxu0 %v390_v2  ;;  %2558 = vmatprep.subr.mxu1 %v392_v3  ;;  %v522_v2 = vld [vmem:[%s5092_s5 + $0x948] sm:$0xff]  ;;  %v524_v3 = vld [vmem:[%s5092_s5 + $0x958] sm:$0xff] }
 0x13f   : > { %2488 = vmatpush2.xpose.msra.mxu0 %v389_v4  ;;  %2559 = vmatpush2.xpose.msra.mxu1 %v391_v5  ;;  %v521_v4 = vld [vmem:[%s5092_s5 + $0x940] sm:$0xff]  ;;  %v523_v5 = vld [vmem:[%s5092_s5 + $0x950] sm:$0xff] }
 0x140   : > { %2489 = vmatprep.subr.mxu0 %v382_v6  ;;  %2560 = vmatprep.subr.mxu1 %v384_v7  ;;  %v514_v6 = vld [vmem:[%s5092_s5 + $0x908] sm:$0xff]  ;;  %v516_v7 = vld [vmem:[%s5092_s5 + $0x918] sm:$0xff] }
 0x143   : > { %2490 = vmatpush2.xpose.msra.mxu0 %v381_v8  ;;  %2561 = vmatpush2.xpose.msra.mxu1 %v383_v9  ;;  %v513_v8 = vld [vmem:[%s5092_s5 + $0x900] sm:$0xff]  ;;  %v515_v9 = vld [vmem:[%s5092_s5 + $0x910] sm:$0xff] }
 0x144   : > { %2491 = vmatprep.subr.mxu0 %v374_v10  ;;  %2562 = vmatprep.subr.mxu1 %v376_v11  ;;  %v506_v10 = vld [vmem:[%s5092_s5 + $0x8c8] sm:$0xff]  ;;  %v508_v11 = vld [vmem:[%s5092_s5 + $0x8d8] sm:$0xff] }
 0x147   : > { %2492 = vmatpush2.xpose.msra.mxu0 %v373_v14  ;;  %2563 = vmatpush2.xpose.msra.mxu1 %v375_v15  ;;  %v505_v14 = vld [vmem:[%s5092_s5 + $0x8c0] sm:$0xff]  ;;  %v507_v15 = vld [vmem:[%s5092_s5 + $0x8d0] sm:$0xff] }
 0x148   : > { %2493 = vmatprep.subr.mxu0 %v366_v16  ;;  %2564 = vmatprep.subr.mxu1 %v368_v17  ;;  %v498_v16 = vld [vmem:[%s5092_s5 + $0x888] sm:$0xff]  ;;  %v500_v17 = vld [vmem:[%s5092_s5 + $0x898] sm:$0xff] }
 0x14b   : > { %2494 = vmatpush2.xpose.msra.mxu0 %v365_v20  ;;  %2565 = vmatpush2.xpose.msra.mxu1 %v367_v21  ;;  %v497_v20 = vld [vmem:[%s5092_s5 + $0x880] sm:$0xff]  ;;  %v499_v21 = vld [vmem:[%s5092_s5 + $0x890] sm:$0xff] }
 0x14c   : > { %2495 = vmatprep.subr.mxu0 %v358_v22  ;;  %2566 = vmatprep.subr.mxu1 %v360_v23  ;;  %v490_v22 = vld [vmem:[%s5092_s5 + $0x848] sm:$0xff]  ;;  %v492_v23 = vld [vmem:[%s5092_s5 + $0x858] sm:$0xff] }
 0x14f   : > { %2496 = vmatpush2.xpose.msra.mxu0 %v357_v46  ;;  %2567 = vmatpush2.xpose.msra.mxu1 %v359_v50  ;;  %v489_v46 = vld [vmem:[%s5092_s5 + $0x840] sm:$0xff]  ;;  %v491_v50 = vld [vmem:[%s5092_s5 + $0x850] sm:$0xff] }
 0x150   : > { %2575 = vmatprep.subr.mxu0 %v602_v24  ;;  %2646 = vmatprep.subr.mxu1 %v604_v25  ;;  %v482_v24 = vld [vmem:[%s5092_s5 + $0x808] sm:$0xff]  ;;  %v484_v25 = vld [vmem:[%s5092_s5 + $0x818] sm:$0xff] }
 0x152   : > { %2498 = vmatmul.mubr.f32.vlgmr.msra.gmra.mxu0 %v5249_v12  ;;  %2569 = vmatmul.mubr.f32.vlgmr.msra.gmra.mxu1 %v5251_v13  ;;  %v585_v12 = vld [vmem:[%s5092_s5 + $0xb40] sm:$0xff]  ;;  %v587_v13 = vld [vmem:[%s5092_s5 + $0xb50] sm:$0xff] }
 0x153   : > { %2576 = vmatpush1.xpose.msra.mxu0 %v601_v26  ;;  %2647 = vmatpush1.xpose.msra.mxu1 %v603_v27  ;;  %v481_v26 = vld [vmem:[%s5092_s5 + $0x800] sm:$0xff]  ;;  %v483_v27 = vld [vmem:[%s5092_s5 + $0x810] sm:$0xff] }
 0x154   : > { %2577 = vmatprep.subr.mxu0 %v594_v28  ;;  %2648 = vmatprep.subr.mxu1 %v596_v29  ;;  %v730_v28 = vld [vmem:[%s5092_s5 + $0xfc8] sm:$0xff]  ;;  %v732_v29 = vld [vmem:[%s5092_s5 + $0xfd8] sm:$0xff] }
 0x155   : > { %2639 = vmatprep.mubr.f32.mxu0 %v5154_v49  ;;  %2710 = vmatprep.mubr.f32.mxu1 %v5162_v53 }
 0x157   : > { %2578 = vmatpush1.xpose.msra.mxu0 %v593_v30  ;;  %2649 = vmatpush1.xpose.msra.mxu1 %v595_v31  ;;  %v729_v30 = vld [vmem:[%s5092_s5 + $0xfc0] sm:$0xff]  ;;  %v731_v31 = vld [vmem:[%s5092_s5 + $0xfd0] sm:$0xff] }
 0x158   : > { %2579 = vmatprep.subr.mxu0 %v586_v32  ;;  %2650 = vmatprep.subr.mxu1 %v588_v33  ;;  %v722_v32 = vld [vmem:[%s5092_s5 + $0xf88] sm:$0xff]  ;;  %v724_v33 = vld [vmem:[%s5092_s5 + $0xf98] sm:$0xff] }
 0x15b   : > { %2580 = vmatpush1.xpose.msra.mxu0 %v585_v12  ;;  %2651 = vmatpush1.xpose.msra.mxu1 %v587_v13  ;;  %v721_v12 = vld [vmem:[%s5092_s5 + $0xf80] sm:$0xff]  ;;  %v723_v13 = vld [vmem:[%s5092_s5 + $0xf90] sm:$0xff] }
 0x15c   : > { %2581 = vmatprep.subr.mxu0 %v578_v34  ;;  %2652 = vmatprep.subr.mxu1 %v580_v35  ;;  %v714_v34 = vld [vmem:[%s5092_s5 + $0xf48] sm:$0xff]  ;;  %v716_v35 = vld [vmem:[%s5092_s5 + $0xf58] sm:$0xff] }
 0x15f   : > { %2582 = vmatpush1.xpose.msra.mxu0 %v577_v36  ;;  %2653 = vmatpush1.xpose.msra.mxu1 %v579_v37  ;;  %v713_v36 = vld [vmem:[%s5092_s5 + $0xf40] sm:$0xff]  ;;  %v715_v37 = vld [vmem:[%s5092_s5 + $0xf50] sm:$0xff] }
 0x160   : > { %2583 = vmatprep.subr.mxu0 %v570_v38  ;;  %2654 = vmatprep.subr.mxu1 %v572_v39  ;;  %v706_v38 = vld [vmem:[%s5092_s5 + $0xf08] sm:$0xff]  ;;  %v708_v39 = vld [vmem:[%s5092_s5 + $0xf18] sm:$0xff] }
 0x163   : > { %2584 = vmatpush1.xpose.msra.mxu0 %v569_v40  ;;  %2655 = vmatpush1.xpose.msra.mxu1 %v571_v41  ;;  %v705_v40 = vld [vmem:[%s5092_s5 + $0xf00] sm:$0xff]  ;;  %v707_v41 = vld [vmem:[%s5092_s5 + $0xf10] sm:$0xff] }
 0x164   : > { %2585 = vmatprep.subr.mxu0 %v562_v42  ;;  %2656 = vmatprep.subr.mxu1 %v564_v43  ;;  %v698_v42 = vld [vmem:[%s5092_s5 + $0xec8] sm:$0xff]  ;;  %v700_v43 = vld [vmem:[%s5092_s5 + $0xed8] sm:$0xff] }
 0x167   : > { %2586 = vmatpush1.xpose.msra.mxu0 %v561_v44  ;;  %2657 = vmatpush1.xpose.msra.mxu1 %v563_v45  ;;  %v697_v44 = vld [vmem:[%s5092_s5 + $0xec0] sm:$0xff]  ;;  %v699_v45 = vld [vmem:[%s5092_s5 + $0xed0] sm:$0xff] }
 0x168   : > { %2587 = vmatprep.subr.mxu0 %v554_v47  ;;  %2658 = vmatprep.subr.mxu1 %v556_v48  ;;  %v690_v47 = vld [vmem:[%s5092_s5 + $0xe88] sm:$0xff]  ;;  %v692_v48 = vld [vmem:[%s5092_s5 + $0xe98] sm:$0xff] }
 0x16b   : > { %2588 = vmatpush1.xpose.msra.mxu0 %v553_v51  ;;  %2659 = vmatpush1.xpose.msra.mxu1 %v555_v52  ;;  %v689_v51 = vld [vmem:[%s5092_s5 + $0xe80] sm:$0xff]  ;;  %v691_v52 = vld [vmem:[%s5092_s5 + $0xe90] sm:$0xff] }
 0x16c   : > { %2589 = vmatprep.subr.mxu0 %v546_v54  ;;  %2660 = vmatprep.subr.mxu1 %v548_v55  ;;  %v682_v54 = vld [vmem:[%s5092_s5 + $0xe48] sm:$0xff]  ;;  %v684_v55 = vld [vmem:[%s5092_s5 + $0xe58] sm:$0xff] }
 0x16f   : > { %2590 = vmatpush1.xpose.msra.mxu0 %v545_v56  ;;  %2661 = vmatpush1.xpose.msra.mxu1 %v547_v57  ;;  %v681_v56 = vld [vmem:[%s5092_s5 + $0xe40] sm:$0xff]  ;;  %v683_v57 = vld [vmem:[%s5092_s5 + $0xe50] sm:$0xff] }
 0x170   : > { %2591 = vmatprep.subr.mxu0 %v538_v58  ;;  %2662 = vmatprep.subr.mxu1 %v540_v59  ;;  %v674_v58 = vld [vmem:[%s5092_s5 + $0xe08] sm:$0xff]  ;;  %v676_v59 = vld [vmem:[%s5092_s5 + $0xe18] sm:$0xff] }
 0x173   : > { %2592 = vmatpush1.xpose.msra.mxu0 %v537_v60  ;;  %2663 = vmatpush1.xpose.msra.mxu1 %v539_v61  ;;  %v673_v60 = vld [vmem:[%s5092_s5 + $0xe00] sm:$0xff]  ;;  %v675_v61 = vld [vmem:[%s5092_s5 + $0xe10] sm:$0xff] }
 0x174   : > { %2593 = vmatprep.subr.mxu0 %v530_v62  ;;  %2664 = vmatprep.subr.mxu1 %v532_v63  ;;  %v666_v62 = vld [vmem:[%s5092_s5 + $0xdc8] sm:$0xff]  ;;  %v668_v63 = vld [vmem:[%s5092_s5 + $0xdd8] sm:$0xff] }
 0x177   : > { %2594 = vmatpush1.xpose.msra.mxu0 %v529_v0  ;;  %2665 = vmatpush1.xpose.msra.mxu1 %v531_v1  ;;  %v665_v0 = vld [vmem:[%s5092_s5 + $0xdc0] sm:$0xff]  ;;  %v667_v1 = vld [vmem:[%s5092_s5 + $0xdd0] sm:$0xff] }
 0x178   : > { %2595 = vmatprep.subr.mxu0 %v522_v2  ;;  %2666 = vmatprep.subr.mxu1 %v524_v3  ;;  %v658_v2 = vld [vmem:[%s5092_s5 + $0xd88] sm:$0xff]  ;;  %v660_v3 = vld [vmem:[%s5092_s5 + $0xd98] sm:$0xff] }
 0x17b   : > { %2596 = vmatpush1.xpose.msra.mxu0 %v521_v4  ;;  %2667 = vmatpush1.xpose.msra.mxu1 %v523_v5  ;;  %v657_v4 = vld [vmem:[%s5092_s5 + $0xd80] sm:$0xff]  ;;  %v659_v5 = vld [vmem:[%s5092_s5 + $0xd90] sm:$0xff] }
 0x17c   : > { %2597 = vmatprep.subr.mxu0 %v514_v6  ;;  %2668 = vmatprep.subr.mxu1 %v516_v7  ;;  %v650_v6 = vld [vmem:[%s5092_s5 + $0xd48] sm:$0xff]  ;;  %v652_v7 = vld [vmem:[%s5092_s5 + $0xd58] sm:$0xff] }
 0x17f   : > { %2598 = vmatpush1.xpose.msra.mxu0 %v513_v8  ;;  %2669 = vmatpush1.xpose.msra.mxu1 %v515_v9  ;;  %v649_v8 = vld [vmem:[%s5092_s5 + $0xd40] sm:$0xff]  ;;  %v651_v9 = vld [vmem:[%s5092_s5 + $0xd50] sm:$0xff] }
 0x180   : > { %2599 = vmatprep.subr.mxu0 %v506_v10  ;;  %2670 = vmatprep.subr.mxu1 %v508_v11  ;;  %v642_v10 = vld [vmem:[%s5092_s5 + $0xd08] sm:$0xff]  ;;  %v644_v11 = vld [vmem:[%s5092_s5 + $0xd18] sm:$0xff] }
 0x183   : > { %2600 = vmatpush1.xpose.msra.mxu0 %v505_v14  ;;  %2671 = vmatpush1.xpose.msra.mxu1 %v507_v15  ;;  %v641_v14 = vld [vmem:[%s5092_s5 + $0xd00] sm:$0xff]  ;;  %v643_v15 = vld [vmem:[%s5092_s5 + $0xd10] sm:$0xff] }
 0x184   : > { %2601 = vmatprep.subr.mxu0 %v498_v16  ;;  %2672 = vmatprep.subr.mxu1 %v500_v17  ;;  %v634_v16 = vld [vmem:[%s5092_s5 + $0xcc8] sm:$0xff]  ;;  %v636_v17 = vld [vmem:[%s5092_s5 + $0xcd8] sm:$0xff] }
 0x187   : > { %2602 = vmatpush1.xpose.msra.mxu0 %v497_v20  ;;  %2673 = vmatpush1.xpose.msra.mxu1 %v499_v21  ;;  %v633_v20 = vld [vmem:[%s5092_s5 + $0xcc0] sm:$0xff]  ;;  %v635_v21 = vld [vmem:[%s5092_s5 + $0xcd0] sm:$0xff] }
 0x188   : > { %2603 = vmatprep.subr.mxu0 %v490_v22  ;;  %2674 = vmatprep.subr.mxu1 %v492_v23  ;;  %v626_v22 = vld [vmem:[%s5092_s5 + $0xc88] sm:$0xff]  ;;  %v628_v23 = vld [vmem:[%s5092_s5 + $0xc98] sm:$0xff] }
 0x18b   : > { %2604 = vmatpush1.xpose.msra.mxu0 %v489_v46  ;;  %2675 = vmatpush1.xpose.msra.mxu1 %v491_v50  ;;  %v625_v46 = vld [vmem:[%s5092_s5 + $0xc80] sm:$0xff]  ;;  %v627_v50 = vld [vmem:[%s5092_s5 + $0xc90] sm:$0xff] }
 0x18c   : > { %2605 = vmatprep.subr.mxu0 %v482_v24  ;;  %2676 = vmatprep.subr.mxu1 %v484_v25  ;;  %v618_v24 = vld [vmem:[%s5092_s5 + $0xc48] sm:$0xff]  ;;  %v620_v25 = vld [vmem:[%s5092_s5 + $0xc58] sm:$0xff] }
 0x18f   : > { %2606 = vmatpush1.xpose.msra.mxu0 %v481_v26  ;;  %2677 = vmatpush1.xpose.msra.mxu1 %v483_v27  ;;  %v617_v26 = vld [vmem:[%s5092_s5 + $0xc40] sm:$0xff]  ;;  %v619_v27 = vld [vmem:[%s5092_s5 + $0xc50] sm:$0xff] }
 0x190   : > { %2607 = vmatprep.subr.mxu0 %v730_v28  ;;  %2678 = vmatprep.subr.mxu1 %v732_v29  ;;  %v610_v28 = vld [vmem:[%s5092_s5 + $0xc08] sm:$0xff]  ;;  %v612_v29 = vld [vmem:[%s5092_s5 + $0xc18] sm:$0xff] }
 0x193   : > { %2608 = vmatpush2.xpose.msra.mxu0 %v729_v30  ;;  %2679 = vmatpush2.xpose.msra.mxu1 %v731_v31  ;;  %v609_v30 = vld [vmem:[%s5092_s5 + $0xc00] sm:$0xff]  ;;  %v611_v31 = vld [vmem:[%s5092_s5 + $0xc10] sm:$0xff] }
 0x194   : > { %2609 = vmatprep.subr.mxu0 %v722_v32  ;;  %2680 = vmatprep.subr.mxu1 %v724_v33  ;;  %v606_v32 = vld [vmem:[%s5092_s5 + $0xbe8] sm:$0xff]  ;;  %v608_v33 = vld [vmem:[%s5092_s5 + $0xbf8] sm:$0xff] }
 0x197   : > { %2610 = vmatpush2.xpose.msra.mxu0 %v721_v12  ;;  %2681 = vmatpush2.xpose.msra.mxu1 %v723_v13  ;;  %v605_v12 = vld [vmem:[%s5092_s5 + $0xbe0] sm:$0xff]  ;;  %v607_v13 = vld [vmem:[%s5092_s5 + $0xbf0] sm:$0xff] }
 0x198   : > { %2611 = vmatprep.subr.mxu0 %v714_v34  ;;  %2682 = vmatprep.subr.mxu1 %v716_v35  ;;  %v598_v34 = vld [vmem:[%s5092_s5 + $0xba8] sm:$0xff]  ;;  %v600_v35 = vld [vmem:[%s5092_s5 + $0xbb8] sm:$0xff] }
 0x19b   : > { %2612 = vmatpush2.xpose.msra.mxu0 %v713_v36  ;;  %2683 = vmatpush2.xpose.msra.mxu1 %v715_v37  ;;  %v4792_v36 = vld [vmem:[#allocation5] sm:$0xff]  ;;  %v4793_v37 = vld [vmem:[#allocation5 + $0x8] sm:$0xff] }
 0x19c   : > { %2613 = vmatprep.subr.mxu0 %v706_v38  ;;  %2684 = vmatprep.subr.mxu1 %v708_v39  ;;  %v597_v38 = vld [vmem:[%s5092_s5 + $0xba0] sm:$0xff]  ;;  %v599_v39 = vld [vmem:[%s5092_s5 + $0xbb0] sm:$0xff] }
 0x19f   : > { %2614 = vmatpush2.xpose.msra.mxu0 %v705_v40  ;;  %2685 = vmatpush2.xpose.msra.mxu1 %v707_v41  ;;  %v590_v40 = vld [vmem:[%s5092_s5 + $0xb68] sm:$0xff]  ;;  %v592_v41 = vld [vmem:[%s5092_s5 + $0xb78] sm:$0xff] }
 0x1a0   : > { %2615 = vmatprep.subr.mxu0 %v698_v42  ;;  %2686 = vmatprep.subr.mxu1 %v700_v43  ;;  %v589_v42 = vld [vmem:[%s5092_s5 + $0xb60] sm:$0xff]  ;;  %v591_v43 = vld [vmem:[%s5092_s5 + $0xb70] sm:$0xff] }
 0x1a3   : > { %2616 = vmatpush2.xpose.msra.mxu0 %v697_v44  ;;  %2687 = vmatpush2.xpose.msra.mxu1 %v699_v45  ;;  %v582_v44 = vld [vmem:[%s5092_s5 + $0xb28] sm:$0xff]  ;;  %v584_v45 = vld [vmem:[%s5092_s5 + $0xb38] sm:$0xff] }
 0x1a4   : > { %2617 = vmatprep.subr.mxu0 %v690_v47  ;;  %2688 = vmatprep.subr.mxu1 %v692_v48  ;;  %v581_v47 = vld [vmem:[%s5092_s5 + $0xb20] sm:$0xff]  ;;  %v583_v48 = vld [vmem:[%s5092_s5 + $0xb30] sm:$0xff] }
 0x1a7   : > { %2618 = vmatpush2.xpose.msra.mxu0 %v689_v51  ;;  %2689 = vmatpush2.xpose.msra.mxu1 %v691_v52  ;;  %v574_v51 = vld [vmem:[%s5092_s5 + $0xae8] sm:$0xff]  ;;  %v576_v52 = vld [vmem:[%s5092_s5 + $0xaf8] sm:$0xff] }
 0x1a8   : > { %2619 = vmatprep.subr.mxu0 %v682_v54  ;;  %2690 = vmatprep.subr.mxu1 %v684_v55  ;;  %v573_v54 = vld [vmem:[%s5092_s5 + $0xae0] sm:$0xff]  ;;  %v575_v55 = vld [vmem:[%s5092_s5 + $0xaf0] sm:$0xff] }
 0x1ab   : > { %2620 = vmatpush2.xpose.msra.mxu0 %v681_v56  ;;  %2691 = vmatpush2.xpose.msra.mxu1 %v683_v57  ;;  %v566_v56 = vld [vmem:[%s5092_s5 + $0xaa8] sm:$0xff]  ;;  %v568_v57 = vld [vmem:[%s5092_s5 + $0xab8] sm:$0xff] }
 0x1ac   : > { %2621 = vmatprep.subr.mxu0 %v674_v58  ;;  %2692 = vmatprep.subr.mxu1 %v676_v59  ;;  %v565_v58 = vld [vmem:[%s5092_s5 + $0xaa0] sm:$0xff]  ;;  %v567_v59 = vld [vmem:[%s5092_s5 + $0xab0] sm:$0xff] }
 0x1af   : > { %2622 = vmatpush2.xpose.msra.mxu0 %v673_v60  ;;  %2693 = vmatpush2.xpose.msra.mxu1 %v675_v61  ;;  %v558_v60 = vld [vmem:[%s5092_s5 + $0xa68] sm:$0xff]  ;;  %v560_v61 = vld [vmem:[%s5092_s5 + $0xa78] sm:$0xff] }
 0x1b0   : > { %2623 = vmatprep.subr.mxu0 %v666_v62  ;;  %2694 = vmatprep.subr.mxu1 %v668_v63  ;;  %v557_v62 = vld [vmem:[%s5092_s5 + $0xa60] sm:$0xff]  ;;  %v559_v63 = vld [vmem:[%s5092_s5 + $0xa70] sm:$0xff] }
 0x1b3   : > { %2624 = vmatpush2.xpose.msra.mxu0 %v665_v0  ;;  %2695 = vmatpush2.xpose.msra.mxu1 %v667_v1  ;;  %v550_v0 = vld [vmem:[%s5092_s5 + $0xa28] sm:$0xff]  ;;  %v552_v1 = vld [vmem:[%s5092_s5 + $0xa38] sm:$0xff] }
 0x1b4   : > { %2625 = vmatprep.subr.mxu0 %v658_v2  ;;  %2696 = vmatprep.subr.mxu1 %v660_v3  ;;  %v549_v2 = vld [vmem:[%s5092_s5 + $0xa20] sm:$0xff]  ;;  %v551_v3 = vld [vmem:[%s5092_s5 + $0xa30] sm:$0xff] }
 0x1b7   : > { %2626 = vmatpush2.xpose.msra.mxu0 %v657_v4  ;;  %2697 = vmatpush2.xpose.msra.mxu1 %v659_v5  ;;  %v542_v4 = vld [vmem:[%s5092_s5 + $0x9e8] sm:$0xff]  ;;  %v544_v5 = vld [vmem:[%s5092_s5 + $0x9f8] sm:$0xff] }
 0x1b8   : > { %2627 = vmatprep.subr.mxu0 %v650_v6  ;;  %2698 = vmatprep.subr.mxu1 %v652_v7  ;;  %v541_v6 = vld [vmem:[%s5092_s5 + $0x9e0] sm:$0xff]  ;;  %v543_v7 = vld [vmem:[%s5092_s5 + $0x9f0] sm:$0xff] }
 0x1bb   : > { %2628 = vmatpush2.xpose.msra.mxu0 %v649_v8  ;;  %2699 = vmatpush2.xpose.msra.mxu1 %v651_v9  ;;  %v534_v8 = vld [vmem:[%s5092_s5 + $0x9a8] sm:$0xff]  ;;  %v536_v9 = vld [vmem:[%s5092_s5 + $0x9b8] sm:$0xff] }
 0x1bc   : > { %2629 = vmatprep.subr.mxu0 %v642_v10  ;;  %2700 = vmatprep.subr.mxu1 %v644_v11  ;;  %v533_v10 = vld [vmem:[%s5092_s5 + $0x9a0] sm:$0xff]  ;;  %v535_v11 = vld [vmem:[%s5092_s5 + $0x9b0] sm:$0xff] }
 0x1bf   : > { %2630 = vmatpush2.xpose.msra.mxu0 %v641_v14  ;;  %2701 = vmatpush2.xpose.msra.mxu1 %v643_v15  ;;  %v526_v14 = vld [vmem:[%s5092_s5 + $0x968] sm:$0xff]  ;;  %v528_v15 = vld [vmem:[%s5092_s5 + $0x978] sm:$0xff] }
 0x1c0   : > { %2631 = vmatprep.subr.mxu0 %v634_v16  ;;  %2702 = vmatprep.subr.mxu1 %v636_v17  ;;  %v525_v16 = vld [vmem:[%s5092_s5 + $0x960] sm:$0xff]  ;;  %v527_v17 = vld [vmem:[%s5092_s5 + $0x970] sm:$0xff] }
 0x1c3   : > { %2632 = vmatpush2.xpose.msra.mxu0 %v633_v20  ;;  %2703 = vmatpush2.xpose.msra.mxu1 %v635_v21  ;;  %v518_v20 = vld [vmem:[%s5092_s5 + $0x928] sm:$0xff]  ;;  %v520_v21 = vld [vmem:[%s5092_s5 + $0x938] sm:$0xff] }
 0x1c4   : > { %2633 = vmatprep.subr.mxu0 %v626_v22  ;;  %2704 = vmatprep.subr.mxu1 %v628_v23  ;;  %v517_v22 = vld [vmem:[%s5092_s5 + $0x920] sm:$0xff]  ;;  %v519_v23 = vld [vmem:[%s5092_s5 + $0x930] sm:$0xff] }
 0x1c7   : > { %2634 = vmatpush2.xpose.msra.mxu0 %v625_v46  ;;  %2705 = vmatpush2.xpose.msra.mxu1 %v627_v50  ;;  %v510_v46 = vld [vmem:[%s5092_s5 + $0x8e8] sm:$0xff]  ;;  %v512_v50 = vld [vmem:[%s5092_s5 + $0x8f8] sm:$0xff] }
 0x1c8   : > { %2635 = vmatprep.subr.mxu0 %v618_v24  ;;  %2706 = vmatprep.subr.mxu1 %v620_v25  ;;  %v509_v24 = vld [vmem:[%s5092_s5 + $0x8e0] sm:$0xff]  ;;  %v511_v25 = vld [vmem:[%s5092_s5 + $0x8f0] sm:$0xff] }
 0x1cb   : > { %2636 = vmatpush2.xpose.msra.mxu0 %v617_v26  ;;  %2707 = vmatpush2.xpose.msra.mxu1 %v619_v27  ;;  %v502_v26 = vld [vmem:[%s5092_s5 + $0x8a8] sm:$0xff]  ;;  %v504_v27 = vld [vmem:[%s5092_s5 + $0x8b8] sm:$0xff] }
 0x1cc   : > { %2637 = vmatprep.subr.mxu0 %v610_v28  ;;  %2708 = vmatprep.subr.mxu1 %v612_v29  ;;  %v501_v28 = vld [vmem:[%s5092_s5 + $0x8a0] sm:$0xff]  ;;  %v503_v29 = vld [vmem:[%s5092_s5 + $0x8b0] sm:$0xff] }
 0x1cf   : > { %2638 = vmatpush2.xpose.msra.mxu0 %v609_v30  ;;  %2709 = vmatpush2.xpose.msra.mxu1 %v611_v31  ;;  %v494_v30 = vld [vmem:[%s5092_s5 + $0x868] sm:$0xff]  ;;  %v496_v31 = vld [vmem:[%s5092_s5 + $0x878] sm:$0xff] }
 0x1d0   : > { %2717 = vmatprep.subr.mxu0 %v606_v32  ;;  %2788 = vmatprep.subr.mxu1 %v608_v33  ;;  %v2357_v32 = vpop.f32.mrf.mxu0  ;;  %v493_v33 = vld [vmem:[%s5092_s5 + $0x860] sm:$0xff] }
 0x1d2   : > { %2640 = vmatmul.mubr.f32.vlgmr.msra.gmra.mxu0 %v4792_v36  ;;  %2711 = vmatmul.mubr.f32.vlgmr.msra.gmra.mxu1 %v4793_v37  ;;  %v2428_v36 = vpop.f32.mrf.mxu1  ;;  %v2359_v37 = vpop.f32.mrf.mxu0 }
 0x1d3   : > { %2718 = vmatpush1.xpose.msra.mxu0 %v605_v12  ;;  %2789 = vmatpush1.xpose.msra.mxu1 %v607_v13  ;;  %v495_v12 = vld [vmem:[%s5092_s5 + $0x870] sm:$0xff]  ;;  %v486_v13 = vld [vmem:[%s5092_s5 + $0x828] sm:$0xff] }
 0x1d4   : > { %2719 = vmatprep.subr.mxu0 %v598_v34  ;;  %2790 = vmatprep.subr.mxu1 %v600_v35  ;;  %v488_v34 = vld [vmem:[%s5092_s5 + $0x838] sm:$0xff]  ;;  %v5587_v35 = vpop.permute.xlu0 %2276 }
 0x1d5   : > { %2781 = vmatprep.mubr.f32.mxu0 %v5259_v18  ;;  %2852 = vmatprep.mubr.f32.mxu1 %v5263_v19 }
 0x1d7   : > { %2720 = vmatpush1.xpose.msra.mxu0 %v597_v38  ;;  %2791 = vmatpush1.xpose.msra.mxu1 %v599_v39  ;;  %v485_v38 = vld [vmem:[%s5092_s5 + $0x820] sm:$0xff]  ;;  %v487_v39 = vld [vmem:[%s5092_s5 + $0x830] sm:$0xff] }
 0x1d8   : > { %2721 = vmatprep.subr.mxu0 %v590_v40  ;;  %2792 = vmatprep.subr.mxu1 %v592_v41  ;;  %v2358_v40 = vadd.f32 %v2357_v32, %v5587_v35  ;;  %v734_v41 = vld [vmem:[%s5092_s5 + $0xfe8] sm:$0xff] }
 0x1d9   : > { %v662_v32 = vld [vmem:[%s5092_s5 + $0xda8] sm:$0xff] }
 0x1db   : > { %2722 = vmatpush1.xpose.msra.mxu0 %v589_v42  ;;  %2793 = vmatpush1.xpose.msra.mxu1 %v591_v43  ;;  %v736_v42 = vld [vmem:[%s5092_s5 + $0xff8] sm:$0xff]  ;;  %v2360_v43 = vadd.f32 %v2359_v37, %v5587_v35  ;;  %v653_v37 = vld [vmem:[%s5092_s5 + $0xd60] sm:$0xff] }
 0x1dc   : > { %2723 = vmatprep.subr.mxu0 %v582_v44  ;;  %2794 = vmatprep.subr.mxu1 %v584_v45  ;;  %v2430_v44 = vpop.f32.mrf.mxu1  ;;  %v733_v45 = vld [vmem:[%s5092_s5 + $0xfe0] sm:$0xff] }
 0x1df   : > { %2724 = vmatpush1.xpose.msra.mxu0 %v581_v47  ;;  %2795 = vmatpush1.xpose.msra.mxu1 %v583_v48  ;;  %v735_v47 = vld [vmem:[%s5092_s5 + $0xff0] sm:$0xff]  ;;  %v2429_v48 = vadd.f32 %v2428_v36, %v2358_v40  ;;  %v656_v36 = vld [vmem:[%s5092_s5 + $0xd78] sm:$0xff] }
 0x1e0   : > { %2725 = vmatprep.subr.mxu0 %v574_v51  ;;  %2796 = vmatprep.subr.mxu1 %v576_v52  ;;  %v726_v51 = vld [vmem:[%s5092_s5 + $0xfa8] sm:$0xff]  ;;  %v728_v52 = vld [vmem:[%s5092_s5 + $0xfb8] sm:$0xff] }
 0x1e1   : > { %v648_v40 = vld [vmem:[%s5092_s5 + $0xd38] sm:$0xff] }
 0x1e3   : > { %2726 = vmatpush1.xpose.msra.mxu0 %v573_v54  ;;  %2797 = vmatpush1.xpose.msra.mxu1 %v575_v55 }
 0x1e4   : > { %2727 = vmatprep.subr.mxu0 %v566_v56  ;;  %2798 = vmatprep.subr.mxu1 %v568_v57  ;;  %v2431_v56 = vadd.f32 %v2430_v44, %v2360_v43  ;;  %v638_v43 = vld [vmem:[%s5092_s5 + $0xce8] sm:$0xff]  ;;  %v640_v44 = vld [vmem:[%s5092_s5 + $0xcf8] sm:$0xff] }
 0x1e7   : > { %2728 = vmatpush1.xpose.msra.mxu0 %v565_v58  ;;  %2799 = vmatpush1.xpose.msra.mxu1 %v567_v59 }
 0x1e8   : > { %2729 = vmatprep.subr.mxu0 %v558_v60  ;;  %2800 = vmatprep.subr.mxu1 %v560_v61  ;;  %v725_v60 = vld [vmem:[%s5092_s5 + $0xfa0] sm:$0xff]  ;;  %v727_v61 = vld [vmem:[%s5092_s5 + $0xfb0] sm:$0xff] }
 0x1eb   : > { %2730 = vmatpush1.xpose.msra.mxu0 %v557_v62  ;;  %2801 = vmatpush1.xpose.msra.mxu1 %v559_v63  ;;  %v718_v63 = vld [vmem:[%s5092_s5 + $0xf68] sm:$0xff] }
 0x1ec   : > { %2731 = vmatprep.subr.mxu0 %v550_v0  ;;  %2802 = vmatprep.subr.mxu1 %v552_v1  ;;  %v720_v0 = vld [vmem:[%s5092_s5 + $0xf78] sm:$0xff] }
 0x1ef   : > { %2732 = vmatpush1.xpose.msra.mxu0 %v549_v2  ;;  %2803 = vmatpush1.xpose.msra.mxu1 %v551_v3  ;;  %v717_v3 = vld [vmem:[%s5092_s5 + $0xf60] sm:$0xff] }
 0x1f0   : > { %2733 = vmatprep.subr.mxu0 %v542_v4  ;;  %2804 = vmatprep.subr.mxu1 %v544_v5  ;;  %v719_v4 = vld [vmem:[%s5092_s5 + $0xf70] sm:$0xff] }
 0x1f3   : > { %2734 = vmatpush1.xpose.msra.mxu0 %v541_v6  ;;  %2805 = vmatpush1.xpose.msra.mxu1 %v543_v7  ;;  %v710_v6 = vld [vmem:[%s5092_s5 + $0xf28] sm:$0xff]  ;;  %v712_v7 = vld [vmem:[%s5092_s5 + $0xf38] sm:$0xff] }
 0x1f4   : > { %2735 = vmatprep.subr.mxu0 %v534_v8  ;;  %2806 = vmatprep.subr.mxu1 %v536_v9  ;;  %v709_v8 = vld [vmem:[%s5092_s5 + $0xf20] sm:$0xff]  ;;  %v711_v9 = vld [vmem:[%s5092_s5 + $0xf30] sm:$0xff] }
 0x1f7   : > { %2736 = vmatpush1.xpose.msra.mxu0 %v533_v10  ;;  %2807 = vmatpush1.xpose.msra.mxu1 %v535_v11  ;;  %v702_v10 = vld [vmem:[%s5092_s5 + $0xee8] sm:$0xff]  ;;  %v704_v11 = vld [vmem:[%s5092_s5 + $0xef8] sm:$0xff] }
 0x1f8   : > { %2737 = vmatprep.subr.mxu0 %v526_v14  ;;  %2808 = vmatprep.subr.mxu1 %v528_v15  ;;  %v701_v14 = vld [vmem:[%s5092_s5 + $0xee0] sm:$0xff]  ;;  %v703_v15 = vld [vmem:[%s5092_s5 + $0xef0] sm:$0xff] }
 0x1fb   : > { %2738 = vmatpush1.xpose.msra.mxu0 %v525_v16  ;;  %2809 = vmatpush1.xpose.msra.mxu1 %v527_v17  ;;  %v694_v16 = vld [vmem:[%s5092_s5 + $0xea8] sm:$0xff]  ;;  %v696_v17 = vld [vmem:[%s5092_s5 + $0xeb8] sm:$0xff] }
 0x1fc   : > { %2739 = vmatprep.subr.mxu0 %v518_v20  ;;  %2810 = vmatprep.subr.mxu1 %v520_v21  ;;  %v693_v20 = vld [vmem:[%s5092_s5 + $0xea0] sm:$0xff]  ;;  %v695_v21 = vld [vmem:[%s5092_s5 + $0xeb0] sm:$0xff] }
 0x1ff   : > { %2740 = vmatpush1.xpose.msra.mxu0 %v517_v22  ;;  %2811 = vmatpush1.xpose.msra.mxu1 %v519_v23  ;;  %v686_v22 = vld [vmem:[%s5092_s5 + $0xe68] sm:$0xff]  ;;  %v688_v23 = vld [vmem:[%s5092_s5 + $0xe78] sm:$0xff] }
 0x200   : > { %2741 = vmatprep.subr.mxu0 %v510_v46  ;;  %2812 = vmatprep.subr.mxu1 %v512_v50  ;;  %v685_v46 = vld [vmem:[%s5092_s5 + $0xe60] sm:$0xff]  ;;  %v687_v50 = vld [vmem:[%s5092_s5 + $0xe70] sm:$0xff] }
 0x203   : > { %2742 = vmatpush1.xpose.msra.mxu0 %v509_v24  ;;  %2813 = vmatpush1.xpose.msra.mxu1 %v511_v25  ;;  %v678_v24 = vld [vmem:[%s5092_s5 + $0xe28] sm:$0xff]  ;;  %v680_v25 = vld [vmem:[%s5092_s5 + $0xe38] sm:$0xff] }
 0x204   : > { %2743 = vmatprep.subr.mxu0 %v502_v26  ;;  %2814 = vmatprep.subr.mxu1 %v504_v27  ;;  %v677_v26 = vld [vmem:[%s5092_s5 + $0xe20] sm:$0xff]  ;;  %v679_v27 = vld [vmem:[%s5092_s5 + $0xe30] sm:$0xff] }
 0x207   : > { %2744 = vmatpush1.xpose.msra.mxu0 %v501_v28  ;;  %2815 = vmatpush1.xpose.msra.mxu1 %v503_v29  ;;  %v670_v28 = vld [vmem:[%s5092_s5 + $0xde8] sm:$0xff]  ;;  %v672_v29 = vld [vmem:[%s5092_s5 + $0xdf8] sm:$0xff] }
 0x208   : > { %2745 = vmatprep.subr.mxu0 %v494_v30  ;;  %2816 = vmatprep.subr.mxu1 %v496_v31  ;;  %v669_v30 = vld [vmem:[%s5092_s5 + $0xde0] sm:$0xff]  ;;  %v671_v31 = vld [vmem:[%s5092_s5 + $0xdf0] sm:$0xff] }
 0x20b   : > { %2746 = vmatpush1.xpose.msra.mxu0 %v493_v33  ;;  %2817 = vmatpush1.xpose.msra.mxu1 %v495_v12  ;;  %v664_v33 = vld [vmem:[%s5092_s5 + $0xdb8] sm:$0xff]  ;;  %v661_v12 = vld [vmem:[%s5092_s5 + $0xda0] sm:$0xff] }
 0x20c   : > { %2747 = vmatprep.subr.mxu0 %v486_v13  ;;  %2818 = vmatprep.subr.mxu1 %v488_v34  ;;  %v663_v13 = vld [vmem:[%s5092_s5 + $0xdb0] sm:$0xff]  ;;  %v654_v34 = vld [vmem:[%s5092_s5 + $0xd68] sm:$0xff] }
 0x20f   : > { %2748 = vmatpush1.xpose.msra.mxu0 %v485_v38  ;;  %2819 = vmatpush1.xpose.msra.mxu1 %v487_v39  ;;  %v655_v38 = vld [vmem:[%s5092_s5 + $0xd70] sm:$0xff]  ;;  %v646_v39 = vld [vmem:[%s5092_s5 + $0xd28] sm:$0xff] }
 0x210   : > { %2749 = vmatprep.subr.mxu0 %v734_v41  ;;  %2820 = vmatprep.subr.mxu1 %v736_v42  ;;  %v645_v41 = vld [vmem:[%s5092_s5 + $0xd20] sm:$0xff]  ;;  %v647_v42 = vld [vmem:[%s5092_s5 + $0xd30] sm:$0xff] }
 0x212   : > { %v2499_v54 = vpop.f32.mrf.mxu0  ;;  %v2570_v55 = vpop.f32.mrf.mxu1 }
 0x213   : > { %v2500_v57 = vadd.f32 %v2499_v54, %v2429_v48  ;;  %2750 = vmatpush2.xpose.msra.mxu0 %v733_v45  ;;  %2821 = vmatpush2.xpose.msra.mxu1 %v735_v47  ;;  %v637_v45 = vld [vmem:[%s5092_s5 + $0xce0] sm:$0xff]  ;;  %v639_v47 = vld [vmem:[%s5092_s5 + $0xcf0] sm:$0xff]  ;;  %v630_v48 = vld [vmem:[%s5092_s5 + $0xca8] sm:$0xff] }
 0x214   : > { %v2501_v58 = vpop.f32.mrf.mxu0  ;;  %v2572_v59 = vpop.f32.mrf.mxu1  ;;  %2751 = vmatprep.subr.mxu0 %v726_v51  ;;  %2822 = vmatprep.subr.mxu1 %v728_v52  ;;  %v632_v51 = vld [vmem:[%s5092_s5 + $0xcb8] sm:$0xff]  ;;  %v629_v52 = vld [vmem:[%s5092_s5 + $0xca0] sm:$0xff]  ;;  %v631_v54 = vld [vmem:[%s5092_s5 + $0xcb0] sm:$0xff] }
 0x215   : > { %v2502_v62 = vadd.f32 %v2501_v58, %v2431_v56  ;;  %v2571_v1 = vadd.f32 %v2570_v55, %v2500_v57  ;;  %v622_v55 = vld [vmem:[%s5092_s5 + $0xc68] sm:$0xff]  ;;  %v624_v56 = vld [vmem:[%s5092_s5 + $0xc78] sm:$0xff]  ;;  %v621_v57 = vld [vmem:[%s5092_s5 + $0xc60] sm:$0xff] }
 0x216   : > { %v623_v58 = vld [vmem:[%s5092_s5 + $0xc70] sm:$0xff] }
 0x217   : > { %v2573_v2 = vadd.f32 %v2572_v59, %v2502_v62  ;;  %2752 = vmatpush2.xpose.msra.mxu0 %v725_v60  ;;  %2823 = vmatpush2.xpose.msra.mxu1 %v727_v61  ;;  %v614_v59 = vld [vmem:[%s5092_s5 + $0xc28] sm:$0xff]  ;;  %v616_v60 = vld [vmem:[%s5092_s5 + $0xc38] sm:$0xff]  ;;  %v613_v61 = vld [vmem:[%s5092_s5 + $0xc20] sm:$0xff] }
 0x218   : > { %2753 = vmatprep.subr.mxu0 %v718_v63  ;;  %2824 = vmatprep.subr.mxu1 %v720_v0  ;;  %v615_v62 = vld [vmem:[%s5092_s5 + $0xc30] sm:$0xff]  ;;  %v858_v63 = vld [vmem:[%s5092_s5 + $0x13c8] sm:$0xff]  ;;  %v860_v0 = vld [vmem:[%s5092_s5 + $0x13d8] sm:$0xff] }
 0x219   : > { %v4579_v5 = vcombine.low %v2571_v1, %v2573_v2  ;;  %v857_v1 = vld [vmem:[%s5092_s5 + $0x13c0] sm:$0xff]  ;;  %v859_v2 = vld [vmem:[%s5092_s5 + $0x13d0] sm:$0xff] }
 0x21b   : > { %4595 = vst [vmem:[%s5608_s11] sm:$0xff] %v4579_v5  ;;  %2754 = vmatpush2.xpose.msra.mxu0 %v717_v3  ;;  %2825 = vmatpush2.xpose.msra.mxu1 %v719_v4  ;;  %v850_v3 = vld [vmem:[%s5092_s5 + $0x1388] sm:$0xff]  ;;  %v852_v4 = vld [vmem:[%s5092_s5 + $0x1398] sm:$0xff]  ;;  %v4794_v5 = vld [vmem:[#allocation5 + $0x10] sm:$0xff] }
 0x21c   : > { %2755 = vmatprep.subr.mxu0 %v710_v6  ;;  %2826 = vmatprep.subr.mxu1 %v712_v7  ;;  %v4795_v6 = vld [vmem:[#allocation5 + $0x18] sm:$0xff]  ;;  %v849_v7 = vld [vmem:[%s5092_s5 + $0x1380] sm:$0xff] }
 0x21f   : > { %2756 = vmatpush2.xpose.msra.mxu0 %v709_v8  ;;  %2827 = vmatpush2.xpose.msra.mxu1 %v711_v9  ;;  %v851_v8 = vld [vmem:[%s5092_s5 + $0x1390] sm:$0xff]  ;;  %v842_v9 = vld [vmem:[%s5092_s5 + $0x1348] sm:$0xff] }
 0x220   : > { %2757 = vmatprep.subr.mxu0 %v702_v10  ;;  %2828 = vmatprep.subr.mxu1 %v704_v11  ;;  %v844_v10 = vld [vmem:[%s5092_s5 + $0x1358] sm:$0xff]  ;;  %v841_v11 = vld [vmem:[%s5092_s5 + $0x1340] sm:$0xff] }
 0x223   : > { %2758 = vmatpush2.xpose.msra.mxu0 %v701_v14  ;;  %2829 = vmatpush2.xpose.msra.mxu1 %v703_v15  ;;  %v843_v14 = vld [vmem:[%s5092_s5 + $0x1350] sm:$0xff]  ;;  %v834_v15 = vld [vmem:[%s5092_s5 + $0x1308] sm:$0xff] }
 0x224   : > { %2759 = vmatprep.subr.mxu0 %v694_v16  ;;  %2830 = vmatprep.subr.mxu1 %v696_v17  ;;  %v836_v16 = vld [vmem:[%s5092_s5 + $0x1318] sm:$0xff]  ;;  %v833_v17 = vld [vmem:[%s5092_s5 + $0x1300] sm:$0xff] }
 0x227   : > { %2760 = vmatpush2.xpose.msra.mxu0 %v693_v20  ;;  %2831 = vmatpush2.xpose.msra.mxu1 %v695_v21  ;;  %v835_v20 = vld [vmem:[%s5092_s5 + $0x1310] sm:$0xff]  ;;  %v826_v21 = vld [vmem:[%s5092_s5 + $0x12c8] sm:$0xff] }
 0x228   : > { %2761 = vmatprep.subr.mxu0 %v686_v22  ;;  %2832 = vmatprep.subr.mxu1 %v688_v23  ;;  %v828_v22 = vld [vmem:[%s5092_s5 + $0x12d8] sm:$0xff]  ;;  %v825_v23 = vld [vmem:[%s5092_s5 + $0x12c0] sm:$0xff] }
 0x22b   : > { %2762 = vmatpush2.xpose.msra.mxu0 %v685_v46  ;;  %2833 = vmatpush2.xpose.msra.mxu1 %v687_v50  ;;  %v827_v46 = vld [vmem:[%s5092_s5 + $0x12d0] sm:$0xff]  ;;  %v818_v50 = vld [vmem:[%s5092_s5 + $0x1288] sm:$0xff] }
 0x22c   : > { %2763 = vmatprep.subr.mxu0 %v678_v24  ;;  %2834 = vmatprep.subr.mxu1 %v680_v25  ;;  %v820_v24 = vld [vmem:[%s5092_s5 + $0x1298] sm:$0xff]  ;;  %v817_v25 = vld [vmem:[%s5092_s5 + $0x1280] sm:$0xff] }
 0x22f   : > { %2764 = vmatpush2.xpose.msra.mxu0 %v677_v26  ;;  %2835 = vmatpush2.xpose.msra.mxu1 %v679_v27  ;;  %v819_v26 = vld [vmem:[%s5092_s5 + $0x1290] sm:$0xff]  ;;  %v810_v27 = vld [vmem:[%s5092_s5 + $0x1248] sm:$0xff] }
 0x230   : > { %2765 = vmatprep.subr.mxu0 %v670_v28  ;;  %2836 = vmatprep.subr.mxu1 %v672_v29  ;;  %v812_v28 = vld [vmem:[%s5092_s5 + $0x1258] sm:$0xff]  ;;  %v809_v29 = vld [vmem:[%s5092_s5 + $0x1240] sm:$0xff] }
 0x233   : > { %2766 = vmatpush2.xpose.msra.mxu0 %v669_v30  ;;  %2837 = vmatpush2.xpose.msra.mxu1 %v671_v31  ;;  %v811_v30 = vld [vmem:[%s5092_s5 + $0x1250] sm:$0xff]  ;;  %v802_v31 = vld [vmem:[%s5092_s5 + $0x1208] sm:$0xff] }
 0x234   : > { %2767 = vmatprep.subr.mxu0 %v662_v32  ;;  %2838 = vmatprep.subr.mxu1 %v664_v33  ;;  %v804_v32 = vld [vmem:[%s5092_s5 + $0x1218] sm:$0xff]  ;;  %v801_v33 = vld [vmem:[%s5092_s5 + $0x1200] sm:$0xff] }
 0x237   : > { %2768 = vmatpush2.xpose.msra.mxu0 %v661_v12  ;;  %2839 = vmatpush2.xpose.msra.mxu1 %v663_v13  ;;  %v803_v12 = vld [vmem:[%s5092_s5 + $0x1210] sm:$0xff]  ;;  %v794_v13 = vld [vmem:[%s5092_s5 + $0x11c8] sm:$0xff] }
 0x238   : > { %2769 = vmatprep.subr.mxu0 %v654_v34  ;;  %2840 = vmatprep.subr.mxu1 %v656_v36  ;;  %v796_v34 = vld [vmem:[%s5092_s5 + $0x11d8] sm:$0xff]  ;;  %v793_v36 = vld [vmem:[%s5092_s5 + $0x11c0] sm:$0xff] }
 0x23b   : > { %2770 = vmatpush2.xpose.msra.mxu0 %v653_v37  ;;  %2841 = vmatpush2.xpose.msra.mxu1 %v655_v38  ;;  %v795_v37 = vld [vmem:[%s5092_s5 + $0x11d0] sm:$0xff]  ;;  %v786_v38 = vld [vmem:[%s5092_s5 + $0x1188] sm:$0xff] }
 0x23c   : > { %2771 = vmatprep.subr.mxu0 %v646_v39  ;;  %2842 = vmatprep.subr.mxu1 %v648_v40  ;;  %v788_v39 = vld [vmem:[%s5092_s5 + $0x1198] sm:$0xff]  ;;  %v785_v40 = vld [vmem:[%s5092_s5 + $0x1180] sm:$0xff] }
 0x23f   : > { %2772 = vmatpush2.xpose.msra.mxu0 %v645_v41  ;;  %2843 = vmatpush2.xpose.msra.mxu1 %v647_v42  ;;  %v787_v41 = vld [vmem:[%s5092_s5 + $0x1190] sm:$0xff]  ;;  %v778_v42 = vld [vmem:[%s5092_s5 + $0x1148] sm:$0xff] }
 0x240   : > { %2773 = vmatprep.subr.mxu0 %v638_v43  ;;  %2844 = vmatprep.subr.mxu1 %v640_v44  ;;  %v780_v43 = vld [vmem:[%s5092_s5 + $0x1158] sm:$0xff]  ;;  %v777_v44 = vld [vmem:[%s5092_s5 + $0x1140] sm:$0xff] }
 0x243   : > { %2774 = vmatpush2.xpose.msra.mxu0 %v637_v45  ;;  %2845 = vmatpush2.xpose.msra.mxu1 %v639_v47  ;;  %v779_v45 = vld [vmem:[%s5092_s5 + $0x1150] sm:$0xff]  ;;  %v770_v47 = vld [vmem:[%s5092_s5 + $0x1108] sm:$0xff] }
 0x244   : > { %2775 = vmatprep.subr.mxu0 %v630_v48  ;;  %2846 = vmatprep.subr.mxu1 %v632_v51  ;;  %v772_v48 = vld [vmem:[%s5092_s5 + $0x1118] sm:$0xff]  ;;  %v769_v51 = vld [vmem:[%s5092_s5 + $0x1100] sm:$0xff] }
 0x247   : > { %2776 = vmatpush2.xpose.msra.mxu0 %v629_v52  ;;  %2847 = vmatpush2.xpose.msra.mxu1 %v631_v54  ;;  %v771_v52 = vld [vmem:[%s5092_s5 + $0x1110] sm:$0xff]  ;;  %v762_v54 = vld [vmem:[%s5092_s5 + $0x10c8] sm:$0xff] }
 0x248   : > { %2777 = vmatprep.subr.mxu0 %v622_v55  ;;  %2848 = vmatprep.subr.mxu1 %v624_v56  ;;  %v764_v55 = vld [vmem:[%s5092_s5 + $0x10d8] sm:$0xff]  ;;  %v761_v56 = vld [vmem:[%s5092_s5 + $0x10c0] sm:$0xff] }
 0x24b   : > { %2778 = vmatpush2.xpose.msra.mxu0 %v621_v57  ;;  %2849 = vmatpush2.xpose.msra.mxu1 %v623_v58  ;;  %v763_v57 = vld [vmem:[%s5092_s5 + $0x10d0] sm:$0xff]  ;;  %v754_v58 = vld [vmem:[%s5092_s5 + $0x1088] sm:$0xff] }
 0x24c   : > { %2779 = vmatprep.subr.mxu0 %v614_v59  ;;  %2850 = vmatprep.subr.mxu1 %v616_v60  ;;  %v756_v59 = vld [vmem:[%s5092_s5 + $0x1098] sm:$0xff]  ;;  %v753_v60 = vld [vmem:[%s5092_s5 + $0x1080] sm:$0xff] }
 0x24f   : > { %2780 = vmatpush2.xpose.msra.mxu0 %v613_v61  ;;  %2851 = vmatpush2.xpose.msra.mxu1 %v615_v62  ;;  %v755_v61 = vld [vmem:[%s5092_s5 + $0x1090] sm:$0xff]  ;;  %v746_v62 = vld [vmem:[%s5092_s5 + $0x1048] sm:$0xff] }
 0x250   : > { %2859 = vmatprep.subr.mxu0 %v858_v63  ;;  %2930 = vmatprep.subr.mxu1 %v860_v0  ;;  %v748_v63 = vld [vmem:[%s5092_s5 + $0x1058] sm:$0xff]  ;;  %v745_v0 = vld [vmem:[%s5092_s5 + $0x1040] sm:$0xff] }
 0x252   : > { %2782 = vmatmul.mubr.f32.vlgmr.msra.gmra.mxu0 %v4794_v5  ;;  %2853 = vmatmul.mubr.f32.vlgmr.msra.gmra.mxu1 %v4795_v6  ;;  %v739_v5 = vld [vmem:[%s5092_s5 + $0x1010] sm:$0xff]  ;;  %v986_v6 = vld [vmem:[%s5092_s5 + $0x17c8] sm:$0xff] }
 0x253   : > { %2860 = vmatpush1.xpose.msra.mxu0 %v857_v1  ;;  %2931 = vmatpush1.xpose.msra.mxu1 %v859_v2  ;;  %v747_v1 = vld [vmem:[%s5092_s5 + $0x1050] sm:$0xff]  ;;  %v738_v2 = vld [vmem:[%s5092_s5 + $0x1008] sm:$0xff] }
 0x254   : > { %2861 = vmatprep.subr.mxu0 %v850_v3  ;;  %2932 = vmatprep.subr.mxu1 %v852_v4  ;;  %v740_v3 = vld [vmem:[%s5092_s5 + $0x1018] sm:$0xff]  ;;  %v737_v4 = vld [vmem:[%s5092_s5 + $0x1000] sm:$0xff] }
 0x255   : > { %2923 = vmatprep.mubr.f32.mxu0 %v5154_v49  ;;  %2994 = vmatprep.mubr.f32.mxu1 %v5162_v53 }
 0x257   : > { %2862 = vmatpush1.xpose.msra.mxu0 %v849_v7  ;;  %2933 = vmatpush1.xpose.msra.mxu1 %v851_v8  ;;  %v988_v7 = vld [vmem:[%s5092_s5 + $0x17d8] sm:$0xff]  ;;  %v985_v8 = vld [vmem:[%s5092_s5 + $0x17c0] sm:$0xff] }
 0x258   : > { %2863 = vmatprep.subr.mxu0 %v842_v9  ;;  %2934 = vmatprep.subr.mxu1 %v844_v10  ;;  %v987_v9 = vld [vmem:[%s5092_s5 + $0x17d0] sm:$0xff]  ;;  %v978_v10 = vld [vmem:[%s5092_s5 + $0x1788] sm:$0xff] }
 0x25b   : > { %2864 = vmatpush1.xpose.msra.mxu0 %v841_v11  ;;  %2935 = vmatpush1.xpose.msra.mxu1 %v843_v14  ;;  %v980_v11 = vld [vmem:[%s5092_s5 + $0x1798] sm:$0xff]  ;;  %v977_v14 = vld [vmem:[%s5092_s5 + $0x1780] sm:$0xff] }
 0x25c   : > { %2865 = vmatprep.subr.mxu0 %v834_v15  ;;  %2936 = vmatprep.subr.mxu1 %v836_v16  ;;  %v979_v15 = vld [vmem:[%s5092_s5 + $0x1790] sm:$0xff]  ;;  %v970_v16 = vld [vmem:[%s5092_s5 + $0x1748] sm:$0xff] }
 0x25f   : > { %2866 = vmatpush1.xpose.msra.mxu0 %v833_v17  ;;  %2937 = vmatpush1.xpose.msra.mxu1 %v835_v20  ;;  %v972_v17 = vld [vmem:[%s5092_s5 + $0x1758] sm:$0xff]  ;;  %v969_v20 = vld [vmem:[%s5092_s5 + $0x1740] sm:$0xff] }
 0x260   : > { %2867 = vmatprep.subr.mxu0 %v826_v21  ;;  %2938 = vmatprep.subr.mxu1 %v828_v22  ;;  %v971_v21 = vld [vmem:[%s5092_s5 + $0x1750] sm:$0xff]  ;;  %v962_v22 = vld [vmem:[%s5092_s5 + $0x1708] sm:$0xff] }
 0x263   : > { %2868 = vmatpush1.xpose.msra.mxu0 %v825_v23  ;;  %2939 = vmatpush1.xpose.msra.mxu1 %v827_v46  ;;  %v964_v23 = vld [vmem:[%s5092_s5 + $0x1718] sm:$0xff]  ;;  %v961_v46 = vld [vmem:[%s5092_s5 + $0x1700] sm:$0xff] }
 0x264   : > { %2869 = vmatprep.subr.mxu0 %v818_v50  ;;  %2940 = vmatprep.subr.mxu1 %v820_v24  ;;  %v963_v50 = vld [vmem:[%s5092_s5 + $0x1710] sm:$0xff]  ;;  %v954_v24 = vld [vmem:[%s5092_s5 + $0x16c8] sm:$0xff] }
 0x267   : > { %2870 = vmatpush1.xpose.msra.mxu0 %v817_v25  ;;  %2941 = vmatpush1.xpose.msra.mxu1 %v819_v26  ;;  %v956_v25 = vld [vmem:[%s5092_s5 + $0x16d8] sm:$0xff]  ;;  %v953_v26 = vld [vmem:[%s5092_s5 + $0x16c0] sm:$0xff] }
 0x268   : > { %2871 = vmatprep.subr.mxu0 %v810_v27  ;;  %2942 = vmatprep.subr.mxu1 %v812_v28  ;;  %v955_v27 = vld [vmem:[%s5092_s5 + $0x16d0] sm:$0xff]  ;;  %v946_v28 = vld [vmem:[%s5092_s5 + $0x1688] sm:$0xff] }
 0x26b   : > { %2872 = vmatpush1.xpose.msra.mxu0 %v809_v29  ;;  %2943 = vmatpush1.xpose.msra.mxu1 %v811_v30  ;;  %v948_v29 = vld [vmem:[%s5092_s5 + $0x1698] sm:$0xff]  ;;  %v945_v30 = vld [vmem:[%s5092_s5 + $0x1680] sm:$0xff] }
 0x26c   : > { %2873 = vmatprep.subr.mxu0 %v802_v31  ;;  %2944 = vmatprep.subr.mxu1 %v804_v32  ;;  %v947_v31 = vld [vmem:[%s5092_s5 + $0x1690] sm:$0xff]  ;;  %v938_v32 = vld [vmem:[%s5092_s5 + $0x1648] sm:$0xff] }
 0x26f   : > { %2874 = vmatpush1.xpose.msra.mxu0 %v801_v33  ;;  %2945 = vmatpush1.xpose.msra.mxu1 %v803_v12  ;;  %v940_v33 = vld [vmem:[%s5092_s5 + $0x1658] sm:$0xff]  ;;  %v937_v12 = vld [vmem:[%s5092_s5 + $0x1640] sm:$0xff] }
 0x270   : > { %2875 = vmatprep.subr.mxu0 %v794_v13  ;;  %2946 = vmatprep.subr.mxu1 %v796_v34  ;;  %v939_v13 = vld [vmem:[%s5092_s5 + $0x1650] sm:$0xff]  ;;  %v930_v34 = vld [vmem:[%s5092_s5 + $0x1608] sm:$0xff] }
 0x273   : > { %2876 = vmatpush1.xpose.msra.mxu0 %v793_v36  ;;  %2947 = vmatpush1.xpose.msra.mxu1 %v795_v37  ;;  %v932_v36 = vld [vmem:[%s5092_s5 + $0x1618] sm:$0xff]  ;;  %v929_v37 = vld [vmem:[%s5092_s5 + $0x1600] sm:$0xff] }
 0x274   : > { %2877 = vmatprep.subr.mxu0 %v786_v38  ;;  %2948 = vmatprep.subr.mxu1 %v788_v39  ;;  %v931_v38 = vld [vmem:[%s5092_s5 + $0x1610] sm:$0xff]  ;;  %v922_v39 = vld [vmem:[%s5092_s5 + $0x15c8] sm:$0xff] }
 0x277   : > { %2878 = vmatpush1.xpose.msra.mxu0 %v785_v40  ;;  %2949 = vmatpush1.xpose.msra.mxu1 %v787_v41  ;;  %v924_v40 = vld [vmem:[%s5092_s5 + $0x15d8] sm:$0xff]  ;;  %v921_v41 = vld [vmem:[%s5092_s5 + $0x15c0] sm:$0xff] }
 0x278   : > { %2879 = vmatprep.subr.mxu0 %v778_v42  ;;  %2950 = vmatprep.subr.mxu1 %v780_v43  ;;  %v923_v42 = vld [vmem:[%s5092_s5 + $0x15d0] sm:$0xff]  ;;  %v914_v43 = vld [vmem:[%s5092_s5 + $0x1588] sm:$0xff] }
 0x27b   : > { %2880 = vmatpush1.xpose.msra.mxu0 %v777_v44  ;;  %2951 = vmatpush1.xpose.msra.mxu1 %v779_v45  ;;  %v916_v44 = vld [vmem:[%s5092_s5 + $0x1598] sm:$0xff]  ;;  %v913_v45 = vld [vmem:[%s5092_s5 + $0x1580] sm:$0xff] }
 0x27c   : > { %2881 = vmatprep.subr.mxu0 %v770_v47  ;;  %2952 = vmatprep.subr.mxu1 %v772_v48  ;;  %v915_v47 = vld [vmem:[%s5092_s5 + $0x1590] sm:$0xff]  ;;  %v906_v48 = vld [vmem:[%s5092_s5 + $0x1548] sm:$0xff] }
 0x27f   : > { %2882 = vmatpush1.xpose.msra.mxu0 %v769_v51  ;;  %2953 = vmatpush1.xpose.msra.mxu1 %v771_v52  ;;  %v908_v51 = vld [vmem:[%s5092_s5 + $0x1558] sm:$0xff]  ;;  %v905_v52 = vld [vmem:[%s5092_s5 + $0x1540] sm:$0xff] }
 0x280   : > { %2883 = vmatprep.subr.mxu0 %v762_v54  ;;  %2954 = vmatprep.subr.mxu1 %v764_v55  ;;  %v907_v54 = vld [vmem:[%s5092_s5 + $0x1550] sm:$0xff]  ;;  %v898_v55 = vld [vmem:[%s5092_s5 + $0x1508] sm:$0xff] }
 0x283   : > { %2884 = vmatpush1.xpose.msra.mxu0 %v761_v56  ;;  %2955 = vmatpush1.xpose.msra.mxu1 %v763_v57  ;;  %v900_v56 = vld [vmem:[%s5092_s5 + $0x1518] sm:$0xff]  ;;  %v897_v57 = vld [vmem:[%s5092_s5 + $0x1500] sm:$0xff] }
 0x284   : > { %2885 = vmatprep.subr.mxu0 %v754_v58  ;;  %2956 = vmatprep.subr.mxu1 %v756_v59  ;;  %v899_v58 = vld [vmem:[%s5092_s5 + $0x1510] sm:$0xff]  ;;  %v890_v59 = vld [vmem:[%s5092_s5 + $0x14c8] sm:$0xff] }
 0x287   : > { %2886 = vmatpush1.xpose.msra.mxu0 %v753_v60  ;;  %2957 = vmatpush1.xpose.msra.mxu1 %v755_v61  ;;  %v892_v60 = vld [vmem:[%s5092_s5 + $0x14d8] sm:$0xff]  ;;  %v889_v61 = vld [vmem:[%s5092_s5 + $0x14c0] sm:$0xff] }
 0x288   : > { %2887 = vmatprep.subr.mxu0 %v746_v62  ;;  %2958 = vmatprep.subr.mxu1 %v748_v63  ;;  %v891_v62 = vld [vmem:[%s5092_s5 + $0x14d0] sm:$0xff]  ;;  %v882_v63 = vld [vmem:[%s5092_s5 + $0x1488] sm:$0xff] }
 0x28b   : > { %2888 = vmatpush1.xpose.msra.mxu0 %v745_v0  ;;  %2959 = vmatpush1.xpose.msra.mxu1 %v747_v1  ;;  %v884_v0 = vld [vmem:[%s5092_s5 + $0x1498] sm:$0xff]  ;;  %v881_v1 = vld [vmem:[%s5092_s5 + $0x1480] sm:$0xff] }
 0x28c   : > { %2889 = vmatprep.subr.mxu0 %v738_v2  ;;  %2960 = vmatprep.subr.mxu1 %v740_v3  ;;  %v883_v2 = vld [vmem:[%s5092_s5 + $0x1490] sm:$0xff]  ;;  %v874_v3 = vld [vmem:[%s5092_s5 + $0x1448] sm:$0xff] }
 0x28f   : > { %2890 = vmatpush1.xpose.msra.mxu0 %v737_v4  ;;  %2961 = vmatpush1.xpose.msra.mxu1 %v739_v5  ;;  %v876_v4 = vld [vmem:[%s5092_s5 + $0x1458] sm:$0xff]  ;;  %v873_v5 = vld [vmem:[%s5092_s5 + $0x1440] sm:$0xff] }
 0x290   : > { %2891 = vmatprep.subr.mxu0 %v986_v6  ;;  %2962 = vmatprep.subr.mxu1 %v988_v7  ;;  %v875_v6 = vld [vmem:[%s5092_s5 + $0x1450] sm:$0xff]  ;;  %v866_v7 = vld [vmem:[%s5092_s5 + $0x1408] sm:$0xff] }
 0x293   : > { %2892 = vmatpush2.xpose.msra.mxu0 %v985_v8  ;;  %2963 = vmatpush2.xpose.msra.mxu1 %v987_v9  ;;  %v868_v8 = vld [vmem:[%s5092_s5 + $0x1418] sm:$0xff]  ;;  %v865_v9 = vld [vmem:[%s5092_s5 + $0x1400] sm:$0xff] }
 0x294   : > { %2893 = vmatprep.subr.mxu0 %v978_v10  ;;  %2964 = vmatprep.subr.mxu1 %v980_v11  ;;  %v867_v10 = vld [vmem:[%s5092_s5 + $0x1410] sm:$0xff]  ;;  %v862_v11 = vld [vmem:[%s5092_s5 + $0x13e8] sm:$0xff] }
 0x297   : > { %2894 = vmatpush2.xpose.msra.mxu0 %v977_v14  ;;  %2965 = vmatpush2.xpose.msra.mxu1 %v979_v15  ;;  %v864_v14 = vld [vmem:[%s5092_s5 + $0x13f8] sm:$0xff]  ;;  %v861_v15 = vld [vmem:[%s5092_s5 + $0x13e0] sm:$0xff] }
 0x298   : > { %2895 = vmatprep.subr.mxu0 %v970_v16  ;;  %2966 = vmatprep.subr.mxu1 %v972_v17  ;;  %v863_v16 = vld [vmem:[%s5092_s5 + $0x13f0] sm:$0xff]  ;;  %v854_v17 = vld [vmem:[%s5092_s5 + $0x13a8] sm:$0xff] }
 0x29b   : > { %2896 = vmatpush2.xpose.msra.mxu0 %v969_v20  ;;  %2967 = vmatpush2.xpose.msra.mxu1 %v971_v21  ;;  %v856_v20 = vld [vmem:[%s5092_s5 + $0x13b8] sm:$0xff]  ;;  %v4796_v21 = vld [vmem:[#allocation5] sm:$0xff] }
 0x29c   : > { %2897 = vmatprep.subr.mxu0 %v962_v22  ;;  %2968 = vmatprep.subr.mxu1 %v964_v23  ;;  %v4797_v22 = vld [vmem:[#allocation5 + $0x8] sm:$0xff]  ;;  %v853_v23 = vld [vmem:[%s5092_s5 + $0x13a0] sm:$0xff] }
 0x29f   : > { %2898 = vmatpush2.xpose.msra.mxu0 %v961_v46  ;;  %2969 = vmatpush2.xpose.msra.mxu1 %v963_v50  ;;  %v855_v46 = vld [vmem:[%s5092_s5 + $0x13b0] sm:$0xff]  ;;  %v846_v50 = vld [vmem:[%s5092_s5 + $0x1368] sm:$0xff] }
 0x2a0   : > { %2899 = vmatprep.subr.mxu0 %v954_v24  ;;  %2970 = vmatprep.subr.mxu1 %v956_v25  ;;  %v848_v24 = vld [vmem:[%s5092_s5 + $0x1378] sm:$0xff]  ;;  %v845_v25 = vld [vmem:[%s5092_s5 + $0x1360] sm:$0xff] }
 0x2a3   : > { %2900 = vmatpush2.xpose.msra.mxu0 %v953_v26  ;;  %2971 = vmatpush2.xpose.msra.mxu1 %v955_v27  ;;  %v847_v26 = vld [vmem:[%s5092_s5 + $0x1370] sm:$0xff]  ;;  %v838_v27 = vld [vmem:[%s5092_s5 + $0x1328] sm:$0xff] }
 0x2a4   : > { %2901 = vmatprep.subr.mxu0 %v946_v28  ;;  %2972 = vmatprep.subr.mxu1 %v948_v29  ;;  %v840_v28 = vld [vmem:[%s5092_s5 + $0x1338] sm:$0xff]  ;;  %v837_v29 = vld [vmem:[%s5092_s5 + $0x1320] sm:$0xff] }
 0x2a7   : > { %2902 = vmatpush2.xpose.msra.mxu0 %v945_v30  ;;  %2973 = vmatpush2.xpose.msra.mxu1 %v947_v31  ;;  %v839_v30 = vld [vmem:[%s5092_s5 + $0x1330] sm:$0xff]  ;;  %v830_v31 = vld [vmem:[%s5092_s5 + $0x12e8] sm:$0xff] }
 0x2a8   : > { %2903 = vmatprep.subr.mxu0 %v938_v32  ;;  %2974 = vmatprep.subr.mxu1 %v940_v33  ;;  %v832_v32 = vld [vmem:[%s5092_s5 + $0x12f8] sm:$0xff]  ;;  %v829_v33 = vld [vmem:[%s5092_s5 + $0x12e0] sm:$0xff] }
 0x2ab   : > { %2904 = vmatpush2.xpose.msra.mxu0 %v937_v12  ;;  %2975 = vmatpush2.xpose.msra.mxu1 %v939_v13  ;;  %v831_v12 = vld [vmem:[%s5092_s5 + $0x12f0] sm:$0xff]  ;;  %v822_v13 = vld [vmem:[%s5092_s5 + $0x12a8] sm:$0xff] }
 0x2ac   : > { %2905 = vmatprep.subr.mxu0 %v930_v34  ;;  %2976 = vmatprep.subr.mxu1 %v932_v36  ;;  %v824_v34 = vld [vmem:[%s5092_s5 + $0x12b8] sm:$0xff]  ;;  %v821_v36 = vld [vmem:[%s5092_s5 + $0x12a0] sm:$0xff] }
 0x2af   : > { %2906 = vmatpush2.xpose.msra.mxu0 %v929_v37  ;;  %2977 = vmatpush2.xpose.msra.mxu1 %v931_v38  ;;  %v823_v37 = vld [vmem:[%s5092_s5 + $0x12b0] sm:$0xff]  ;;  %v814_v38 = vld [vmem:[%s5092_s5 + $0x1268] sm:$0xff] }
 0x2b0   : > { %2907 = vmatprep.subr.mxu0 %v922_v39  ;;  %2978 = vmatprep.subr.mxu1 %v924_v40  ;;  %v816_v39 = vld [vmem:[%s5092_s5 + $0x1278] sm:$0xff]  ;;  %v813_v40 = vld [vmem:[%s5092_s5 + $0x1260] sm:$0xff] }
 0x2b3   : > { %2908 = vmatpush2.xpose.msra.mxu0 %v921_v41  ;;  %2979 = vmatpush2.xpose.msra.mxu1 %v923_v42  ;;  %v815_v41 = vld [vmem:[%s5092_s5 + $0x1270] sm:$0xff]  ;;  %v806_v42 = vld [vmem:[%s5092_s5 + $0x1228] sm:$0xff] }
 0x2b4   : > { %2909 = vmatprep.subr.mxu0 %v914_v43  ;;  %2980 = vmatprep.subr.mxu1 %v916_v44  ;;  %v808_v43 = vld [vmem:[%s5092_s5 + $0x1238] sm:$0xff]  ;;  %v805_v44 = vld [vmem:[%s5092_s5 + $0x1220] sm:$0xff] }
 0x2b7   : > { %2910 = vmatpush2.xpose.msra.mxu0 %v913_v45  ;;  %2981 = vmatpush2.xpose.msra.mxu1 %v915_v47  ;;  %v807_v45 = vld [vmem:[%s5092_s5 + $0x1230] sm:$0xff]  ;;  %v798_v47 = vld [vmem:[%s5092_s5 + $0x11e8] sm:$0xff] }
 0x2b8   : > { %2911 = vmatprep.subr.mxu0 %v906_v48  ;;  %2982 = vmatprep.subr.mxu1 %v908_v51  ;;  %v800_v48 = vld [vmem:[%s5092_s5 + $0x11f8] sm:$0xff]  ;;  %v797_v51 = vld [vmem:[%s5092_s5 + $0x11e0] sm:$0xff] }
 0x2bb   : > { %2912 = vmatpush2.xpose.msra.mxu0 %v905_v52  ;;  %2983 = vmatpush2.xpose.msra.mxu1 %v907_v54  ;;  %v799_v52 = vld [vmem:[%s5092_s5 + $0x11f0] sm:$0xff]  ;;  %v790_v54 = vld [vmem:[%s5092_s5 + $0x11a8] sm:$0xff] }
 0x2bc   : > { %2913 = vmatprep.subr.mxu0 %v898_v55  ;;  %2984 = vmatprep.subr.mxu1 %v900_v56  ;;  %v792_v55 = vld [vmem:[%s5092_s5 + $0x11b8] sm:$0xff]  ;;  %v789_v56 = vld [vmem:[%s5092_s5 + $0x11a0] sm:$0xff] }
 0x2bf   : > { %2914 = vmatpush2.xpose.msra.mxu0 %v897_v57  ;;  %2985 = vmatpush2.xpose.msra.mxu1 %v899_v58  ;;  %v791_v57 = vld [vmem:[%s5092_s5 + $0x11b0] sm:$0xff]  ;;  %v782_v58 = vld [vmem:[%s5092_s5 + $0x1168] sm:$0xff] }
 0x2c0   : > { %2915 = vmatprep.subr.mxu0 %v890_v59  ;;  %2986 = vmatprep.subr.mxu1 %v892_v60  ;;  %v784_v59 = vld [vmem:[%s5092_s5 + $0x1178] sm:$0xff]  ;;  %v781_v60 = vld [vmem:[%s5092_s5 + $0x1160] sm:$0xff] }
 0x2c3   : > { %2916 = vmatpush2.xpose.msra.mxu0 %v889_v61  ;;  %2987 = vmatpush2.xpose.msra.mxu1 %v891_v62  ;;  %v783_v61 = vld [vmem:[%s5092_s5 + $0x1170] sm:$0xff]  ;;  %v774_v62 = vld [vmem:[%s5092_s5 + $0x1128] sm:$0xff] }
 0x2c4   : > { %2917 = vmatprep.subr.mxu0 %v882_v63  ;;  %2988 = vmatprep.subr.mxu1 %v884_v0  ;;  %v776_v63 = vld [vmem:[%s5092_s5 + $0x1138] sm:$0xff]  ;;  %v773_v0 = vld [vmem:[%s5092_s5 + $0x1120] sm:$0xff] }
 0x2c7   : > { %2918 = vmatpush2.xpose.msra.mxu0 %v881_v1  ;;  %2989 = vmatpush2.xpose.msra.mxu1 %v883_v2  ;;  %v775_v1 = vld [vmem:[%s5092_s5 + $0x1130] sm:$0xff]  ;;  %v766_v2 = vld [vmem:[%s5092_s5 + $0x10e8] sm:$0xff] }
 0x2c8   : > { %2919 = vmatprep.subr.mxu0 %v874_v3  ;;  %2990 = vmatprep.subr.mxu1 %v876_v4  ;;  %v768_v3 = vld [vmem:[%s5092_s5 + $0x10f8] sm:$0xff]  ;;  %v765_v4 = vld [vmem:[%s5092_s5 + $0x10e0] sm:$0xff] }
 0x2cb   : > { %2920 = vmatpush2.xpose.msra.mxu0 %v873_v5  ;;  %2991 = vmatpush2.xpose.msra.mxu1 %v875_v6  ;;  %v767_v5 = vld [vmem:[%s5092_s5 + $0x10f0] sm:$0xff]  ;;  %v758_v6 = vld [vmem:[%s5092_s5 + $0x10a8] sm:$0xff] }
 0x2cc   : > { %2921 = vmatprep.subr.mxu0 %v866_v7  ;;  %2992 = vmatprep.subr.mxu1 %v868_v8  ;;  %v760_v7 = vld [vmem:[%s5092_s5 + $0x10b8] sm:$0xff]  ;;  %v757_v8 = vld [vmem:[%s5092_s5 + $0x10a0] sm:$0xff] }
 0x2cf   : > { %2922 = vmatpush2.xpose.msra.mxu0 %v865_v9  ;;  %2993 = vmatpush2.xpose.msra.mxu1 %v867_v10  ;;  %v759_v9 = vld [vmem:[%s5092_s5 + $0x10b0] sm:$0xff]  ;;  %v750_v10 = vld [vmem:[%s5092_s5 + $0x1068] sm:$0xff] }
 0x2d0   : > { %3001 = vmatprep.subr.mxu0 %v862_v11  ;;  %3072 = vmatprep.subr.mxu1 %v864_v14  ;;  %v752_v11 = vld [vmem:[%s5092_s5 + $0x1078] sm:$0xff]  ;;  %v2641_v14 = vpop.f32.mrf.mxu0 }
 0x2d2   : > { %2924 = vmatmul.mubr.f32.vlgmr.msra.gmra.mxu0 %v4796_v21  ;;  %2995 = vmatmul.mubr.f32.vlgmr.msra.gmra.mxu1 %v4797_v22  ;;  %v2712_v21 = vpop.f32.mrf.mxu1  ;;  %v2643_v22 = vpop.f32.mrf.mxu0 }
 0x2d3   : > { %3002 = vmatpush1.xpose.msra.mxu0 %v861_v15  ;;  %3073 = vmatpush1.xpose.msra.mxu1 %v863_v16  ;;  %v749_v15 = vld [vmem:[%s5092_s5 + $0x1060] sm:$0xff]  ;;  %v751_v16 = vld [vmem:[%s5092_s5 + $0x1070] sm:$0xff] }
 0x2d4   : > { %3003 = vmatprep.subr.mxu0 %v854_v17  ;;  %3074 = vmatprep.subr.mxu1 %v856_v20  ;;  %v742_v17 = vld [vmem:[%s5092_s5 + $0x1028] sm:$0xff]  ;;  %v744_v20 = vld [vmem:[%s5092_s5 + $0x1038] sm:$0xff] }
 0x2d5   : > { %3065 = vmatprep.mubr.f32.mxu0 %v5259_v18  ;;  %3136 = vmatprep.mubr.f32.mxu1 %v5263_v19 }
 0x2d7   : > { %3004 = vmatpush1.xpose.msra.mxu0 %v853_v23  ;;  %3075 = vmatpush1.xpose.msra.mxu1 %v855_v46  ;;  %v741_v23 = vld [vmem:[%s5092_s5 + $0x1020] sm:$0xff]  ;;  %v743_v46 = vld [vmem:[%s5092_s5 + $0x1030] sm:$0xff] }
 0x2d8   : > { %3005 = vmatprep.subr.mxu0 %v846_v50  ;;  %3076 = vmatprep.subr.mxu1 %v848_v24  ;;  %v2642_v50 = vadd.f32 %v2641_v14, %v5587_v35  ;;  %v990_v24 = vld [vmem:[%s5092_s5 + $0x17e8] sm:$0xff] }
 0x2d9   : > { %v918_v14 = vld [vmem:[%s5092_s5 + $0x15a8] sm:$0xff] }
 0x2db   : > { %3006 = vmatpush1.xpose.msra.mxu0 %v845_v25  ;;  %3077 = vmatpush1.xpose.msra.mxu1 %v847_v26  ;;  %v992_v25 = vld [vmem:[%s5092_s5 + $0x17f8] sm:$0xff]  ;;  %v2644_v26 = vadd.f32 %v2643_v22, %v5587_v35  ;;  %v909_v22 = vld [vmem:[%s5092_s5 + $0x1560] sm:$0xff] }
 0x2dc   : > { %3007 = vmatprep.subr.mxu0 %v838_v27  ;;  %3078 = vmatprep.subr.mxu1 %v840_v28  ;;  %v2714_v27 = vpop.f32.mrf.mxu1  ;;  %v989_v28 = vld [vmem:[%s5092_s5 + $0x17e0] sm:$0xff] }
 0x2df   : > { %3008 = vmatpush1.xpose.msra.mxu0 %v837_v29  ;;  %3079 = vmatpush1.xpose.msra.mxu1 %v839_v30  ;;  %v991_v29 = vld [vmem:[%s5092_s5 + $0x17f0] sm:$0xff]  ;;  %v2713_v30 = vadd.f32 %v2712_v21, %v2642_v50  ;;  %v912_v21 = vld [vmem:[%s5092_s5 + $0x1578] sm:$0xff] }
 0x2e0   : > { %3009 = vmatprep.subr.mxu0 %v830_v31  ;;  %3080 = vmatprep.subr.mxu1 %v832_v32  ;;  %v982_v31 = vld [vmem:[%s5092_s5 + $0x17a8] sm:$0xff]  ;;  %v984_v32 = vld [vmem:[%s5092_s5 + $0x17b8] sm:$0xff] }
 0x2e1   : > { %v904_v50 = vld [vmem:[%s5092_s5 + $0x1538] sm:$0xff] }
 0x2e3   : > { %3010 = vmatpush1.xpose.msra.mxu0 %v829_v33  ;;  %3081 = vmatpush1.xpose.msra.mxu1 %v831_v12 }
 0x2e4   : > { %3011 = vmatprep.subr.mxu0 %v822_v13  ;;  %3082 = vmatprep.subr.mxu1 %v824_v34  ;;  %v2715_v13 = vadd.f32 %v2714_v27, %v2644_v26  ;;  %v894_v26 = vld [vmem:[%s5092_s5 + $0x14e8] sm:$0xff]  ;;  %v896_v27 = vld [vmem:[%s5092_s5 + $0x14f8] sm:$0xff] }
 0x2e7   : > { %3012 = vmatpush1.xpose.msra.mxu0 %v821_v36  ;;  %3083 = vmatpush1.xpose.msra.mxu1 %v823_v37 }
 0x2e8   : > { %3013 = vmatprep.subr.mxu0 %v814_v38  ;;  %3084 = vmatprep.subr.mxu1 %v816_v39  ;;  %v981_v38 = vld [vmem:[%s5092_s5 + $0x17a0] sm:$0xff]  ;;  %v983_v39 = vld [vmem:[%s5092_s5 + $0x17b0] sm:$0xff] }
 0x2eb   : > { %3014 = vmatpush1.xpose.msra.mxu0 %v813_v40  ;;  %3085 = vmatpush1.xpose.msra.mxu1 %v815_v41  ;;  %v974_v41 = vld [vmem:[%s5092_s5 + $0x1768] sm:$0xff] }
 0x2ec   : > { %3015 = vmatprep.subr.mxu0 %v806_v42  ;;  %3086 = vmatprep.subr.mxu1 %v808_v43  ;;  %v976_v42 = vld [vmem:[%s5092_s5 + $0x1778] sm:$0xff] }
 0x2ef   : > { %3016 = vmatpush1.xpose.msra.mxu0 %v805_v44  ;;  %3087 = vmatpush1.xpose.msra.mxu1 %v807_v45  ;;  %v973_v45 = vld [vmem:[%s5092_s5 + $0x1760] sm:$0xff] }
 0x2f0   : > { %3017 = vmatprep.subr.mxu0 %v798_v47  ;;  %3088 = vmatprep.subr.mxu1 %v800_v48  ;;  %v975_v47 = vld [vmem:[%s5092_s5 + $0x1770] sm:$0xff] }
 0x2f3   : > { %3018 = vmatpush1.xpose.msra.mxu0 %v797_v51  ;;  %3089 = vmatpush1.xpose.msra.mxu1 %v799_v52  ;;  %v966_v51 = vld [vmem:[%s5092_s5 + $0x1728] sm:$0xff]  ;;  %v968_v52 = vld [vmem:[%s5092_s5 + $0x1738] sm:$0xff] }
 0x2f4   : > { %3019 = vmatprep.subr.mxu0 %v790_v54  ;;  %3090 = vmatprep.subr.mxu1 %v792_v55  ;;  %v965_v54 = vld [vmem:[%s5092_s5 + $0x1720] sm:$0xff]  ;;  %v967_v55 = vld [vmem:[%s5092_s5 + $0x1730] sm:$0xff] }
 0x2f7   : > { %3020 = vmatpush1.xpose.msra.mxu0 %v789_v56  ;;  %3091 = vmatpush1.xpose.msra.mxu1 %v791_v57  ;;  %v958_v56 = vld [vmem:[%s5092_s5 + $0x16e8] sm:$0xff]  ;;  %v960_v57 = vld [vmem:[%s5092_s5 + $0x16f8] sm:$0xff] }
 0x2f8   : > { %3021 = vmatprep.subr.mxu0 %v782_v58  ;;  %3092 = vmatprep.subr.mxu1 %v784_v59  ;;  %v957_v58 = vld [vmem:[%s5092_s5 + $0x16e0] sm:$0xff]  ;;  %v959_v59 = vld [vmem:[%s5092_s5 + $0x16f0] sm:$0xff] }
 0x2fb   : > { %3022 = vmatpush1.xpose.msra.mxu0 %v781_v60  ;;  %3093 = vmatpush1.xpose.msra.mxu1 %v783_v61  ;;  %v950_v60 = vld [vmem:[%s5092_s5 + $0x16a8] sm:$0xff]  ;;  %v952_v61 = vld [vmem:[%s5092_s5 + $0x16b8] sm:$0xff] }
 0x2fc   : > { %3023 = vmatprep.subr.mxu0 %v774_v62  ;;  %3094 = vmatprep.subr.mxu1 %v776_v63  ;;  %v949_v62 = vld [vmem:[%s5092_s5 + $0x16a0] sm:$0xff]  ;;  %v951_v63 = vld [vmem:[%s5092_s5 + $0x16b0] sm:$0xff] }
 0x2ff   : > { %3024 = vmatpush1.xpose.msra.mxu0 %v773_v0  ;;  %3095 = vmatpush1.xpose.msra.mxu1 %v775_v1  ;;  %v942_v0 = vld [vmem:[%s5092_s5 + $0x1668] sm:$0xff]  ;;  %v944_v1 = vld [vmem:[%s5092_s5 + $0x1678] sm:$0xff] }
 0x300   : > { %3025 = vmatprep.subr.mxu0 %v766_v2  ;;  %3096 = vmatprep.subr.mxu1 %v768_v3  ;;  %v941_v2 = vld [vmem:[%s5092_s5 + $0x1660] sm:$0xff]  ;;  %v943_v3 = vld [vmem:[%s5092_s5 + $0x1670] sm:$0xff] }
 0x303   : > { %3026 = vmatpush1.xpose.msra.mxu0 %v765_v4  ;;  %3097 = vmatpush1.xpose.msra.mxu1 %v767_v5  ;;  %v934_v4 = vld [vmem:[%s5092_s5 + $0x1628] sm:$0xff]  ;;  %v936_v5 = vld [vmem:[%s5092_s5 + $0x1638] sm:$0xff] }
 0x304   : > { %3027 = vmatprep.subr.mxu0 %v758_v6  ;;  %3098 = vmatprep.subr.mxu1 %v760_v7  ;;  %v933_v6 = vld [vmem:[%s5092_s5 + $0x1620] sm:$0xff]  ;;  %v935_v7 = vld [vmem:[%s5092_s5 + $0x1630] sm:$0xff] }
 0x307   : > { %3028 = vmatpush1.xpose.msra.mxu0 %v757_v8  ;;  %3099 = vmatpush1.xpose.msra.mxu1 %v759_v9  ;;  %v926_v8 = vld [vmem:[%s5092_s5 + $0x15e8] sm:$0xff]  ;;  %v928_v9 = vld [vmem:[%s5092_s5 + $0x15f8] sm:$0xff] }
 0x308   : > { %3029 = vmatprep.subr.mxu0 %v750_v10  ;;  %3100 = vmatprep.subr.mxu1 %v752_v11  ;;  %v925_v10 = vld [vmem:[%s5092_s5 + $0x15e0] sm:$0xff]  ;;  %v927_v11 = vld [vmem:[%s5092_s5 + $0x15f0] sm:$0xff] }
 0x30b   : > { %3030 = vmatpush1.xpose.msra.mxu0 %v749_v15  ;;  %3101 = vmatpush1.xpose.msra.mxu1 %v751_v16  ;;  %v920_v15 = vld [vmem:[%s5092_s5 + $0x15b8] sm:$0xff]  ;;  %v917_v16 = vld [vmem:[%s5092_s5 + $0x15a0] sm:$0xff] }
 0x30c   : > { %3031 = vmatprep.subr.mxu0 %v742_v17  ;;  %3102 = vmatprep.subr.mxu1 %v744_v20  ;;  %v919_v17 = vld [vmem:[%s5092_s5 + $0x15b0] sm:$0xff]  ;;  %v910_v20 = vld [vmem:[%s5092_s5 + $0x1568] sm:$0xff] }
 0x30f   : > { %3032 = vmatpush1.xpose.msra.mxu0 %v741_v23  ;;  %3103 = vmatpush1.xpose.msra.mxu1 %v743_v46  ;;  %v911_v23 = vld [vmem:[%s5092_s5 + $0x1570] sm:$0xff]  ;;  %v902_v46 = vld [vmem:[%s5092_s5 + $0x1528] sm:$0xff] }
 0x310   : > { %3033 = vmatprep.subr.mxu0 %v990_v24  ;;  %3104 = vmatprep.subr.mxu1 %v992_v25  ;;  %v901_v24 = vld [vmem:[%s5092_s5 + $0x1520] sm:$0xff]  ;;  %v903_v25 = vld [vmem:[%s5092_s5 + $0x1530] sm:$0xff] }
 0x312   : > { %v2783_v33 = vpop.f32.mrf.mxu0  ;;  %v2854_v12 = vpop.f32.mrf.mxu1 }
 0x313   : > { %v2784_v34 = vadd.f32 %v2783_v33, %v2713_v30  ;;  %3034 = vmatpush2.xpose.msra.mxu0 %v989_v28  ;;  %3105 = vmatpush2.xpose.msra.mxu1 %v991_v29  ;;  %v893_v28 = vld [vmem:[%s5092_s5 + $0x14e0] sm:$0xff]  ;;  %v895_v29 = vld [vmem:[%s5092_s5 + $0x14f0] sm:$0xff]  ;;  %v886_v30 = vld [vmem:[%s5092_s5 + $0x14a8] sm:$0xff] }
 0x314   : > { %v2785_v36 = vpop.f32.mrf.mxu0  ;;  %v2856_v37 = vpop.f32.mrf.mxu1  ;;  %3035 = vmatprep.subr.mxu0 %v982_v31  ;;  %3106 = vmatprep.subr.mxu1 %v984_v32  ;;  %v888_v31 = vld [vmem:[%s5092_s5 + $0x14b8] sm:$0xff]  ;;  %v885_v32 = vld [vmem:[%s5092_s5 + $0x14a0] sm:$0xff]  ;;  %v887_v33 = vld [vmem:[%s5092_s5 + $0x14b0] sm:$0xff] }
 0x315   : > { %v2786_v40 = vadd.f32 %v2785_v36, %v2715_v13  ;;  %v2855_v43 = vadd.f32 %v2854_v12, %v2784_v34  ;;  %v878_v12 = vld [vmem:[%s5092_s5 + $0x1468] sm:$0xff]  ;;  %v880_v13 = vld [vmem:[%s5092_s5 + $0x1478] sm:$0xff]  ;;  %v877_v34 = vld [vmem:[%s5092_s5 + $0x1460] sm:$0xff] }
 0x316   : > { %v879_v36 = vld [vmem:[%s5092_s5 + $0x1470] sm:$0xff] }
 0x317   : > { %v2857_v44 = vadd.f32 %v2856_v37, %v2786_v40  ;;  %3036 = vmatpush2.xpose.msra.mxu0 %v981_v38  ;;  %3107 = vmatpush2.xpose.msra.mxu1 %v983_v39  ;;  %v870_v37 = vld [vmem:[%s5092_s5 + $0x1428] sm:$0xff]  ;;  %v872_v38 = vld [vmem:[%s5092_s5 + $0x1438] sm:$0xff]  ;;  %v869_v39 = vld [vmem:[%s5092_s5 + $0x1420] sm:$0xff] }
 0x318   : > { %3037 = vmatprep.subr.mxu0 %v974_v41  ;;  %3108 = vmatprep.subr.mxu1 %v976_v42  ;;  %v871_v40 = vld [vmem:[%s5092_s5 + $0x1430] sm:$0xff]  ;;  %v1114_v41 = vld [vmem:[%s5092_s5 + $0x1bc8] sm:$0xff]  ;;  %v1116_v42 = vld [vmem:[%s5092_s5 + $0x1bd8] sm:$0xff] }
 0x319   : > { %v4580_v48 = vcombine.low %v2855_v43, %v2857_v44  ;;  %v1113_v43 = vld [vmem:[%s5092_s5 + $0x1bc0] sm:$0xff]  ;;  %v1115_v44 = vld [vmem:[%s5092_s5 + $0x1bd0] sm:$0xff] }
 0x31b   : > { %4596 = vst [vmem:[%s5608_s11 + $0x8] sm:$0xff] %v4580_v48  ;;  %3038 = vmatpush2.xpose.msra.mxu0 %v973_v45  ;;  %3109 = vmatpush2.xpose.msra.mxu1 %v975_v47  ;;  %v1106_v45 = vld [vmem:[%s5092_s5 + $0x1b88] sm:$0xff]  ;;  %v1108_v47 = vld [vmem:[%s5092_s5 + $0x1b98] sm:$0xff]  ;;  %v4798_v48 = vld [vmem:[#allocation5 + $0x10] sm:$0xff] }
 0x31c   : > { %3039 = vmatprep.subr.mxu0 %v966_v51  ;;  %3110 = vmatprep.subr.mxu1 %v968_v52  ;;  %v4799_v51 = vld [vmem:[#allocation5 + $0x18] sm:$0xff]  ;;  %v1105_v52 = vld [vmem:[%s5092_s5 + $0x1b80] sm:$0xff] }
 0x31f   : > { %3040 = vmatpush2.xpose.msra.mxu0 %v965_v54  ;;  %3111 = vmatpush2.xpose.msra.mxu1 %v967_v55  ;;  %v1107_v54 = vld [vmem:[%s5092_s5 + $0x1b90] sm:$0xff]  ;;  %v1098_v55 = vld [vmem:[%s5092_s5 + $0x1b48] sm:$0xff] }
 0x320   : > { %3041 = vmatprep.subr.mxu0 %v958_v56  ;;  %3112 = vmatprep.subr.mxu1 %v960_v57  ;;  %v1100_v56 = vld [vmem:[%s5092_s5 + $0x1b58] sm:$0xff]  ;;  %v1097_v57 = vld [vmem:[%s5092_s5 + $0x1b40] sm:$0xff] }
 0x323   : > { %3042 = vmatpush2.xpose.msra.mxu0 %v957_v58  ;;  %3113 = vmatpush2.xpose.msra.mxu1 %v959_v59  ;;  %v1099_v58 = vld [vmem:[%s5092_s5 + $0x1b50] sm:$0xff]  ;;  %v1090_v59 = vld [vmem:[%s5092_s5 + $0x1b08] sm:$0xff] }
 0x324   : > { %3043 = vmatprep.subr.mxu0 %v950_v60  ;;  %3114 = vmatprep.subr.mxu1 %v952_v61  ;;  %v1092_v60 = vld [vmem:[%s5092_s5 + $0x1b18] sm:$0xff]  ;;  %v1089_v61 = vld [vmem:[%s5092_s5 + $0x1b00] sm:$0xff] }
 0x327   : > { %3044 = vmatpush2.xpose.msra.mxu0 %v949_v62  ;;  %3115 = vmatpush2.xpose.msra.mxu1 %v951_v63  ;;  %v1091_v62 = vld [vmem:[%s5092_s5 + $0x1b10] sm:$0xff]  ;;  %v1082_v63 = vld [vmem:[%s5092_s5 + $0x1ac8] sm:$0xff] }
 0x328   : > { %3045 = vmatprep.subr.mxu0 %v942_v0  ;;  %3116 = vmatprep.subr.mxu1 %v944_v1  ;;  %v1084_v0 = vld [vmem:[%s5092_s5 + $0x1ad8] sm:$0xff]  ;;  %v1081_v1 = vld [vmem:[%s5092_s5 + $0x1ac0] sm:$0xff] }
 0x32b   : > { %3046 = vmatpush2.xpose.msra.mxu0 %v941_v2  ;;  %3117 = vmatpush2.xpose.msra.mxu1 %v943_v3  ;;  %v1083_v2 = vld [vmem:[%s5092_s5 + $0x1ad0] sm:$0xff]  ;;  %v1074_v3 = vld [vmem:[%s5092_s5 + $0x1a88] sm:$0xff] }
 0x32c   : > { %3047 = vmatprep.subr.mxu0 %v934_v4  ;;  %3118 = vmatprep.subr.mxu1 %v936_v5  ;;  %v1076_v4 = vld [vmem:[%s5092_s5 + $0x1a98] sm:$0xff]  ;;  %v1073_v5 = vld [vmem:[%s5092_s5 + $0x1a80] sm:$0xff] }
 0x32f   : > { %3048 = vmatpush2.xpose.msra.mxu0 %v933_v6  ;;  %3119 = vmatpush2.xpose.msra.mxu1 %v935_v7  ;;  %v1075_v6 = vld [vmem:[%s5092_s5 + $0x1a90] sm:$0xff]  ;;  %v1066_v7 = vld [vmem:[%s5092_s5 + $0x1a48] sm:$0xff] }
 0x330   : > { %3049 = vmatprep.subr.mxu0 %v926_v8  ;;  %3120 = vmatprep.subr.mxu1 %v928_v9  ;;  %v1068_v8 = vld [vmem:[%s5092_s5 + $0x1a58] sm:$0xff]  ;;  %v1065_v9 = vld [vmem:[%s5092_s5 + $0x1a40] sm:$0xff] }
 0x333   : > { %3050 = vmatpush2.xpose.msra.mxu0 %v925_v10  ;;  %3121 = vmatpush2.xpose.msra.mxu1 %v927_v11  ;;  %v1067_v10 = vld [vmem:[%s5092_s5 + $0x1a50] sm:$0xff]  ;;  %v1058_v11 = vld [vmem:[%s5092_s5 + $0x1a08] sm:$0xff] }
 0x334   : > { %3051 = vmatprep.subr.mxu0 %v918_v14  ;;  %3122 = vmatprep.subr.mxu1 %v920_v15  ;;  %v1060_v14 = vld [vmem:[%s5092_s5 + $0x1a18] sm:$0xff]  ;;  %v1057_v15 = vld [vmem:[%s5092_s5 + $0x1a00] sm:$0xff] }
 0x337   : > { %3052 = vmatpush2.xpose.msra.mxu0 %v917_v16  ;;  %3123 = vmatpush2.xpose.msra.mxu1 %v919_v17  ;;  %v1059_v16 = vld [vmem:[%s5092_s5 + $0x1a10] sm:$0xff]  ;;  %v1050_v17 = vld [vmem:[%s5092_s5 + $0x19c8] sm:$0xff] }
 0x338   : > { %3053 = vmatprep.subr.mxu0 %v910_v20  ;;  %3124 = vmatprep.subr.mxu1 %v912_v21  ;;  %v1052_v20 = vld [vmem:[%s5092_s5 + $0x19d8] sm:$0xff]  ;;  %v1049_v21 = vld [vmem:[%s5092_s5 + $0x19c0] sm:$0xff] }
 0x33b   : > { %3054 = vmatpush2.xpose.msra.mxu0 %v909_v22  ;;  %3125 = vmatpush2.xpose.msra.mxu1 %v911_v23  ;;  %v1051_v22 = vld [vmem:[%s5092_s5 + $0x19d0] sm:$0xff]  ;;  %v1042_v23 = vld [vmem:[%s5092_s5 + $0x1988] sm:$0xff] }
 0x33c   : > { %3055 = vmatprep.subr.mxu0 %v902_v46  ;;  %3126 = vmatprep.subr.mxu1 %v904_v50  ;;  %v1044_v46 = vld [vmem:[%s5092_s5 + $0x1998] sm:$0xff]  ;;  %v1041_v50 = vld [vmem:[%s5092_s5 + $0x1980] sm:$0xff] }
 0x33f   : > { %3056 = vmatpush2.xpose.msra.mxu0 %v901_v24  ;;  %3127 = vmatpush2.xpose.msra.mxu1 %v903_v25  ;;  %v1043_v24 = vld [vmem:[%s5092_s5 + $0x1990] sm:$0xff]  ;;  %v1034_v25 = vld [vmem:[%s5092_s5 + $0x1948] sm:$0xff] }
 0x340   : > { %3057 = vmatprep.subr.mxu0 %v894_v26  ;;  %3128 = vmatprep.subr.mxu1 %v896_v27  ;;  %v1036_v26 = vld [vmem:[%s5092_s5 + $0x1958] sm:$0xff]  ;;  %v1033_v27 = vld [vmem:[%s5092_s5 + $0x1940] sm:$0xff] }
 0x343   : > { %3058 = vmatpush2.xpose.msra.mxu0 %v893_v28  ;;  %3129 = vmatpush2.xpose.msra.mxu1 %v895_v29  ;;  %v1035_v28 = vld [vmem:[%s5092_s5 + $0x1950] sm:$0xff]  ;;  %v1026_v29 = vld [vmem:[%s5092_s5 + $0x1908] sm:$0xff] }
 0x344   : > { %3059 = vmatprep.subr.mxu0 %v886_v30  ;;  %3130 = vmatprep.subr.mxu1 %v888_v31  ;;  %v1028_v30 = vld [vmem:[%s5092_s5 + $0x1918] sm:$0xff]  ;;  %v1025_v31 = vld [vmem:[%s5092_s5 + $0x1900] sm:$0xff] }
 0x347   : > { %3060 = vmatpush2.xpose.msra.mxu0 %v885_v32  ;;  %3131 = vmatpush2.xpose.msra.mxu1 %v887_v33  ;;  %v1027_v32 = vld [vmem:[%s5092_s5 + $0x1910] sm:$0xff]  ;;  %v1018_v33 = vld [vmem:[%s5092_s5 + $0x18c8] sm:$0xff] }
 0x348   : > { %3061 = vmatprep.subr.mxu0 %v878_v12  ;;  %3132 = vmatprep.subr.mxu1 %v880_v13  ;;  %v1020_v12 = vld [vmem:[%s5092_s5 + $0x18d8] sm:$0xff]  ;;  %v1017_v13 = vld [vmem:[%s5092_s5 + $0x18c0] sm:$0xff] }
 0x34b   : > { %3062 = vmatpush2.xpose.msra.mxu0 %v877_v34  ;;  %3133 = vmatpush2.xpose.msra.mxu1 %v879_v36  ;;  %v1019_v34 = vld [vmem:[%s5092_s5 + $0x18d0] sm:$0xff]  ;;  %v1010_v36 = vld [vmem:[%s5092_s5 + $0x1888] sm:$0xff] }
 0x34c   : > { %3063 = vmatprep.subr.mxu0 %v870_v37  ;;  %3134 = vmatprep.subr.mxu1 %v872_v38  ;;  %v1012_v37 = vld [vmem:[%s5092_s5 + $0x1898] sm:$0xff]  ;;  %v1009_v38 = vld [vmem:[%s5092_s5 + $0x1880] sm:$0xff] }
 0x34f   : > { %3064 = vmatpush2.xpose.msra.mxu0 %v869_v39  ;;  %3135 = vmatpush2.xpose.msra.mxu1 %v871_v40  ;;  %v1011_v39 = vld [vmem:[%s5092_s5 + $0x1890] sm:$0xff]  ;;  %v1002_v40 = vld [vmem:[%s5092_s5 + $0x1848] sm:$0xff] }
 0x350   : > { %3143 = vmatprep.subr.mxu0 %v1114_v41  ;;  %3214 = vmatprep.subr.mxu1 %v1116_v42  ;;  %v1004_v41 = vld [vmem:[%s5092_s5 + $0x1858] sm:$0xff]  ;;  %v1001_v42 = vld [vmem:[%s5092_s5 + $0x1840] sm:$0xff] }
 0x352   : > { %3066 = vmatmul.mubr.f32.vlgmr.msra.gmra.mxu0 %v4798_v48  ;;  %3137 = vmatmul.mubr.f32.vlgmr.msra.gmra.mxu1 %v4799_v51  ;;  %v995_v48 = vld [vmem:[%s5092_s5 + $0x1810] sm:$0xff]  ;;  %v1242_v51 = vld [vmem:[%s5092_s5 + $0x1fc8] sm:$0xff] }
 0x353   : > { %3144 = vmatpush1.xpose.msra.mxu0 %v1113_v43  ;;  %3215 = vmatpush1.xpose.msra.mxu1 %v1115_v44  ;;  %v1003_v43 = vld [vmem:[%s5092_s5 + $0x1850] sm:$0xff]  ;;  %v994_v44 = vld [vmem:[%s5092_s5 + $0x1808] sm:$0xff] }
 0x354   : > { %3145 = vmatprep.subr.mxu0 %v1106_v45  ;;  %3216 = vmatprep.subr.mxu1 %v1108_v47  ;;  %v996_v45 = vld [vmem:[%s5092_s5 + $0x1818] sm:$0xff]  ;;  %v993_v47 = vld [vmem:[%s5092_s5 + $0x1800] sm:$0xff] }
 0x355   : > { %3207 = vmatprep.mubr.f32.mxu0 %v5154_v49  ;;  %3278 = vmatprep.mubr.f32.mxu1 %v5162_v53 }
 0x357   : > { %3146 = vmatpush1.xpose.msra.mxu0 %v1105_v52  ;;  %3217 = vmatpush1.xpose.msra.mxu1 %v1107_v54  ;;  %v1244_v52 = vld [vmem:[%s5092_s5 + $0x1fd8] sm:$0xff]  ;;  %v1241_v54 = vld [vmem:[%s5092_s5 + $0x1fc0] sm:$0xff] }
 0x358   : > { %3147 = vmatprep.subr.mxu0 %v1098_v55  ;;  %3218 = vmatprep.subr.mxu1 %v1100_v56  ;;  %v1243_v55 = vld [vmem:[%s5092_s5 + $0x1fd0] sm:$0xff]  ;;  %v1234_v56 = vld [vmem:[%s5092_s5 + $0x1f88] sm:$0xff] }
 0x35b   : > { %3148 = vmatpush1.xpose.msra.mxu0 %v1097_v57  ;;  %3219 = vmatpush1.xpose.msra.mxu1 %v1099_v58  ;;  %v1236_v57 = vld [vmem:[%s5092_s5 + $0x1f98] sm:$0xff]  ;;  %v1233_v58 = vld [vmem:[%s5092_s5 + $0x1f80] sm:$0xff] }
 0x35c   : > { %3149 = vmatprep.subr.mxu0 %v1090_v59  ;;  %3220 = vmatprep.subr.mxu1 %v1092_v60  ;;  %v1235_v59 = vld [vmem:[%s5092_s5 + $0x1f90] sm:$0xff]  ;;  %v1226_v60 = vld [vmem:[%s5092_s5 + $0x1f48] sm:$0xff] }
 0x35f   : > { %3150 = vmatpush1.xpose.msra.mxu0 %v1089_v61  ;;  %3221 = vmatpush1.xpose.msra.mxu1 %v1091_v62  ;;  %v1228_v61 = vld [vmem:[%s5092_s5 + $0x1f58] sm:$0xff]  ;;  %v1225_v62 = vld [vmem:[%s5092_s5 + $0x1f40] sm:$0xff] }
 0x360   : > { %3151 = vmatprep.subr.mxu0 %v1082_v63  ;;  %3222 = vmatprep.subr.mxu1 %v1084_v0  ;;  %v1227_v63 = vld [vmem:[%s5092_s5 + $0x1f50] sm:$0xff]  ;;  %v1218_v0 = vld [vmem:[%s5092_s5 + $0x1f08] sm:$0xff] }
 0x363   : > { %3152 = vmatpush1.xpose.msra.mxu0 %v1081_v1  ;;  %3223 = vmatpush1.xpose.msra.mxu1 %v1083_v2  ;;  %v1220_v1 = vld [vmem:[%s5092_s5 + $0x1f18] sm:$0xff]  ;;  %v1217_v2 = vld [vmem:[%s5092_s5 + $0x1f00] sm:$0xff] }
 0x364   : > { %3153 = vmatprep.subr.mxu0 %v1074_v3  ;;  %3224 = vmatprep.subr.mxu1 %v1076_v4  ;;  %v1219_v3 = vld [vmem:[%s5092_s5 + $0x1f10] sm:$0xff]  ;;  %v1210_v4 = vld [vmem:[%s5092_s5 + $0x1ec8] sm:$0xff] }
 0x367   : > { %3154 = vmatpush1.xpose.msra.mxu0 %v1073_v5  ;;  %3225 = vmatpush1.xpose.msra.mxu1 %v1075_v6  ;;  %v1212_v5 = vld [vmem:[%s5092_s5 + $0x1ed8] sm:$0xff]  ;;  %v1209_v6 = vld [vmem:[%s5092_s5 + $0x1ec0] sm:$0xff] }
 0x368   : > { %3155 = vmatprep.subr.mxu0 %v1066_v7  ;;  %3226 = vmatprep.subr.mxu1 %v1068_v8  ;;  %v1211_v7 = vld [vmem:[%s5092_s5 + $0x1ed0] sm:$0xff]  ;;  %v1202_v8 = vld [vmem:[%s5092_s5 + $0x1e88] sm:$0xff] }
 0x36b   : > { %3156 = vmatpush1.xpose.msra.mxu0 %v1065_v9  ;;  %3227 = vmatpush1.xpose.msra.mxu1 %v1067_v10  ;;  %v1204_v9 = vld [vmem:[%s5092_s5 + $0x1e98] sm:$0xff]  ;;  %v1201_v10 = vld [vmem:[%s5092_s5 + $0x1e80] sm:$0xff] }
 0x36c   : > { %3157 = vmatprep.subr.mxu0 %v1058_v11  ;;  %3228 = vmatprep.subr.mxu1 %v1060_v14  ;;  %v1203_v11 = vld [vmem:[%s5092_s5 + $0x1e90] sm:$0xff]  ;;  %v1194_v14 = vld [vmem:[%s5092_s5 + $0x1e48] sm:$0xff] }
 0x36f   : > { %3158 = vmatpush1.xpose.msra.mxu0 %v1057_v15  ;;  %3229 = vmatpush1.xpose.msra.mxu1 %v1059_v16  ;;  %v1196_v15 = vld [vmem:[%s5092_s5 + $0x1e58] sm:$0xff]  ;;  %v1193_v16 = vld [vmem:[%s5092_s5 + $0x1e40] sm:$0xff] }
 0x370   : > { %3159 = vmatprep.subr.mxu0 %v1050_v17  ;;  %3230 = vmatprep.subr.mxu1 %v1052_v20  ;;  %v1195_v17 = vld [vmem:[%s5092_s5 + $0x1e50] sm:$0xff]  ;;  %v1186_v20 = vld [vmem:[%s5092_s5 + $0x1e08] sm:$0xff] }
 0x373   : > { %3160 = vmatpush1.xpose.msra.mxu0 %v1049_v21  ;;  %3231 = vmatpush1.xpose.msra.mxu1 %v1051_v22  ;;  %v1188_v21 = vld [vmem:[%s5092_s5 + $0x1e18] sm:$0xff]  ;;  %v1185_v22 = vld [vmem:[%s5092_s5 + $0x1e00] sm:$0xff] }
 0x374   : > { %3161 = vmatprep.subr.mxu0 %v1042_v23  ;;  %3232 = vmatprep.subr.mxu1 %v1044_v46  ;;  %v1187_v23 = vld [vmem:[%s5092_s5 + $0x1e10] sm:$0xff]  ;;  %v1178_v46 = vld [vmem:[%s5092_s5 + $0x1dc8] sm:$0xff] }
 0x377   : > { %3162 = vmatpush1.xpose.msra.mxu0 %v1041_v50  ;;  %3233 = vmatpush1.xpose.msra.mxu1 %v1043_v24  ;;  %v1180_v50 = vld [vmem:[%s5092_s5 + $0x1dd8] sm:$0xff]  ;;  %v1177_v24 = vld [vmem:[%s5092_s5 + $0x1dc0] sm:$0xff] }
 0x378   : > { %3163 = vmatprep.subr.mxu0 %v1034_v25  ;;  %3234 = vmatprep.subr.mxu1 %v1036_v26  ;;  %v1179_v25 = vld [vmem:[%s5092_s5 + $0x1dd0] sm:$0xff]  ;;  %v1170_v26 = vld [vmem:[%s5092_s5 + $0x1d88] sm:$0xff] }
 0x37b   : > { %3164 = vmatpush1.xpose.msra.mxu0 %v1033_v27  ;;  %3235 = vmatpush1.xpose.msra.mxu1 %v1035_v28  ;;  %v1172_v27 = vld [vmem:[%s5092_s5 + $0x1d98] sm:$0xff]  ;;  %v1169_v28 = vld [vmem:[%s5092_s5 + $0x1d80] sm:$0xff] }
 0x37c   : > { %3165 = vmatprep.subr.mxu0 %v1026_v29  ;;  %3236 = vmatprep.subr.mxu1 %v1028_v30  ;;  %v1171_v29 = vld [vmem:[%s5092_s5 + $0x1d90] sm:$0xff]  ;;  %v1162_v30 = vld [vmem:[%s5092_s5 + $0x1d48] sm:$0xff] }
 0x37f   : > { %3166 = vmatpush1.xpose.msra.mxu0 %v1025_v31  ;;  %3237 = vmatpush1.xpose.msra.mxu1 %v1027_v32  ;;  %v1164_v31 = vld [vmem:[%s5092_s5 + $0x1d58] sm:$0xff]  ;;  %v1161_v32 = vld [vmem:[%s5092_s5 + $0x1d40] sm:$0xff] }
 0x380   : > { %3167 = vmatprep.subr.mxu0 %v1018_v33  ;;  %3238 = vmatprep.subr.mxu1 %v1020_v12  ;;  %v1163_v33 = vld [vmem:[%s5092_s5 + $0x1d50] sm:$0xff]  ;;  %v1154_v12 = vld [vmem:[%s5092_s5 + $0x1d08] sm:$0xff] }
 0x383   : > { %3168 = vmatpush1.xpose.msra.mxu0 %v1017_v13  ;;  %3239 = vmatpush1.xpose.msra.mxu1 %v1019_v34  ;;  %v1156_v13 = vld [vmem:[%s5092_s5 + $0x1d18] sm:$0xff]  ;;  %v1153_v34 = vld [vmem:[%s5092_s5 + $0x1d00] sm:$0xff] }
 0x384   : > { %3169 = vmatprep.subr.mxu0 %v1010_v36  ;;  %3240 = vmatprep.subr.mxu1 %v1012_v37  ;;  %v1155_v36 = vld [vmem:[%s5092_s5 + $0x1d10] sm:$0xff]  ;;  %v1146_v37 = vld [vmem:[%s5092_s5 + $0x1cc8] sm:$0xff] }
 0x387   : > { %3170 = vmatpush1.xpose.msra.mxu0 %v1009_v38  ;;  %3241 = vmatpush1.xpose.msra.mxu1 %v1011_v39  ;;  %v1148_v38 = vld [vmem:[%s5092_s5 + $0x1cd8] sm:$0xff]  ;;  %v1145_v39 = vld [vmem:[%s5092_s5 + $0x1cc0] sm:$0xff] }
 0x388   : > { %3171 = vmatprep.subr.mxu0 %v1002_v40  ;;  %3242 = vmatprep.subr.mxu1 %v1004_v41  ;;  %v1147_v40 = vld [vmem:[%s5092_s5 + $0x1cd0] sm:$0xff]  ;;  %v1138_v41 = vld [vmem:[%s5092_s5 + $0x1c88] sm:$0xff] }
 0x38b   : > { %3172 = vmatpush1.xpose.msra.mxu0 %v1001_v42  ;;  %3243 = vmatpush1.xpose.msra.mxu1 %v1003_v43  ;;  %v1140_v42 = vld [vmem:[%s5092_s5 + $0x1c98] sm:$0xff]  ;;  %v1137_v43 = vld [vmem:[%s5092_s5 + $0x1c80] sm:$0xff] }
 0x38c   : > { %3173 = vmatprep.subr.mxu0 %v994_v44  ;;  %3244 = vmatprep.subr.mxu1 %v996_v45  ;;  %v1139_v44 = vld [vmem:[%s5092_s5 + $0x1c90] sm:$0xff]  ;;  %v1130_v45 = vld [vmem:[%s5092_s5 + $0x1c48] sm:$0xff] }
 0x38f   : > { %3174 = vmatpush1.xpose.msra.mxu0 %v993_v47  ;;  %3245 = vmatpush1.xpose.msra.mxu1 %v995_v48  ;;  %v1132_v47 = vld [vmem:[%s5092_s5 + $0x1c58] sm:$0xff]  ;;  %v1129_v48 = vld [vmem:[%s5092_s5 + $0x1c40] sm:$0xff] }
 0x390   : > { %3175 = vmatprep.subr.mxu0 %v1242_v51  ;;  %3246 = vmatprep.subr.mxu1 %v1244_v52  ;;  %v1131_v51 = vld [vmem:[%s5092_s5 + $0x1c50] sm:$0xff]  ;;  %v1122_v52 = vld [vmem:[%s5092_s5 + $0x1c08] sm:$0xff] }
 0x393   : > { %3176 = vmatpush2.xpose.msra.mxu0 %v1241_v54  ;;  %3247 = vmatpush2.xpose.msra.mxu1 %v1243_v55  ;;  %v1124_v54 = vld [vmem:[%s5092_s5 + $0x1c18] sm:$0xff]  ;;  %v1121_v55 = vld [vmem:[%s5092_s5 + $0x1c00] sm:$0xff] }
 0x394   : > { %3177 = vmatprep.subr.mxu0 %v1234_v56  ;;  %3248 = vmatprep.subr.mxu1 %v1236_v57  ;;  %v1123_v56 = vld [vmem:[%s5092_s5 + $0x1c10] sm:$0xff]  ;;  %v1118_v57 = vld [vmem:[%s5092_s5 + $0x1be8] sm:$0xff] }
 0x397   : > { %3178 = vmatpush2.xpose.msra.mxu0 %v1233_v58  ;;  %3249 = vmatpush2.xpose.msra.mxu1 %v1235_v59  ;;  %v1120_v58 = vld [vmem:[%s5092_s5 + $0x1bf8] sm:$0xff]  ;;  %v1117_v59 = vld [vmem:[%s5092_s5 + $0x1be0] sm:$0xff] }
 0x398   : > { %3179 = vmatprep.subr.mxu0 %v1226_v60  ;;  %3250 = vmatprep.subr.mxu1 %v1228_v61  ;;  %v1119_v60 = vld [vmem:[%s5092_s5 + $0x1bf0] sm:$0xff]  ;;  %v1110_v61 = vld [vmem:[%s5092_s5 + $0x1ba8] sm:$0xff] }
 0x39b   : > { %3180 = vmatpush2.xpose.msra.mxu0 %v1225_v62  ;;  %3251 = vmatpush2.xpose.msra.mxu1 %v1227_v63  ;;  %v1112_v62 = vld [vmem:[%s5092_s5 + $0x1bb8] sm:$0xff]  ;;  %v4800_v63 = vld [vmem:[#allocation5] sm:$0xff] }
 0x39c   : > { %3181 = vmatprep.subr.mxu0 %v1218_v0  ;;  %3252 = vmatprep.subr.mxu1 %v1220_v1  ;;  %v4801_v0 = vld [vmem:[#allocation5 + $0x8] sm:$0xff]  ;;  %v1109_v1 = vld [vmem:[%s5092_s5 + $0x1ba0] sm:$0xff] }
 0x39f   : > { %3182 = vmatpush2.xpose.msra.mxu0 %v1217_v2  ;;  %3253 = vmatpush2.xpose.msra.mxu1 %v1219_v3  ;;  %v1111_v2 = vld [vmem:[%s5092_s5 + $0x1bb0] sm:$0xff]  ;;  %v1102_v3 = vld [vmem:[%s5092_s5 + $0x1b68] sm:$0xff] }
 0x3a0   : > { %3183 = vmatprep.subr.mxu0 %v1210_v4  ;;  %3254 = vmatprep.subr.mxu1 %v1212_v5  ;;  %v1104_v4 = vld [vmem:[%s5092_s5 + $0x1b78] sm:$0xff]  ;;  %v1101_v5 = vld [vmem:[%s5092_s5 + $0x1b60] sm:$0xff] }
 0x3a3   : > { %3184 = vmatpush2.xpose.msra.mxu0 %v1209_v6  ;;  %3255 = vmatpush2.xpose.msra.mxu1 %v1211_v7  ;;  %v1103_v6 = vld [vmem:[%s5092_s5 + $0x1b70] sm:$0xff]  ;;  %v1094_v7 = vld [vmem:[%s5092_s5 + $0x1b28] sm:$0xff] }
 0x3a4   : > { %3185 = vmatprep.subr.mxu0 %v1202_v8  ;;  %3256 = vmatprep.subr.mxu1 %v1204_v9  ;;  %v1096_v8 = vld [vmem:[%s5092_s5 + $0x1b38] sm:$0xff]  ;;  %v1093_v9 = vld [vmem:[%s5092_s5 + $0x1b20] sm:$0xff] }
 0x3a7   : > { %3186 = vmatpush2.xpose.msra.mxu0 %v1201_v10  ;;  %3257 = vmatpush2.xpose.msra.mxu1 %v1203_v11  ;;  %v1095_v10 = vld [vmem:[%s5092_s5 + $0x1b30] sm:$0xff]  ;;  %v1086_v11 = vld [vmem:[%s5092_s5 + $0x1ae8] sm:$0xff] }
 0x3a8   : > { %3187 = vmatprep.subr.mxu0 %v1194_v14  ;;  %3258 = vmatprep.subr.mxu1 %v1196_v15  ;;  %v1088_v14 = vld [vmem:[%s5092_s5 + $0x1af8] sm:$0xff]  ;;  %v1085_v15 = vld [vmem:[%s5092_s5 + $0x1ae0] sm:$0xff] }
 0x3ab   : > { %3188 = vmatpush2.xpose.msra.mxu0 %v1193_v16  ;;  %3259 = vmatpush2.xpose.msra.mxu1 %v1195_v17  ;;  %v1087_v16 = vld [vmem:[%s5092_s5 + $0x1af0] sm:$0xff]  ;;  %v1078_v17 = vld [vmem:[%s5092_s5 + $0x1aa8] sm:$0xff] }
 0x3ac   : > { %3189 = vmatprep.subr.mxu0 %v1186_v20  ;;  %3260 = vmatprep.subr.mxu1 %v1188_v21  ;;  %v1080_v20 = vld [vmem:[%s5092_s5 + $0x1ab8] sm:$0xff]  ;;  %v1077_v21 = vld [vmem:[%s5092_s5 + $0x1aa0] sm:$0xff] }
 0x3af   : > { %3190 = vmatpush2.xpose.msra.mxu0 %v1185_v22  ;;  %3261 = vmatpush2.xpose.msra.mxu1 %v1187_v23  ;;  %v1079_v22 = vld [vmem:[%s5092_s5 + $0x1ab0] sm:$0xff]  ;;  %v1070_v23 = vld [vmem:[%s5092_s5 + $0x1a68] sm:$0xff] }
 0x3b0   : > { %3191 = vmatprep.subr.mxu0 %v1178_v46  ;;  %3262 = vmatprep.subr.mxu1 %v1180_v50  ;;  %v1072_v46 = vld [vmem:[%s5092_s5 + $0x1a78] sm:$0xff]  ;;  %v1069_v50 = vld [vmem:[%s5092_s5 + $0x1a60] sm:$0xff] }
 0x3b3   : > { %3192 = vmatpush2.xpose.msra.mxu0 %v1177_v24  ;;  %3263 = vmatpush2.xpose.msra.mxu1 %v1179_v25  ;;  %v1071_v24 = vld [vmem:[%s5092_s5 + $0x1a70] sm:$0xff]  ;;  %v1062_v25 = vld [vmem:[%s5092_s5 + $0x1a28] sm:$0xff] }
 0x3b4   : > { %3193 = vmatprep.subr.mxu0 %v1170_v26  ;;  %3264 = vmatprep.subr.mxu1 %v1172_v27  ;;  %v1064_v26 = vld [vmem:[%s5092_s5 + $0x1a38] sm:$0xff]  ;;  %v1061_v27 = vld [vmem:[%s5092_s5 + $0x1a20] sm:$0xff] }
 0x3b7   : > { %3194 = vmatpush2.xpose.msra.mxu0 %v1169_v28  ;;  %3265 = vmatpush2.xpose.msra.mxu1 %v1171_v29  ;;  %v1063_v28 = vld [vmem:[%s5092_s5 + $0x1a30] sm:$0xff]  ;;  %v1054_v29 = vld [vmem:[%s5092_s5 + $0x19e8] sm:$0xff] }
 0x3b8   : > { %3195 = vmatprep.subr.mxu0 %v1162_v30  ;;  %3266 = vmatprep.subr.mxu1 %v1164_v31  ;;  %v1056_v30 = vld [vmem:[%s5092_s5 + $0x19f8] sm:$0xff]  ;;  %v1053_v31 = vld [vmem:[%s5092_s5 + $0x19e0] sm:$0xff] }
 0x3bb   : > { %3196 = vmatpush2.xpose.msra.mxu0 %v1161_v32  ;;  %3267 = vmatpush2.xpose.msra.mxu1 %v1163_v33  ;;  %v1055_v32 = vld [vmem:[%s5092_s5 + $0x19f0] sm:$0xff]  ;;  %v1046_v33 = vld [vmem:[%s5092_s5 + $0x19a8] sm:$0xff] }
 0x3bc   : > { %3197 = vmatprep.subr.mxu0 %v1154_v12  ;;  %3268 = vmatprep.subr.mxu1 %v1156_v13  ;;  %v1048_v12 = vld [vmem:[%s5092_s5 + $0x19b8] sm:$0xff]  ;;  %v1045_v13 = vld [vmem:[%s5092_s5 + $0x19a0] sm:$0xff] }
 0x3bf   : > { %3198 = vmatpush2.xpose.msra.mxu0 %v1153_v34  ;;  %3269 = vmatpush2.xpose.msra.mxu1 %v1155_v36  ;;  %v1047_v34 = vld [vmem:[%s5092_s5 + $0x19b0] sm:$0xff]  ;;  %v1038_v36 = vld [vmem:[%s5092_s5 + $0x1968] sm:$0xff] }
 0x3c0   : > { %3199 = vmatprep.subr.mxu0 %v1146_v37  ;;  %3270 = vmatprep.subr.mxu1 %v1148_v38  ;;  %v1040_v37 = vld [vmem:[%s5092_s5 + $0x1978] sm:$0xff]  ;;  %v1037_v38 = vld [vmem:[%s5092_s5 + $0x1960] sm:$0xff] }
 0x3c3   : > { %3200 = vmatpush2.xpose.msra.mxu0 %v1145_v39  ;;  %3271 = vmatpush2.xpose.msra.mxu1 %v1147_v40  ;;  %v1039_v39 = vld [vmem:[%s5092_s5 + $0x1970] sm:$0xff]  ;;  %v1030_v40 = vld [vmem:[%s5092_s5 + $0x1928] sm:$0xff] }
 0x3c4   : > { %3201 = vmatprep.subr.mxu0 %v1138_v41  ;;  %3272 = vmatprep.subr.mxu1 %v1140_v42  ;;  %v1032_v41 = vld [vmem:[%s5092_s5 + $0x1938] sm:$0xff]  ;;  %v1029_v42 = vld [vmem:[%s5092_s5 + $0x1920] sm:$0xff] }
 0x3c7   : > { %3202 = vmatpush2.xpose.msra.mxu0 %v1137_v43  ;;  %3273 = vmatpush2.xpose.msra.mxu1 %v1139_v44  ;;  %v1031_v43 = vld [vmem:[%s5092_s5 + $0x1930] sm:$0xff]  ;;  %v1022_v44 = vld [vmem:[%s5092_s5 + $0x18e8] sm:$0xff] }
 0x3c8   : > { %3203 = vmatprep.subr.mxu0 %v1130_v45  ;;  %3274 = vmatprep.subr.mxu1 %v1132_v47  ;;  %v1024_v45 = vld [vmem:[%s5092_s5 + $0x18f8] sm:$0xff]  ;;  %v1021_v47 = vld [vmem:[%s5092_s5 + $0x18e0] sm:$0xff] }
 0x3cb   : > { %3204 = vmatpush2.xpose.msra.mxu0 %v1129_v48  ;;  %3275 = vmatpush2.xpose.msra.mxu1 %v1131_v51  ;;  %v1023_v48 = vld [vmem:[%s5092_s5 + $0x18f0] sm:$0xff]  ;;  %v1014_v51 = vld [vmem:[%s5092_s5 + $0x18a8] sm:$0xff] }
 0x3cc   : > { %3205 = vmatprep.subr.mxu0 %v1122_v52  ;;  %3276 = vmatprep.subr.mxu1 %v1124_v54  ;;  %v1016_v52 = vld [vmem:[%s5092_s5 + $0x18b8] sm:$0xff]  ;;  %v1013_v54 = vld [vmem:[%s5092_s5 + $0x18a0] sm:$0xff] }
 0x3cf   : > { %3206 = vmatpush2.xpose.msra.mxu0 %v1121_v55  ;;  %3277 = vmatpush2.xpose.msra.mxu1 %v1123_v56  ;;  %v1015_v55 = vld [vmem:[%s5092_s5 + $0x18b0] sm:$0xff]  ;;  %v1006_v56 = vld [vmem:[%s5092_s5 + $0x1868] sm:$0xff] }
 0x3d0   : > { %3285 = vmatprep.subr.mxu0 %v1118_v57  ;;  %3356 = vmatprep.subr.mxu1 %v1120_v58  ;;  %v1008_v57 = vld [vmem:[%s5092_s5 + $0x1878] sm:$0xff]  ;;  %v2925_v58 = vpop.f32.mrf.mxu0 }
 0x3d2   : > { %3208 = vmatmul.mubr.f32.vlgmr.msra.gmra.mxu0 %v4800_v63  ;;  %3279 = vmatmul.mubr.f32.vlgmr.msra.gmra.mxu1 %v4801_v0  ;;  %v2996_v63 = vpop.f32.mrf.mxu1  ;;  %v2927_v0 = vpop.f32.mrf.mxu0 }
 0x3d3   : > { %3286 = vmatpush1.xpose.msra.mxu0 %v1117_v59  ;;  %3357 = vmatpush1.xpose.msra.mxu1 %v1119_v60  ;;  %v1005_v59 = vld [vmem:[%s5092_s5 + $0x1860] sm:$0xff]  ;;  %v1007_v60 = vld [vmem:[%s5092_s5 + $0x1870] sm:$0xff] }
 0x3d4   : > { %3287 = vmatprep.subr.mxu0 %v1110_v61  ;;  %3358 = vmatprep.subr.mxu1 %v1112_v62  ;;  %v998_v61 = vld [vmem:[%s5092_s5 + $0x1828] sm:$0xff]  ;;  %v1000_v62 = vld [vmem:[%s5092_s5 + $0x1838] sm:$0xff] }
 0x3d5   : > { %3349 = vmatprep.mubr.f32.mxu0 %v5259_v18  ;;  %3420 = vmatprep.mubr.f32.mxu1 %v5263_v19 }
 0x3d7   : > { %3288 = vmatpush1.xpose.msra.mxu0 %v1109_v1  ;;  %3359 = vmatpush1.xpose.msra.mxu1 %v1111_v2  ;;  %v997_v1 = vld [vmem:[%s5092_s5 + $0x1820] sm:$0xff]  ;;  %v999_v2 = vld [vmem:[%s5092_s5 + $0x1830] sm:$0xff] }
 0x3d8   : > { %3289 = vmatprep.subr.mxu0 %v1102_v3  ;;  %3360 = vmatprep.subr.mxu1 %v1104_v4  ;;  %v2926_v3 = vadd.f32 %v2925_v58, %v5587_v35  ;;  %v1246_v4 = vld [vmem:[%s5092_s5 + $0x1fe8] sm:$0xff] }
 0x3d9   : > { %v1174_v58 = vld [vmem:[%s5092_s5 + $0x1da8] sm:$0xff] }
 0x3db   : > { %3290 = vmatpush1.xpose.msra.mxu0 %v1101_v5  ;;  %3361 = vmatpush1.xpose.msra.mxu1 %v1103_v6  ;;  %v1248_v5 = vld [vmem:[%s5092_s5 + $0x1ff8] sm:$0xff]  ;;  %v2928_v6 = vadd.f32 %v2927_v0, %v5587_v35  ;;  %v1165_v0 = vld [vmem:[%s5092_s5 + $0x1d60] sm:$0xff] }
 0x3dc   : > { %3291 = vmatprep.subr.mxu0 %v1094_v7  ;;  %3362 = vmatprep.subr.mxu1 %v1096_v8  ;;  %v2998_v7 = vpop.f32.mrf.mxu1  ;;  %v1245_v8 = vld [vmem:[%s5092_s5 + $0x1fe0] sm:$0xff] }
 0x3df   : > { %3292 = vmatpush1.xpose.msra.mxu0 %v1093_v9  ;;  %3363 = vmatpush1.xpose.msra.mxu1 %v1095_v10  ;;  %v1247_v9 = vld [vmem:[%s5092_s5 + $0x1ff0] sm:$0xff]  ;;  %v2997_v10 = vadd.f32 %v2996_v63, %v2926_v3  ;;  %v1168_v63 = vld [vmem:[%s5092_s5 + $0x1d78] sm:$0xff] }
 0x3e0   : > { %3293 = vmatprep.subr.mxu0 %v1086_v11  ;;  %3364 = vmatprep.subr.mxu1 %v1088_v14  ;;  %v1238_v11 = vld [vmem:[%s5092_s5 + $0x1fa8] sm:$0xff]  ;;  %v1240_v14 = vld [vmem:[%s5092_s5 + $0x1fb8] sm:$0xff] }
 0x3e1   : > { %v1160_v3 = vld [vmem:[%s5092_s5 + $0x1d38] sm:$0xff] }
 0x3e3   : > { %3294 = vmatpush1.xpose.msra.mxu0 %v1085_v15  ;;  %3365 = vmatpush1.xpose.msra.mxu1 %v1087_v16 }
 0x3e4   : > { %3295 = vmatprep.subr.mxu0 %v1078_v17  ;;  %3366 = vmatprep.subr.mxu1 %v1080_v20  ;;  %v2999_v17 = vadd.f32 %v2998_v7, %v2928_v6  ;;  %v1150_v6 = vld [vmem:[%s5092_s5 + $0x1ce8] sm:$0xff]  ;;  %v1152_v7 = vld [vmem:[%s5092_s5 + $0x1cf8] sm:$0xff] }
 0x3e7   : > { %3296 = vmatpush1.xpose.msra.mxu0 %v1077_v21  ;;  %3367 = vmatpush1.xpose.msra.mxu1 %v1079_v22 }
 0x3e8   : > { %3297 = vmatprep.subr.mxu0 %v1070_v23  ;;  %3368 = vmatprep.subr.mxu1 %v1072_v46  ;;  %v1237_v23 = vld [vmem:[%s5092_s5 + $0x1fa0] sm:$0xff]  ;;  %v1239_v46 = vld [vmem:[%s5092_s5 + $0x1fb0] sm:$0xff] }
 0x3eb   : > { %3298 = vmatpush1.xpose.msra.mxu0 %v1069_v50  ;;  %3369 = vmatpush1.xpose.msra.mxu1 %v1071_v24  ;;  %v1230_v24 = vld [vmem:[%s5092_s5 + $0x1f68] sm:$0xff] }
 0x3ec   : > { %3299 = vmatprep.subr.mxu0 %v1062_v25  ;;  %3370 = vmatprep.subr.mxu1 %v1064_v26  ;;  %v1232_v25 = vld [vmem:[%s5092_s5 + $0x1f78] sm:$0xff] }
 0x3ef   : > { %3300 = vmatpush1.xpose.msra.mxu0 %v1061_v27  ;;  %3371 = vmatpush1.xpose.msra.mxu1 %v1063_v28  ;;  %v1229_v28 = vld [vmem:[%s5092_s5 + $0x1f60] sm:$0xff] }
 0x3f0   : > { %3301 = vmatprep.subr.mxu0 %v1054_v29  ;;  %3372 = vmatprep.subr.mxu1 %v1056_v30  ;;  %v1231_v29 = vld [vmem:[%s5092_s5 + $0x1f70] sm:$0xff] }
 0x3f3   : > { %3302 = vmatpush1.xpose.msra.mxu0 %v1053_v31  ;;  %3373 = vmatpush1.xpose.msra.mxu1 %v1055_v32  ;;  %v1222_v31 = vld [vmem:[%s5092_s5 + $0x1f28] sm:$0xff]  ;;  %v1224_v32 = vld [vmem:[%s5092_s5 + $0x1f38] sm:$0xff] }
 0x3f4   : > { %3303 = vmatprep.subr.mxu0 %v1046_v33  ;;  %3374 = vmatprep.subr.mxu1 %v1048_v12  ;;  %v1221_v33 = vld [vmem:[%s5092_s5 + $0x1f20] sm:$0xff]  ;;  %v1223_v12 = vld [vmem:[%s5092_s5 + $0x1f30] sm:$0xff] }
 0x3f7   : > { %3304 = vmatpush1.xpose.msra.mxu0 %v1045_v13  ;;  %3375 = vmatpush1.xpose.msra.mxu1 %v1047_v34  ;;  %v1214_v13 = vld [vmem:[%s5092_s5 + $0x1ee8] sm:$0xff]  ;;  %v1216_v34 = vld [vmem:[%s5092_s5 + $0x1ef8] sm:$0xff] }
 0x3f8   : > { %3305 = vmatprep.subr.mxu0 %v1038_v36  ;;  %3376 = vmatprep.subr.mxu1 %v1040_v37  ;;  %v1213_v36 = vld [vmem:[%s5092_s5 + $0x1ee0] sm:$0xff]  ;;  %v1215_v37 = vld [vmem:[%s5092_s5 + $0x1ef0] sm:$0xff] }
 0x3fb   : > { %3306 = vmatpush1.xpose.msra.mxu0 %v1037_v38  ;;  %3377 = vmatpush1.xpose.msra.mxu1 %v1039_v39  ;;  %v1206_v38 = vld [vmem:[%s5092_s5 + $0x1ea8] sm:$0xff]  ;;  %v1208_v39 = vld [vmem:[%s5092_s5 + $0x1eb8] sm:$0xff] }
 0x3fc   : > { %3307 = vmatprep.subr.mxu0 %v1030_v40  ;;  %3378 = vmatprep.subr.mxu1 %v1032_v41  ;;  %v1205_v40 = vld [vmem:[%s5092_s5 + $0x1ea0] sm:$0xff]  ;;  %v1207_v41 = vld [vmem:[%s5092_s5 + $0x1eb0] sm:$0xff] }
 0x3ff   : > { %3308 = vmatpush1.xpose.msra.mxu0 %v1029_v42  ;;  %3379 = vmatpush1.xpose.msra.mxu1 %v1031_v43  ;;  %v1198_v42 = vld [vmem:[%s5092_s5 + $0x1e68] sm:$0xff]  ;;  %v1200_v43 = vld [vmem:[%s5092_s5 + $0x1e78] sm:$0xff] }
 0x400   : > { %3309 = vmatprep.subr.mxu0 %v1022_v44  ;;  %3380 = vmatprep.subr.mxu1 %v1024_v45  ;;  %v1197_v44 = vld [vmem:[%s5092_s5 + $0x1e60] sm:$0xff]  ;;  %v1199_v45 = vld [vmem:[%s5092_s5 + $0x1e70] sm:$0xff] }
 0x403   : > { %3310 = vmatpush1.xpose.msra.mxu0 %v1021_v47  ;;  %3381 = vmatpush1.xpose.msra.mxu1 %v1023_v48  ;;  %v1190_v47 = vld [vmem:[%s5092_s5 + $0x1e28] sm:$0xff]  ;;  %v1192_v48 = vld [vmem:[%s5092_s5 + $0x1e38] sm:$0xff] }
 0x404   : > { %3311 = vmatprep.subr.mxu0 %v1014_v51  ;;  %3382 = vmatprep.subr.mxu1 %v1016_v52  ;;  %v1189_v51 = vld [vmem:[%s5092_s5 + $0x1e20] sm:$0xff]  ;;  %v1191_v52 = vld [vmem:[%s5092_s5 + $0x1e30] sm:$0xff] }
 0x407   : > { %3312 = vmatpush1.xpose.msra.mxu0 %v1013_v54  ;;  %3383 = vmatpush1.xpose.msra.mxu1 %v1015_v55  ;;  %v1182_v54 = vld [vmem:[%s5092_s5 + $0x1de8] sm:$0xff]  ;;  %v1184_v55 = vld [vmem:[%s5092_s5 + $0x1df8] sm:$0xff] }
 0x408   : > { %3313 = vmatprep.subr.mxu0 %v1006_v56  ;;  %3384 = vmatprep.subr.mxu1 %v1008_v57  ;;  %v1181_v56 = vld [vmem:[%s5092_s5 + $0x1de0] sm:$0xff]  ;;  %v1183_v57 = vld [vmem:[%s5092_s5 + $0x1df0] sm:$0xff] }
 0x40b   : > { %3314 = vmatpush1.xpose.msra.mxu0 %v1005_v59  ;;  %3385 = vmatpush1.xpose.msra.mxu1 %v1007_v60  ;;  %v1176_v59 = vld [vmem:[%s5092_s5 + $0x1db8] sm:$0xff]  ;;  %v1173_v60 = vld [vmem:[%s5092_s5 + $0x1da0] sm:$0xff] }
 0x40c   : > { %3315 = vmatprep.subr.mxu0 %v998_v61  ;;  %3386 = vmatprep.subr.mxu1 %v1000_v62  ;;  %v1175_v61 = vld [vmem:[%s5092_s5 + $0x1db0] sm:$0xff]  ;;  %v1166_v62 = vld [vmem:[%s5092_s5 + $0x1d68] sm:$0xff] }
 0x40f   : > { %3316 = vmatpush1.xpose.msra.mxu0 %v997_v1  ;;  %3387 = vmatpush1.xpose.msra.mxu1 %v999_v2  ;;  %v1167_v1 = vld [vmem:[%s5092_s5 + $0x1d70] sm:$0xff]  ;;  %v1158_v2 = vld [vmem:[%s5092_s5 + $0x1d28] sm:$0xff] }
 0x410   : > { %3317 = vmatprep.subr.mxu0 %v1246_v4  ;;  %3388 = vmatprep.subr.mxu1 %v1248_v5  ;;  %v1157_v4 = vld [vmem:[%s5092_s5 + $0x1d20] sm:$0xff]  ;;  %v1159_v5 = vld [vmem:[%s5092_s5 + $0x1d30] sm:$0xff] }
 0x412   : > { %v3067_v15 = vpop.f32.mrf.mxu0  ;;  %v3138_v16 = vpop.f32.mrf.mxu1 }
 0x413   : > { %v3068_v20 = vadd.f32 %v3067_v15, %v2997_v10  ;;  %3318 = vmatpush2.xpose.msra.mxu0 %v1245_v8  ;;  %3389 = vmatpush2.xpose.msra.mxu1 %v1247_v9  ;;  %v1149_v8 = vld [vmem:[%s5092_s5 + $0x1ce0] sm:$0xff]  ;;  %v1151_v9 = vld [vmem:[%s5092_s5 + $0x1cf0] sm:$0xff]  ;;  %v1142_v10 = vld [vmem:[%s5092_s5 + $0x1ca8] sm:$0xff] }
 0x414   : > { %v3069_v21 = vpop.f32.mrf.mxu0  ;;  %v3140_v22 = vpop.f32.mrf.mxu1  ;;  %3319 = vmatprep.subr.mxu0 %v1238_v11  ;;  %3390 = vmatprep.subr.mxu1 %v1240_v14  ;;  %v1144_v11 = vld [vmem:[%s5092_s5 + $0x1cb8] sm:$0xff]  ;;  %v1141_v14 = vld [vmem:[%s5092_s5 + $0x1ca0] sm:$0xff]  ;;  %v1143_v15 = vld [vmem:[%s5092_s5 + $0x1cb0] sm:$0xff] }
 0x415   : > { %v3070_v50 = vadd.f32 %v3069_v21, %v2999_v17  ;;  %v3139_v26 = vadd.f32 %v3138_v16, %v3068_v20  ;;  %v1134_v16 = vld [vmem:[%s5092_s5 + $0x1c68] sm:$0xff]  ;;  %v1136_v17 = vld [vmem:[%s5092_s5 + $0x1c78] sm:$0xff]  ;;  %v1133_v20 = vld [vmem:[%s5092_s5 + $0x1c60] sm:$0xff] }
 0x416   : > { %v1135_v21 = vld [vmem:[%s5092_s5 + $0x1c70] sm:$0xff] }
 0x417   : > { %v3141_v27 = vadd.f32 %v3140_v22, %v3070_v50  ;;  %3320 = vmatpush2.xpose.msra.mxu0 %v1237_v23  ;;  %3391 = vmatpush2.xpose.msra.mxu1 %v1239_v46  ;;  %v1126_v22 = vld [vmem:[%s5092_s5 + $0x1c28] sm:$0xff]  ;;  %v1128_v23 = vld [vmem:[%s5092_s5 + $0x1c38] sm:$0xff]  ;;  %v1125_v46 = vld [vmem:[%s5092_s5 + $0x1c20] sm:$0xff] }
 0x418   : > { %3321 = vmatprep.subr.mxu0 %v1230_v24  ;;  %3392 = vmatprep.subr.mxu1 %v1232_v25  ;;  %v1127_v50 = vld [vmem:[%s5092_s5 + $0x1c30] sm:$0xff]  ;;  %v1370_v24 = vld [vmem:[%s5092_s5 + $0x23c8] sm:$0xff]  ;;  %v1372_v25 = vld [vmem:[%s5092_s5 + $0x23d8] sm:$0xff] }
 0x419   : > { %v4581_v30 = vcombine.low %v3139_v26, %v3141_v27  ;;  %v1369_v26 = vld [vmem:[%s5092_s5 + $0x23c0] sm:$0xff]  ;;  %v1371_v27 = vld [vmem:[%s5092_s5 + $0x23d0] sm:$0xff] }
 0x41b   : > { %4597 = vst [vmem:[%s5608_s11 + $0x10] sm:$0xff] %v4581_v30  ;;  %3322 = vmatpush2.xpose.msra.mxu0 %v1229_v28  ;;  %3393 = vmatpush2.xpose.msra.mxu1 %v1231_v29  ;;  %v1362_v28 = vld [vmem:[%s5092_s5 + $0x2388] sm:$0xff]  ;;  %v1364_v29 = vld [vmem:[%s5092_s5 + $0x2398] sm:$0xff]  ;;  %v4802_v30 = vld [vmem:[#allocation5 + $0x10] sm:$0xff] }
 0x41c   : > { %3323 = vmatprep.subr.mxu0 %v1222_v31  ;;  %3394 = vmatprep.subr.mxu1 %v1224_v32  ;;  %v4803_v31 = vld [vmem:[#allocation5 + $0x18] sm:$0xff]  ;;  %v1361_v32 = vld [vmem:[%s5092_s5 + $0x2380] sm:$0xff] }
 0x41f   : > { %3324 = vmatpush2.xpose.msra.mxu0 %v1221_v33  ;;  %3395 = vmatpush2.xpose.msra.mxu1 %v1223_v12  ;;  %v1363_v33 = vld [vmem:[%s5092_s5 + $0x2390] sm:$0xff]  ;;  %v1354_v12 = vld [vmem:[%s5092_s5 + $0x2348] sm:$0xff] }
 0x420   : > { %3325 = vmatprep.subr.mxu0 %v1214_v13  ;;  %3396 = vmatprep.subr.mxu1 %v1216_v34  ;;  %v1356_v13 = vld [vmem:[%s5092_s5 + $0x2358] sm:$0xff]  ;;  %v1353_v34 = vld [vmem:[%s5092_s5 + $0x2340] sm:$0xff] }
 0x423   : > { %3326 = vmatpush2.xpose.msra.mxu0 %v1213_v36  ;;  %3397 = vmatpush2.xpose.msra.mxu1 %v1215_v37  ;;  %v1355_v36 = vld [vmem:[%s5092_s5 + $0x2350] sm:$0xff]  ;;  %v1346_v37 = vld [vmem:[%s5092_s5 + $0x2308] sm:$0xff] }
 0x424   : > { %3327 = vmatprep.subr.mxu0 %v1206_v38  ;;  %3398 = vmatprep.subr.mxu1 %v1208_v39  ;;  %v1348_v38 = vld [vmem:[%s5092_s5 + $0x2318] sm:$0xff]  ;;  %v1345_v39 = vld [vmem:[%s5092_s5 + $0x2300] sm:$0xff] }
 0x427   : > { %3328 = vmatpush2.xpose.msra.mxu0 %v1205_v40  ;;  %3399 = vmatpush2.xpose.msra.mxu1 %v1207_v41  ;;  %v1347_v40 = vld [vmem:[%s5092_s5 + $0x2310] sm:$0xff]  ;;  %v1338_v41 = vld [vmem:[%s5092_s5 + $0x22c8] sm:$0xff] }
 0x428   : > { %3329 = vmatprep.subr.mxu0 %v1198_v42  ;;  %3400 = vmatprep.subr.mxu1 %v1200_v43  ;;  %v1340_v42 = vld [vmem:[%s5092_s5 + $0x22d8] sm:$0xff]  ;;  %v1337_v43 = vld [vmem:[%s5092_s5 + $0x22c0] sm:$0xff] }
 0x42b   : > { %3330 = vmatpush2.xpose.msra.mxu0 %v1197_v44  ;;  %3401 = vmatpush2.xpose.msra.mxu1 %v1199_v45  ;;  %v1339_v44 = vld [vmem:[%s5092_s5 + $0x22d0] sm:$0xff]  ;;  %v1330_v45 = vld [vmem:[%s5092_s5 + $0x2288] sm:$0xff] }
 0x42c   : > { %3331 = vmatprep.subr.mxu0 %v1190_v47  ;;  %3402 = vmatprep.subr.mxu1 %v1192_v48  ;;  %v1332_v47 = vld [vmem:[%s5092_s5 + $0x2298] sm:$0xff]  ;;  %v1329_v48 = vld [vmem:[%s5092_s5 + $0x2280] sm:$0xff] }
 0x42f   : > { %3332 = vmatpush2.xpose.msra.mxu0 %v1189_v51  ;;  %3403 = vmatpush2.xpose.msra.mxu1 %v1191_v52  ;;  %v1331_v51 = vld [vmem:[%s5092_s5 + $0x2290] sm:$0xff]  ;;  %v1322_v52 = vld [vmem:[%s5092_s5 + $0x2248] sm:$0xff] }
 0x430   : > { %3333 = vmatprep.subr.mxu0 %v1182_v54  ;;  %3404 = vmatprep.subr.mxu1 %v1184_v55  ;;  %v1324_v54 = vld [vmem:[%s5092_s5 + $0x2258] sm:$0xff]  ;;  %v1321_v55 = vld [vmem:[%s5092_s5 + $0x2240] sm:$0xff] }
 0x433   : > { %3334 = vmatpush2.xpose.msra.mxu0 %v1181_v56  ;;  %3405 = vmatpush2.xpose.msra.mxu1 %v1183_v57  ;;  %v1323_v56 = vld [vmem:[%s5092_s5 + $0x2250] sm:$0xff]  ;;  %v1314_v57 = vld [vmem:[%s5092_s5 + $0x2208] sm:$0xff] }
 0x434   : > { %3335 = vmatprep.subr.mxu0 %v1174_v58  ;;  %3406 = vmatprep.subr.mxu1 %v1176_v59  ;;  %v1316_v58 = vld [vmem:[%s5092_s5 + $0x2218] sm:$0xff]  ;;  %v1313_v59 = vld [vmem:[%s5092_s5 + $0x2200] sm:$0xff] }
 0x437   : > { %3336 = vmatpush2.xpose.msra.mxu0 %v1173_v60  ;;  %3407 = vmatpush2.xpose.msra.mxu1 %v1175_v61  ;;  %v1315_v60 = vld [vmem:[%s5092_s5 + $0x2210] sm:$0xff]  ;;  %v1306_v61 = vld [vmem:[%s5092_s5 + $0x21c8] sm:$0xff] }
 0x438   : > { %3337 = vmatprep.subr.mxu0 %v1166_v62  ;;  %3408 = vmatprep.subr.mxu1 %v1168_v63  ;;  %v1308_v62 = vld [vmem:[%s5092_s5 + $0x21d8] sm:$0xff]  ;;  %v1305_v63 = vld [vmem:[%s5092_s5 + $0x21c0] sm:$0xff] }
 0x43b   : > { %3338 = vmatpush2.xpose.msra.mxu0 %v1165_v0  ;;  %3409 = vmatpush2.xpose.msra.mxu1 %v1167_v1  ;;  %v1307_v0 = vld [vmem:[%s5092_s5 + $0x21d0] sm:$0xff]  ;;  %v1298_v1 = vld [vmem:[%s5092_s5 + $0x2188] sm:$0xff] }
 0x43c   : > { %3339 = vmatprep.subr.mxu0 %v1158_v2  ;;  %3410 = vmatprep.subr.mxu1 %v1160_v3  ;;  %v1300_v2 = vld [vmem:[%s5092_s5 + $0x2198] sm:$0xff]  ;;  %v1297_v3 = vld [vmem:[%s5092_s5 + $0x2180] sm:$0xff] }
 0x43f   : > { %3340 = vmatpush2.xpose.msra.mxu0 %v1157_v4  ;;  %3411 = vmatpush2.xpose.msra.mxu1 %v1159_v5  ;;  %v1299_v4 = vld [vmem:[%s5092_s5 + $0x2190] sm:$0xff]  ;;  %v1290_v5 = vld [vmem:[%s5092_s5 + $0x2148] sm:$0xff] }
 0x440   : > { %3341 = vmatprep.subr.mxu0 %v1150_v6  ;;  %3412 = vmatprep.subr.mxu1 %v1152_v7  ;;  %v1292_v6 = vld [vmem:[%s5092_s5 + $0x2158] sm:$0xff]  ;;  %v1289_v7 = vld [vmem:[%s5092_s5 + $0x2140] sm:$0xff] }
 0x443   : > { %3342 = vmatpush2.xpose.msra.mxu0 %v1149_v8  ;;  %3413 = vmatpush2.xpose.msra.mxu1 %v1151_v9  ;;  %v1291_v8 = vld [vmem:[%s5092_s5 + $0x2150] sm:$0xff]  ;;  %v1282_v9 = vld [vmem:[%s5092_s5 + $0x2108] sm:$0xff] }
 0x444   : > { %3343 = vmatprep.subr.mxu0 %v1142_v10  ;;  %3414 = vmatprep.subr.mxu1 %v1144_v11  ;;  %v1284_v10 = vld [vmem:[%s5092_s5 + $0x2118] sm:$0xff]  ;;  %v1281_v11 = vld [vmem:[%s5092_s5 + $0x2100] sm:$0xff] }
 0x447   : > { %3344 = vmatpush2.xpose.msra.mxu0 %v1141_v14  ;;  %3415 = vmatpush2.xpose.msra.mxu1 %v1143_v15  ;;  %v1283_v14 = vld [vmem:[%s5092_s5 + $0x2110] sm:$0xff]  ;;  %v1274_v15 = vld [vmem:[%s5092_s5 + $0x20c8] sm:$0xff] }
 0x448   : > { %3345 = vmatprep.subr.mxu0 %v1134_v16  ;;  %3416 = vmatprep.subr.mxu1 %v1136_v17  ;;  %v1276_v16 = vld [vmem:[%s5092_s5 + $0x20d8] sm:$0xff]  ;;  %v1273_v17 = vld [vmem:[%s5092_s5 + $0x20c0] sm:$0xff] }
 0x44b   : > { %3346 = vmatpush2.xpose.msra.mxu0 %v1133_v20  ;;  %3417 = vmatpush2.xpose.msra.mxu1 %v1135_v21  ;;  %v1275_v20 = vld [vmem:[%s5092_s5 + $0x20d0] sm:$0xff]  ;;  %v1266_v21 = vld [vmem:[%s5092_s5 + $0x2088] sm:$0xff] }
 0x44c   : > { %3347 = vmatprep.subr.mxu0 %v1126_v22  ;;  %3418 = vmatprep.subr.mxu1 %v1128_v23  ;;  %v1268_v22 = vld [vmem:[%s5092_s5 + $0x2098] sm:$0xff]  ;;  %v1265_v23 = vld [vmem:[%s5092_s5 + $0x2080] sm:$0xff] }
 0x44f   : > { %3348 = vmatpush2.xpose.msra.mxu0 %v1125_v46  ;;  %3419 = vmatpush2.xpose.msra.mxu1 %v1127_v50  ;;  %v1267_v46 = vld [vmem:[%s5092_s5 + $0x2090] sm:$0xff]  ;;  %v1258_v50 = vld [vmem:[%s5092_s5 + $0x2048] sm:$0xff] }
 0x450   : > { %3427 = vmatprep.subr.mxu0 %v1370_v24  ;;  %3498 = vmatprep.subr.mxu1 %v1372_v25  ;;  %v1260_v24 = vld [vmem:[%s5092_s5 + $0x2058] sm:$0xff]  ;;  %v1257_v25 = vld [vmem:[%s5092_s5 + $0x2040] sm:$0xff] }
 0x452   : > { %3350 = vmatmul.mubr.f32.vlgmr.msra.gmra.mxu0 %v4802_v30  ;;  %3421 = vmatmul.mubr.f32.vlgmr.msra.gmra.mxu1 %v4803_v31  ;;  %v1251_v30 = vld [vmem:[%s5092_s5 + $0x2010] sm:$0xff]  ;;  %v1498_v31 = vld [vmem:[%s5092_s5 + $0x27c8] sm:$0xff] }
 0x453   : > { %3428 = vmatpush1.xpose.msra.mxu0 %v1369_v26  ;;  %3499 = vmatpush1.xpose.msra.mxu1 %v1371_v27  ;;  %v1259_v26 = vld [vmem:[%s5092_s5 + $0x2050] sm:$0xff]  ;;  %v1250_v27 = vld [vmem:[%s5092_s5 + $0x2008] sm:$0xff] }
 0x454   : > { %3429 = vmatprep.subr.mxu0 %v1362_v28  ;;  %3500 = vmatprep.subr.mxu1 %v1364_v29  ;;  %v1252_v28 = vld [vmem:[%s5092_s5 + $0x2018] sm:$0xff]  ;;  %v1249_v29 = vld [vmem:[%s5092_s5 + $0x2000] sm:$0xff] }
 0x455   : > { %3491 = vmatprep.mubr.f32.mxu0 %v5154_v49  ;;  %3562 = vmatprep.mubr.f32.mxu1 %v5162_v53 }
 0x457   : > { %3430 = vmatpush1.xpose.msra.mxu0 %v1361_v32  ;;  %3501 = vmatpush1.xpose.msra.mxu1 %v1363_v33  ;;  %v1500_v32 = vld [vmem:[%s5092_s5 + $0x27d8] sm:$0xff]  ;;  %v1497_v33 = vld [vmem:[%s5092_s5 + $0x27c0] sm:$0xff] }
 0x458   : > { %3431 = vmatprep.subr.mxu0 %v1354_v12  ;;  %3502 = vmatprep.subr.mxu1 %v1356_v13  ;;  %v1499_v12 = vld [vmem:[%s5092_s5 + $0x27d0] sm:$0xff]  ;;  %v1490_v13 = vld [vmem:[%s5092_s5 + $0x2788] sm:$0xff] }
 0x45b   : > { %3432 = vmatpush1.xpose.msra.mxu0 %v1353_v34  ;;  %3503 = vmatpush1.xpose.msra.mxu1 %v1355_v36  ;;  %v1492_v34 = vld [vmem:[%s5092_s5 + $0x2798] sm:$0xff]  ;;  %v1489_v36 = vld [vmem:[%s5092_s5 + $0x2780] sm:$0xff] }
 0x45c   : > { %3433 = vmatprep.subr.mxu0 %v1346_v37  ;;  %3504 = vmatprep.subr.mxu1 %v1348_v38  ;;  %v1491_v37 = vld [vmem:[%s5092_s5 + $0x2790] sm:$0xff]  ;;  %v1482_v38 = vld [vmem:[%s5092_s5 + $0x2748] sm:$0xff] }
 0x45f   : > { %3434 = vmatpush1.xpose.msra.mxu0 %v1345_v39  ;;  %3505 = vmatpush1.xpose.msra.mxu1 %v1347_v40  ;;  %v1484_v39 = vld [vmem:[%s5092_s5 + $0x2758] sm:$0xff]  ;;  %v1481_v40 = vld [vmem:[%s5092_s5 + $0x2740] sm:$0xff] }
 0x460   : > { %3435 = vmatprep.subr.mxu0 %v1338_v41  ;;  %3506 = vmatprep.subr.mxu1 %v1340_v42  ;;  %v1483_v41 = vld [vmem:[%s5092_s5 + $0x2750] sm:$0xff]  ;;  %v1474_v42 = vld [vmem:[%s5092_s5 + $0x2708] sm:$0xff] }
 0x463   : > { %3436 = vmatpush1.xpose.msra.mxu0 %v1337_v43  ;;  %3507 = vmatpush1.xpose.msra.mxu1 %v1339_v44  ;;  %v1476_v43 = vld [vmem:[%s5092_s5 + $0x2718] sm:$0xff]  ;;  %v1473_v44 = vld [vmem:[%s5092_s5 + $0x2700] sm:$0xff] }
 0x464   : > { %3437 = vmatprep.subr.mxu0 %v1330_v45  ;;  %3508 = vmatprep.subr.mxu1 %v1332_v47  ;;  %v1475_v45 = vld [vmem:[%s5092_s5 + $0x2710] sm:$0xff]  ;;  %v1466_v47 = vld [vmem:[%s5092_s5 + $0x26c8] sm:$0xff] }
 0x467   : > { %3438 = vmatpush1.xpose.msra.mxu0 %v1329_v48  ;;  %3509 = vmatpush1.xpose.msra.mxu1 %v1331_v51  ;;  %v1468_v48 = vld [vmem:[%s5092_s5 + $0x26d8] sm:$0xff]  ;;  %v1465_v51 = vld [vmem:[%s5092_s5 + $0x26c0] sm:$0xff] }
 0x468   : > { %3439 = vmatprep.subr.mxu0 %v1322_v52  ;;  %3510 = vmatprep.subr.mxu1 %v1324_v54  ;;  %v1467_v52 = vld [vmem:[%s5092_s5 + $0x26d0] sm:$0xff]  ;;  %v1458_v54 = vld [vmem:[%s5092_s5 + $0x2688] sm:$0xff] }
 0x46b   : > { %3440 = vmatpush1.xpose.msra.mxu0 %v1321_v55  ;;  %3511 = vmatpush1.xpose.msra.mxu1 %v1323_v56  ;;  %v1460_v55 = vld [vmem:[%s5092_s5 + $0x2698] sm:$0xff]  ;;  %v1457_v56 = vld [vmem:[%s5092_s5 + $0x2680] sm:$0xff] }
 0x46c   : > { %3441 = vmatprep.subr.mxu0 %v1314_v57  ;;  %3512 = vmatprep.subr.mxu1 %v1316_v58  ;;  %v1459_v57 = vld [vmem:[%s5092_s5 + $0x2690] sm:$0xff]  ;;  %v1450_v58 = vld [vmem:[%s5092_s5 + $0x2648] sm:$0xff] }
 0x46f   : > { %3442 = vmatpush1.xpose.msra.mxu0 %v1313_v59  ;;  %3513 = vmatpush1.xpose.msra.mxu1 %v1315_v60  ;;  %v1452_v59 = vld [vmem:[%s5092_s5 + $0x2658] sm:$0xff]  ;;  %v1449_v60 = vld [vmem:[%s5092_s5 + $0x2640] sm:$0xff] }
 0x470   : > { %3443 = vmatprep.subr.mxu0 %v1306_v61  ;;  %3514 = vmatprep.subr.mxu1 %v1308_v62  ;;  %v1451_v61 = vld [vmem:[%s5092_s5 + $0x2650] sm:$0xff]  ;;  %v1442_v62 = vld [vmem:[%s5092_s5 + $0x2608] sm:$0xff] }
 0x473   : > { %3444 = vmatpush1.xpose.msra.mxu0 %v1305_v63  ;;  %3515 = vmatpush1.xpose.msra.mxu1 %v1307_v0  ;;  %v1444_v63 = vld [vmem:[%s5092_s5 + $0x2618] sm:$0xff]  ;;  %v1441_v0 = vld [vmem:[%s5092_s5 + $0x2600] sm:$0xff] }
 0x474   : > { %3445 = vmatprep.subr.mxu0 %v1298_v1  ;;  %3516 = vmatprep.subr.mxu1 %v1300_v2  ;;  %v1443_v1 = vld [vmem:[%s5092_s5 + $0x2610] sm:$0xff]  ;;  %v1434_v2 = vld [vmem:[%s5092_s5 + $0x25c8] sm:$0xff] }
 0x477   : > { %3446 = vmatpush1.xpose.msra.mxu0 %v1297_v3  ;;  %3517 = vmatpush1.xpose.msra.mxu1 %v1299_v4  ;;  %v1436_v3 = vld [vmem:[%s5092_s5 + $0x25d8] sm:$0xff]  ;;  %v1433_v4 = vld [vmem:[%s5092_s5 + $0x25c0] sm:$0xff] }
 0x478   : > { %3447 = vmatprep.subr.mxu0 %v1290_v5  ;;  %3518 = vmatprep.subr.mxu1 %v1292_v6  ;;  %v1435_v5 = vld [vmem:[%s5092_s5 + $0x25d0] sm:$0xff]  ;;  %v1426_v6 = vld [vmem:[%s5092_s5 + $0x2588] sm:$0xff] }
 0x47b   : > { %3448 = vmatpush1.xpose.msra.mxu0 %v1289_v7  ;;  %3519 = vmatpush1.xpose.msra.mxu1 %v1291_v8  ;;  %v1428_v7 = vld [vmem:[%s5092_s5 + $0x2598] sm:$0xff]  ;;  %v1425_v8 = vld [vmem:[%s5092_s5 + $0x2580] sm:$0xff] }
 0x47c   : > { %3449 = vmatprep.subr.mxu0 %v1282_v9  ;;  %3520 = vmatprep.subr.mxu1 %v1284_v10  ;;  %v1427_v9 = vld [vmem:[%s5092_s5 + $0x2590] sm:$0xff]  ;;  %v1418_v10 = vld [vmem:[%s5092_s5 + $0x2548] sm:$0xff] }
 0x47f   : > { %3450 = vmatpush1.xpose.msra.mxu0 %v1281_v11  ;;  %3521 = vmatpush1.xpose.msra.mxu1 %v1283_v14  ;;  %v1420_v11 = vld [vmem:[%s5092_s5 + $0x2558] sm:$0xff]  ;;  %v1417_v14 = vld [vmem:[%s5092_s5 + $0x2540] sm:$0xff] }
 0x480   : > { %3451 = vmatprep.subr.mxu0 %v1274_v15  ;;  %3522 = vmatprep.subr.mxu1 %v1276_v16  ;;  %v1419_v15 = vld [vmem:[%s5092_s5 + $0x2550] sm:$0xff]  ;;  %v1410_v16 = vld [vmem:[%s5092_s5 + $0x2508] sm:$0xff] }
 0x483   : > { %3452 = vmatpush1.xpose.msra.mxu0 %v1273_v17  ;;  %3523 = vmatpush1.xpose.msra.mxu1 %v1275_v20  ;;  %v1412_v17 = vld [vmem:[%s5092_s5 + $0x2518] sm:$0xff]  ;;  %v1409_v20 = vld [vmem:[%s5092_s5 + $0x2500] sm:$0xff] }
 0x484   : > { %3453 = vmatprep.subr.mxu0 %v1266_v21  ;;  %3524 = vmatprep.subr.mxu1 %v1268_v22  ;;  %v1411_v21 = vld [vmem:[%s5092_s5 + $0x2510] sm:$0xff]  ;;  %v1402_v22 = vld [vmem:[%s5092_s5 + $0x24c8] sm:$0xff] }
 0x487   : > { %3454 = vmatpush1.xpose.msra.mxu0 %v1265_v23  ;;  %3525 = vmatpush1.xpose.msra.mxu1 %v1267_v46  ;;  %v1404_v23 = vld [vmem:[%s5092_s5 + $0x24d8] sm:$0xff]  ;;  %v1401_v46 = vld [vmem:[%s5092_s5 + $0x24c0] sm:$0xff] }
 0x488   : > { %3455 = vmatprep.subr.mxu0 %v1258_v50  ;;  %3526 = vmatprep.subr.mxu1 %v1260_v24  ;;  %v1403_v50 = vld [vmem:[%s5092_s5 + $0x24d0] sm:$0xff]  ;;  %v1394_v24 = vld [vmem:[%s5092_s5 + $0x2488] sm:$0xff] }
 0x48b   : > { %3456 = vmatpush1.xpose.msra.mxu0 %v1257_v25  ;;  %3527 = vmatpush1.xpose.msra.mxu1 %v1259_v26  ;;  %v1396_v25 = vld [vmem:[%s5092_s5 + $0x2498] sm:$0xff]  ;;  %v1393_v26 = vld [vmem:[%s5092_s5 + $0x2480] sm:$0xff] }
 0x48c   : > { %3457 = vmatprep.subr.mxu0 %v1250_v27  ;;  %3528 = vmatprep.subr.mxu1 %v1252_v28  ;;  %v1395_v27 = vld [vmem:[%s5092_s5 + $0x2490] sm:$0xff]  ;;  %v1386_v28 = vld [vmem:[%s5092_s5 + $0x2448] sm:$0xff] }
 0x48f   : > { %3458 = vmatpush1.xpose.msra.mxu0 %v1249_v29  ;;  %3529 = vmatpush1.xpose.msra.mxu1 %v1251_v30  ;;  %v1388_v29 = vld [vmem:[%s5092_s5 + $0x2458] sm:$0xff]  ;;  %v1385_v30 = vld [vmem:[%s5092_s5 + $0x2440] sm:$0xff] }
 0x490   : > { %3459 = vmatprep.subr.mxu0 %v1498_v31  ;;  %3530 = vmatprep.subr.mxu1 %v1500_v32  ;;  %v1387_v31 = vld [vmem:[%s5092_s5 + $0x2450] sm:$0xff]  ;;  %v1378_v32 = vld [vmem:[%s5092_s5 + $0x2408] sm:$0xff] }
 0x493   : > { %3460 = vmatpush2.xpose.msra.mxu0 %v1497_v33  ;;  %3531 = vmatpush2.xpose.msra.mxu1 %v1499_v12  ;;  %v1380_v33 = vld [vmem:[%s5092_s5 + $0x2418] sm:$0xff]  ;;  %v1377_v12 = vld [vmem:[%s5092_s5 + $0x2400] sm:$0xff] }
 0x494   : > { %3461 = vmatprep.subr.mxu0 %v1490_v13  ;;  %3532 = vmatprep.subr.mxu1 %v1492_v34  ;;  %v1379_v13 = vld [vmem:[%s5092_s5 + $0x2410] sm:$0xff]  ;;  %v1374_v34 = vld [vmem:[%s5092_s5 + $0x23e8] sm:$0xff] }
 0x497   : > { %3462 = vmatpush2.xpose.msra.mxu0 %v1489_v36  ;;  %3533 = vmatpush2.xpose.msra.mxu1 %v1491_v37  ;;  %v1376_v36 = vld [vmem:[%s5092_s5 + $0x23f8] sm:$0xff]  ;;  %v1373_v37 = vld [vmem:[%s5092_s5 + $0x23e0] sm:$0xff] }
 0x498   : > { %3463 = vmatprep.subr.mxu0 %v1482_v38  ;;  %3534 = vmatprep.subr.mxu1 %v1484_v39  ;;  %v1375_v38 = vld [vmem:[%s5092_s5 + $0x23f0] sm:$0xff]  ;;  %v1366_v39 = vld [vmem:[%s5092_s5 + $0x23a8] sm:$0xff] }
 0x49b   : > { %3464 = vmatpush2.xpose.msra.mxu0 %v1481_v40  ;;  %3535 = vmatpush2.xpose.msra.mxu1 %v1483_v41  ;;  %v1368_v40 = vld [vmem:[%s5092_s5 + $0x23b8] sm:$0xff]  ;;  %v4804_v41 = vld [vmem:[#allocation5] sm:$0xff] }
 0x49c   : > { %3465 = vmatprep.subr.mxu0 %v1474_v42  ;;  %3536 = vmatprep.subr.mxu1 %v1476_v43  ;;  %v4805_v42 = vld [vmem:[#allocation5 + $0x8] sm:$0xff]  ;;  %v1365_v43 = vld [vmem:[%s5092_s5 + $0x23a0] sm:$0xff] }
 0x49f   : > { %3466 = vmatpush2.xpose.msra.mxu0 %v1473_v44  ;;  %3537 = vmatpush2.xpose.msra.mxu1 %v1475_v45  ;;  %v1367_v44 = vld [vmem:[%s5092_s5 + $0x23b0] sm:$0xff]  ;;  %v1358_v45 = vld [vmem:[%s5092_s5 + $0x2368] sm:$0xff] }
 0x4a0   : > { %3467 = vmatprep.subr.mxu0 %v1466_v47  ;;  %3538 = vmatprep.subr.mxu1 %v1468_v48  ;;  %v1360_v47 = vld [vmem:[%s5092_s5 + $0x2378] sm:$0xff]  ;;  %v1357_v48 = vld [vmem:[%s5092_s5 + $0x2360] sm:$0xff] }
 0x4a3   : > { %3468 = vmatpush2.xpose.msra.mxu0 %v1465_v51  ;;  %3539 = vmatpush2.xpose.msra.mxu1 %v1467_v52  ;;  %v1359_v51 = vld [vmem:[%s5092_s5 + $0x2370] sm:$0xff]  ;;  %v1350_v52 = vld [vmem:[%s5092_s5 + $0x2328] sm:$0xff] }
 0x4a4   : > { %3469 = vmatprep.subr.mxu0 %v1458_v54  ;;  %3540 = vmatprep.subr.mxu1 %v1460_v55  ;;  %v1352_v54 = vld [vmem:[%s5092_s5 + $0x2338] sm:$0xff]  ;;  %v1349_v55 = vld [vmem:[%s5092_s5 + $0x2320] sm:$0xff] }
 0x4a7   : > { %3470 = vmatpush2.xpose.msra.mxu0 %v1457_v56  ;;  %3541 = vmatpush2.xpose.msra.mxu1 %v1459_v57  ;;  %v1351_v56 = vld [vmem:[%s5092_s5 + $0x2330] sm:$0xff]  ;;  %v1342_v57 = vld [vmem:[%s5092_s5 + $0x22e8] sm:$0xff] }
 0x4a8   : > { %3471 = vmatprep.subr.mxu0 %v1450_v58  ;;  %3542 = vmatprep.subr.mxu1 %v1452_v59  ;;  %v1344_v58 = vld [vmem:[%s5092_s5 + $0x22f8] sm:$0xff]  ;;  %v1341_v59 = vld [vmem:[%s5092_s5 + $0x22e0] sm:$0xff] }
 0x4ab   : > { %3472 = vmatpush2.xpose.msra.mxu0 %v1449_v60  ;;  %3543 = vmatpush2.xpose.msra.mxu1 %v1451_v61  ;;  %v1343_v60 = vld [vmem:[%s5092_s5 + $0x22f0] sm:$0xff]  ;;  %v1334_v61 = vld [vmem:[%s5092_s5 + $0x22a8] sm:$0xff] }
 0x4ac   : > { %3473 = vmatprep.subr.mxu0 %v1442_v62  ;;  %3544 = vmatprep.subr.mxu1 %v1444_v63  ;;  %v1336_v62 = vld [vmem:[%s5092_s5 + $0x22b8] sm:$0xff]  ;;  %v1333_v63 = vld [vmem:[%s5092_s5 + $0x22a0] sm:$0xff] }
 0x4af   : > { %3474 = vmatpush2.xpose.msra.mxu0 %v1441_v0  ;;  %3545 = vmatpush2.xpose.msra.mxu1 %v1443_v1  ;;  %v1335_v0 = vld [vmem:[%s5092_s5 + $0x22b0] sm:$0xff]  ;;  %v1326_v1 = vld [vmem:[%s5092_s5 + $0x2268] sm:$0xff] }
 0x4b0   : > { %3475 = vmatprep.subr.mxu0 %v1434_v2  ;;  %3546 = vmatprep.subr.mxu1 %v1436_v3  ;;  %v1328_v2 = vld [vmem:[%s5092_s5 + $0x2278] sm:$0xff]  ;;  %v1325_v3 = vld [vmem:[%s5092_s5 + $0x2260] sm:$0xff] }
 0x4b3   : > { %3476 = vmatpush2.xpose.msra.mxu0 %v1433_v4  ;;  %3547 = vmatpush2.xpose.msra.mxu1 %v1435_v5  ;;  %v1327_v4 = vld [vmem:[%s5092_s5 + $0x2270] sm:$0xff]  ;;  %v1318_v5 = vld [vmem:[%s5092_s5 + $0x2228] sm:$0xff] }
 0x4b4   : > { %3477 = vmatprep.subr.mxu0 %v1426_v6  ;;  %3548 = vmatprep.subr.mxu1 %v1428_v7  ;;  %v1320_v6 = vld [vmem:[%s5092_s5 + $0x2238] sm:$0xff]  ;;  %v1317_v7 = vld [vmem:[%s5092_s5 + $0x2220] sm:$0xff] }
 0x4b7   : > { %3478 = vmatpush2.xpose.msra.mxu0 %v1425_v8  ;;  %3549 = vmatpush2.xpose.msra.mxu1 %v1427_v9  ;;  %v1319_v8 = vld [vmem:[%s5092_s5 + $0x2230] sm:$0xff]  ;;  %v1310_v9 = vld [vmem:[%s5092_s5 + $0x21e8] sm:$0xff] }
 0x4b8   : > { %3479 = vmatprep.subr.mxu0 %v1418_v10  ;;  %3550 = vmatprep.subr.mxu1 %v1420_v11  ;;  %v1312_v10 = vld [vmem:[%s5092_s5 + $0x21f8] sm:$0xff]  ;;  %v1309_v11 = vld [vmem:[%s5092_s5 + $0x21e0] sm:$0xff] }
 0x4bb   : > { %3480 = vmatpush2.xpose.msra.mxu0 %v1417_v14  ;;  %3551 = vmatpush2.xpose.msra.mxu1 %v1419_v15  ;;  %v1311_v14 = vld [vmem:[%s5092_s5 + $0x21f0] sm:$0xff]  ;;  %v1302_v15 = vld [vmem:[%s5092_s5 + $0x21a8] sm:$0xff] }
 0x4bc   : > { %3481 = vmatprep.subr.mxu0 %v1410_v16  ;;  %3552 = vmatprep.subr.mxu1 %v1412_v17  ;;  %v1304_v16 = vld [vmem:[%s5092_s5 + $0x21b8] sm:$0xff]  ;;  %v1301_v17 = vld [vmem:[%s5092_s5 + $0x21a0] sm:$0xff] }
 0x4bf   : > { %3482 = vmatpush2.xpose.msra.mxu0 %v1409_v20  ;;  %3553 = vmatpush2.xpose.msra.mxu1 %v1411_v21  ;;  %v1303_v20 = vld [vmem:[%s5092_s5 + $0x21b0] sm:$0xff]  ;;  %v1294_v21 = vld [vmem:[%s5092_s5 + $0x2168] sm:$0xff] }
 0x4c0   : > { %3483 = vmatprep.subr.mxu0 %v1402_v22  ;;  %3554 = vmatprep.subr.mxu1 %v1404_v23  ;;  %v1296_v22 = vld [vmem:[%s5092_s5 + $0x2178] sm:$0xff]  ;;  %v1293_v23 = vld [vmem:[%s5092_s5 + $0x2160] sm:$0xff] }
 0x4c3   : > { %3484 = vmatpush2.xpose.msra.mxu0 %v1401_v46  ;;  %3555 = vmatpush2.xpose.msra.mxu1 %v1403_v50  ;;  %v1295_v46 = vld [vmem:[%s5092_s5 + $0x2170] sm:$0xff]  ;;  %v1286_v50 = vld [vmem:[%s5092_s5 + $0x2128] sm:$0xff] }
 0x4c4   : > { %3485 = vmatprep.subr.mxu0 %v1394_v24  ;;  %3556 = vmatprep.subr.mxu1 %v1396_v25  ;;  %v1288_v24 = vld [vmem:[%s5092_s5 + $0x2138] sm:$0xff]  ;;  %v1285_v25 = vld [vmem:[%s5092_s5 + $0x2120] sm:$0xff] }
 0x4c7   : > { %3486 = vmatpush2.xpose.msra.mxu0 %v1393_v26  ;;  %3557 = vmatpush2.xpose.msra.mxu1 %v1395_v27  ;;  %v1287_v26 = vld [vmem:[%s5092_s5 + $0x2130] sm:$0xff]  ;;  %v1278_v27 = vld [vmem:[%s5092_s5 + $0x20e8] sm:$0xff] }
 0x4c8   : > { %3487 = vmatprep.subr.mxu0 %v1386_v28  ;;  %3558 = vmatprep.subr.mxu1 %v1388_v29  ;;  %v1280_v28 = vld [vmem:[%s5092_s5 + $0x20f8] sm:$0xff]  ;;  %v1277_v29 = vld [vmem:[%s5092_s5 + $0x20e0] sm:$0xff] }
 0x4cb   : > { %3488 = vmatpush2.xpose.msra.mxu0 %v1385_v30  ;;  %3559 = vmatpush2.xpose.msra.mxu1 %v1387_v31  ;;  %v1279_v30 = vld [vmem:[%s5092_s5 + $0x20f0] sm:$0xff]  ;;  %v1270_v31 = vld [vmem:[%s5092_s5 + $0x20a8] sm:$0xff] }
 0x4cc   : > { %3489 = vmatprep.subr.mxu0 %v1378_v32  ;;  %3560 = vmatprep.subr.mxu1 %v1380_v33  ;;  %v1272_v32 = vld [vmem:[%s5092_s5 + $0x20b8] sm:$0xff]  ;;  %v1269_v33 = vld [vmem:[%s5092_s5 + $0x20a0] sm:$0xff] }
 0x4cf   : > { %3490 = vmatpush2.xpose.msra.mxu0 %v1377_v12  ;;  %3561 = vmatpush2.xpose.msra.mxu1 %v1379_v13  ;;  %v1271_v12 = vld [vmem:[%s5092_s5 + $0x20b0] sm:$0xff]  ;;  %v1262_v13 = vld [vmem:[%s5092_s5 + $0x2068] sm:$0xff] }
 0x4d0   : > { %3569 = vmatprep.subr.mxu0 %v1374_v34  ;;  %3640 = vmatprep.subr.mxu1 %v1376_v36  ;;  %v1264_v34 = vld [vmem:[%s5092_s5 + $0x2078] sm:$0xff]  ;;  %v3209_v36 = vpop.f32.mrf.mxu0 }
 0x4d2   : > { %3492 = vmatmul.mubr.f32.vlgmr.msra.gmra.mxu0 %v4804_v41  ;;  %3563 = vmatmul.mubr.f32.vlgmr.msra.gmra.mxu1 %v4805_v42  ;;  %v3280_v41 = vpop.f32.mrf.mxu1  ;;  %v3211_v42 = vpop.f32.mrf.mxu0 }
 0x4d3   : > { %3570 = vmatpush1.xpose.msra.mxu0 %v1373_v37  ;;  %3641 = vmatpush1.xpose.msra.mxu1 %v1375_v38  ;;  %v1261_v37 = vld [vmem:[%s5092_s5 + $0x2060] sm:$0xff]  ;;  %v1263_v38 = vld [vmem:[%s5092_s5 + $0x2070] sm:$0xff] }
 0x4d4   : > { %3571 = vmatprep.subr.mxu0 %v1366_v39  ;;  %3642 = vmatprep.subr.mxu1 %v1368_v40  ;;  %v1254_v39 = vld [vmem:[%s5092_s5 + $0x2028] sm:$0xff]  ;;  %v1256_v40 = vld [vmem:[%s5092_s5 + $0x2038] sm:$0xff] }
 0x4d5   : > { %3633 = vmatprep.mubr.f32.mxu0 %v5259_v18  ;;  %3704 = vmatprep.mubr.f32.mxu1 %v5263_v19 }
 0x4d7   : > { %3572 = vmatpush1.xpose.msra.mxu0 %v1365_v43  ;;  %3643 = vmatpush1.xpose.msra.mxu1 %v1367_v44  ;;  %v1253_v43 = vld [vmem:[%s5092_s5 + $0x2020] sm:$0xff]  ;;  %v1255_v44 = vld [vmem:[%s5092_s5 + $0x2030] sm:$0xff] }
 0x4d8   : > { %3573 = vmatprep.subr.mxu0 %v1358_v45  ;;  %3644 = vmatprep.subr.mxu1 %v1360_v47  ;;  %v3210_v45 = vadd.f32 %v3209_v36, %v5587_v35  ;;  %v1502_v47 = vld [vmem:[%s5092_s5 + $0x27e8] sm:$0xff] }
 0x4d9   : > { %v1430_v36 = vld [vmem:[%s5092_s5 + $0x25a8] sm:$0xff] }
 0x4db   : > { %3574 = vmatpush1.xpose.msra.mxu0 %v1357_v48  ;;  %3645 = vmatpush1.xpose.msra.mxu1 %v1359_v51  ;;  %v1504_v48 = vld [vmem:[%s5092_s5 + $0x27f8] sm:$0xff]  ;;  %v3212_v51 = vadd.f32 %v3211_v42, %v5587_v35  ;;  %v1421_v42 = vld [vmem:[%s5092_s5 + $0x2560] sm:$0xff] }
 0x4dc   : > { %3575 = vmatprep.subr.mxu0 %v1350_v52  ;;  %3646 = vmatprep.subr.mxu1 %v1352_v54  ;;  %v3282_v52 = vpop.f32.mrf.mxu1  ;;  %v1501_v54 = vld [vmem:[%s5092_s5 + $0x27e0] sm:$0xff] }
 0x4df   : > { %3576 = vmatpush1.xpose.msra.mxu0 %v1349_v55  ;;  %3647 = vmatpush1.xpose.msra.mxu1 %v1351_v56  ;;  %v1503_v55 = vld [vmem:[%s5092_s5 + $0x27f0] sm:$0xff]  ;;  %v3281_v56 = vadd.f32 %v3280_v41, %v3210_v45  ;;  %v1424_v41 = vld [vmem:[%s5092_s5 + $0x2578] sm:$0xff] }
 0x4e0   : > { %3577 = vmatprep.subr.mxu0 %v1342_v57  ;;  %3648 = vmatprep.subr.mxu1 %v1344_v58  ;;  %v1494_v57 = vld [vmem:[%s5092_s5 + $0x27a8] sm:$0xff]  ;;  %v1496_v58 = vld [vmem:[%s5092_s5 + $0x27b8] sm:$0xff] }
 0x4e1   : > { %v1416_v45 = vld [vmem:[%s5092_s5 + $0x2538] sm:$0xff] }
 0x4e3   : > { %3578 = vmatpush1.xpose.msra.mxu0 %v1341_v59  ;;  %3649 = vmatpush1.xpose.msra.mxu1 %v1343_v60 }
 0x4e4   : > { %3579 = vmatprep.subr.mxu0 %v1334_v61  ;;  %3650 = vmatprep.subr.mxu1 %v1336_v62  ;;  %v3283_v61 = vadd.f32 %v3282_v52, %v3212_v51  ;;  %v1406_v51 = vld [vmem:[%s5092_s5 + $0x24e8] sm:$0xff]  ;;  %v1408_v52 = vld [vmem:[%s5092_s5 + $0x24f8] sm:$0xff] }
 0x4e7   : > { %3580 = vmatpush1.xpose.msra.mxu0 %v1333_v63  ;;  %3651 = vmatpush1.xpose.msra.mxu1 %v1335_v0 }
 0x4e8   : > { %3581 = vmatprep.subr.mxu0 %v1326_v1  ;;  %3652 = vmatprep.subr.mxu1 %v1328_v2  ;;  %v1493_v1 = vld [vmem:[%s5092_s5 + $0x27a0] sm:$0xff]  ;;  %v1495_v2 = vld [vmem:[%s5092_s5 + $0x27b0] sm:$0xff] }
 0x4eb   : > { %3582 = vmatpush1.xpose.msra.mxu0 %v1325_v3  ;;  %3653 = vmatpush1.xpose.msra.mxu1 %v1327_v4  ;;  %v1486_v4 = vld [vmem:[%s5092_s5 + $0x2768] sm:$0xff] }
 0x4ec   : > { %3583 = vmatprep.subr.mxu0 %v1318_v5  ;;  %3654 = vmatprep.subr.mxu1 %v1320_v6  ;;  %v1488_v5 = vld [vmem:[%s5092_s5 + $0x2778] sm:$0xff] }
 0x4ef   : > { %3584 = vmatpush1.xpose.msra.mxu0 %v1317_v7  ;;  %3655 = vmatpush1.xpose.msra.mxu1 %v1319_v8  ;;  %v1485_v8 = vld [vmem:[%s5092_s5 + $0x2760] sm:$0xff] }
 0x4f0   : > { %3585 = vmatprep.subr.mxu0 %v1310_v9  ;;  %3656 = vmatprep.subr.mxu1 %v1312_v10  ;;  %v1487_v9 = vld [vmem:[%s5092_s5 + $0x2770] sm:$0xff] }
 0x4f3   : > { %3586 = vmatpush1.xpose.msra.mxu0 %v1309_v11  ;;  %3657 = vmatpush1.xpose.msra.mxu1 %v1311_v14  ;;  %v1478_v11 = vld [vmem:[%s5092_s5 + $0x2728] sm:$0xff]  ;;  %v1480_v14 = vld [vmem:[%s5092_s5 + $0x2738] sm:$0xff] }
 0x4f4   : > { %3587 = vmatprep.subr.mxu0 %v1302_v15  ;;  %3658 = vmatprep.subr.mxu1 %v1304_v16  ;;  %v1477_v15 = vld [vmem:[%s5092_s5 + $0x2720] sm:$0xff]  ;;  %v1479_v16 = vld [vmem:[%s5092_s5 + $0x2730] sm:$0xff] }
 0x4f7   : > { %3588 = vmatpush1.xpose.msra.mxu0 %v1301_v17  ;;  %3659 = vmatpush1.xpose.msra.mxu1 %v1303_v20  ;;  %v1470_v17 = vld [vmem:[%s5092_s5 + $0x26e8] sm:$0xff]  ;;  %v1472_v20 = vld [vmem:[%s5092_s5 + $0x26f8] sm:$0xff] }
 0x4f8   : > { %3589 = vmatprep.subr.mxu0 %v1294_v21  ;;  %3660 = vmatprep.subr.mxu1 %v1296_v22  ;;  %v1469_v21 = vld [vmem:[%s5092_s5 + $0x26e0] sm:$0xff]  ;;  %v1471_v22 = vld [vmem:[%s5092_s5 + $0x26f0] sm:$0xff] }
 0x4fb   : > { %3590 = vmatpush1.xpose.msra.mxu0 %v1293_v23  ;;  %3661 = vmatpush1.xpose.msra.mxu1 %v1295_v46  ;;  %v1462_v23 = vld [vmem:[%s5092_s5 + $0x26a8] sm:$0xff]  ;;  %v1464_v46 = vld [vmem:[%s5092_s5 + $0x26b8] sm:$0xff] }
 0x4fc   : > { %3591 = vmatprep.subr.mxu0 %v1286_v50  ;;  %3662 = vmatprep.subr.mxu1 %v1288_v24  ;;  %v1461_v50 = vld [vmem:[%s5092_s5 + $0x26a0] sm:$0xff]  ;;  %v1463_v24 = vld [vmem:[%s5092_s5 + $0x26b0] sm:$0xff] }
 0x4ff   : > { %3592 = vmatpush1.xpose.msra.mxu0 %v1285_v25  ;;  %3663 = vmatpush1.xpose.msra.mxu1 %v1287_v26  ;;  %v1454_v25 = vld [vmem:[%s5092_s5 + $0x2668] sm:$0xff]  ;;  %v1456_v26 = vld [vmem:[%s5092_s5 + $0x2678] sm:$0xff] }
 0x500   : > { %3593 = vmatprep.subr.mxu0 %v1278_v27  ;;  %3664 = vmatprep.subr.mxu1 %v1280_v28  ;;  %v1453_v27 = vld [vmem:[%s5092_s5 + $0x2660] sm:$0xff]  ;;  %v1455_v28 = vld [vmem:[%s5092_s5 + $0x2670] sm:$0xff] }
 0x503   : > { %3594 = vmatpush1.xpose.msra.mxu0 %v1277_v29  ;;  %3665 = vmatpush1.xpose.msra.mxu1 %v1279_v30  ;;  %v1446_v29 = vld [vmem:[%s5092_s5 + $0x2628] sm:$0xff]  ;;  %v1448_v30 = vld [vmem:[%s5092_s5 + $0x2638] sm:$0xff] }
 0x504   : > { %3595 = vmatprep.subr.mxu0 %v1270_v31  ;;  %3666 = vmatprep.subr.mxu1 %v1272_v32  ;;  %v1445_v31 = vld [vmem:[%s5092_s5 + $0x2620] sm:$0xff]  ;;  %v1447_v32 = vld [vmem:[%s5092_s5 + $0x2630] sm:$0xff] }
 0x507   : > { %3596 = vmatpush1.xpose.msra.mxu0 %v1269_v33  ;;  %3667 = vmatpush1.xpose.msra.mxu1 %v1271_v12  ;;  %v1438_v33 = vld [vmem:[%s5092_s5 + $0x25e8] sm:$0xff]  ;;  %v1440_v12 = vld [vmem:[%s5092_s5 + $0x25f8] sm:$0xff] }
 0x508   : > { %3597 = vmatprep.subr.mxu0 %v1262_v13  ;;  %3668 = vmatprep.subr.mxu1 %v1264_v34  ;;  %v1437_v13 = vld [vmem:[%s5092_s5 + $0x25e0] sm:$0xff]  ;;  %v1439_v34 = vld [vmem:[%s5092_s5 + $0x25f0] sm:$0xff] }
 0x50b   : > { %3598 = vmatpush1.xpose.msra.mxu0 %v1261_v37  ;;  %3669 = vmatpush1.xpose.msra.mxu1 %v1263_v38  ;;  %v1432_v37 = vld [vmem:[%s5092_s5 + $0x25b8] sm:$0xff]  ;;  %v1429_v38 = vld [vmem:[%s5092_s5 + $0x25a0] sm:$0xff] }
 0x50c   : > { %3599 = vmatprep.subr.mxu0 %v1254_v39  ;;  %3670 = vmatprep.subr.mxu1 %v1256_v40  ;;  %v1431_v39 = vld [vmem:[%s5092_s5 + $0x25b0] sm:$0xff]  ;;  %v1422_v40 = vld [vmem:[%s5092_s5 + $0x2568] sm:$0xff] }
 0x50f   : > { %3600 = vmatpush1.xpose.msra.mxu0 %v1253_v43  ;;  %3671 = vmatpush1.xpose.msra.mxu1 %v1255_v44  ;;  %v1423_v43 = vld [vmem:[%s5092_s5 + $0x2570] sm:$0xff]  ;;  %v1414_v44 = vld [vmem:[%s5092_s5 + $0x2528] sm:$0xff] }
 0x510   : > { %3601 = vmatprep.subr.mxu0 %v1502_v47  ;;  %3672 = vmatprep.subr.mxu1 %v1504_v48  ;;  %v1413_v47 = vld [vmem:[%s5092_s5 + $0x2520] sm:$0xff]  ;;  %v1415_v48 = vld [vmem:[%s5092_s5 + $0x2530] sm:$0xff] }
 0x512   : > { %v3351_v59 = vpop.f32.mrf.mxu0  ;;  %v3422_v60 = vpop.f32.mrf.mxu1 }
 0x513   : > { %v3352_v62 = vadd.f32 %v3351_v59, %v3281_v56  ;;  %3602 = vmatpush2.xpose.msra.mxu0 %v1501_v54  ;;  %3673 = vmatpush2.xpose.msra.mxu1 %v1503_v55  ;;  %v1405_v54 = vld [vmem:[%s5092_s5 + $0x24e0] sm:$0xff]  ;;  %v1407_v55 = vld [vmem:[%s5092_s5 + $0x24f0] sm:$0xff]  ;;  %v1398_v56 = vld [vmem:[%s5092_s5 + $0x24a8] sm:$0xff] }
 0x514   : > { %v3353_v63 = vpop.f32.mrf.mxu0  ;;  %v3424_v0 = vpop.f32.mrf.mxu1  ;;  %3603 = vmatprep.subr.mxu0 %v1494_v57  ;;  %3674 = vmatprep.subr.mxu1 %v1496_v58  ;;  %v1400_v57 = vld [vmem:[%s5092_s5 + $0x24b8] sm:$0xff]  ;;  %v1397_v58 = vld [vmem:[%s5092_s5 + $0x24a0] sm:$0xff]  ;;  %v1399_v59 = vld [vmem:[%s5092_s5 + $0x24b0] sm:$0xff] }
 0x515   : > { %v3354_v3 = vadd.f32 %v3353_v63, %v3283_v61  ;;  %v3423_v6 = vadd.f32 %v3422_v60, %v3352_v62  ;;  %v1390_v60 = vld [vmem:[%s5092_s5 + $0x2468] sm:$0xff]  ;;  %v1392_v61 = vld [vmem:[%s5092_s5 + $0x2478] sm:$0xff]  ;;  %v1389_v62 = vld [vmem:[%s5092_s5 + $0x2460] sm:$0xff] }
 0x516   : > { %v1391_v63 = vld [vmem:[%s5092_s5 + $0x2470] sm:$0xff] }
 0x517   : > { %v3425_v7 = vadd.f32 %v3424_v0, %v3354_v3  ;;  %3604 = vmatpush2.xpose.msra.mxu0 %v1493_v1  ;;  %3675 = vmatpush2.xpose.msra.mxu1 %v1495_v2  ;;  %v1382_v0 = vld [vmem:[%s5092_s5 + $0x2428] sm:$0xff]  ;;  %v1384_v1 = vld [vmem:[%s5092_s5 + $0x2438] sm:$0xff]  ;;  %v1381_v2 = vld [vmem:[%s5092_s5 + $0x2420] sm:$0xff] }
 0x518   : > { %3605 = vmatprep.subr.mxu0 %v1486_v4  ;;  %3676 = vmatprep.subr.mxu1 %v1488_v5  ;;  %v1383_v3 = vld [vmem:[%s5092_s5 + $0x2430] sm:$0xff]  ;;  %v1626_v4 = vld [vmem:[%s5092_s5 + $0x2bc8] sm:$0xff]  ;;  %v1628_v5 = vld [vmem:[%s5092_s5 + $0x2bd8] sm:$0xff] }
 0x519   : > { %v4582_v10 = vcombine.low %v3423_v6, %v3425_v7  ;;  %v1625_v6 = vld [vmem:[%s5092_s5 + $0x2bc0] sm:$0xff]  ;;  %v1627_v7 = vld [vmem:[%s5092_s5 + $0x2bd0] sm:$0xff] }
 0x51b   : > { %4598 = vst [vmem:[%s5608_s11 + $0x18] sm:$0xff] %v4582_v10  ;;  %3606 = vmatpush2.xpose.msra.mxu0 %v1485_v8  ;;  %3677 = vmatpush2.xpose.msra.mxu1 %v1487_v9  ;;  %v1618_v8 = vld [vmem:[%s5092_s5 + $0x2b88] sm:$0xff]  ;;  %v1620_v9 = vld [vmem:[%s5092_s5 + $0x2b98] sm:$0xff]  ;;  %v4806_v10 = vld [vmem:[#allocation5 + $0x10] sm:$0xff] }
 0x51c   : > { %3607 = vmatprep.subr.mxu0 %v1478_v11  ;;  %3678 = vmatprep.subr.mxu1 %v1480_v14  ;;  %v4807_v11 = vld [vmem:[#allocation5 + $0x18] sm:$0xff]  ;;  %v1617_v14 = vld [vmem:[%s5092_s5 + $0x2b80] sm:$0xff] }
 0x51f   : > { %3608 = vmatpush2.xpose.msra.mxu0 %v1477_v15  ;;  %3679 = vmatpush2.xpose.msra.mxu1 %v1479_v16  ;;  %v1619_v15 = vld [vmem:[%s5092_s5 + $0x2b90] sm:$0xff]  ;;  %v1610_v16 = vld [vmem:[%s5092_s5 + $0x2b48] sm:$0xff] }
 0x520   : > { %3609 = vmatprep.subr.mxu0 %v1470_v17  ;;  %3680 = vmatprep.subr.mxu1 %v1472_v20  ;;  %v1612_v17 = vld [vmem:[%s5092_s5 + $0x2b58] sm:$0xff]  ;;  %v1609_v20 = vld [vmem:[%s5092_s5 + $0x2b40] sm:$0xff] }
 0x523   : > { %3610 = vmatpush2.xpose.msra.mxu0 %v1469_v21  ;;  %3681 = vmatpush2.xpose.msra.mxu1 %v1471_v22  ;;  %v1611_v21 = vld [vmem:[%s5092_s5 + $0x2b50] sm:$0xff]  ;;  %v1602_v22 = vld [vmem:[%s5092_s5 + $0x2b08] sm:$0xff] }
 0x524   : > { %3611 = vmatprep.subr.mxu0 %v1462_v23  ;;  %3682 = vmatprep.subr.mxu1 %v1464_v46  ;;  %v1604_v23 = vld [vmem:[%s5092_s5 + $0x2b18] sm:$0xff]  ;;  %v1601_v46 = vld [vmem:[%s5092_s5 + $0x2b00] sm:$0xff] }
 0x527   : > { %3612 = vmatpush2.xpose.msra.mxu0 %v1461_v50  ;;  %3683 = vmatpush2.xpose.msra.mxu1 %v1463_v24  ;;  %v1603_v50 = vld [vmem:[%s5092_s5 + $0x2b10] sm:$0xff]  ;;  %v1594_v24 = vld [vmem:[%s5092_s5 + $0x2ac8] sm:$0xff] }
 0x528   : > { %3613 = vmatprep.subr.mxu0 %v1454_v25  ;;  %3684 = vmatprep.subr.mxu1 %v1456_v26  ;;  %v1596_v25 = vld [vmem:[%s5092_s5 + $0x2ad8] sm:$0xff]  ;;  %v1593_v26 = vld [vmem:[%s5092_s5 + $0x2ac0] sm:$0xff] }
 0x52b   : > { %3614 = vmatpush2.xpose.msra.mxu0 %v1453_v27  ;;  %3685 = vmatpush2.xpose.msra.mxu1 %v1455_v28  ;;  %v1595_v27 = vld [vmem:[%s5092_s5 + $0x2ad0] sm:$0xff]  ;;  %v1586_v28 = vld [vmem:[%s5092_s5 + $0x2a88] sm:$0xff] }
 0x52c   : > { %3615 = vmatprep.subr.mxu0 %v1446_v29  ;;  %3686 = vmatprep.subr.mxu1 %v1448_v30  ;;  %v1588_v29 = vld [vmem:[%s5092_s5 + $0x2a98] sm:$0xff]  ;;  %v1585_v30 = vld [vmem:[%s5092_s5 + $0x2a80] sm:$0xff] }
 0x52f   : > { %3616 = vmatpush2.xpose.msra.mxu0 %v1445_v31  ;;  %3687 = vmatpush2.xpose.msra.mxu1 %v1447_v32  ;;  %v1587_v31 = vld [vmem:[%s5092_s5 + $0x2a90] sm:$0xff]  ;;  %v1578_v32 = vld [vmem:[%s5092_s5 + $0x2a48] sm:$0xff] }
 0x530   : > { %3617 = vmatprep.subr.mxu0 %v1438_v33  ;;  %3688 = vmatprep.subr.mxu1 %v1440_v12  ;;  %v1580_v33 = vld [vmem:[%s5092_s5 + $0x2a58] sm:$0xff]  ;;  %v1577_v12 = vld [vmem:[%s5092_s5 + $0x2a40] sm:$0xff] }
 0x533   : > { %3618 = vmatpush2.xpose.msra.mxu0 %v1437_v13  ;;  %3689 = vmatpush2.xpose.msra.mxu1 %v1439_v34  ;;  %v1579_v13 = vld [vmem:[%s5092_s5 + $0x2a50] sm:$0xff]  ;;  %v1570_v34 = vld [vmem:[%s5092_s5 + $0x2a08] sm:$0xff] }
 0x534   : > { %3619 = vmatprep.subr.mxu0 %v1430_v36  ;;  %3690 = vmatprep.subr.mxu1 %v1432_v37  ;;  %v1572_v36 = vld [vmem:[%s5092_s5 + $0x2a18] sm:$0xff]  ;;  %v1569_v37 = vld [vmem:[%s5092_s5 + $0x2a00] sm:$0xff] }
 0x537   : > { %3620 = vmatpush2.xpose.msra.mxu0 %v1429_v38  ;;  %3691 = vmatpush2.xpose.msra.mxu1 %v1431_v39  ;;  %v1571_v38 = vld [vmem:[%s5092_s5 + $0x2a10] sm:$0xff]  ;;  %v1562_v39 = vld [vmem:[%s5092_s5 + $0x29c8] sm:$0xff] }
 0x538   : > { %3621 = vmatprep.subr.mxu0 %v1422_v40  ;;  %3692 = vmatprep.subr.mxu1 %v1424_v41  ;;  %v1564_v40 = vld [vmem:[%s5092_s5 + $0x29d8] sm:$0xff]  ;;  %v1561_v41 = vld [vmem:[%s5092_s5 + $0x29c0] sm:$0xff] }
 0x53b   : > { %3622 = vmatpush2.xpose.msra.mxu0 %v1421_v42  ;;  %3693 = vmatpush2.xpose.msra.mxu1 %v1423_v43  ;;  %v1563_v42 = vld [vmem:[%s5092_s5 + $0x29d0] sm:$0xff]  ;;  %v1554_v43 = vld [vmem:[%s5092_s5 + $0x2988] sm:$0xff] }
 0x53c   : > { %3623 = vmatprep.subr.mxu0 %v1414_v44  ;;  %3694 = vmatprep.subr.mxu1 %v1416_v45  ;;  %v1556_v44 = vld [vmem:[%s5092_s5 + $0x2998] sm:$0xff]  ;;  %v1553_v45 = vld [vmem:[%s5092_s5 + $0x2980] sm:$0xff] }
 0x53f   : > { %3624 = vmatpush2.xpose.msra.mxu0 %v1413_v47  ;;  %3695 = vmatpush2.xpose.msra.mxu1 %v1415_v48  ;;  %v1555_v47 = vld [vmem:[%s5092_s5 + $0x2990] sm:$0xff]  ;;  %v1546_v48 = vld [vmem:[%s5092_s5 + $0x2948] sm:$0xff] }
 0x540   : > { %3625 = vmatprep.subr.mxu0 %v1406_v51  ;;  %3696 = vmatprep.subr.mxu1 %v1408_v52  ;;  %v1548_v51 = vld [vmem:[%s5092_s5 + $0x2958] sm:$0xff]  ;;  %v1545_v52 = vld [vmem:[%s5092_s5 + $0x2940] sm:$0xff] }
 0x543   : > { %3626 = vmatpush2.xpose.msra.mxu0 %v1405_v54  ;;  %3697 = vmatpush2.xpose.msra.mxu1 %v1407_v55  ;;  %v1547_v54 = vld [vmem:[%s5092_s5 + $0x2950] sm:$0xff]  ;;  %v1538_v55 = vld [vmem:[%s5092_s5 + $0x2908] sm:$0xff] }
 0x544   : > { %3627 = vmatprep.subr.mxu0 %v1398_v56  ;;  %3698 = vmatprep.subr.mxu1 %v1400_v57  ;;  %v1540_v56 = vld [vmem:[%s5092_s5 + $0x2918] sm:$0xff]  ;;  %v1537_v57 = vld [vmem:[%s5092_s5 + $0x2900] sm:$0xff] }
 0x547   : > { %3628 = vmatpush2.xpose.msra.mxu0 %v1397_v58  ;;  %3699 = vmatpush2.xpose.msra.mxu1 %v1399_v59  ;;  %v1539_v58 = vld [vmem:[%s5092_s5 + $0x2910] sm:$0xff]  ;;  %v1530_v59 = vld [vmem:[%s5092_s5 + $0x28c8] sm:$0xff] }
 0x548   : > { %3629 = vmatprep.subr.mxu0 %v1390_v60  ;;  %3700 = vmatprep.subr.mxu1 %v1392_v61  ;;  %v1532_v60 = vld [vmem:[%s5092_s5 + $0x28d8] sm:$0xff]  ;;  %v1529_v61 = vld [vmem:[%s5092_s5 + $0x28c0] sm:$0xff] }
 0x54b   : > { %3630 = vmatpush2.xpose.msra.mxu0 %v1389_v62  ;;  %3701 = vmatpush2.xpose.msra.mxu1 %v1391_v63  ;;  %v1531_v62 = vld [vmem:[%s5092_s5 + $0x28d0] sm:$0xff]  ;;  %v1522_v63 = vld [vmem:[%s5092_s5 + $0x2888] sm:$0xff] }
 0x54c   : > { %3631 = vmatprep.subr.mxu0 %v1382_v0  ;;  %3702 = vmatprep.subr.mxu1 %v1384_v1  ;;  %v1524_v0 = vld [vmem:[%s5092_s5 + $0x2898] sm:$0xff]  ;;  %v1521_v1 = vld [vmem:[%s5092_s5 + $0x2880] sm:$0xff] }
 0x54f   : > { %3632 = vmatpush2.xpose.msra.mxu0 %v1381_v2  ;;  %3703 = vmatpush2.xpose.msra.mxu1 %v1383_v3  ;;  %v1523_v2 = vld [vmem:[%s5092_s5 + $0x2890] sm:$0xff]  ;;  %v1514_v3 = vld [vmem:[%s5092_s5 + $0x2848] sm:$0xff] }
 0x550   : > { %3711 = vmatprep.subr.mxu0 %v1626_v4  ;;  %3782 = vmatprep.subr.mxu1 %v1628_v5  ;;  %v1516_v4 = vld [vmem:[%s5092_s5 + $0x2858] sm:$0xff]  ;;  %v1513_v5 = vld [vmem:[%s5092_s5 + $0x2840] sm:$0xff] }
 0x552   : > { %3634 = vmatmul.mubr.f32.vlgmr.msra.gmra.mxu0 %v4806_v10  ;;  %3705 = vmatmul.mubr.f32.vlgmr.msra.gmra.mxu1 %v4807_v11  ;;  %v1507_v10 = vld [vmem:[%s5092_s5 + $0x2810] sm:$0xff]  ;;  %v1754_v11 = vld [vmem:[%s5092_s5 + $0x2fc8] sm:$0xff] }
 0x553   : > { %3712 = vmatpush1.xpose.msra.mxu0 %v1625_v6  ;;  %3783 = vmatpush1.xpose.msra.mxu1 %v1627_v7  ;;  %v1515_v6 = vld [vmem:[%s5092_s5 + $0x2850] sm:$0xff]  ;;  %v1506_v7 = vld [vmem:[%s5092_s5 + $0x2808] sm:$0xff] }
 0x554   : > { %3713 = vmatprep.subr.mxu0 %v1618_v8  ;;  %3784 = vmatprep.subr.mxu1 %v1620_v9  ;;  %v1508_v8 = vld [vmem:[%s5092_s5 + $0x2818] sm:$0xff]  ;;  %v1505_v9 = vld [vmem:[%s5092_s5 + $0x2800] sm:$0xff] }
 0x555   : > { %3775 = vmatprep.mubr.f32.mxu0 %v5154_v49  ;;  %3846 = vmatprep.mubr.f32.mxu1 %v5162_v53 }
 0x557   : > { %3714 = vmatpush1.xpose.msra.mxu0 %v1617_v14  ;;  %3785 = vmatpush1.xpose.msra.mxu1 %v1619_v15  ;;  %v1756_v14 = vld [vmem:[%s5092_s5 + $0x2fd8] sm:$0xff]  ;;  %v1753_v15 = vld [vmem:[%s5092_s5 + $0x2fc0] sm:$0xff] }
 0x558   : > { %3715 = vmatprep.subr.mxu0 %v1610_v16  ;;  %3786 = vmatprep.subr.mxu1 %v1612_v17  ;;  %v1755_v16 = vld [vmem:[%s5092_s5 + $0x2fd0] sm:$0xff]  ;;  %v1746_v17 = vld [vmem:[%s5092_s5 + $0x2f88] sm:$0xff] }
 0x55b   : > { %3716 = vmatpush1.xpose.msra.mxu0 %v1609_v20  ;;  %3787 = vmatpush1.xpose.msra.mxu1 %v1611_v21  ;;  %v1748_v20 = vld [vmem:[%s5092_s5 + $0x2f98] sm:$0xff]  ;;  %v1745_v21 = vld [vmem:[%s5092_s5 + $0x2f80] sm:$0xff] }
 0x55c   : > { %3717 = vmatprep.subr.mxu0 %v1602_v22  ;;  %3788 = vmatprep.subr.mxu1 %v1604_v23  ;;  %v1747_v22 = vld [vmem:[%s5092_s5 + $0x2f90] sm:$0xff]  ;;  %v1738_v23 = vld [vmem:[%s5092_s5 + $0x2f48] sm:$0xff] }
 0x55f   : > { %3718 = vmatpush1.xpose.msra.mxu0 %v1601_v46  ;;  %3789 = vmatpush1.xpose.msra.mxu1 %v1603_v50  ;;  %v1740_v46 = vld [vmem:[%s5092_s5 + $0x2f58] sm:$0xff]  ;;  %v1737_v50 = vld [vmem:[%s5092_s5 + $0x2f40] sm:$0xff] }
 0x560   : > { %3719 = vmatprep.subr.mxu0 %v1594_v24  ;;  %3790 = vmatprep.subr.mxu1 %v1596_v25  ;;  %v1739_v24 = vld [vmem:[%s5092_s5 + $0x2f50] sm:$0xff]  ;;  %v1730_v25 = vld [vmem:[%s5092_s5 + $0x2f08] sm:$0xff] }
 0x563   : > { %3720 = vmatpush1.xpose.msra.mxu0 %v1593_v26  ;;  %3791 = vmatpush1.xpose.msra.mxu1 %v1595_v27  ;;  %v1732_v26 = vld [vmem:[%s5092_s5 + $0x2f18] sm:$0xff]  ;;  %v1729_v27 = vld [vmem:[%s5092_s5 + $0x2f00] sm:$0xff] }
 0x564   : > { %3721 = vmatprep.subr.mxu0 %v1586_v28  ;;  %3792 = vmatprep.subr.mxu1 %v1588_v29  ;;  %v1731_v28 = vld [vmem:[%s5092_s5 + $0x2f10] sm:$0xff]  ;;  %v1722_v29 = vld [vmem:[%s5092_s5 + $0x2ec8] sm:$0xff] }
 0x567   : > { %3722 = vmatpush1.xpose.msra.mxu0 %v1585_v30  ;;  %3793 = vmatpush1.xpose.msra.mxu1 %v1587_v31  ;;  %v1724_v30 = vld [vmem:[%s5092_s5 + $0x2ed8] sm:$0xff]  ;;  %v1721_v31 = vld [vmem:[%s5092_s5 + $0x2ec0] sm:$0xff] }
 0x568   : > { %3723 = vmatprep.subr.mxu0 %v1578_v32  ;;  %3794 = vmatprep.subr.mxu1 %v1580_v33  ;;  %v1723_v32 = vld [vmem:[%s5092_s5 + $0x2ed0] sm:$0xff]  ;;  %v1714_v33 = vld [vmem:[%s5092_s5 + $0x2e88] sm:$0xff] }
 0x56b   : > { %3724 = vmatpush1.xpose.msra.mxu0 %v1577_v12  ;;  %3795 = vmatpush1.xpose.msra.mxu1 %v1579_v13  ;;  %v1716_v12 = vld [vmem:[%s5092_s5 + $0x2e98] sm:$0xff]  ;;  %v1713_v13 = vld [vmem:[%s5092_s5 + $0x2e80] sm:$0xff] }
 0x56c   : > { %3725 = vmatprep.subr.mxu0 %v1570_v34  ;;  %3796 = vmatprep.subr.mxu1 %v1572_v36  ;;  %v1715_v34 = vld [vmem:[%s5092_s5 + $0x2e90] sm:$0xff]  ;;  %v1706_v36 = vld [vmem:[%s5092_s5 + $0x2e48] sm:$0xff] }
 0x56f   : > { %3726 = vmatpush1.xpose.msra.mxu0 %v1569_v37  ;;  %3797 = vmatpush1.xpose.msra.mxu1 %v1571_v38  ;;  %v1708_v37 = vld [vmem:[%s5092_s5 + $0x2e58] sm:$0xff]  ;;  %v1705_v38 = vld [vmem:[%s5092_s5 + $0x2e40] sm:$0xff] }
 0x570   : > { %3727 = vmatprep.subr.mxu0 %v1562_v39  ;;  %3798 = vmatprep.subr.mxu1 %v1564_v40  ;;  %v1707_v39 = vld [vmem:[%s5092_s5 + $0x2e50] sm:$0xff]  ;;  %v1698_v40 = vld [vmem:[%s5092_s5 + $0x2e08] sm:$0xff] }
 0x573   : > { %3728 = vmatpush1.xpose.msra.mxu0 %v1561_v41  ;;  %3799 = vmatpush1.xpose.msra.mxu1 %v1563_v42  ;;  %v1700_v41 = vld [vmem:[%s5092_s5 + $0x2e18] sm:$0xff]  ;;  %v1697_v42 = vld [vmem:[%s5092_s5 + $0x2e00] sm:$0xff] }
 0x574   : > { %3729 = vmatprep.subr.mxu0 %v1554_v43  ;;  %3800 = vmatprep.subr.mxu1 %v1556_v44  ;;  %v1699_v43 = vld [vmem:[%s5092_s5 + $0x2e10] sm:$0xff]  ;;  %v1690_v44 = vld [vmem:[%s5092_s5 + $0x2dc8] sm:$0xff] }
 0x577   : > { %3730 = vmatpush1.xpose.msra.mxu0 %v1553_v45  ;;  %3801 = vmatpush1.xpose.msra.mxu1 %v1555_v47  ;;  %v1692_v45 = vld [vmem:[%s5092_s5 + $0x2dd8] sm:$0xff]  ;;  %v1689_v47 = vld [vmem:[%s5092_s5 + $0x2dc0] sm:$0xff] }
 0x578   : > { %3731 = vmatprep.subr.mxu0 %v1546_v48  ;;  %3802 = vmatprep.subr.mxu1 %v1548_v51  ;;  %v1691_v48 = vld [vmem:[%s5092_s5 + $0x2dd0] sm:$0xff]  ;;  %v1682_v51 = vld [vmem:[%s5092_s5 + $0x2d88] sm:$0xff] }
 0x57b   : > { %3732 = vmatpush1.xpose.msra.mxu0 %v1545_v52  ;;  %3803 = vmatpush1.xpose.msra.mxu1 %v1547_v54  ;;  %v1684_v52 = vld [vmem:[%s5092_s5 + $0x2d98] sm:$0xff]  ;;  %v1681_v54 = vld [vmem:[%s5092_s5 + $0x2d80] sm:$0xff] }
 0x57c   : > { %3733 = vmatprep.subr.mxu0 %v1538_v55  ;;  %3804 = vmatprep.subr.mxu1 %v1540_v56  ;;  %v1683_v55 = vld [vmem:[%s5092_s5 + $0x2d90] sm:$0xff]  ;;  %v1674_v56 = vld [vmem:[%s5092_s5 + $0x2d48] sm:$0xff] }
 0x57f   : > { %3734 = vmatpush1.xpose.msra.mxu0 %v1537_v57  ;;  %3805 = vmatpush1.xpose.msra.mxu1 %v1539_v58  ;;  %v1676_v57 = vld [vmem:[%s5092_s5 + $0x2d58] sm:$0xff]  ;;  %v1673_v58 = vld [vmem:[%s5092_s5 + $0x2d40] sm:$0xff] }
 0x580   : > { %3735 = vmatprep.subr.mxu0 %v1530_v59  ;;  %3806 = vmatprep.subr.mxu1 %v1532_v60  ;;  %v1675_v59 = vld [vmem:[%s5092_s5 + $0x2d50] sm:$0xff]  ;;  %v1666_v60 = vld [vmem:[%s5092_s5 + $0x2d08] sm:$0xff] }
 0x583   : > { %3736 = vmatpush1.xpose.msra.mxu0 %v1529_v61  ;;  %3807 = vmatpush1.xpose.msra.mxu1 %v1531_v62  ;;  %v1668_v61 = vld [vmem:[%s5092_s5 + $0x2d18] sm:$0xff]  ;;  %v1665_v62 = vld [vmem:[%s5092_s5 + $0x2d00] sm:$0xff] }
 0x584   : > { %3737 = vmatprep.subr.mxu0 %v1522_v63  ;;  %3808 = vmatprep.subr.mxu1 %v1524_v0  ;;  %v1667_v63 = vld [vmem:[%s5092_s5 + $0x2d10] sm:$0xff]  ;;  %v1658_v0 = vld [vmem:[%s5092_s5 + $0x2cc8] sm:$0xff] }
 0x587   : > { %3738 = vmatpush1.xpose.msra.mxu0 %v1521_v1  ;;  %3809 = vmatpush1.xpose.msra.mxu1 %v1523_v2  ;;  %v1660_v1 = vld [vmem:[%s5092_s5 + $0x2cd8] sm:$0xff]  ;;  %v1657_v2 = vld [vmem:[%s5092_s5 + $0x2cc0] sm:$0xff] }
 0x588   : > { %3739 = vmatprep.subr.mxu0 %v1514_v3  ;;  %3810 = vmatprep.subr.mxu1 %v1516_v4  ;;  %v1659_v3 = vld [vmem:[%s5092_s5 + $0x2cd0] sm:$0xff]  ;;  %v1650_v4 = vld [vmem:[%s5092_s5 + $0x2c88] sm:$0xff] }
 0x58b   : > { %3740 = vmatpush1.xpose.msra.mxu0 %v1513_v5  ;;  %3811 = vmatpush1.xpose.msra.mxu1 %v1515_v6  ;;  %v1652_v5 = vld [vmem:[%s5092_s5 + $0x2c98] sm:$0xff]  ;;  %v1649_v6 = vld [vmem:[%s5092_s5 + $0x2c80] sm:$0xff] }
 0x58c   : > { %3741 = vmatprep.subr.mxu0 %v1506_v7  ;;  %3812 = vmatprep.subr.mxu1 %v1508_v8  ;;  %v1651_v7 = vld [vmem:[%s5092_s5 + $0x2c90] sm:$0xff]  ;;  %v1642_v8 = vld [vmem:[%s5092_s5 + $0x2c48] sm:$0xff] }
 0x58f   : > { %3742 = vmatpush1.xpose.msra.mxu0 %v1505_v9  ;;  %3813 = vmatpush1.xpose.msra.mxu1 %v1507_v10  ;;  %v1644_v9 = vld [vmem:[%s5092_s5 + $0x2c58] sm:$0xff]  ;;  %v1641_v10 = vld [vmem:[%s5092_s5 + $0x2c40] sm:$0xff] }
 0x590   : > { %3743 = vmatprep.subr.mxu0 %v1754_v11  ;;  %3814 = vmatprep.subr.mxu1 %v1756_v14  ;;  %v1643_v11 = vld [vmem:[%s5092_s5 + $0x2c50] sm:$0xff]  ;;  %v1634_v14 = vld [vmem:[%s5092_s5 + $0x2c08] sm:$0xff] }
 0x593   : > { %3744 = vmatpush2.xpose.msra.mxu0 %v1753_v15  ;;  %3815 = vmatpush2.xpose.msra.mxu1 %v1755_v16  ;;  %v1636_v15 = vld [vmem:[%s5092_s5 + $0x2c18] sm:$0xff]  ;;  %v1633_v16 = vld [vmem:[%s5092_s5 + $0x2c00] sm:$0xff] }
 0x594   : > { %3745 = vmatprep.subr.mxu0 %v1746_v17  ;;  %3816 = vmatprep.subr.mxu1 %v1748_v20  ;;  %v1635_v17 = vld [vmem:[%s5092_s5 + $0x2c10] sm:$0xff]  ;;  %v1630_v20 = vld [vmem:[%s5092_s5 + $0x2be8] sm:$0xff] }
 0x597   : > { %3746 = vmatpush2.xpose.msra.mxu0 %v1745_v21  ;;  %3817 = vmatpush2.xpose.msra.mxu1 %v1747_v22  ;;  %v1632_v21 = vld [vmem:[%s5092_s5 + $0x2bf8] sm:$0xff]  ;;  %v1629_v22 = vld [vmem:[%s5092_s5 + $0x2be0] sm:$0xff] }
 0x598   : > { %3747 = vmatprep.subr.mxu0 %v1738_v23  ;;  %3818 = vmatprep.subr.mxu1 %v1740_v46  ;;  %v1631_v23 = vld [vmem:[%s5092_s5 + $0x2bf0] sm:$0xff]  ;;  %v1622_v46 = vld [vmem:[%s5092_s5 + $0x2ba8] sm:$0xff] }
 0x59b   : > { %3748 = vmatpush2.xpose.msra.mxu0 %v1737_v50  ;;  %3819 = vmatpush2.xpose.msra.mxu1 %v1739_v24  ;;  %v1624_v50 = vld [vmem:[%s5092_s5 + $0x2bb8] sm:$0xff]  ;;  %v4808_v24 = vld [vmem:[#allocation5] sm:$0xff] }
 0x59c   : > { %3749 = vmatprep.subr.mxu0 %v1730_v25  ;;  %3820 = vmatprep.subr.mxu1 %v1732_v26  ;;  %v4809_v25 = vld [vmem:[#allocation5 + $0x8] sm:$0xff]  ;;  %v1621_v26 = vld [vmem:[%s5092_s5 + $0x2ba0] sm:$0xff] }
 0x59f   : > { %3750 = vmatpush2.xpose.msra.mxu0 %v1729_v27  ;;  %3821 = vmatpush2.xpose.msra.mxu1 %v1731_v28  ;;  %v1623_v27 = vld [vmem:[%s5092_s5 + $0x2bb0] sm:$0xff]  ;;  %v1614_v28 = vld [vmem:[%s5092_s5 + $0x2b68] sm:$0xff] }
 0x5a0   : > { %3751 = vmatprep.subr.mxu0 %v1722_v29  ;;  %3822 = vmatprep.subr.mxu1 %v1724_v30  ;;  %v1616_v29 = vld [vmem:[%s5092_s5 + $0x2b78] sm:$0xff]  ;;  %v1613_v30 = vld [vmem:[%s5092_s5 + $0x2b60] sm:$0xff] }
 0x5a3   : > { %3752 = vmatpush2.xpose.msra.mxu0 %v1721_v31  ;;  %3823 = vmatpush2.xpose.msra.mxu1 %v1723_v32  ;;  %v1615_v31 = vld [vmem:[%s5092_s5 + $0x2b70] sm:$0xff]  ;;  %v1606_v32 = vld [vmem:[%s5092_s5 + $0x2b28] sm:$0xff] }
 0x5a4   : > { %3753 = vmatprep.subr.mxu0 %v1714_v33  ;;  %3824 = vmatprep.subr.mxu1 %v1716_v12  ;;  %v1608_v33 = vld [vmem:[%s5092_s5 + $0x2b38] sm:$0xff]  ;;  %v1605_v12 = vld [vmem:[%s5092_s5 + $0x2b20] sm:$0xff] }
 0x5a7   : > { %3754 = vmatpush2.xpose.msra.mxu0 %v1713_v13  ;;  %3825 = vmatpush2.xpose.msra.mxu1 %v1715_v34  ;;  %v1607_v13 = vld [vmem:[%s5092_s5 + $0x2b30] sm:$0xff]  ;;  %v1598_v34 = vld [vmem:[%s5092_s5 + $0x2ae8] sm:$0xff] }
 0x5a8   : > { %3755 = vmatprep.subr.mxu0 %v1706_v36  ;;  %3826 = vmatprep.subr.mxu1 %v1708_v37  ;;  %v1600_v36 = vld [vmem:[%s5092_s5 + $0x2af8] sm:$0xff]  ;;  %v1597_v37 = vld [vmem:[%s5092_s5 + $0x2ae0] sm:$0xff] }
 0x5ab   : > { %3756 = vmatpush2.xpose.msra.mxu0 %v1705_v38  ;;  %3827 = vmatpush2.xpose.msra.mxu1 %v1707_v39  ;;  %v1599_v38 = vld [vmem:[%s5092_s5 + $0x2af0] sm:$0xff]  ;;  %v1590_v39 = vld [vmem:[%s5092_s5 + $0x2aa8] sm:$0xff] }
 0x5ac   : > { %3757 = vmatprep.subr.mxu0 %v1698_v40  ;;  %3828 = vmatprep.subr.mxu1 %v1700_v41  ;;  %v1592_v40 = vld [vmem:[%s5092_s5 + $0x2ab8] sm:$0xff]  ;;  %v1589_v41 = vld [vmem:[%s5092_s5 + $0x2aa0] sm:$0xff] }
 0x5af   : > { %3758 = vmatpush2.xpose.msra.mxu0 %v1697_v42  ;;  %3829 = vmatpush2.xpose.msra.mxu1 %v1699_v43  ;;  %v1591_v42 = vld [vmem:[%s5092_s5 + $0x2ab0] sm:$0xff]  ;;  %v1582_v43 = vld [vmem:[%s5092_s5 + $0x2a68] sm:$0xff] }
 0x5b0   : > { %3759 = vmatprep.subr.mxu0 %v1690_v44  ;;  %3830 = vmatprep.subr.mxu1 %v1692_v45  ;;  %v1584_v44 = vld [vmem:[%s5092_s5 + $0x2a78] sm:$0xff]  ;;  %v1581_v45 = vld [vmem:[%s5092_s5 + $0x2a60] sm:$0xff] }
 0x5b3   : > { %3760 = vmatpush2.xpose.msra.mxu0 %v1689_v47  ;;  %3831 = vmatpush2.xpose.msra.mxu1 %v1691_v48  ;;  %v1583_v47 = vld [vmem:[%s5092_s5 + $0x2a70] sm:$0xff]  ;;  %v1574_v48 = vld [vmem:[%s5092_s5 + $0x2a28] sm:$0xff] }
 0x5b4   : > { %3761 = vmatprep.subr.mxu0 %v1682_v51  ;;  %3832 = vmatprep.subr.mxu1 %v1684_v52  ;;  %v1576_v51 = vld [vmem:[%s5092_s5 + $0x2a38] sm:$0xff]  ;;  %v1573_v52 = vld [vmem:[%s5092_s5 + $0x2a20] sm:$0xff] }
 0x5b7   : > { %3762 = vmatpush2.xpose.msra.mxu0 %v1681_v54  ;;  %3833 = vmatpush2.xpose.msra.mxu1 %v1683_v55  ;;  %v1575_v54 = vld [vmem:[%s5092_s5 + $0x2a30] sm:$0xff]  ;;  %v1566_v55 = vld [vmem:[%s5092_s5 + $0x29e8] sm:$0xff] }
 0x5b8   : > { %3763 = vmatprep.subr.mxu0 %v1674_v56  ;;  %3834 = vmatprep.subr.mxu1 %v1676_v57  ;;  %v1568_v56 = vld [vmem:[%s5092_s5 + $0x29f8] sm:$0xff]  ;;  %v1565_v57 = vld [vmem:[%s5092_s5 + $0x29e0] sm:$0xff] }
 0x5bb   : > { %3764 = vmatpush2.xpose.msra.mxu0 %v1673_v58  ;;  %3835 = vmatpush2.xpose.msra.mxu1 %v1675_v59  ;;  %v1567_v58 = vld [vmem:[%s5092_s5 + $0x29f0] sm:$0xff]  ;;  %v1558_v59 = vld [vmem:[%s5092_s5 + $0x29a8] sm:$0xff] }
 0x5bc   : > { %3765 = vmatprep.subr.mxu0 %v1666_v60  ;;  %3836 = vmatprep.subr.mxu1 %v1668_v61  ;;  %v1560_v60 = vld [vmem:[%s5092_s5 + $0x29b8] sm:$0xff]  ;;  %v1557_v61 = vld [vmem:[%s5092_s5 + $0x29a0] sm:$0xff] }
 0x5bf   : > { %3766 = vmatpush2.xpose.msra.mxu0 %v1665_v62  ;;  %3837 = vmatpush2.xpose.msra.mxu1 %v1667_v63  ;;  %v1559_v62 = vld [vmem:[%s5092_s5 + $0x29b0] sm:$0xff]  ;;  %v1550_v63 = vld [vmem:[%s5092_s5 + $0x2968] sm:$0xff] }
 0x5c0   : > { %3767 = vmatprep.subr.mxu0 %v1658_v0  ;;  %3838 = vmatprep.subr.mxu1 %v1660_v1  ;;  %v1552_v0 = vld [vmem:[%s5092_s5 + $0x2978] sm:$0xff]  ;;  %v1549_v1 = vld [vmem:[%s5092_s5 + $0x2960] sm:$0xff] }
 0x5c3   : > { %3768 = vmatpush2.xpose.msra.mxu0 %v1657_v2  ;;  %3839 = vmatpush2.xpose.msra.mxu1 %v1659_v3  ;;  %v1551_v2 = vld [vmem:[%s5092_s5 + $0x2970] sm:$0xff]  ;;  %v1542_v3 = vld [vmem:[%s5092_s5 + $0x2928] sm:$0xff] }
 0x5c4   : > { %3769 = vmatprep.subr.mxu0 %v1650_v4  ;;  %3840 = vmatprep.subr.mxu1 %v1652_v5  ;;  %v1544_v4 = vld [vmem:[%s5092_s5 + $0x2938] sm:$0xff]  ;;  %v1541_v5 = vld [vmem:[%s5092_s5 + $0x2920] sm:$0xff] }
 0x5c7   : > { %3770 = vmatpush2.xpose.msra.mxu0 %v1649_v6  ;;  %3841 = vmatpush2.xpose.msra.mxu1 %v1651_v7  ;;  %v1543_v6 = vld [vmem:[%s5092_s5 + $0x2930] sm:$0xff]  ;;  %v1534_v7 = vld [vmem:[%s5092_s5 + $0x28e8] sm:$0xff] }
 0x5c8   : > { %3771 = vmatprep.subr.mxu0 %v1642_v8  ;;  %3842 = vmatprep.subr.mxu1 %v1644_v9  ;;  %v1536_v8 = vld [vmem:[%s5092_s5 + $0x28f8] sm:$0xff]  ;;  %v1533_v9 = vld [vmem:[%s5092_s5 + $0x28e0] sm:$0xff] }
 0x5cb   : > { %3772 = vmatpush2.xpose.msra.mxu0 %v1641_v10  ;;  %3843 = vmatpush2.xpose.msra.mxu1 %v1643_v11  ;;  %v1535_v10 = vld [vmem:[%s5092_s5 + $0x28f0] sm:$0xff]  ;;  %v1526_v11 = vld [vmem:[%s5092_s5 + $0x28a8] sm:$0xff] }
 0x5cc   : > { %3773 = vmatprep.subr.mxu0 %v1634_v14  ;;  %3844 = vmatprep.subr.mxu1 %v1636_v15  ;;  %v1528_v14 = vld [vmem:[%s5092_s5 + $0x28b8] sm:$0xff]  ;;  %v1525_v15 = vld [vmem:[%s5092_s5 + $0x28a0] sm:$0xff] }
 0x5cf   : > { %3774 = vmatpush2.xpose.msra.mxu0 %v1633_v16  ;;  %3845 = vmatpush2.xpose.msra.mxu1 %v1635_v17  ;;  %v1527_v16 = vld [vmem:[%s5092_s5 + $0x28b0] sm:$0xff]  ;;  %v1518_v17 = vld [vmem:[%s5092_s5 + $0x2868] sm:$0xff] }
 0x5d0   : > { %3853 = vmatprep.subr.mxu0 %v1630_v20  ;;  %3924 = vmatprep.subr.mxu1 %v1632_v21  ;;  %v1520_v20 = vld [vmem:[%s5092_s5 + $0x2878] sm:$0xff]  ;;  %v3493_v21 = vpop.f32.mrf.mxu0 }
 0x5d2   : > { %3776 = vmatmul.mubr.f32.vlgmr.msra.gmra.mxu0 %v4808_v24  ;;  %3847 = vmatmul.mubr.f32.vlgmr.msra.gmra.mxu1 %v4809_v25  ;;  %v3564_v24 = vpop.f32.mrf.mxu1  ;;  %v3495_v25 = vpop.f32.mrf.mxu0 }
 0x5d3   : > { %3854 = vmatpush1.xpose.msra.mxu0 %v1629_v22  ;;  %3925 = vmatpush1.xpose.msra.mxu1 %v1631_v23  ;;  %v1517_v22 = vld [vmem:[%s5092_s5 + $0x2860] sm:$0xff]  ;;  %v1519_v23 = vld [vmem:[%s5092_s5 + $0x2870] sm:$0xff] }
 0x5d4   : > { %3855 = vmatprep.subr.mxu0 %v1622_v46  ;;  %3926 = vmatprep.subr.mxu1 %v1624_v50  ;;  %v1510_v46 = vld [vmem:[%s5092_s5 + $0x2828] sm:$0xff]  ;;  %v1512_v50 = vld [vmem:[%s5092_s5 + $0x2838] sm:$0xff] }
 0x5d5   : > { %3917 = vmatprep.mubr.f32.mxu0 %v5259_v18  ;;  %3988 = vmatprep.mubr.f32.mxu1 %v5263_v19 }
 0x5d7   : > { %3856 = vmatpush1.xpose.msra.mxu0 %v1621_v26  ;;  %3927 = vmatpush1.xpose.msra.mxu1 %v1623_v27  ;;  %v1509_v26 = vld [vmem:[%s5092_s5 + $0x2820] sm:$0xff]  ;;  %v1511_v27 = vld [vmem:[%s5092_s5 + $0x2830] sm:$0xff] }
 0x5d8   : > { %3857 = vmatprep.subr.mxu0 %v1614_v28  ;;  %3928 = vmatprep.subr.mxu1 %v1616_v29  ;;  %v3494_v28 = vadd.f32 %v3493_v21, %v5587_v35  ;;  %v1758_v29 = vld [vmem:[%s5092_s5 + $0x2fe8] sm:$0xff] }
 0x5d9   : > { %v1686_v21 = vld [vmem:[%s5092_s5 + $0x2da8] sm:$0xff] }
 0x5db   : > { %3858 = vmatpush1.xpose.msra.mxu0 %v1613_v30  ;;  %3929 = vmatpush1.xpose.msra.mxu1 %v1615_v31  ;;  %v1760_v30 = vld [vmem:[%s5092_s5 + $0x2ff8] sm:$0xff]  ;;  %v3496_v31 = vadd.f32 %v3495_v25, %v5587_v35  ;;  %v1677_v25 = vld [vmem:[%s5092_s5 + $0x2d60] sm:$0xff] }
 0x5dc   : > { %3859 = vmatprep.subr.mxu0 %v1606_v32  ;;  %3930 = vmatprep.subr.mxu1 %v1608_v33  ;;  %v3566_v32 = vpop.f32.mrf.mxu1  ;;  %v1757_v33 = vld [vmem:[%s5092_s5 + $0x2fe0] sm:$0xff] }
 0x5df   : > { %3860 = vmatpush1.xpose.msra.mxu0 %v1605_v12  ;;  %3931 = vmatpush1.xpose.msra.mxu1 %v1607_v13  ;;  %v1759_v12 = vld [vmem:[%s5092_s5 + $0x2ff0] sm:$0xff]  ;;  %v3565_v13 = vadd.f32 %v3564_v24, %v3494_v28  ;;  %v1680_v24 = vld [vmem:[%s5092_s5 + $0x2d78] sm:$0xff] }
 0x5e0   : > { %3861 = vmatprep.subr.mxu0 %v1598_v34  ;;  %3932 = vmatprep.subr.mxu1 %v1600_v36  ;;  %v1750_v34 = vld [vmem:[%s5092_s5 + $0x2fa8] sm:$0xff]  ;;  %v1752_v36 = vld [vmem:[%s5092_s5 + $0x2fb8] sm:$0xff] }
 0x5e1   : > { %v1672_v28 = vld [vmem:[%s5092_s5 + $0x2d38] sm:$0xff] }
 0x5e3   : > { %3862 = vmatpush1.xpose.msra.mxu0 %v1597_v37  ;;  %3933 = vmatpush1.xpose.msra.mxu1 %v1599_v38 }
 0x5e4   : > { %3863 = vmatprep.subr.mxu0 %v1590_v39  ;;  %3934 = vmatprep.subr.mxu1 %v1592_v40  ;;  %v3567_v39 = vadd.f32 %v3566_v32, %v3496_v31  ;;  %v1662_v31 = vld [vmem:[%s5092_s5 + $0x2ce8] sm:$0xff]  ;;  %v1664_v32 = vld [vmem:[%s5092_s5 + $0x2cf8] sm:$0xff] }
 0x5e7   : > { %3864 = vmatpush1.xpose.msra.mxu0 %v1589_v41  ;;  %3935 = vmatpush1.xpose.msra.mxu1 %v1591_v42 }
 0x5e8   : > { %3865 = vmatprep.subr.mxu0 %v1582_v43  ;;  %3936 = vmatprep.subr.mxu1 %v1584_v44  ;;  %v1749_v43 = vld [vmem:[%s5092_s5 + $0x2fa0] sm:$0xff]  ;;  %v1751_v44 = vld [vmem:[%s5092_s5 + $0x2fb0] sm:$0xff] }
 0x5eb   : > { %3866 = vmatpush1.xpose.msra.mxu0 %v1581_v45  ;;  %3937 = vmatpush1.xpose.msra.mxu1 %v1583_v47  ;;  %v1742_v47 = vld [vmem:[%s5092_s5 + $0x2f68] sm:$0xff] }
 0x5ec   : > { %3867 = vmatprep.subr.mxu0 %v1574_v48  ;;  %3938 = vmatprep.subr.mxu1 %v1576_v51  ;;  %v1744_v48 = vld [vmem:[%s5092_s5 + $0x2f78] sm:$0xff] }
 0x5ef   : > { %3868 = vmatpush1.xpose.msra.mxu0 %v1573_v52  ;;  %3939 = vmatpush1.xpose.msra.mxu1 %v1575_v54  ;;  %v1741_v54 = vld [vmem:[%s5092_s5 + $0x2f60] sm:$0xff] }
 0x5f0   : > { %3869 = vmatprep.subr.mxu0 %v1566_v55  ;;  %3940 = vmatprep.subr.mxu1 %v1568_v56  ;;  %v1743_v55 = vld [vmem:[%s5092_s5 + $0x2f70] sm:$0xff] }
 0x5f3   : > { %3870 = vmatpush1.xpose.msra.mxu0 %v1565_v57  ;;  %3941 = vmatpush1.xpose.msra.mxu1 %v1567_v58  ;;  %v1734_v57 = vld [vmem:[%s5092_s5 + $0x2f28] sm:$0xff]  ;;  %v1736_v58 = vld [vmem:[%s5092_s5 + $0x2f38] sm:$0xff] }
 0x5f4   : > { %3871 = vmatprep.subr.mxu0 %v1558_v59  ;;  %3942 = vmatprep.subr.mxu1 %v1560_v60  ;;  %v1733_v59 = vld [vmem:[%s5092_s5 + $0x2f20] sm:$0xff]  ;;  %v1735_v60 = vld [vmem:[%s5092_s5 + $0x2f30] sm:$0xff] }
 0x5f7   : > { %3872 = vmatpush1.xpose.msra.mxu0 %v1557_v61  ;;  %3943 = vmatpush1.xpose.msra.mxu1 %v1559_v62  ;;  %v1726_v61 = vld [vmem:[%s5092_s5 + $0x2ee8] sm:$0xff]  ;;  %v1728_v62 = vld [vmem:[%s5092_s5 + $0x2ef8] sm:$0xff] }
 0x5f8   : > { %3873 = vmatprep.subr.mxu0 %v1550_v63  ;;  %3944 = vmatprep.subr.mxu1 %v1552_v0  ;;  %v1725_v63 = vld [vmem:[%s5092_s5 + $0x2ee0] sm:$0xff]  ;;  %v1727_v0 = vld [vmem:[%s5092_s5 + $0x2ef0] sm:$0xff] }
 0x5fb   : > { %3874 = vmatpush1.xpose.msra.mxu0 %v1549_v1  ;;  %3945 = vmatpush1.xpose.msra.mxu1 %v1551_v2  ;;  %v1718_v1 = vld [vmem:[%s5092_s5 + $0x2ea8] sm:$0xff]  ;;  %v1720_v2 = vld [vmem:[%s5092_s5 + $0x2eb8] sm:$0xff] }
 0x5fc   : > { %3875 = vmatprep.subr.mxu0 %v1542_v3  ;;  %3946 = vmatprep.subr.mxu1 %v1544_v4  ;;  %v1717_v3 = vld [vmem:[%s5092_s5 + $0x2ea0] sm:$0xff]  ;;  %v1719_v4 = vld [vmem:[%s5092_s5 + $0x2eb0] sm:$0xff] }
 0x5ff   : > { %3876 = vmatpush1.xpose.msra.mxu0 %v1541_v5  ;;  %3947 = vmatpush1.xpose.msra.mxu1 %v1543_v6  ;;  %v1710_v5 = vld [vmem:[%s5092_s5 + $0x2e68] sm:$0xff]  ;;  %v1712_v6 = vld [vmem:[%s5092_s5 + $0x2e78] sm:$0xff] }
 0x600   : > { %3877 = vmatprep.subr.mxu0 %v1534_v7  ;;  %3948 = vmatprep.subr.mxu1 %v1536_v8  ;;  %v1709_v7 = vld [vmem:[%s5092_s5 + $0x2e60] sm:$0xff]  ;;  %v1711_v8 = vld [vmem:[%s5092_s5 + $0x2e70] sm:$0xff] }
 0x603   : > { %3878 = vmatpush1.xpose.msra.mxu0 %v1533_v9  ;;  %3949 = vmatpush1.xpose.msra.mxu1 %v1535_v10  ;;  %v1702_v9 = vld [vmem:[%s5092_s5 + $0x2e28] sm:$0xff]  ;;  %v1704_v10 = vld [vmem:[%s5092_s5 + $0x2e38] sm:$0xff] }
 0x604   : > { %3879 = vmatprep.subr.mxu0 %v1526_v11  ;;  %3950 = vmatprep.subr.mxu1 %v1528_v14  ;;  %v1701_v11 = vld [vmem:[%s5092_s5 + $0x2e20] sm:$0xff]  ;;  %v1703_v14 = vld [vmem:[%s5092_s5 + $0x2e30] sm:$0xff] }
 0x607   : > { %3880 = vmatpush1.xpose.msra.mxu0 %v1525_v15  ;;  %3951 = vmatpush1.xpose.msra.mxu1 %v1527_v16  ;;  %v1694_v15 = vld [vmem:[%s5092_s5 + $0x2de8] sm:$0xff]  ;;  %v1696_v16 = vld [vmem:[%s5092_s5 + $0x2df8] sm:$0xff] }
 0x608   : > { %3881 = vmatprep.subr.mxu0 %v1518_v17  ;;  %3952 = vmatprep.subr.mxu1 %v1520_v20  ;;  %v1693_v17 = vld [vmem:[%s5092_s5 + $0x2de0] sm:$0xff]  ;;  %v1695_v20 = vld [vmem:[%s5092_s5 + $0x2df0] sm:$0xff] }
 0x60b   : > { %3882 = vmatpush1.xpose.msra.mxu0 %v1517_v22  ;;  %3953 = vmatpush1.xpose.msra.mxu1 %v1519_v23  ;;  %v1688_v22 = vld [vmem:[%s5092_s5 + $0x2db8] sm:$0xff]  ;;  %v1685_v23 = vld [vmem:[%s5092_s5 + $0x2da0] sm:$0xff] }
 0x60c   : > { %3883 = vmatprep.subr.mxu0 %v1510_v46  ;;  %3954 = vmatprep.subr.mxu1 %v1512_v50  ;;  %v1687_v46 = vld [vmem:[%s5092_s5 + $0x2db0] sm:$0xff]  ;;  %v1678_v50 = vld [vmem:[%s5092_s5 + $0x2d68] sm:$0xff] }
 0x60f   : > { %3884 = vmatpush1.xpose.msra.mxu0 %v1509_v26  ;;  %3955 = vmatpush1.xpose.msra.mxu1 %v1511_v27  ;;  %v1679_v26 = vld [vmem:[%s5092_s5 + $0x2d70] sm:$0xff]  ;;  %v1670_v27 = vld [vmem:[%s5092_s5 + $0x2d28] sm:$0xff] }
 0x610   : > { %3885 = vmatprep.subr.mxu0 %v1758_v29  ;;  %3956 = vmatprep.subr.mxu1 %v1760_v30  ;;  %v1669_v29 = vld [vmem:[%s5092_s5 + $0x2d20] sm:$0xff]  ;;  %v1671_v30 = vld [vmem:[%s5092_s5 + $0x2d30] sm:$0xff] }
 0x612   : > { %v3635_v37 = vpop.f32.mrf.mxu0  ;;  %v3706_v38 = vpop.f32.mrf.mxu1 }
 0x613   : > { %v3636_v40 = vadd.f32 %v3635_v37, %v3565_v13  ;;  %3886 = vmatpush2.xpose.msra.mxu0 %v1757_v33  ;;  %3957 = vmatpush2.xpose.msra.mxu1 %v1759_v12  ;;  %v1661_v33 = vld [vmem:[%s5092_s5 + $0x2ce0] sm:$0xff]  ;;  %v1663_v12 = vld [vmem:[%s5092_s5 + $0x2cf0] sm:$0xff]  ;;  %v1654_v13 = vld [vmem:[%s5092_s5 + $0x2ca8] sm:$0xff] }
 0x614   : > { %v3637_v41 = vpop.f32.mrf.mxu0  ;;  %v3708_v42 = vpop.f32.mrf.mxu1  ;;  %3887 = vmatprep.subr.mxu0 %v1750_v34  ;;  %3958 = vmatprep.subr.mxu1 %v1752_v36  ;;  %v1656_v34 = vld [vmem:[%s5092_s5 + $0x2cb8] sm:$0xff]  ;;  %v1653_v36 = vld [vmem:[%s5092_s5 + $0x2ca0] sm:$0xff]  ;;  %v1655_v37 = vld [vmem:[%s5092_s5 + $0x2cb0] sm:$0xff] }
 0x615   : > { %v3638_v45 = vadd.f32 %v3637_v41, %v3567_v39  ;;  %v3707_v51 = vadd.f32 %v3706_v38, %v3636_v40  ;;  %v1646_v38 = vld [vmem:[%s5092_s5 + $0x2c68] sm:$0xff]  ;;  %v1648_v39 = vld [vmem:[%s5092_s5 + $0x2c78] sm:$0xff]  ;;  %v1645_v40 = vld [vmem:[%s5092_s5 + $0x2c60] sm:$0xff] }
 0x616   : > { %v1647_v41 = vld [vmem:[%s5092_s5 + $0x2c70] sm:$0xff] }
 0x617   : > { %v3709_v52 = vadd.f32 %v3708_v42, %v3638_v45  ;;  %3888 = vmatpush2.xpose.msra.mxu0 %v1749_v43  ;;  %3959 = vmatpush2.xpose.msra.mxu1 %v1751_v44  ;;  %v1638_v42 = vld [vmem:[%s5092_s5 + $0x2c28] sm:$0xff]  ;;  %v1640_v43 = vld [vmem:[%s5092_s5 + $0x2c38] sm:$0xff]  ;;  %v1637_v44 = vld [vmem:[%s5092_s5 + $0x2c20] sm:$0xff] }
 0x618   : > { %3889 = vmatprep.subr.mxu0 %v1742_v47  ;;  %3960 = vmatprep.subr.mxu1 %v1744_v48  ;;  %v1639_v45 = vld [vmem:[%s5092_s5 + $0x2c30] sm:$0xff]  ;;  %v1882_v47 = vld [vmem:[%s5092_s5 + $0x33c8] sm:$0xff]  ;;  %v1884_v48 = vld [vmem:[%s5092_s5 + $0x33d8] sm:$0xff] }
 0x619   : > { %v4583_v56 = vcombine.low %v3707_v51, %v3709_v52  ;;  %v1881_v51 = vld [vmem:[%s5092_s5 + $0x33c0] sm:$0xff]  ;;  %v1883_v52 = vld [vmem:[%s5092_s5 + $0x33d0] sm:$0xff] }
 0x61b   : > { %4599 = vst [vmem:[%s5608_s11 + $0x20] sm:$0xff] %v4583_v56  ;;  %3890 = vmatpush2.xpose.msra.mxu0 %v1741_v54  ;;  %3961 = vmatpush2.xpose.msra.mxu1 %v1743_v55  ;;  %v1874_v54 = vld [vmem:[%s5092_s5 + $0x3388] sm:$0xff]  ;;  %v1876_v55 = vld [vmem:[%s5092_s5 + $0x3398] sm:$0xff]  ;;  %v4810_v56 = vld [vmem:[#allocation5 + $0x10] sm:$0xff] }
 0x61c   : > { %3891 = vmatprep.subr.mxu0 %v1734_v57  ;;  %3962 = vmatprep.subr.mxu1 %v1736_v58  ;;  %v4811_v57 = vld [vmem:[#allocation5 + $0x18] sm:$0xff]  ;;  %v1873_v58 = vld [vmem:[%s5092_s5 + $0x3380] sm:$0xff] }
 0x61f   : > { %3892 = vmatpush2.xpose.msra.mxu0 %v1733_v59  ;;  %3963 = vmatpush2.xpose.msra.mxu1 %v1735_v60  ;;  %v1875_v59 = vld [vmem:[%s5092_s5 + $0x3390] sm:$0xff]  ;;  %v1866_v60 = vld [vmem:[%s5092_s5 + $0x3348] sm:$0xff] }
 0x620   : > { %3893 = vmatprep.subr.mxu0 %v1726_v61  ;;  %3964 = vmatprep.subr.mxu1 %v1728_v62  ;;  %v1868_v61 = vld [vmem:[%s5092_s5 + $0x3358] sm:$0xff]  ;;  %v1865_v62 = vld [vmem:[%s5092_s5 + $0x3340] sm:$0xff] }
 0x623   : > { %3894 = vmatpush2.xpose.msra.mxu0 %v1725_v63  ;;  %3965 = vmatpush2.xpose.msra.mxu1 %v1727_v0  ;;  %v1867_v63 = vld [vmem:[%s5092_s5 + $0x3350] sm:$0xff]  ;;  %v1858_v0 = vld [vmem:[%s5092_s5 + $0x3308] sm:$0xff] }
 0x624   : > { %3895 = vmatprep.subr.mxu0 %v1718_v1  ;;  %3966 = vmatprep.subr.mxu1 %v1720_v2  ;;  %v1860_v1 = vld [vmem:[%s5092_s5 + $0x3318] sm:$0xff]  ;;  %v1857_v2 = vld [vmem:[%s5092_s5 + $0x3300] sm:$0xff] }
 0x627   : > { %3896 = vmatpush2.xpose.msra.mxu0 %v1717_v3  ;;  %3967 = vmatpush2.xpose.msra.mxu1 %v1719_v4  ;;  %v1859_v3 = vld [vmem:[%s5092_s5 + $0x3310] sm:$0xff]  ;;  %v1850_v4 = vld [vmem:[%s5092_s5 + $0x32c8] sm:$0xff] }
 0x628   : > { %3897 = vmatprep.subr.mxu0 %v1710_v5  ;;  %3968 = vmatprep.subr.mxu1 %v1712_v6  ;;  %v1852_v5 = vld [vmem:[%s5092_s5 + $0x32d8] sm:$0xff]  ;;  %v1849_v6 = vld [vmem:[%s5092_s5 + $0x32c0] sm:$0xff] }
 0x62b   : > { %3898 = vmatpush2.xpose.msra.mxu0 %v1709_v7  ;;  %3969 = vmatpush2.xpose.msra.mxu1 %v1711_v8  ;;  %v1851_v7 = vld [vmem:[%s5092_s5 + $0x32d0] sm:$0xff]  ;;  %v1842_v8 = vld [vmem:[%s5092_s5 + $0x3288] sm:$0xff] }
 0x62c   : > { %3899 = vmatprep.subr.mxu0 %v1702_v9  ;;  %3970 = vmatprep.subr.mxu1 %v1704_v10  ;;  %v1844_v9 = vld [vmem:[%s5092_s5 + $0x3298] sm:$0xff]  ;;  %v1841_v10 = vld [vmem:[%s5092_s5 + $0x3280] sm:$0xff] }
 0x62f   : > { %3900 = vmatpush2.xpose.msra.mxu0 %v1701_v11  ;;  %3971 = vmatpush2.xpose.msra.mxu1 %v1703_v14  ;;  %v1843_v11 = vld [vmem:[%s5092_s5 + $0x3290] sm:$0xff]  ;;  %v1834_v14 = vld [vmem:[%s5092_s5 + $0x3248] sm:$0xff] }
 0x630   : > { %3901 = vmatprep.subr.mxu0 %v1694_v15  ;;  %3972 = vmatprep.subr.mxu1 %v1696_v16  ;;  %v1836_v15 = vld [vmem:[%s5092_s5 + $0x3258] sm:$0xff]  ;;  %v1833_v16 = vld [vmem:[%s5092_s5 + $0x3240] sm:$0xff] }
 0x633   : > { %3902 = vmatpush2.xpose.msra.mxu0 %v1693_v17  ;;  %3973 = vmatpush2.xpose.msra.mxu1 %v1695_v20  ;;  %v1835_v17 = vld [vmem:[%s5092_s5 + $0x3250] sm:$0xff]  ;;  %v1826_v20 = vld [vmem:[%s5092_s5 + $0x3208] sm:$0xff] }
 0x634   : > { %3903 = vmatprep.subr.mxu0 %v1686_v21  ;;  %3974 = vmatprep.subr.mxu1 %v1688_v22  ;;  %v1828_v21 = vld [vmem:[%s5092_s5 + $0x3218] sm:$0xff]  ;;  %v1825_v22 = vld [vmem:[%s5092_s5 + $0x3200] sm:$0xff] }
 0x637   : > { %3904 = vmatpush2.xpose.msra.mxu0 %v1685_v23  ;;  %3975 = vmatpush2.xpose.msra.mxu1 %v1687_v46  ;;  %v1827_v23 = vld [vmem:[%s5092_s5 + $0x3210] sm:$0xff]  ;;  %v1818_v46 = vld [vmem:[%s5092_s5 + $0x31c8] sm:$0xff] }
 0x638   : > { %3905 = vmatprep.subr.mxu0 %v1678_v50  ;;  %3976 = vmatprep.subr.mxu1 %v1680_v24  ;;  %v1820_v50 = vld [vmem:[%s5092_s5 + $0x31d8] sm:$0xff]  ;;  %v1817_v24 = vld [vmem:[%s5092_s5 + $0x31c0] sm:$0xff] }
 0x63b   : > { %3906 = vmatpush2.xpose.msra.mxu0 %v1677_v25  ;;  %3977 = vmatpush2.xpose.msra.mxu1 %v1679_v26  ;;  %v1819_v25 = vld [vmem:[%s5092_s5 + $0x31d0] sm:$0xff]  ;;  %v1810_v26 = vld [vmem:[%s5092_s5 + $0x3188] sm:$0xff] }
 0x63c   : > { %3907 = vmatprep.subr.mxu0 %v1670_v27  ;;  %3978 = vmatprep.subr.mxu1 %v1672_v28  ;;  %v1812_v27 = vld [vmem:[%s5092_s5 + $0x3198] sm:$0xff]  ;;  %v1809_v28 = vld [vmem:[%s5092_s5 + $0x3180] sm:$0xff] }
 0x63f   : > { %3908 = vmatpush2.xpose.msra.mxu0 %v1669_v29  ;;  %3979 = vmatpush2.xpose.msra.mxu1 %v1671_v30  ;;  %v1811_v29 = vld [vmem:[%s5092_s5 + $0x3190] sm:$0xff]  ;;  %v1802_v30 = vld [vmem:[%s5092_s5 + $0x3148] sm:$0xff] }
 0x640   : > { %3909 = vmatprep.subr.mxu0 %v1662_v31  ;;  %3980 = vmatprep.subr.mxu1 %v1664_v32  ;;  %v1804_v31 = vld [vmem:[%s5092_s5 + $0x3158] sm:$0xff]  ;;  %v1801_v32 = vld [vmem:[%s5092_s5 + $0x3140] sm:$0xff] }
 0x643   : > { %3910 = vmatpush2.xpose.msra.mxu0 %v1661_v33  ;;  %3981 = vmatpush2.xpose.msra.mxu1 %v1663_v12  ;;  %v1803_v33 = vld [vmem:[%s5092_s5 + $0x3150] sm:$0xff]  ;;  %v1794_v12 = vld [vmem:[%s5092_s5 + $0x3108] sm:$0xff] }
 0x644   : > { %3911 = vmatprep.subr.mxu0 %v1654_v13  ;;  %3982 = vmatprep.subr.mxu1 %v1656_v34  ;;  %v1796_v13 = vld [vmem:[%s5092_s5 + $0x3118] sm:$0xff]  ;;  %v1793_v34 = vld [vmem:[%s5092_s5 + $0x3100] sm:$0xff] }
 0x647   : > { %3912 = vmatpush2.xpose.msra.mxu0 %v1653_v36  ;;  %3983 = vmatpush2.xpose.msra.mxu1 %v1655_v37  ;;  %v1795_v36 = vld [vmem:[%s5092_s5 + $0x3110] sm:$0xff]  ;;  %v1786_v37 = vld [vmem:[%s5092_s5 + $0x30c8] sm:$0xff] }
 0x648   : > { %3913 = vmatprep.subr.mxu0 %v1646_v38  ;;  %3984 = vmatprep.subr.mxu1 %v1648_v39  ;;  %v1788_v38 = vld [vmem:[%s5092_s5 + $0x30d8] sm:$0xff]  ;;  %v1785_v39 = vld [vmem:[%s5092_s5 + $0x30c0] sm:$0xff] }
 0x64b   : > { %3914 = vmatpush2.xpose.msra.mxu0 %v1645_v40  ;;  %3985 = vmatpush2.xpose.msra.mxu1 %v1647_v41  ;;  %v1787_v40 = vld [vmem:[%s5092_s5 + $0x30d0] sm:$0xff]  ;;  %v1778_v41 = vld [vmem:[%s5092_s5 + $0x3088] sm:$0xff] }
 0x64c   : > { %3915 = vmatprep.subr.mxu0 %v1638_v42  ;;  %3986 = vmatprep.subr.mxu1 %v1640_v43  ;;  %v1780_v42 = vld [vmem:[%s5092_s5 + $0x3098] sm:$0xff]  ;;  %v1777_v43 = vld [vmem:[%s5092_s5 + $0x3080] sm:$0xff] }
 0x64f   : > { %3916 = vmatpush2.xpose.msra.mxu0 %v1637_v44  ;;  %3987 = vmatpush2.xpose.msra.mxu1 %v1639_v45  ;;  %v1779_v44 = vld [vmem:[%s5092_s5 + $0x3090] sm:$0xff]  ;;  %v1770_v45 = vld [vmem:[%s5092_s5 + $0x3048] sm:$0xff] }
 0x650   : > { %3995 = vmatprep.subr.mxu0 %v1882_v47  ;;  %4066 = vmatprep.subr.mxu1 %v1884_v48  ;;  %v1772_v47 = vld [vmem:[%s5092_s5 + $0x3058] sm:$0xff]  ;;  %v1769_v48 = vld [vmem:[%s5092_s5 + $0x3040] sm:$0xff] }
 0x652   : > { %3918 = vmatmul.mubr.f32.vlgmr.msra.gmra.mxu0 %v4810_v56  ;;  %3989 = vmatmul.mubr.f32.vlgmr.msra.gmra.mxu1 %v4811_v57  ;;  %v1763_v56 = vld [vmem:[%s5092_s5 + $0x3010] sm:$0xff]  ;;  %v2010_v57 = vld [vmem:[%s5092_s5 + $0x37c8] sm:$0xff] }
 0x653   : > { %3996 = vmatpush1.xpose.msra.mxu0 %v1881_v51  ;;  %4067 = vmatpush1.xpose.msra.mxu1 %v1883_v52  ;;  %v1771_v51 = vld [vmem:[%s5092_s5 + $0x3050] sm:$0xff]  ;;  %v1762_v52 = vld [vmem:[%s5092_s5 + $0x3008] sm:$0xff] }
 0x654   : > { %3997 = vmatprep.subr.mxu0 %v1874_v54  ;;  %4068 = vmatprep.subr.mxu1 %v1876_v55  ;;  %v1764_v54 = vld [vmem:[%s5092_s5 + $0x3018] sm:$0xff]  ;;  %v1761_v55 = vld [vmem:[%s5092_s5 + $0x3000] sm:$0xff] }
 0x655   : > { %4059 = vmatprep.mubr.f32.mxu0 %v5154_v49  ;;  %4130 = vmatprep.mubr.f32.mxu1 %v5162_v53 }
 0x657   : > { %3998 = vmatpush1.xpose.msra.mxu0 %v1873_v58  ;;  %4069 = vmatpush1.xpose.msra.mxu1 %v1875_v59  ;;  %v2012_v58 = vld [vmem:[%s5092_s5 + $0x37d8] sm:$0xff]  ;;  %v2009_v59 = vld [vmem:[%s5092_s5 + $0x37c0] sm:$0xff] }
 0x658   : > { %3999 = vmatprep.subr.mxu0 %v1866_v60  ;;  %4070 = vmatprep.subr.mxu1 %v1868_v61  ;;  %v2011_v60 = vld [vmem:[%s5092_s5 + $0x37d0] sm:$0xff]  ;;  %v2002_v61 = vld [vmem:[%s5092_s5 + $0x3788] sm:$0xff] }
 0x65b   : > { %4000 = vmatpush1.xpose.msra.mxu0 %v1865_v62  ;;  %4071 = vmatpush1.xpose.msra.mxu1 %v1867_v63  ;;  %v2004_v62 = vld [vmem:[%s5092_s5 + $0x3798] sm:$0xff]  ;;  %v2001_v63 = vld [vmem:[%s5092_s5 + $0x3780] sm:$0xff] }
 0x65c   : > { %4001 = vmatprep.subr.mxu0 %v1858_v0  ;;  %4072 = vmatprep.subr.mxu1 %v1860_v1  ;;  %v2003_v0 = vld [vmem:[%s5092_s5 + $0x3790] sm:$0xff]  ;;  %v1994_v1 = vld [vmem:[%s5092_s5 + $0x3748] sm:$0xff] }
 0x65f   : > { %4002 = vmatpush1.xpose.msra.mxu0 %v1857_v2  ;;  %4073 = vmatpush1.xpose.msra.mxu1 %v1859_v3  ;;  %v1996_v2 = vld [vmem:[%s5092_s5 + $0x3758] sm:$0xff]  ;;  %v1993_v3 = vld [vmem:[%s5092_s5 + $0x3740] sm:$0xff] }
 0x660   : > { %4003 = vmatprep.subr.mxu0 %v1850_v4  ;;  %4074 = vmatprep.subr.mxu1 %v1852_v5  ;;  %v1995_v4 = vld [vmem:[%s5092_s5 + $0x3750] sm:$0xff]  ;;  %v1986_v5 = vld [vmem:[%s5092_s5 + $0x3708] sm:$0xff] }
 0x663   : > { %4004 = vmatpush1.xpose.msra.mxu0 %v1849_v6  ;;  %4075 = vmatpush1.xpose.msra.mxu1 %v1851_v7  ;;  %v1988_v6 = vld [vmem:[%s5092_s5 + $0x3718] sm:$0xff]  ;;  %v1985_v7 = vld [vmem:[%s5092_s5 + $0x3700] sm:$0xff] }
 0x664   : > { %4005 = vmatprep.subr.mxu0 %v1842_v8  ;;  %4076 = vmatprep.subr.mxu1 %v1844_v9  ;;  %v1987_v8 = vld [vmem:[%s5092_s5 + $0x3710] sm:$0xff]  ;;  %v1978_v9 = vld [vmem:[%s5092_s5 + $0x36c8] sm:$0xff] }
 0x667   : > { %4006 = vmatpush1.xpose.msra.mxu0 %v1841_v10  ;;  %4077 = vmatpush1.xpose.msra.mxu1 %v1843_v11  ;;  %v1980_v10 = vld [vmem:[%s5092_s5 + $0x36d8] sm:$0xff]  ;;  %v1977_v11 = vld [vmem:[%s5092_s5 + $0x36c0] sm:$0xff] }
 0x668   : > { %4007 = vmatprep.subr.mxu0 %v1834_v14  ;;  %4078 = vmatprep.subr.mxu1 %v1836_v15  ;;  %v1979_v14 = vld [vmem:[%s5092_s5 + $0x36d0] sm:$0xff]  ;;  %v1970_v15 = vld [vmem:[%s5092_s5 + $0x3688] sm:$0xff] }
 0x66b   : > { %4008 = vmatpush1.xpose.msra.mxu0 %v1833_v16  ;;  %4079 = vmatpush1.xpose.msra.mxu1 %v1835_v17  ;;  %v1972_v16 = vld [vmem:[%s5092_s5 + $0x3698] sm:$0xff]  ;;  %v1969_v17 = vld [vmem:[%s5092_s5 + $0x3680] sm:$0xff] }
 0x66c   : > { %4009 = vmatprep.subr.mxu0 %v1826_v20  ;;  %4080 = vmatprep.subr.mxu1 %v1828_v21  ;;  %v1971_v20 = vld [vmem:[%s5092_s5 + $0x3690] sm:$0xff]  ;;  %v1962_v21 = vld [vmem:[%s5092_s5 + $0x3648] sm:$0xff] }
 0x66f   : > { %4010 = vmatpush1.xpose.msra.mxu0 %v1825_v22  ;;  %4081 = vmatpush1.xpose.msra.mxu1 %v1827_v23  ;;  %v1964_v22 = vld [vmem:[%s5092_s5 + $0x3658] sm:$0xff]  ;;  %v1961_v23 = vld [vmem:[%s5092_s5 + $0x3640] sm:$0xff] }
 0x670   : > { %4011 = vmatprep.subr.mxu0 %v1818_v46  ;;  %4082 = vmatprep.subr.mxu1 %v1820_v50  ;;  %v1963_v46 = vld [vmem:[%s5092_s5 + $0x3650] sm:$0xff]  ;;  %v1954_v50 = vld [vmem:[%s5092_s5 + $0x3608] sm:$0xff] }
 0x673   : > { %4012 = vmatpush1.xpose.msra.mxu0 %v1817_v24  ;;  %4083 = vmatpush1.xpose.msra.mxu1 %v1819_v25  ;;  %v1956_v24 = vld [vmem:[%s5092_s5 + $0x3618] sm:$0xff]  ;;  %v1953_v25 = vld [vmem:[%s5092_s5 + $0x3600] sm:$0xff] }
 0x674   : > { %4013 = vmatprep.subr.mxu0 %v1810_v26  ;;  %4084 = vmatprep.subr.mxu1 %v1812_v27  ;;  %v1955_v26 = vld [vmem:[%s5092_s5 + $0x3610] sm:$0xff]  ;;  %v1946_v27 = vld [vmem:[%s5092_s5 + $0x35c8] sm:$0xff] }
 0x677   : > { %4014 = vmatpush1.xpose.msra.mxu0 %v1809_v28  ;;  %4085 = vmatpush1.xpose.msra.mxu1 %v1811_v29  ;;  %v1948_v28 = vld [vmem:[%s5092_s5 + $0x35d8] sm:$0xff]  ;;  %v1945_v29 = vld [vmem:[%s5092_s5 + $0x35c0] sm:$0xff] }
 0x678   : > { %4015 = vmatprep.subr.mxu0 %v1802_v30  ;;  %4086 = vmatprep.subr.mxu1 %v1804_v31  ;;  %v1947_v30 = vld [vmem:[%s5092_s5 + $0x35d0] sm:$0xff]  ;;  %v1938_v31 = vld [vmem:[%s5092_s5 + $0x3588] sm:$0xff] }
 0x67b   : > { %4016 = vmatpush1.xpose.msra.mxu0 %v1801_v32  ;;  %4087 = vmatpush1.xpose.msra.mxu1 %v1803_v33  ;;  %v1940_v32 = vld [vmem:[%s5092_s5 + $0x3598] sm:$0xff]  ;;  %v1937_v33 = vld [vmem:[%s5092_s5 + $0x3580] sm:$0xff] }
 0x67c   : > { %4017 = vmatprep.subr.mxu0 %v1794_v12  ;;  %4088 = vmatprep.subr.mxu1 %v1796_v13  ;;  %v1939_v12 = vld [vmem:[%s5092_s5 + $0x3590] sm:$0xff]  ;;  %v1930_v13 = vld [vmem:[%s5092_s5 + $0x3548] sm:$0xff] }
 0x67f   : > { %4018 = vmatpush1.xpose.msra.mxu0 %v1793_v34  ;;  %4089 = vmatpush1.xpose.msra.mxu1 %v1795_v36  ;;  %v1932_v34 = vld [vmem:[%s5092_s5 + $0x3558] sm:$0xff]  ;;  %v1929_v36 = vld [vmem:[%s5092_s5 + $0x3540] sm:$0xff] }
 0x680   : > { %4019 = vmatprep.subr.mxu0 %v1786_v37  ;;  %4090 = vmatprep.subr.mxu1 %v1788_v38  ;;  %v1931_v37 = vld [vmem:[%s5092_s5 + $0x3550] sm:$0xff]  ;;  %v1922_v38 = vld [vmem:[%s5092_s5 + $0x3508] sm:$0xff] }
 0x683   : > { %4020 = vmatpush1.xpose.msra.mxu0 %v1785_v39  ;;  %4091 = vmatpush1.xpose.msra.mxu1 %v1787_v40  ;;  %v1924_v39 = vld [vmem:[%s5092_s5 + $0x3518] sm:$0xff]  ;;  %v1921_v40 = vld [vmem:[%s5092_s5 + $0x3500] sm:$0xff] }
 0x684   : > { %4021 = vmatprep.subr.mxu0 %v1778_v41  ;;  %4092 = vmatprep.subr.mxu1 %v1780_v42  ;;  %v1923_v41 = vld [vmem:[%s5092_s5 + $0x3510] sm:$0xff]  ;;  %v1914_v42 = vld [vmem:[%s5092_s5 + $0x34c8] sm:$0xff] }
 0x687   : > { %4022 = vmatpush1.xpose.msra.mxu0 %v1777_v43  ;;  %4093 = vmatpush1.xpose.msra.mxu1 %v1779_v44  ;;  %v1916_v43 = vld [vmem:[%s5092_s5 + $0x34d8] sm:$0xff]  ;;  %v1913_v44 = vld [vmem:[%s5092_s5 + $0x34c0] sm:$0xff] }
 0x688   : > { %4023 = vmatprep.subr.mxu0 %v1770_v45  ;;  %4094 = vmatprep.subr.mxu1 %v1772_v47  ;;  %v1915_v45 = vld [vmem:[%s5092_s5 + $0x34d0] sm:$0xff]  ;;  %v1906_v47 = vld [vmem:[%s5092_s5 + $0x3488] sm:$0xff] }
 0x68b   : > { %4024 = vmatpush1.xpose.msra.mxu0 %v1769_v48  ;;  %4095 = vmatpush1.xpose.msra.mxu1 %v1771_v51  ;;  %v1908_v48 = vld [vmem:[%s5092_s5 + $0x3498] sm:$0xff]  ;;  %v1905_v51 = vld [vmem:[%s5092_s5 + $0x3480] sm:$0xff] }
 0x68c   : > { %4025 = vmatprep.subr.mxu0 %v1762_v52  ;;  %4096 = vmatprep.subr.mxu1 %v1764_v54  ;;  %v1907_v52 = vld [vmem:[%s5092_s5 + $0x3490] sm:$0xff]  ;;  %v1898_v54 = vld [vmem:[%s5092_s5 + $0x3448] sm:$0xff] }
 0x68f   : > { %4026 = vmatpush1.xpose.msra.mxu0 %v1761_v55  ;;  %4097 = vmatpush1.xpose.msra.mxu1 %v1763_v56  ;;  %v1900_v55 = vld [vmem:[%s5092_s5 + $0x3458] sm:$0xff]  ;;  %v1897_v56 = vld [vmem:[%s5092_s5 + $0x3440] sm:$0xff] }
 0x690   : > { %4027 = vmatprep.subr.mxu0 %v2010_v57  ;;  %4098 = vmatprep.subr.mxu1 %v2012_v58  ;;  %v1899_v57 = vld [vmem:[%s5092_s5 + $0x3450] sm:$0xff]  ;;  %v1890_v58 = vld [vmem:[%s5092_s5 + $0x3408] sm:$0xff] }
 0x693   : > { %4028 = vmatpush2.xpose.msra.mxu0 %v2009_v59  ;;  %4099 = vmatpush2.xpose.msra.mxu1 %v2011_v60  ;;  %v1892_v59 = vld [vmem:[%s5092_s5 + $0x3418] sm:$0xff]  ;;  %v1889_v60 = vld [vmem:[%s5092_s5 + $0x3400] sm:$0xff] }
 0x694   : > { %4029 = vmatprep.subr.mxu0 %v2002_v61  ;;  %4100 = vmatprep.subr.mxu1 %v2004_v62  ;;  %v1891_v61 = vld [vmem:[%s5092_s5 + $0x3410] sm:$0xff]  ;;  %v1886_v62 = vld [vmem:[%s5092_s5 + $0x33e8] sm:$0xff] }
 0x697   : > { %4030 = vmatpush2.xpose.msra.mxu0 %v2001_v63  ;;  %4101 = vmatpush2.xpose.msra.mxu1 %v2003_v0  ;;  %v1888_v63 = vld [vmem:[%s5092_s5 + $0x33f8] sm:$0xff]  ;;  %v1885_v0 = vld [vmem:[%s5092_s5 + $0x33e0] sm:$0xff] }
 0x698   : > { %4031 = vmatprep.subr.mxu0 %v1994_v1  ;;  %4102 = vmatprep.subr.mxu1 %v1996_v2  ;;  %v1887_v1 = vld [vmem:[%s5092_s5 + $0x33f0] sm:$0xff]  ;;  %v1878_v2 = vld [vmem:[%s5092_s5 + $0x33a8] sm:$0xff] }
 0x69b   : > { %4032 = vmatpush2.xpose.msra.mxu0 %v1993_v3  ;;  %4103 = vmatpush2.xpose.msra.mxu1 %v1995_v4  ;;  %v1880_v3 = vld [vmem:[%s5092_s5 + $0x33b8] sm:$0xff]  ;;  %v4812_v4 = vld [vmem:[#allocation5] sm:$0xff] }
 0x69c   : > { %4033 = vmatprep.subr.mxu0 %v1986_v5  ;;  %4104 = vmatprep.subr.mxu1 %v1988_v6  ;;  %v4813_v5 = vld [vmem:[#allocation5 + $0x8] sm:$0xff]  ;;  %v1877_v6 = vld [vmem:[%s5092_s5 + $0x33a0] sm:$0xff] }
 0x69f   : > { %4034 = vmatpush2.xpose.msra.mxu0 %v1985_v7  ;;  %4105 = vmatpush2.xpose.msra.mxu1 %v1987_v8  ;;  %v1879_v7 = vld [vmem:[%s5092_s5 + $0x33b0] sm:$0xff]  ;;  %v1870_v8 = vld [vmem:[%s5092_s5 + $0x3368] sm:$0xff] }
 0x6a0   : > { %4035 = vmatprep.subr.mxu0 %v1978_v9  ;;  %4106 = vmatprep.subr.mxu1 %v1980_v10  ;;  %v1872_v9 = vld [vmem:[%s5092_s5 + $0x3378] sm:$0xff]  ;;  %v1869_v10 = vld [vmem:[%s5092_s5 + $0x3360] sm:$0xff] }
 0x6a3   : > { %4036 = vmatpush2.xpose.msra.mxu0 %v1977_v11  ;;  %4107 = vmatpush2.xpose.msra.mxu1 %v1979_v14  ;;  %v1871_v11 = vld [vmem:[%s5092_s5 + $0x3370] sm:$0xff]  ;;  %v1862_v14 = vld [vmem:[%s5092_s5 + $0x3328] sm:$0xff] }
 0x6a4   : > { %4037 = vmatprep.subr.mxu0 %v1970_v15  ;;  %4108 = vmatprep.subr.mxu1 %v1972_v16  ;;  %v1864_v15 = vld [vmem:[%s5092_s5 + $0x3338] sm:$0xff]  ;;  %v1861_v16 = vld [vmem:[%s5092_s5 + $0x3320] sm:$0xff] }
 0x6a7   : > { %4038 = vmatpush2.xpose.msra.mxu0 %v1969_v17  ;;  %4109 = vmatpush2.xpose.msra.mxu1 %v1971_v20  ;;  %v1863_v17 = vld [vmem:[%s5092_s5 + $0x3330] sm:$0xff]  ;;  %v1854_v20 = vld [vmem:[%s5092_s5 + $0x32e8] sm:$0xff] }
 0x6a8   : > { %4039 = vmatprep.subr.mxu0 %v1962_v21  ;;  %4110 = vmatprep.subr.mxu1 %v1964_v22  ;;  %v1856_v21 = vld [vmem:[%s5092_s5 + $0x32f8] sm:$0xff]  ;;  %v1853_v22 = vld [vmem:[%s5092_s5 + $0x32e0] sm:$0xff] }
 0x6ab   : > { %4040 = vmatpush2.xpose.msra.mxu0 %v1961_v23  ;;  %4111 = vmatpush2.xpose.msra.mxu1 %v1963_v46  ;;  %v1855_v23 = vld [vmem:[%s5092_s5 + $0x32f0] sm:$0xff]  ;;  %v1846_v46 = vld [vmem:[%s5092_s5 + $0x32a8] sm:$0xff] }
 0x6ac   : > { %4041 = vmatprep.subr.mxu0 %v1954_v50  ;;  %4112 = vmatprep.subr.mxu1 %v1956_v24  ;;  %v1848_v50 = vld [vmem:[%s5092_s5 + $0x32b8] sm:$0xff]  ;;  %v1845_v24 = vld [vmem:[%s5092_s5 + $0x32a0] sm:$0xff] }
 0x6af   : > { %4042 = vmatpush2.xpose.msra.mxu0 %v1953_v25  ;;  %4113 = vmatpush2.xpose.msra.mxu1 %v1955_v26  ;;  %v1847_v25 = vld [vmem:[%s5092_s5 + $0x32b0] sm:$0xff]  ;;  %v1838_v26 = vld [vmem:[%s5092_s5 + $0x3268] sm:$0xff] }
 0x6b0   : > { %4043 = vmatprep.subr.mxu0 %v1946_v27  ;;  %4114 = vmatprep.subr.mxu1 %v1948_v28  ;;  %v1840_v27 = vld [vmem:[%s5092_s5 + $0x3278] sm:$0xff]  ;;  %v1837_v28 = vld [vmem:[%s5092_s5 + $0x3260] sm:$0xff] }
 0x6b3   : > { %4044 = vmatpush2.xpose.msra.mxu0 %v1945_v29  ;;  %4115 = vmatpush2.xpose.msra.mxu1 %v1947_v30  ;;  %v1839_v29 = vld [vmem:[%s5092_s5 + $0x3270] sm:$0xff]  ;;  %v1830_v30 = vld [vmem:[%s5092_s5 + $0x3228] sm:$0xff] }
 0x6b4   : > { %4045 = vmatprep.subr.mxu0 %v1938_v31  ;;  %4116 = vmatprep.subr.mxu1 %v1940_v32  ;;  %v1832_v31 = vld [vmem:[%s5092_s5 + $0x3238] sm:$0xff]  ;;  %v1829_v32 = vld [vmem:[%s5092_s5 + $0x3220] sm:$0xff] }
 0x6b7   : > { %4046 = vmatpush2.xpose.msra.mxu0 %v1937_v33  ;;  %4117 = vmatpush2.xpose.msra.mxu1 %v1939_v12  ;;  %v1831_v33 = vld [vmem:[%s5092_s5 + $0x3230] sm:$0xff]  ;;  %v1822_v12 = vld [vmem:[%s5092_s5 + $0x31e8] sm:$0xff] }
 0x6b8   : > { %4047 = vmatprep.subr.mxu0 %v1930_v13  ;;  %4118 = vmatprep.subr.mxu1 %v1932_v34  ;;  %v1824_v13 = vld [vmem:[%s5092_s5 + $0x31f8] sm:$0xff]  ;;  %v1821_v34 = vld [vmem:[%s5092_s5 + $0x31e0] sm:$0xff] }
 0x6bb   : > { %4048 = vmatpush2.xpose.msra.mxu0 %v1929_v36  ;;  %4119 = vmatpush2.xpose.msra.mxu1 %v1931_v37  ;;  %v1823_v36 = vld [vmem:[%s5092_s5 + $0x31f0] sm:$0xff]  ;;  %v1814_v37 = vld [vmem:[%s5092_s5 + $0x31a8] sm:$0xff] }
 0x6bc   : > { %4049 = vmatprep.subr.mxu0 %v1922_v38  ;;  %4120 = vmatprep.subr.mxu1 %v1924_v39  ;;  %v1816_v38 = vld [vmem:[%s5092_s5 + $0x31b8] sm:$0xff]  ;;  %v1813_v39 = vld [vmem:[%s5092_s5 + $0x31a0] sm:$0xff] }
 0x6bf   : > { %4050 = vmatpush2.xpose.msra.mxu0 %v1921_v40  ;;  %4121 = vmatpush2.xpose.msra.mxu1 %v1923_v41  ;;  %v1815_v40 = vld [vmem:[%s5092_s5 + $0x31b0] sm:$0xff]  ;;  %v1806_v41 = vld [vmem:[%s5092_s5 + $0x3168] sm:$0xff] }
 0x6c0   : > { %4051 = vmatprep.subr.mxu0 %v1914_v42  ;;  %4122 = vmatprep.subr.mxu1 %v1916_v43  ;;  %v1808_v42 = vld [vmem:[%s5092_s5 + $0x3178] sm:$0xff]  ;;  %v1805_v43 = vld [vmem:[%s5092_s5 + $0x3160] sm:$0xff] }
 0x6c3   : > { %4052 = vmatpush2.xpose.msra.mxu0 %v1913_v44  ;;  %4123 = vmatpush2.xpose.msra.mxu1 %v1915_v45  ;;  %v1807_v44 = vld [vmem:[%s5092_s5 + $0x3170] sm:$0xff]  ;;  %v1798_v45 = vld [vmem:[%s5092_s5 + $0x3128] sm:$0xff] }
 0x6c4   : > { %4053 = vmatprep.subr.mxu0 %v1906_v47  ;;  %4124 = vmatprep.subr.mxu1 %v1908_v48  ;;  %v1800_v47 = vld [vmem:[%s5092_s5 + $0x3138] sm:$0xff]  ;;  %v1797_v48 = vld [vmem:[%s5092_s5 + $0x3120] sm:$0xff] }
 0x6c7   : > { %4054 = vmatpush2.xpose.msra.mxu0 %v1905_v51  ;;  %4125 = vmatpush2.xpose.msra.mxu1 %v1907_v52  ;;  %v1799_v51 = vld [vmem:[%s5092_s5 + $0x3130] sm:$0xff]  ;;  %v1790_v52 = vld [vmem:[%s5092_s5 + $0x30e8] sm:$0xff] }
 0x6c8   : > { %4055 = vmatprep.subr.mxu0 %v1898_v54  ;;  %4126 = vmatprep.subr.mxu1 %v1900_v55  ;;  %v1792_v54 = vld [vmem:[%s5092_s5 + $0x30f8] sm:$0xff]  ;;  %v1789_v55 = vld [vmem:[%s5092_s5 + $0x30e0] sm:$0xff] }
 0x6cb   : > { %4056 = vmatpush2.xpose.msra.mxu0 %v1897_v56  ;;  %4127 = vmatpush2.xpose.msra.mxu1 %v1899_v57  ;;  %v1791_v56 = vld [vmem:[%s5092_s5 + $0x30f0] sm:$0xff]  ;;  %v1782_v57 = vld [vmem:[%s5092_s5 + $0x30a8] sm:$0xff] }
 0x6cc   : > { %4057 = vmatprep.subr.mxu0 %v1890_v58  ;;  %4128 = vmatprep.subr.mxu1 %v1892_v59  ;;  %v1784_v58 = vld [vmem:[%s5092_s5 + $0x30b8] sm:$0xff]  ;;  %v1781_v59 = vld [vmem:[%s5092_s5 + $0x30a0] sm:$0xff] }
 0x6cf   : > { %4058 = vmatpush2.xpose.msra.mxu0 %v1889_v60  ;;  %4129 = vmatpush2.xpose.msra.mxu1 %v1891_v61  ;;  %v1783_v60 = vld [vmem:[%s5092_s5 + $0x30b0] sm:$0xff]  ;;  %v1774_v61 = vld [vmem:[%s5092_s5 + $0x3068] sm:$0xff] }
 0x6d0   : > { %4137 = vmatprep.subr.mxu0 %v1886_v62  ;;  %4208 = vmatprep.subr.mxu1 %v1888_v63  ;;  %v1776_v62 = vld [vmem:[%s5092_s5 + $0x3078] sm:$0xff]  ;;  %v3777_v63 = vpop.f32.mrf.mxu0 }
 0x6d2   : > { %4060 = vmatmul.mubr.f32.vlgmr.msra.gmra.mxu0 %v4812_v4  ;;  %4131 = vmatmul.mubr.f32.vlgmr.msra.gmra.mxu1 %v4813_v5  ;;  %v3848_v4 = vpop.f32.mrf.mxu1  ;;  %v3779_v5 = vpop.f32.mrf.mxu0 }
 0x6d3   : > { %4138 = vmatpush1.xpose.msra.mxu0 %v1885_v0  ;;  %4209 = vmatpush1.xpose.msra.mxu1 %v1887_v1  ;;  %v1773_v0 = vld [vmem:[%s5092_s5 + $0x3060] sm:$0xff]  ;;  %v1775_v1 = vld [vmem:[%s5092_s5 + $0x3070] sm:$0xff] }
 0x6d4   : > { %4139 = vmatprep.subr.mxu0 %v1878_v2  ;;  %4210 = vmatprep.subr.mxu1 %v1880_v3  ;;  %v1766_v2 = vld [vmem:[%s5092_s5 + $0x3028] sm:$0xff]  ;;  %v1768_v3 = vld [vmem:[%s5092_s5 + $0x3038] sm:$0xff] }
 0x6d5   : > { %4201 = vmatprep.mubr.f32.mxu0 %v5259_v18  ;;  %4272 = vmatprep.mubr.f32.mxu1 %v5263_v19 }
 0x6d7   : > { %4140 = vmatpush1.xpose.msra.mxu0 %v1877_v6  ;;  %4211 = vmatpush1.xpose.msra.mxu1 %v1879_v7  ;;  %v1765_v6 = vld [vmem:[%s5092_s5 + $0x3020] sm:$0xff]  ;;  %v1767_v7 = vld [vmem:[%s5092_s5 + $0x3030] sm:$0xff] }
 0x6d8   : > { %4141 = vmatprep.subr.mxu0 %v1870_v8  ;;  %4212 = vmatprep.subr.mxu1 %v1872_v9  ;;  %v3778_v8 = vadd.f32 %v3777_v63, %v5587_v35  ;;  %v2014_v9 = vld [vmem:[%s5092_s5 + $0x37e8] sm:$0xff] }
 0x6d9   : > { %v1942_v63 = vld [vmem:[%s5092_s5 + $0x35a8] sm:$0xff] }
 0x6db   : > { %4142 = vmatpush1.xpose.msra.mxu0 %v1869_v10  ;;  %4213 = vmatpush1.xpose.msra.mxu1 %v1871_v11  ;;  %v2016_v10 = vld [vmem:[%s5092_s5 + $0x37f8] sm:$0xff]  ;;  %v3780_v11 = vadd.f32 %v3779_v5, %v5587_v35  ;;  %v1933_v5 = vld [vmem:[%s5092_s5 + $0x3560] sm:$0xff] }
 0x6dc   : > { %4143 = vmatprep.subr.mxu0 %v1862_v14  ;;  %4214 = vmatprep.subr.mxu1 %v1864_v15  ;;  %v3850_v14 = vpop.f32.mrf.mxu1  ;;  %v2013_v15 = vld [vmem:[%s5092_s5 + $0x37e0] sm:$0xff] }
 0x6df   : > { %4144 = vmatpush1.xpose.msra.mxu0 %v1861_v16  ;;  %4215 = vmatpush1.xpose.msra.mxu1 %v1863_v17  ;;  %v2015_v16 = vld [vmem:[%s5092_s5 + $0x37f0] sm:$0xff]  ;;  %v3849_v17 = vadd.f32 %v3848_v4, %v3778_v8  ;;  %v1936_v4 = vld [vmem:[%s5092_s5 + $0x3578] sm:$0xff] }
 0x6e0   : > { %4145 = vmatprep.subr.mxu0 %v1854_v20  ;;  %4216 = vmatprep.subr.mxu1 %v1856_v21  ;;  %v2006_v20 = vld [vmem:[%s5092_s5 + $0x37a8] sm:$0xff]  ;;  %v2008_v21 = vld [vmem:[%s5092_s5 + $0x37b8] sm:$0xff] }
 0x6e1   : > { %v1928_v8 = vld [vmem:[%s5092_s5 + $0x3538] sm:$0xff] }
 0x6e3   : > { %4146 = vmatpush1.xpose.msra.mxu0 %v1853_v22  ;;  %4217 = vmatpush1.xpose.msra.mxu1 %v1855_v23 }
 0x6e4   : > { %4147 = vmatprep.subr.mxu0 %v1846_v46  ;;  %4218 = vmatprep.subr.mxu1 %v1848_v50  ;;  %v3851_v46 = vadd.f32 %v3850_v14, %v3780_v11  ;;  %v1918_v11 = vld [vmem:[%s5092_s5 + $0x34e8] sm:$0xff]  ;;  %v1920_v14 = vld [vmem:[%s5092_s5 + $0x34f8] sm:$0xff] }
 0x6e7   : > { %4148 = vmatpush1.xpose.msra.mxu0 %v1845_v24  ;;  %4219 = vmatpush1.xpose.msra.mxu1 %v1847_v25 }
 0x6e8   : > { %4149 = vmatprep.subr.mxu0 %v1838_v26  ;;  %4220 = vmatprep.subr.mxu1 %v1840_v27  ;;  %v2005_v26 = vld [vmem:[%s5092_s5 + $0x37a0] sm:$0xff]  ;;  %v2007_v27 = vld [vmem:[%s5092_s5 + $0x37b0] sm:$0xff] }
 0x6eb   : > { %4150 = vmatpush1.xpose.msra.mxu0 %v1837_v28  ;;  %4221 = vmatpush1.xpose.msra.mxu1 %v1839_v29  ;;  %v1998_v29 = vld [vmem:[%s5092_s5 + $0x3768] sm:$0xff] }
 0x6ec   : > { %4151 = vmatprep.subr.mxu0 %v1830_v30  ;;  %4222 = vmatprep.subr.mxu1 %v1832_v31  ;;  %v2000_v30 = vld [vmem:[%s5092_s5 + $0x3778] sm:$0xff] }
 0x6ef   : > { %4152 = vmatpush1.xpose.msra.mxu0 %v1829_v32  ;;  %4223 = vmatpush1.xpose.msra.mxu1 %v1831_v33  ;;  %v1997_v33 = vld [vmem:[%s5092_s5 + $0x3760] sm:$0xff] }
 0x6f0   : > { %4153 = vmatprep.subr.mxu0 %v1822_v12  ;;  %4224 = vmatprep.subr.mxu1 %v1824_v13  ;;  %v1999_v12 = vld [vmem:[%s5092_s5 + $0x3770] sm:$0xff] }
 0x6f3   : > { %4154 = vmatpush1.xpose.msra.mxu0 %v1821_v34  ;;  %4225 = vmatpush1.xpose.msra.mxu1 %v1823_v36  ;;  %v1990_v34 = vld [vmem:[%s5092_s5 + $0x3728] sm:$0xff]  ;;  %v1992_v36 = vld [vmem:[%s5092_s5 + $0x3738] sm:$0xff] }
 0x6f4   : > { %4155 = vmatprep.subr.mxu0 %v1814_v37  ;;  %4226 = vmatprep.subr.mxu1 %v1816_v38  ;;  %v1989_v37 = vld [vmem:[%s5092_s5 + $0x3720] sm:$0xff]  ;;  %v1991_v38 = vld [vmem:[%s5092_s5 + $0x3730] sm:$0xff] }
 0x6f7   : > { %4156 = vmatpush1.xpose.msra.mxu0 %v1813_v39  ;;  %4227 = vmatpush1.xpose.msra.mxu1 %v1815_v40  ;;  %v1982_v39 = vld [vmem:[%s5092_s5 + $0x36e8] sm:$0xff]  ;;  %v1984_v40 = vld [vmem:[%s5092_s5 + $0x36f8] sm:$0xff] }
 0x6f8   : > { %4157 = vmatprep.subr.mxu0 %v1806_v41  ;;  %4228 = vmatprep.subr.mxu1 %v1808_v42  ;;  %v1981_v41 = vld [vmem:[%s5092_s5 + $0x36e0] sm:$0xff]  ;;  %v1983_v42 = vld [vmem:[%s5092_s5 + $0x36f0] sm:$0xff] }
 0x6fb   : > { %4158 = vmatpush1.xpose.msra.mxu0 %v1805_v43  ;;  %4229 = vmatpush1.xpose.msra.mxu1 %v1807_v44  ;;  %v1974_v43 = vld [vmem:[%s5092_s5 + $0x36a8] sm:$0xff]  ;;  %v1976_v44 = vld [vmem:[%s5092_s5 + $0x36b8] sm:$0xff] }
 0x6fc   : > { %4159 = vmatprep.subr.mxu0 %v1798_v45  ;;  %4230 = vmatprep.subr.mxu1 %v1800_v47  ;;  %v1973_v45 = vld [vmem:[%s5092_s5 + $0x36a0] sm:$0xff]  ;;  %v1975_v47 = vld [vmem:[%s5092_s5 + $0x36b0] sm:$0xff] }
 0x6ff   : > { %4160 = vmatpush1.xpose.msra.mxu0 %v1797_v48  ;;  %4231 = vmatpush1.xpose.msra.mxu1 %v1799_v51  ;;  %v1966_v48 = vld [vmem:[%s5092_s5 + $0x3668] sm:$0xff]  ;;  %v1968_v51 = vld [vmem:[%s5092_s5 + $0x3678] sm:$0xff] }
 0x700   : > { %4161 = vmatprep.subr.mxu0 %v1790_v52  ;;  %4232 = vmatprep.subr.mxu1 %v1792_v54  ;;  %v1965_v52 = vld [vmem:[%s5092_s5 + $0x3660] sm:$0xff]  ;;  %v1967_v54 = vld [vmem:[%s5092_s5 + $0x3670] sm:$0xff] }
 0x703   : > { %4162 = vmatpush1.xpose.msra.mxu0 %v1789_v55  ;;  %4233 = vmatpush1.xpose.msra.mxu1 %v1791_v56  ;;  %v1958_v55 = vld [vmem:[%s5092_s5 + $0x3628] sm:$0xff]  ;;  %v1960_v56 = vld [vmem:[%s5092_s5 + $0x3638] sm:$0xff] }
 0x704   : > { %4163 = vmatprep.subr.mxu0 %v1782_v57  ;;  %4234 = vmatprep.subr.mxu1 %v1784_v58  ;;  %v1957_v57 = vld [vmem:[%s5092_s5 + $0x3620] sm:$0xff]  ;;  %v1959_v58 = vld [vmem:[%s5092_s5 + $0x3630] sm:$0xff] }
 0x707   : > { %4164 = vmatpush1.xpose.msra.mxu0 %v1781_v59  ;;  %4235 = vmatpush1.xpose.msra.mxu1 %v1783_v60  ;;  %v1950_v59 = vld [vmem:[%s5092_s5 + $0x35e8] sm:$0xff]  ;;  %v1952_v60 = vld [vmem:[%s5092_s5 + $0x35f8] sm:$0xff] }
 0x708   : > { %4165 = vmatprep.subr.mxu0 %v1774_v61  ;;  %4236 = vmatprep.subr.mxu1 %v1776_v62  ;;  %v1949_v61 = vld [vmem:[%s5092_s5 + $0x35e0] sm:$0xff]  ;;  %v1951_v62 = vld [vmem:[%s5092_s5 + $0x35f0] sm:$0xff] }
 0x70b   : > { %4166 = vmatpush1.xpose.msra.mxu0 %v1773_v0  ;;  %4237 = vmatpush1.xpose.msra.mxu1 %v1775_v1  ;;  %v1944_v0 = vld [vmem:[%s5092_s5 + $0x35b8] sm:$0xff]  ;;  %v1941_v1 = vld [vmem:[%s5092_s5 + $0x35a0] sm:$0xff] }
 0x70c   : > { %4167 = vmatprep.subr.mxu0 %v1766_v2  ;;  %4238 = vmatprep.subr.mxu1 %v1768_v3  ;;  %v1943_v2 = vld [vmem:[%s5092_s5 + $0x35b0] sm:$0xff]  ;;  %v1934_v3 = vld [vmem:[%s5092_s5 + $0x3568] sm:$0xff] }
 0x70f   : > { %4168 = vmatpush1.xpose.msra.mxu0 %v1765_v6  ;;  %4239 = vmatpush1.xpose.msra.mxu1 %v1767_v7  ;;  %v1935_v6 = vld [vmem:[%s5092_s5 + $0x3570] sm:$0xff]  ;;  %v1926_v7 = vld [vmem:[%s5092_s5 + $0x3528] sm:$0xff] }
 0x710   : > { %4169 = vmatprep.subr.mxu0 %v2014_v9  ;;  %4240 = vmatprep.subr.mxu1 %v2016_v10  ;;  %v1925_v9 = vld [vmem:[%s5092_s5 + $0x3520] sm:$0xff]  ;;  %v1927_v10 = vld [vmem:[%s5092_s5 + $0x3530] sm:$0xff] }
 0x712   : > { %v3919_v22 = vpop.f32.mrf.mxu0  ;;  %v3990_v23 = vpop.f32.mrf.mxu1 }
 0x713   : > { %v3920_v50 = vadd.f32 %v3919_v22, %v3849_v17  ;;  %4170 = vmatpush2.xpose.msra.mxu0 %v2013_v15  ;;  %4241 = vmatpush2.xpose.msra.mxu1 %v2015_v16  ;;  %v1917_v15 = vld [vmem:[%s5092_s5 + $0x34e0] sm:$0xff]  ;;  %v1919_v16 = vld [vmem:[%s5092_s5 + $0x34f0] sm:$0xff]  ;;  %v1910_v17 = vld [vmem:[%s5092_s5 + $0x34a8] sm:$0xff] }
 0x714   : > { %v3921_v24 = vpop.f32.mrf.mxu0  ;;  %v3992_v25 = vpop.f32.mrf.mxu1  ;;  %4171 = vmatprep.subr.mxu0 %v2006_v20  ;;  %4242 = vmatprep.subr.mxu1 %v2008_v21  ;;  %v1912_v20 = vld [vmem:[%s5092_s5 + $0x34b8] sm:$0xff]  ;;  %v1909_v21 = vld [vmem:[%s5092_s5 + $0x34a0] sm:$0xff]  ;;  %v1911_v22 = vld [vmem:[%s5092_s5 + $0x34b0] sm:$0xff] }
 0x715   : > { %v3922_v28 = vadd.f32 %v3921_v24, %v3851_v46  ;;  %v3991_v31 = vadd.f32 %v3990_v23, %v3920_v50  ;;  %v1902_v23 = vld [vmem:[%s5092_s5 + $0x3468] sm:$0xff]  ;;  %v1904_v46 = vld [vmem:[%s5092_s5 + $0x3478] sm:$0xff]  ;;  %v1901_v50 = vld [vmem:[%s5092_s5 + $0x3460] sm:$0xff] }
 0x716   : > { %v1903_v24 = vld [vmem:[%s5092_s5 + $0x3470] sm:$0xff] }
 0x717   : > { %v3993_v32 = vadd.f32 %v3992_v25, %v3922_v28  ;;  %4172 = vmatpush2.xpose.msra.mxu0 %v2005_v26  ;;  %4243 = vmatpush2.xpose.msra.mxu1 %v2007_v27  ;;  %v1894_v25 = vld [vmem:[%s5092_s5 + $0x3428] sm:$0xff]  ;;  %v1896_v26 = vld [vmem:[%s5092_s5 + $0x3438] sm:$0xff]  ;;  %v1893_v27 = vld [vmem:[%s5092_s5 + $0x3420] sm:$0xff] }
 0x718   : > { %4173 = vmatprep.subr.mxu0 %v1998_v29  ;;  %4244 = vmatprep.subr.mxu1 %v2000_v30  ;;  %v1895_v28 = vld [vmem:[%s5092_s5 + $0x3430] sm:$0xff]  ;;  %v2138_v29 = vld [vmem:[%s5092_s5 + $0x3bc8] sm:$0xff]  ;;  %v2140_v30 = vld [vmem:[%s5092_s5 + $0x3bd8] sm:$0xff] }
 0x719   : > { %v4584_v13 = vcombine.low %v3991_v31, %v3993_v32  ;;  %v2137_v31 = vld [vmem:[%s5092_s5 + $0x3bc0] sm:$0xff]  ;;  %v2139_v32 = vld [vmem:[%s5092_s5 + $0x3bd0] sm:$0xff] }
 0x71b   : > { %4600 = vst [vmem:[%s5608_s11 + $0x28] sm:$0xff] %v4584_v13  ;;  %4174 = vmatpush2.xpose.msra.mxu0 %v1997_v33  ;;  %4245 = vmatpush2.xpose.msra.mxu1 %v1999_v12  ;;  %v2130_v33 = vld [vmem:[%s5092_s5 + $0x3b88] sm:$0xff]  ;;  %v2132_v12 = vld [vmem:[%s5092_s5 + $0x3b98] sm:$0xff]  ;;  %v4814_v13 = vld [vmem:[#allocation5 + $0x10] sm:$0xff] }
 0x71c   : > { %4175 = vmatprep.subr.mxu0 %v1990_v34  ;;  %4246 = vmatprep.subr.mxu1 %v1992_v36  ;;  %v4815_v34 = vld [vmem:[#allocation5 + $0x18] sm:$0xff]  ;;  %v2129_v36 = vld [vmem:[%s5092_s5 + $0x3b80] sm:$0xff] }
 0x71f   : > { %4176 = vmatpush2.xpose.msra.mxu0 %v1989_v37  ;;  %4247 = vmatpush2.xpose.msra.mxu1 %v1991_v38  ;;  %v2131_v37 = vld [vmem:[%s5092_s5 + $0x3b90] sm:$0xff]  ;;  %v2122_v38 = vld [vmem:[%s5092_s5 + $0x3b48] sm:$0xff] }
 0x720   : > { %4177 = vmatprep.subr.mxu0 %v1982_v39  ;;  %4248 = vmatprep.subr.mxu1 %v1984_v40  ;;  %v2124_v39 = vld [vmem:[%s5092_s5 + $0x3b58] sm:$0xff]  ;;  %v2121_v40 = vld [vmem:[%s5092_s5 + $0x3b40] sm:$0xff] }
 0x723   : > { %4178 = vmatpush2.xpose.msra.mxu0 %v1981_v41  ;;  %4249 = vmatpush2.xpose.msra.mxu1 %v1983_v42  ;;  %v2123_v41 = vld [vmem:[%s5092_s5 + $0x3b50] sm:$0xff]  ;;  %v2114_v42 = vld [vmem:[%s5092_s5 + $0x3b08] sm:$0xff] }
 0x724   : > { %4179 = vmatprep.subr.mxu0 %v1974_v43  ;;  %4250 = vmatprep.subr.mxu1 %v1976_v44  ;;  %v2116_v43 = vld [vmem:[%s5092_s5 + $0x3b18] sm:$0xff]  ;;  %v2106_v44 = vld [vmem:[%s5092_s5 + $0x3ac8] sm:$0xff] }
 0x727   : > { %4180 = vmatpush2.xpose.msra.mxu0 %v1973_v45  ;;  %4251 = vmatpush2.xpose.msra.mxu1 %v1975_v47  ;;  %v2108_v45 = vld [vmem:[%s5092_s5 + $0x3ad8] sm:$0xff]  ;;  %v2105_v47 = vld [vmem:[%s5092_s5 + $0x3ac0] sm:$0xff] }
 0x728   : > { %4181 = vmatprep.subr.mxu0 %v1966_v48  ;;  %4252 = vmatprep.subr.mxu1 %v1968_v51  ;;  %v2107_v48 = vld [vmem:[%s5092_s5 + $0x3ad0] sm:$0xff]  ;;  %v2098_v51 = vld [vmem:[%s5092_s5 + $0x3a88] sm:$0xff] }
 0x72b   : > { %4182 = vmatpush2.xpose.msra.mxu0 %v1965_v52  ;;  %4253 = vmatpush2.xpose.msra.mxu1 %v1967_v54  ;;  %v2100_v52 = vld [vmem:[%s5092_s5 + $0x3a98] sm:$0xff]  ;;  %v2097_v54 = vld [vmem:[%s5092_s5 + $0x3a80] sm:$0xff] }
 0x72c   : > { %4183 = vmatprep.subr.mxu0 %v1958_v55  ;;  %4254 = vmatprep.subr.mxu1 %v1960_v56  ;;  %v2099_v55 = vld [vmem:[%s5092_s5 + $0x3a90] sm:$0xff]  ;;  %v2090_v56 = vld [vmem:[%s5092_s5 + $0x3a48] sm:$0xff] }
 0x72f   : > { %4184 = vmatpush2.xpose.msra.mxu0 %v1957_v57  ;;  %4255 = vmatpush2.xpose.msra.mxu1 %v1959_v58  ;;  %v2092_v57 = vld [vmem:[%s5092_s5 + $0x3a58] sm:$0xff]  ;;  %v2089_v58 = vld [vmem:[%s5092_s5 + $0x3a40] sm:$0xff] }
 0x730   : > { %4185 = vmatprep.subr.mxu0 %v1950_v59  ;;  %4256 = vmatprep.subr.mxu1 %v1952_v60  ;;  %v2091_v59 = vld [vmem:[%s5092_s5 + $0x3a50] sm:$0xff]  ;;  %v2082_v60 = vld [vmem:[%s5092_s5 + $0x3a08] sm:$0xff] }
 0x733   : > { %4186 = vmatpush2.xpose.msra.mxu0 %v1949_v61  ;;  %4257 = vmatpush2.xpose.msra.mxu1 %v1951_v62  ;;  %v2084_v61 = vld [vmem:[%s5092_s5 + $0x3a18] sm:$0xff]  ;;  %v2081_v62 = vld [vmem:[%s5092_s5 + $0x3a00] sm:$0xff] }
 0x734   : > { %4187 = vmatprep.subr.mxu0 %v1942_v63  ;;  %4258 = vmatprep.subr.mxu1 %v1944_v0  ;;  %v2083_v63 = vld [vmem:[%s5092_s5 + $0x3a10] sm:$0xff]  ;;  %v2074_v0 = vld [vmem:[%s5092_s5 + $0x39c8] sm:$0xff] }
 0x737   : > { %4188 = vmatpush2.xpose.msra.mxu0 %v1941_v1  ;;  %4259 = vmatpush2.xpose.msra.mxu1 %v1943_v2  ;;  %v2076_v1 = vld [vmem:[%s5092_s5 + $0x39d8] sm:$0xff]  ;;  %v2073_v2 = vld [vmem:[%s5092_s5 + $0x39c0] sm:$0xff] }
 0x738   : > { %4189 = vmatprep.subr.mxu0 %v1934_v3  ;;  %4260 = vmatprep.subr.mxu1 %v1936_v4  ;;  %v2075_v3 = vld [vmem:[%s5092_s5 + $0x39d0] sm:$0xff]  ;;  %v2066_v4 = vld [vmem:[%s5092_s5 + $0x3988] sm:$0xff] }
 0x73b   : > { %4190 = vmatpush2.xpose.msra.mxu0 %v1933_v5  ;;  %4261 = vmatpush2.xpose.msra.mxu1 %v1935_v6  ;;  %v2068_v5 = vld [vmem:[%s5092_s5 + $0x3998] sm:$0xff]  ;;  %v2065_v6 = vld [vmem:[%s5092_s5 + $0x3980] sm:$0xff] }
 0x73c   : > { %4191 = vmatprep.subr.mxu0 %v1926_v7  ;;  %4262 = vmatprep.subr.mxu1 %v1928_v8  ;;  %v2067_v7 = vld [vmem:[%s5092_s5 + $0x3990] sm:$0xff]  ;;  %v2058_v8 = vld [vmem:[%s5092_s5 + $0x3948] sm:$0xff] }
 0x73f   : > { %4192 = vmatpush2.xpose.msra.mxu0 %v1925_v9  ;;  %4263 = vmatpush2.xpose.msra.mxu1 %v1927_v10  ;;  %v2060_v9 = vld [vmem:[%s5092_s5 + $0x3958] sm:$0xff]  ;;  %v2057_v10 = vld [vmem:[%s5092_s5 + $0x3940] sm:$0xff] }
 0x740   : > { %4193 = vmatprep.subr.mxu0 %v1918_v11  ;;  %4264 = vmatprep.subr.mxu1 %v1920_v14  ;;  %v2059_v11 = vld [vmem:[%s5092_s5 + $0x3950] sm:$0xff]  ;;  %v2050_v14 = vld [vmem:[%s5092_s5 + $0x3908] sm:$0xff] }
 0x743   : > { %4194 = vmatpush2.xpose.msra.mxu0 %v1917_v15  ;;  %4265 = vmatpush2.xpose.msra.mxu1 %v1919_v16  ;;  %v2052_v15 = vld [vmem:[%s5092_s5 + $0x3918] sm:$0xff]  ;;  %v2049_v16 = vld [vmem:[%s5092_s5 + $0x3900] sm:$0xff] }
 0x744   : > { %4195 = vmatprep.subr.mxu0 %v1910_v17  ;;  %4266 = vmatprep.subr.mxu1 %v1912_v20  ;;  %v2051_v17 = vld [vmem:[%s5092_s5 + $0x3910] sm:$0xff]  ;;  %v2042_v20 = vld [vmem:[%s5092_s5 + $0x38c8] sm:$0xff] }
 0x747   : > { %4196 = vmatpush2.xpose.msra.mxu0 %v1909_v21  ;;  %4267 = vmatpush2.xpose.msra.mxu1 %v1911_v22  ;;  %v2044_v21 = vld [vmem:[%s5092_s5 + $0x38d8] sm:$0xff]  ;;  %v2041_v22 = vld [vmem:[%s5092_s5 + $0x38c0] sm:$0xff] }
 0x748   : > { %4197 = vmatprep.subr.mxu0 %v1902_v23  ;;  %4268 = vmatprep.subr.mxu1 %v1904_v46  ;;  %v2043_v23 = vld [vmem:[%s5092_s5 + $0x38d0] sm:$0xff]  ;;  %v2034_v46 = vld [vmem:[%s5092_s5 + $0x3888] sm:$0xff] }
 0x74b   : > { %4198 = vmatpush2.xpose.msra.mxu0 %v1901_v50  ;;  %4269 = vmatpush2.xpose.msra.mxu1 %v1903_v24  ;;  %v2036_v50 = vld [vmem:[%s5092_s5 + $0x3898] sm:$0xff]  ;;  %v2033_v24 = vld [vmem:[%s5092_s5 + $0x3880] sm:$0xff] }
 0x74c   : > { %4199 = vmatprep.subr.mxu0 %v1894_v25  ;;  %4270 = vmatprep.subr.mxu1 %v1896_v26  ;;  %v2035_v25 = vld [vmem:[%s5092_s5 + $0x3890] sm:$0xff]  ;;  %v2026_v26 = vld [vmem:[%s5092_s5 + $0x3848] sm:$0xff] }
 0x74f   : > { %4200 = vmatpush2.xpose.msra.mxu0 %v1893_v27  ;;  %4271 = vmatpush2.xpose.msra.mxu1 %v1895_v28  ;;  %v2028_v27 = vld [vmem:[%s5092_s5 + $0x3858] sm:$0xff]  ;;  %v2025_v28 = vld [vmem:[%s5092_s5 + $0x3840] sm:$0xff] }
 0x750   : > { %4279 = vmatprep.subr.mxu0 %v2138_v29  ;;  %4350 = vmatprep.subr.mxu1 %v2140_v30  ;;  %v2027_v29 = vld [vmem:[%s5092_s5 + $0x3850] sm:$0xff]  ;;  %v2018_v30 = vld [vmem:[%s5092_s5 + $0x3808] sm:$0xff] }
 0x752   : > { %4202 = vmatmul.mubr.f32.vlgmr.msra.gmra.mxu0 %v4814_v13  ;;  %4273 = vmatmul.mubr.f32.vlgmr.msra.gmra.mxu1 %v4815_v34  ;;  %v2268_v13 = vld [vmem:[%s5092_s5 + $0x3fd8] sm:$0xff]  ;;  %v2265_v34 = vld [vmem:[%s5092_s5 + $0x3fc0] sm:$0xff] }
 0x753   : > { %4280 = vmatpush1.xpose.msra.mxu0 %v2137_v31  ;;  %4351 = vmatpush1.xpose.msra.mxu1 %v2139_v32  ;;  %v2020_v31 = vld [vmem:[%s5092_s5 + $0x3818] sm:$0xff]  ;;  %v2017_v32 = vld [vmem:[%s5092_s5 + $0x3800] sm:$0xff] }
 0x754   : > { %4281 = vmatprep.subr.mxu0 %v2130_v33  ;;  %4352 = vmatprep.subr.mxu1 %v2132_v12  ;;  %v2019_v33 = vld [vmem:[%s5092_s5 + $0x3810] sm:$0xff]  ;;  %v2266_v12 = vld [vmem:[%s5092_s5 + $0x3fc8] sm:$0xff] }
 0x755   : > { %4343 = vmatprep.mubr.f32.mxu0 %v5154_v49  ;;  %4414 = vmatprep.mubr.f32.mxu1 %v5162_v53  ;;  %v2113_v49 = vld [vmem:[%s5092_s5 + $0x3b00] sm:$0xff]  ;;  %v2115_v53 = vld [vmem:[%s5092_s5 + $0x3b10] sm:$0xff] }
 0x757   : > { %4282 = vmatpush1.xpose.msra.mxu0 %v2129_v36  ;;  %4353 = vmatpush1.xpose.msra.mxu1 %v2131_v37  ;;  %v2267_v36 = vld [vmem:[%s5092_s5 + $0x3fd0] sm:$0xff]  ;;  %v2258_v37 = vld [vmem:[%s5092_s5 + $0x3f88] sm:$0xff] }
 0x758   : > { %4283 = vmatprep.subr.mxu0 %v2122_v38  ;;  %4354 = vmatprep.subr.mxu1 %v2124_v39  ;;  %v2260_v38 = vld [vmem:[%s5092_s5 + $0x3f98] sm:$0xff]  ;;  %v2257_v39 = vld [vmem:[%s5092_s5 + $0x3f80] sm:$0xff] }
 0x75b   : > { %4284 = vmatpush1.xpose.msra.mxu0 %v2121_v40  ;;  %4355 = vmatpush1.xpose.msra.mxu1 %v2123_v41  ;;  %v2259_v40 = vld [vmem:[%s5092_s5 + $0x3f90] sm:$0xff]  ;;  %v2250_v41 = vld [vmem:[%s5092_s5 + $0x3f48] sm:$0xff] }
 0x75c   : > { %4285 = vmatprep.subr.mxu0 %v2114_v42  ;;  %4356 = vmatprep.subr.mxu1 %v2116_v43  ;;  %v2252_v42 = vld [vmem:[%s5092_s5 + $0x3f58] sm:$0xff]  ;;  %v2249_v43 = vld [vmem:[%s5092_s5 + $0x3f40] sm:$0xff] }
 0x75f   : > { %4286 = vmatpush1.xpose.msra.mxu0 %v2113_v49  ;;  %4357 = vmatpush1.xpose.msra.mxu1 %v2115_v53  ;;  %v2251_v49 = vld [vmem:[%s5092_s5 + $0x3f50] sm:$0xff]  ;;  %v2242_v53 = vld [vmem:[%s5092_s5 + $0x3f08] sm:$0xff] }
 0x760   : > { %4287 = vmatprep.subr.mxu0 %v2106_v44  ;;  %4358 = vmatprep.subr.mxu1 %v2108_v45  ;;  %v2244_v44 = vld [vmem:[%s5092_s5 + $0x3f18] sm:$0xff]  ;;  %v2241_v45 = vld [vmem:[%s5092_s5 + $0x3f00] sm:$0xff] }
 0x763   : > { %4288 = vmatpush1.xpose.msra.mxu0 %v2105_v47  ;;  %4359 = vmatpush1.xpose.msra.mxu1 %v2107_v48  ;;  %v2243_v47 = vld [vmem:[%s5092_s5 + $0x3f10] sm:$0xff]  ;;  %v2234_v48 = vld [vmem:[%s5092_s5 + $0x3ec8] sm:$0xff] }
 0x764   : > { %4289 = vmatprep.subr.mxu0 %v2098_v51  ;;  %4360 = vmatprep.subr.mxu1 %v2100_v52  ;;  %v2236_v51 = vld [vmem:[%s5092_s5 + $0x3ed8] sm:$0xff]  ;;  %v2233_v52 = vld [vmem:[%s5092_s5 + $0x3ec0] sm:$0xff] }
 0x767   : > { %4290 = vmatpush1.xpose.msra.mxu0 %v2097_v54  ;;  %4361 = vmatpush1.xpose.msra.mxu1 %v2099_v55  ;;  %v2235_v54 = vld [vmem:[%s5092_s5 + $0x3ed0] sm:$0xff]  ;;  %v2226_v55 = vld [vmem:[%s5092_s5 + $0x3e88] sm:$0xff] }
 0x768   : > { %4291 = vmatprep.subr.mxu0 %v2090_v56  ;;  %4362 = vmatprep.subr.mxu1 %v2092_v57  ;;  %v2228_v56 = vld [vmem:[%s5092_s5 + $0x3e98] sm:$0xff]  ;;  %v2225_v57 = vld [vmem:[%s5092_s5 + $0x3e80] sm:$0xff] }
 0x76b   : > { %4292 = vmatpush1.xpose.msra.mxu0 %v2089_v58  ;;  %4363 = vmatpush1.xpose.msra.mxu1 %v2091_v59  ;;  %v2227_v58 = vld [vmem:[%s5092_s5 + $0x3e90] sm:$0xff]  ;;  %v2218_v59 = vld [vmem:[%s5092_s5 + $0x3e48] sm:$0xff] }
 0x76c   : > { %4293 = vmatprep.subr.mxu0 %v2082_v60  ;;  %4364 = vmatprep.subr.mxu1 %v2084_v61  ;;  %v2220_v60 = vld [vmem:[%s5092_s5 + $0x3e58] sm:$0xff]  ;;  %v2217_v61 = vld [vmem:[%s5092_s5 + $0x3e40] sm:$0xff] }
 0x76f   : > { %4294 = vmatpush1.xpose.msra.mxu0 %v2081_v62  ;;  %4365 = vmatpush1.xpose.msra.mxu1 %v2083_v63  ;;  %v2219_v62 = vld [vmem:[%s5092_s5 + $0x3e50] sm:$0xff]  ;;  %v2210_v63 = vld [vmem:[%s5092_s5 + $0x3e08] sm:$0xff] }
 0x770   : > { %4295 = vmatprep.subr.mxu0 %v2074_v0  ;;  %4366 = vmatprep.subr.mxu1 %v2076_v1  ;;  %v2212_v0 = vld [vmem:[%s5092_s5 + $0x3e18] sm:$0xff]  ;;  %v2209_v1 = vld [vmem:[%s5092_s5 + $0x3e00] sm:$0xff] }
 0x773   : > { %4296 = vmatpush1.xpose.msra.mxu0 %v2073_v2  ;;  %4367 = vmatpush1.xpose.msra.mxu1 %v2075_v3  ;;  %v2211_v2 = vld [vmem:[%s5092_s5 + $0x3e10] sm:$0xff]  ;;  %v2202_v3 = vld [vmem:[%s5092_s5 + $0x3dc8] sm:$0xff] }
 0x774   : > { %4297 = vmatprep.subr.mxu0 %v2066_v4  ;;  %4368 = vmatprep.subr.mxu1 %v2068_v5  ;;  %v2204_v4 = vld [vmem:[%s5092_s5 + $0x3dd8] sm:$0xff]  ;;  %v2201_v5 = vld [vmem:[%s5092_s5 + $0x3dc0] sm:$0xff] }
 0x777   : > { %4298 = vmatpush1.xpose.msra.mxu0 %v2065_v6  ;;  %4369 = vmatpush1.xpose.msra.mxu1 %v2067_v7  ;;  %v2203_v6 = vld [vmem:[%s5092_s5 + $0x3dd0] sm:$0xff]  ;;  %v2194_v7 = vld [vmem:[%s5092_s5 + $0x3d88] sm:$0xff] }
 0x778   : > { %4299 = vmatprep.subr.mxu0 %v2058_v8  ;;  %4370 = vmatprep.subr.mxu1 %v2060_v9  ;;  %v2196_v8 = vld [vmem:[%s5092_s5 + $0x3d98] sm:$0xff]  ;;  %v2193_v9 = vld [vmem:[%s5092_s5 + $0x3d80] sm:$0xff] }
 0x77b   : > { %4300 = vmatpush1.xpose.msra.mxu0 %v2057_v10  ;;  %4371 = vmatpush1.xpose.msra.mxu1 %v2059_v11  ;;  %v2195_v10 = vld [vmem:[%s5092_s5 + $0x3d90] sm:$0xff]  ;;  %v2186_v11 = vld [vmem:[%s5092_s5 + $0x3d48] sm:$0xff] }
 0x77c   : > { %4301 = vmatprep.subr.mxu0 %v2050_v14  ;;  %4372 = vmatprep.subr.mxu1 %v2052_v15  ;;  %v2188_v14 = vld [vmem:[%s5092_s5 + $0x3d58] sm:$0xff]  ;;  %v2185_v15 = vld [vmem:[%s5092_s5 + $0x3d40] sm:$0xff] }
 0x77f   : > { %4302 = vmatpush1.xpose.msra.mxu0 %v2049_v16  ;;  %4373 = vmatpush1.xpose.msra.mxu1 %v2051_v17  ;;  %v2187_v16 = vld [vmem:[%s5092_s5 + $0x3d50] sm:$0xff]  ;;  %v2178_v17 = vld [vmem:[%s5092_s5 + $0x3d08] sm:$0xff] }
 0x780   : > { %4303 = vmatprep.subr.mxu0 %v2042_v20  ;;  %4374 = vmatprep.subr.mxu1 %v2044_v21  ;;  %v2180_v20 = vld [vmem:[%s5092_s5 + $0x3d18] sm:$0xff]  ;;  %v2177_v21 = vld [vmem:[%s5092_s5 + $0x3d00] sm:$0xff] }
 0x783   : > { %4304 = vmatpush1.xpose.msra.mxu0 %v2041_v22  ;;  %4375 = vmatpush1.xpose.msra.mxu1 %v2043_v23  ;;  %v2179_v22 = vld [vmem:[%s5092_s5 + $0x3d10] sm:$0xff]  ;;  %v2170_v23 = vld [vmem:[%s5092_s5 + $0x3cc8] sm:$0xff] }
 0x784   : > { %4305 = vmatprep.subr.mxu0 %v2034_v46  ;;  %4376 = vmatprep.subr.mxu1 %v2036_v50  ;;  %v2172_v46 = vld [vmem:[%s5092_s5 + $0x3cd8] sm:$0xff]  ;;  %v2169_v50 = vld [vmem:[%s5092_s5 + $0x3cc0] sm:$0xff] }
 0x787   : > { %4306 = vmatpush1.xpose.msra.mxu0 %v2033_v24  ;;  %4377 = vmatpush1.xpose.msra.mxu1 %v2035_v25  ;;  %v2171_v24 = vld [vmem:[%s5092_s5 + $0x3cd0] sm:$0xff]  ;;  %v2162_v25 = vld [vmem:[%s5092_s5 + $0x3c88] sm:$0xff] }
 0x788   : > { %4307 = vmatprep.subr.mxu0 %v2026_v26  ;;  %4378 = vmatprep.subr.mxu1 %v2028_v27  ;;  %v2164_v26 = vld [vmem:[%s5092_s5 + $0x3c98] sm:$0xff]  ;;  %v2161_v27 = vld [vmem:[%s5092_s5 + $0x3c80] sm:$0xff] }
 0x78b   : > { %4308 = vmatpush1.xpose.msra.mxu0 %v2025_v28  ;;  %4379 = vmatpush1.xpose.msra.mxu1 %v2027_v29  ;;  %v2163_v28 = vld [vmem:[%s5092_s5 + $0x3c90] sm:$0xff]  ;;  %v2154_v29 = vld [vmem:[%s5092_s5 + $0x3c48] sm:$0xff] }
 0x78c   : > { %4309 = vmatprep.subr.mxu0 %v2018_v30  ;;  %4380 = vmatprep.subr.mxu1 %v2020_v31  ;;  %v2156_v30 = vld [vmem:[%s5092_s5 + $0x3c58] sm:$0xff]  ;;  %v2153_v31 = vld [vmem:[%s5092_s5 + $0x3c40] sm:$0xff] }
 0x78f   : > { %4310 = vmatpush1.xpose.msra.mxu0 %v2017_v32  ;;  %4381 = vmatpush1.xpose.msra.mxu1 %v2019_v33  ;;  %v2155_v32 = vld [vmem:[%s5092_s5 + $0x3c50] sm:$0xff]  ;;  %v2146_v33 = vld [vmem:[%s5092_s5 + $0x3c08] sm:$0xff] }
 0x790   : > { %4311 = vmatprep.subr.mxu0 %v2266_v12  ;;  %4382 = vmatprep.subr.mxu1 %v2268_v13  ;;  %v2148_v12 = vld [vmem:[%s5092_s5 + $0x3c18] sm:$0xff]  ;;  %v2145_v13 = vld [vmem:[%s5092_s5 + $0x3c00] sm:$0xff] }
 0x793   : > { %4312 = vmatpush2.xpose.msra.mxu0 %v2265_v34  ;;  %4383 = vmatpush2.xpose.msra.mxu1 %v2267_v36  ;;  %v2147_v34 = vld [vmem:[%s5092_s5 + $0x3c10] sm:$0xff]  ;;  %v2142_v36 = vld [vmem:[%s5092_s5 + $0x3be8] sm:$0xff] }
 0x794   : > { %4313 = vmatprep.subr.mxu0 %v2258_v37  ;;  %4384 = vmatprep.subr.mxu1 %v2260_v38  ;;  %v2144_v37 = vld [vmem:[%s5092_s5 + $0x3bf8] sm:$0xff]  ;;  %v2141_v38 = vld [vmem:[%s5092_s5 + $0x3be0] sm:$0xff] }
 0x797   : > { %4314 = vmatpush2.xpose.msra.mxu0 %v2257_v39  ;;  %4385 = vmatpush2.xpose.msra.mxu1 %v2259_v40  ;;  %v2143_v39 = vld [vmem:[%s5092_s5 + $0x3bf0] sm:$0xff]  ;;  %v2134_v40 = vld [vmem:[%s5092_s5 + $0x3ba8] sm:$0xff] }
 0x798   : > { %4315 = vmatprep.subr.mxu0 %v2250_v41  ;;  %4386 = vmatprep.subr.mxu1 %v2252_v42  ;;  %v2136_v41 = vld [vmem:[%s5092_s5 + $0x3bb8] sm:$0xff]  ;;  %v4816_v42 = vld [vmem:[#allocation5] sm:$0xff] }
 0x79b   : > { %4316 = vmatpush2.xpose.msra.mxu0 %v2249_v43  ;;  %4387 = vmatpush2.xpose.msra.mxu1 %v2251_v49  ;;  %v4817_v43 = vld [vmem:[#allocation5 + $0x8] sm:$0xff]  ;;  %v2133_v49 = vld [vmem:[%s5092_s5 + $0x3ba0] sm:$0xff] }
 0x79c   : > { %4317 = vmatprep.subr.mxu0 %v2242_v53  ;;  %4388 = vmatprep.subr.mxu1 %v2244_v44  ;;  %v2135_v53 = vld [vmem:[%s5092_s5 + $0x3bb0] sm:$0xff]  ;;  %v2126_v44 = vld [vmem:[%s5092_s5 + $0x3b68] sm:$0xff] }
 0x79f   : > { %4318 = vmatpush2.xpose.msra.mxu0 %v2241_v45  ;;  %4389 = vmatpush2.xpose.msra.mxu1 %v2243_v47  ;;  %v2128_v45 = vld [vmem:[%s5092_s5 + $0x3b78] sm:$0xff]  ;;  %v2125_v47 = vld [vmem:[%s5092_s5 + $0x3b60] sm:$0xff] }
 0x7a0   : > { %4319 = vmatprep.subr.mxu0 %v2234_v48  ;;  %4390 = vmatprep.subr.mxu1 %v2236_v51  ;;  %v2127_v48 = vld [vmem:[%s5092_s5 + $0x3b70] sm:$0xff]  ;;  %v2118_v51 = vld [vmem:[%s5092_s5 + $0x3b28] sm:$0xff] }
 0x7a3   : > { %4320 = vmatpush2.xpose.msra.mxu0 %v2233_v52  ;;  %4391 = vmatpush2.xpose.msra.mxu1 %v2235_v54  ;;  %v2120_v52 = vld [vmem:[%s5092_s5 + $0x3b38] sm:$0xff]  ;;  %v2110_v54 = vld [vmem:[%s5092_s5 + $0x3ae8] sm:$0xff] }
 0x7a4   : > { %4321 = vmatprep.subr.mxu0 %v2226_v55  ;;  %4392 = vmatprep.subr.mxu1 %v2228_v56  ;;  %v2112_v55 = vld [vmem:[%s5092_s5 + $0x3af8] sm:$0xff]  ;;  %v2109_v56 = vld [vmem:[%s5092_s5 + $0x3ae0] sm:$0xff] }
 0x7a7   : > { %4322 = vmatpush2.xpose.msra.mxu0 %v2225_v57  ;;  %4393 = vmatpush2.xpose.msra.mxu1 %v2227_v58  ;;  %v2111_v57 = vld [vmem:[%s5092_s5 + $0x3af0] sm:$0xff]  ;;  %v2102_v58 = vld [vmem:[%s5092_s5 + $0x3aa8] sm:$0xff] }
 0x7a8   : > { %4323 = vmatprep.subr.mxu0 %v2218_v59  ;;  %4394 = vmatprep.subr.mxu1 %v2220_v60  ;;  %v2104_v59 = vld [vmem:[%s5092_s5 + $0x3ab8] sm:$0xff]  ;;  %v2101_v60 = vld [vmem:[%s5092_s5 + $0x3aa0] sm:$0xff] }
 0x7ab   : > { %4324 = vmatpush2.xpose.msra.mxu0 %v2217_v61  ;;  %4395 = vmatpush2.xpose.msra.mxu1 %v2219_v62  ;;  %v2103_v61 = vld [vmem:[%s5092_s5 + $0x3ab0] sm:$0xff]  ;;  %v2094_v62 = vld [vmem:[%s5092_s5 + $0x3a68] sm:$0xff] }
 0x7ac   : > { %4325 = vmatprep.subr.mxu0 %v2210_v63  ;;  %4396 = vmatprep.subr.mxu1 %v2212_v0  ;;  %v2096_v63 = vld [vmem:[%s5092_s5 + $0x3a78] sm:$0xff]  ;;  %v2093_v0 = vld [vmem:[%s5092_s5 + $0x3a60] sm:$0xff] }
 0x7af   : > { %4326 = vmatpush2.xpose.msra.mxu0 %v2209_v1  ;;  %4397 = vmatpush2.xpose.msra.mxu1 %v2211_v2  ;;  %v2095_v1 = vld [vmem:[%s5092_s5 + $0x3a70] sm:$0xff]  ;;  %v2086_v2 = vld [vmem:[%s5092_s5 + $0x3a28] sm:$0xff] }
 0x7b0   : > { %4327 = vmatprep.subr.mxu0 %v2202_v3  ;;  %4398 = vmatprep.subr.mxu1 %v2204_v4  ;;  %v2088_v3 = vld [vmem:[%s5092_s5 + $0x3a38] sm:$0xff]  ;;  %v2085_v4 = vld [vmem:[%s5092_s5 + $0x3a20] sm:$0xff] }
 0x7b3   : > { %4328 = vmatpush2.xpose.msra.mxu0 %v2201_v5  ;;  %4399 = vmatpush2.xpose.msra.mxu1 %v2203_v6  ;;  %v2087_v5 = vld [vmem:[%s5092_s5 + $0x3a30] sm:$0xff]  ;;  %v2078_v6 = vld [vmem:[%s5092_s5 + $0x39e8] sm:$0xff] }
 0x7b4   : > { %4329 = vmatprep.subr.mxu0 %v2194_v7  ;;  %4400 = vmatprep.subr.mxu1 %v2196_v8  ;;  %v2080_v7 = vld [vmem:[%s5092_s5 + $0x39f8] sm:$0xff]  ;;  %v2077_v8 = vld [vmem:[%s5092_s5 + $0x39e0] sm:$0xff] }
 0x7b7   : > { %4330 = vmatpush2.xpose.msra.mxu0 %v2193_v9  ;;  %4401 = vmatpush2.xpose.msra.mxu1 %v2195_v10  ;;  %v2079_v9 = vld [vmem:[%s5092_s5 + $0x39f0] sm:$0xff]  ;;  %v2070_v10 = vld [vmem:[%s5092_s5 + $0x39a8] sm:$0xff] }
 0x7b8   : > { %4331 = vmatprep.subr.mxu0 %v2186_v11  ;;  %4402 = vmatprep.subr.mxu1 %v2188_v14  ;;  %v2072_v11 = vld [vmem:[%s5092_s5 + $0x39b8] sm:$0xff]  ;;  %v2069_v14 = vld [vmem:[%s5092_s5 + $0x39a0] sm:$0xff] }
 0x7bb   : > { %4332 = vmatpush2.xpose.msra.mxu0 %v2185_v15  ;;  %4403 = vmatpush2.xpose.msra.mxu1 %v2187_v16  ;;  %v2071_v15 = vld [vmem:[%s5092_s5 + $0x39b0] sm:$0xff]  ;;  %v2062_v16 = vld [vmem:[%s5092_s5 + $0x3968] sm:$0xff] }
 0x7bc   : > { %4333 = vmatprep.subr.mxu0 %v2178_v17  ;;  %4404 = vmatprep.subr.mxu1 %v2180_v20  ;;  %v2064_v17 = vld [vmem:[%s5092_s5 + $0x3978] sm:$0xff]  ;;  %v2061_v20 = vld [vmem:[%s5092_s5 + $0x3960] sm:$0xff] }
 0x7bf   : > { %4334 = vmatpush2.xpose.msra.mxu0 %v2177_v21  ;;  %4405 = vmatpush2.xpose.msra.mxu1 %v2179_v22  ;;  %v2063_v21 = vld [vmem:[%s5092_s5 + $0x3970] sm:$0xff]  ;;  %v2054_v22 = vld [vmem:[%s5092_s5 + $0x3928] sm:$0xff] }
 0x7c0   : > { %4335 = vmatprep.subr.mxu0 %v2170_v23  ;;  %4406 = vmatprep.subr.mxu1 %v2172_v46  ;;  %v2056_v23 = vld [vmem:[%s5092_s5 + $0x3938] sm:$0xff]  ;;  %v2053_v46 = vld [vmem:[%s5092_s5 + $0x3920] sm:$0xff] }
 0x7c3   : > { %4336 = vmatpush2.xpose.msra.mxu0 %v2169_v50  ;;  %4407 = vmatpush2.xpose.msra.mxu1 %v2171_v24  ;;  %v2055_v50 = vld [vmem:[%s5092_s5 + $0x3930] sm:$0xff]  ;;  %v2046_v24 = vld [vmem:[%s5092_s5 + $0x38e8] sm:$0xff] }
 0x7c4   : > { %4337 = vmatprep.subr.mxu0 %v2162_v25  ;;  %4408 = vmatprep.subr.mxu1 %v2164_v26  ;;  %v2048_v25 = vld [vmem:[%s5092_s5 + $0x38f8] sm:$0xff]  ;;  %v2045_v26 = vld [vmem:[%s5092_s5 + $0x38e0] sm:$0xff] }
 0x7c7   : > { %4338 = vmatpush2.xpose.msra.mxu0 %v2161_v27  ;;  %4409 = vmatpush2.xpose.msra.mxu1 %v2163_v28  ;;  %v2047_v27 = vld [vmem:[%s5092_s5 + $0x38f0] sm:$0xff]  ;;  %v2038_v28 = vld [vmem:[%s5092_s5 + $0x38a8] sm:$0xff] }
 0x7c8   : > { %4339 = vmatprep.subr.mxu0 %v2154_v29  ;;  %4410 = vmatprep.subr.mxu1 %v2156_v30  ;;  %v2040_v29 = vld [vmem:[%s5092_s5 + $0x38b8] sm:$0xff]  ;;  %v2037_v30 = vld [vmem:[%s5092_s5 + $0x38a0] sm:$0xff] }
 0x7cb   : > { %4340 = vmatpush2.xpose.msra.mxu0 %v2153_v31  ;;  %4411 = vmatpush2.xpose.msra.mxu1 %v2155_v32  ;;  %v2039_v31 = vld [vmem:[%s5092_s5 + $0x38b0] sm:$0xff]  ;;  %v2030_v32 = vld [vmem:[%s5092_s5 + $0x3868] sm:$0xff] }
 0x7cc   : > { %4341 = vmatprep.subr.mxu0 %v2146_v33  ;;  %4412 = vmatprep.subr.mxu1 %v2148_v12  ;;  %v2032_v33 = vld [vmem:[%s5092_s5 + $0x3878] sm:$0xff]  ;;  %v4061_v12 = vpop.f32.mrf.mxu0 }
 0x7cf   : > { %4342 = vmatpush2.xpose.msra.mxu0 %v2145_v13  ;;  %4413 = vmatpush2.xpose.msra.mxu1 %v2147_v34  ;;  %v2029_v13 = vld [vmem:[%s5092_s5 + $0x3860] sm:$0xff]  ;;  %v2031_v34 = vld [vmem:[%s5092_s5 + $0x3870] sm:$0xff] }
 0x7d0   : > { %4421 = vmatprep.subr.mxu0 %v2142_v36  ;;  %4492 = vmatprep.subr.mxu1 %v2144_v37  ;;  %v2022_v36 = vld [vmem:[%s5092_s5 + $0x3828] sm:$0xff]  ;;  %v2024_v37 = vld [vmem:[%s5092_s5 + $0x3838] sm:$0xff] }
 0x7d2   : > { %4344 = vmatmul.mubr.f32.vlgmr.msra.gmra.mxu0 %v4816_v42  ;;  %4415 = vmatmul.mubr.f32.vlgmr.msra.gmra.mxu1 %v4817_v43  ;;  %v4062_v42 = vadd.f32 %v4061_v12, %v5587_v35  ;;  %v2270_v43 = vld [vmem:[%s5092_s5 + $0x3fe8] sm:$0xff] }
 0x7d3   : > { %4422 = vmatpush1.xpose.msra.mxu0 %v2141_v38  ;;  %4493 = vmatpush1.xpose.msra.mxu1 %v2143_v39  ;;  %v4132_v38 = vpop.f32.mrf.mxu1  ;;  %v4063_v39 = vpop.f32.mrf.mxu0  ;;  %v2190_v12 = vld [vmem:[%s5092_s5 + $0x3d68] sm:$0xff] }
 0x7d4   : > { %4423 = vmatprep.subr.mxu0 %v2134_v40  ;;  %4494 = vmatprep.subr.mxu1 %v2136_v41  ;;  %v2021_v40 = vld [vmem:[%s5092_s5 + $0x3820] sm:$0xff]  ;;  %v2023_v41 = vld [vmem:[%s5092_s5 + $0x3830] sm:$0xff] }
 0x7d5   : > { %4485 = vmatprep.mubr.f32.mxu0 %v5259_v18  ;;  %4556 = vmatprep.mubr.f32.mxu1 %v5263_v19  ;;  %v2117_v18 = vld [vmem:[%s5092_s5 + $0x3b20] sm:$0xff]  ;;  %v2119_v19 = vld [vmem:[%s5092_s5 + $0x3b30] sm:$0xff] }
 0x7d7   : > { %4424 = vmatpush1.xpose.msra.mxu0 %v2133_v49  ;;  %4495 = vmatpush1.xpose.msra.mxu1 %v2135_v53  ;;  %v2272_v49 = vld [vmem:[%s5092_s5 + $0x3ff8] sm:$0xff]  ;;  %v4064_v53 = vadd.f32 %v4063_v39, %v5587_v35  ;;  %v2181_v39 = vld [vmem:[%s5092_s5 + $0x3d20] sm:$0xff] }
 0x7d8   : > { %4425 = vmatprep.subr.mxu0 %v2126_v44  ;;  %4496 = vmatprep.subr.mxu1 %v2128_v45  ;;  %v4134_v44 = vpop.f32.mrf.mxu1  ;;  %v2269_v45 = vld [vmem:[%s5092_s5 + $0x3fe0] sm:$0xff] }
 0x7db   : > { %4426 = vmatpush1.xpose.msra.mxu0 %v2125_v47  ;;  %4497 = vmatpush1.xpose.msra.mxu1 %v2127_v48  ;;  %v2271_v47 = vld [vmem:[%s5092_s5 + $0x3ff0] sm:$0xff]  ;;  %v4133_v48 = vadd.f32 %v4132_v38, %v4062_v42  ;;  %v2184_v38 = vld [vmem:[%s5092_s5 + $0x3d38] sm:$0xff] }
 0x7dc   : > { %4427 = vmatprep.subr.mxu0 %v2118_v51  ;;  %4498 = vmatprep.subr.mxu1 %v2120_v52  ;;  %v2262_v51 = vld [vmem:[%s5092_s5 + $0x3fa8] sm:$0xff]  ;;  %v2264_v52 = vld [vmem:[%s5092_s5 + $0x3fb8] sm:$0xff] }
 0x7dd   : > { %v2176_v42 = vld [vmem:[%s5092_s5 + $0x3cf8] sm:$0xff] }
 0x7df   : > { %4428 = vmatpush1.xpose.msra.mxu0 %v2117_v18  ;;  %4499 = vmatpush1.xpose.msra.mxu1 %v2119_v19 }
 0x7e0   : > { %4429 = vmatprep.subr.mxu0 %v2110_v54  ;;  %4500 = vmatprep.subr.mxu1 %v2112_v55  ;;  %v4135_v54 = vadd.f32 %v4134_v44, %v4064_v53  ;;  %v2166_v53 = vld [vmem:[%s5092_s5 + $0x3ca8] sm:$0xff]  ;;  %v2168_v44 = vld [vmem:[%s5092_s5 + $0x3cb8] sm:$0xff] }
 0x7e3   : > { %4430 = vmatpush1.xpose.msra.mxu0 %v2109_v56  ;;  %4501 = vmatpush1.xpose.msra.mxu1 %v2111_v57 }
 0x7e4   : > { %4431 = vmatprep.subr.mxu0 %v2102_v58  ;;  %4502 = vmatprep.subr.mxu1 %v2104_v59  ;;  %v2261_v58 = vld [vmem:[%s5092_s5 + $0x3fa0] sm:$0xff]  ;;  %v2263_v59 = vld [vmem:[%s5092_s5 + $0x3fb0] sm:$0xff] }
 0x7e7   : > { %4432 = vmatpush1.xpose.msra.mxu0 %v2101_v60  ;;  %4503 = vmatpush1.xpose.msra.mxu1 %v2103_v61  ;;  %v2254_v61 = vld [vmem:[%s5092_s5 + $0x3f68] sm:$0xff] }
 0x7e8   : > { %4433 = vmatprep.subr.mxu0 %v2094_v62  ;;  %4504 = vmatprep.subr.mxu1 %v2096_v63  ;;  %v2256_v62 = vld [vmem:[%s5092_s5 + $0x3f78] sm:$0xff] }
 0x7eb   : > { %4434 = vmatpush1.xpose.msra.mxu0 %v2093_v0  ;;  %4505 = vmatpush1.xpose.msra.mxu1 %v2095_v1  ;;  %v2253_v1 = vld [vmem:[%s5092_s5 + $0x3f60] sm:$0xff] }
 0x7ec   : > { %4435 = vmatprep.subr.mxu0 %v2086_v2  ;;  %4506 = vmatprep.subr.mxu1 %v2088_v3  ;;  %v2255_v2 = vld [vmem:[%s5092_s5 + $0x3f70] sm:$0xff] }
 0x7ef   : > { %4436 = vmatpush1.xpose.msra.mxu0 %v2085_v4  ;;  %4507 = vmatpush1.xpose.msra.mxu1 %v2087_v5  ;;  %v2246_v4 = vld [vmem:[%s5092_s5 + $0x3f28] sm:$0xff]  ;;  %v2248_v5 = vld [vmem:[%s5092_s5 + $0x3f38] sm:$0xff] }
 0x7f0   : > { %4437 = vmatprep.subr.mxu0 %v2078_v6  ;;  %4508 = vmatprep.subr.mxu1 %v2080_v7  ;;  %v2245_v6 = vld [vmem:[%s5092_s5 + $0x3f20] sm:$0xff]  ;;  %v2247_v7 = vld [vmem:[%s5092_s5 + $0x3f30] sm:$0xff] }
 0x7f3   : > { %4438 = vmatpush1.xpose.msra.mxu0 %v2077_v8  ;;  %4509 = vmatpush1.xpose.msra.mxu1 %v2079_v9  ;;  %v2238_v8 = vld [vmem:[%s5092_s5 + $0x3ee8] sm:$0xff]  ;;  %v2240_v9 = vld [vmem:[%s5092_s5 + $0x3ef8] sm:$0xff] }
 0x7f4   : > { %4439 = vmatprep.subr.mxu0 %v2070_v10  ;;  %4510 = vmatprep.subr.mxu1 %v2072_v11  ;;  %v2237_v10 = vld [vmem:[%s5092_s5 + $0x3ee0] sm:$0xff]  ;;  %v2239_v11 = vld [vmem:[%s5092_s5 + $0x3ef0] sm:$0xff] }
 0x7f7   : > { %4440 = vmatpush1.xpose.msra.mxu0 %v2069_v14  ;;  %4511 = vmatpush1.xpose.msra.mxu1 %v2071_v15  ;;  %v2230_v14 = vld [vmem:[%s5092_s5 + $0x3ea8] sm:$0xff]  ;;  %v2232_v15 = vld [vmem:[%s5092_s5 + $0x3eb8] sm:$0xff] }
 0x7f8   : > { %4441 = vmatprep.subr.mxu0 %v2062_v16  ;;  %4512 = vmatprep.subr.mxu1 %v2064_v17  ;;  %v2229_v16 = vld [vmem:[%s5092_s5 + $0x3ea0] sm:$0xff]  ;;  %v2231_v17 = vld [vmem:[%s5092_s5 + $0x3eb0] sm:$0xff] }
 0x7fb   : > { %4442 = vmatpush1.xpose.msra.mxu0 %v2061_v20  ;;  %4513 = vmatpush1.xpose.msra.mxu1 %v2063_v21  ;;  %v2222_v20 = vld [vmem:[%s5092_s5 + $0x3e68] sm:$0xff]  ;;  %v2224_v21 = vld [vmem:[%s5092_s5 + $0x3e78] sm:$0xff] }
 0x7fc   : > { %4443 = vmatprep.subr.mxu0 %v2054_v22  ;;  %4514 = vmatprep.subr.mxu1 %v2056_v23  ;;  %v2221_v22 = vld [vmem:[%s5092_s5 + $0x3e60] sm:$0xff]  ;;  %v2223_v23 = vld [vmem:[%s5092_s5 + $0x3e70] sm:$0xff] }
 0x7ff   : > { %4444 = vmatpush1.xpose.msra.mxu0 %v2053_v46  ;;  %4515 = vmatpush1.xpose.msra.mxu1 %v2055_v50  ;;  %v2214_v46 = vld [vmem:[%s5092_s5 + $0x3e28] sm:$0xff]  ;;  %v2216_v50 = vld [vmem:[%s5092_s5 + $0x3e38] sm:$0xff] }
 0x800   : > { %4445 = vmatprep.subr.mxu0 %v2046_v24  ;;  %4516 = vmatprep.subr.mxu1 %v2048_v25  ;;  %v2213_v24 = vld [vmem:[%s5092_s5 + $0x3e20] sm:$0xff]  ;;  %v2215_v25 = vld [vmem:[%s5092_s5 + $0x3e30] sm:$0xff] }
 0x803   : > { %4446 = vmatpush1.xpose.msra.mxu0 %v2045_v26  ;;  %4517 = vmatpush1.xpose.msra.mxu1 %v2047_v27  ;;  %v2206_v26 = vld [vmem:[%s5092_s5 + $0x3de8] sm:$0xff]  ;;  %v2208_v27 = vld [vmem:[%s5092_s5 + $0x3df8] sm:$0xff] }
 0x804   : > { %4447 = vmatprep.subr.mxu0 %v2038_v28  ;;  %4518 = vmatprep.subr.mxu1 %v2040_v29  ;;  %v2205_v28 = vld [vmem:[%s5092_s5 + $0x3de0] sm:$0xff]  ;;  %v2207_v29 = vld [vmem:[%s5092_s5 + $0x3df0] sm:$0xff] }
 0x807   : > { %4448 = vmatpush1.xpose.msra.mxu0 %v2037_v30  ;;  %4519 = vmatpush1.xpose.msra.mxu1 %v2039_v31  ;;  %v2198_v30 = vld [vmem:[%s5092_s5 + $0x3da8] sm:$0xff]  ;;  %v2200_v31 = vld [vmem:[%s5092_s5 + $0x3db8] sm:$0xff] }
 0x808   : > { %4449 = vmatprep.subr.mxu0 %v2030_v32  ;;  %4520 = vmatprep.subr.mxu1 %v2032_v33  ;;  %v2197_v32 = vld [vmem:[%s5092_s5 + $0x3da0] sm:$0xff]  ;;  %v2199_v33 = vld [vmem:[%s5092_s5 + $0x3db0] sm:$0xff] }
 0x80b   : > { %4450 = vmatpush1.xpose.msra.mxu0 %v2029_v13  ;;  %4521 = vmatpush1.xpose.msra.mxu1 %v2031_v34  ;;  %v2192_v13 = vld [vmem:[%s5092_s5 + $0x3d78] sm:$0xff]  ;;  %v2189_v34 = vld [vmem:[%s5092_s5 + $0x3d60] sm:$0xff] }
 0x80c   : > { %4451 = vmatprep.subr.mxu0 %v2022_v36  ;;  %4522 = vmatprep.subr.mxu1 %v2024_v37  ;;  %v2191_v36 = vld [vmem:[%s5092_s5 + $0x3d70] sm:$0xff]  ;;  %v2182_v37 = vld [vmem:[%s5092_s5 + $0x3d28] sm:$0xff] }
 0x80f   : > { %4452 = vmatpush1.xpose.msra.mxu0 %v2021_v40  ;;  %4523 = vmatpush1.xpose.msra.mxu1 %v2023_v41  ;;  %v2183_v40 = vld [vmem:[%s5092_s5 + $0x3d30] sm:$0xff]  ;;  %v2174_v41 = vld [vmem:[%s5092_s5 + $0x3ce8] sm:$0xff] }
 0x810   : > { %4453 = vmatprep.subr.mxu0 %v2270_v43  ;;  %4524 = vmatprep.subr.mxu1 %v2272_v49  ;;  %v2173_v43 = vld [vmem:[%s5092_s5 + $0x3ce0] sm:$0xff]  ;;  %v2175_v49 = vld [vmem:[%s5092_s5 + $0x3cf0] sm:$0xff] }
 0x812   : > { %v4203_v18 = vpop.f32.mrf.mxu0  ;;  %v4274_v19 = vpop.f32.mrf.mxu1 }
 0x813   : > { %v4204_v55 = vadd.f32 %v4203_v18, %v4133_v48  ;;  %4454 = vmatpush2.xpose.msra.mxu0 %v2269_v45  ;;  %4525 = vmatpush2.xpose.msra.mxu1 %v2271_v47  ;;  %v2165_v45 = vld [vmem:[%s5092_s5 + $0x3ca0] sm:$0xff]  ;;  %v2167_v47 = vld [vmem:[%s5092_s5 + $0x3cb0] sm:$0xff]  ;;  %v2158_v48 = vld [vmem:[%s5092_s5 + $0x3c68] sm:$0xff] }
 0x814   : > { %v4205_v56 = vpop.f32.mrf.mxu0  ;;  %v4276_v57 = vpop.f32.mrf.mxu1  ;;  %4455 = vmatprep.subr.mxu0 %v2262_v51  ;;  %4526 = vmatprep.subr.mxu1 %v2264_v52  ;;  %v2160_v51 = vld [vmem:[%s5092_s5 + $0x3c78] sm:$0xff]  ;;  %v2157_v52 = vld [vmem:[%s5092_s5 + $0x3c60] sm:$0xff]  ;;  %v2159_v18 = vld [vmem:[%s5092_s5 + $0x3c70] sm:$0xff] }
 0x815   : > { %v4206_v60 = vadd.f32 %v4205_v56, %v4135_v54  ;;  %v4275_v63 = vadd.f32 %v4274_v19, %v4204_v55  ;;  %v2150_v19 = vld [vmem:[%s5092_s5 + $0x3c28] sm:$0xff]  ;;  %v2152_v54 = vld [vmem:[%s5092_s5 + $0x3c38] sm:$0xff]  ;;  %v2149_v55 = vld [vmem:[%s5092_s5 + $0x3c20] sm:$0xff] }
 0x816   : > { %v2151_v56 = vld [vmem:[%s5092_s5 + $0x3c30] sm:$0xff] }
 0x817   : > { %v4277_v0 = vadd.f32 %v4276_v57, %v4206_v60  ;;  %4456 = vmatpush2.xpose.msra.mxu0 %v2261_v58  ;;  %4527 = vmatpush2.xpose.msra.mxu1 %v2263_v59  ;;  %v4818_v57 = vld [vmem:[#allocation5 + $0x10] sm:$0xff]  ;;  %v4819_v58 = vld [vmem:[#allocation5 + $0x18] sm:$0xff] }
 0x818   : > { %4457 = vmatprep.subr.mxu0 %v2254_v61  ;;  %4528 = vmatprep.subr.mxu1 %v2256_v62 }
 0x819   : > { %v4585_v3 = vcombine.low %v4275_v63, %v4277_v0 }
 0x81b   : > { %4601 = vst [vmem:[%s5608_s11 + $0x30] sm:$0xff] %v4585_v3  ;;  %4458 = vmatpush2.xpose.msra.mxu0 %v2253_v1  ;;  %4529 = vmatpush2.xpose.msra.mxu1 %v2255_v2 }
 0x81c   : > { %4459 = vmatprep.subr.mxu0 %v2246_v4  ;;  %4530 = vmatprep.subr.mxu1 %v2248_v5 }
 0x81f   : > { %4460 = vmatpush2.xpose.msra.mxu0 %v2245_v6  ;;  %4531 = vmatpush2.xpose.msra.mxu1 %v2247_v7 }
 0x820   : > { %4461 = vmatprep.subr.mxu0 %v2238_v8  ;;  %4532 = vmatprep.subr.mxu1 %v2240_v9 }
 0x823   : > { %4462 = vmatpush2.xpose.msra.mxu0 %v2237_v10  ;;  %4533 = vmatpush2.xpose.msra.mxu1 %v2239_v11 }
 0x824   : > { %4463 = vmatprep.subr.mxu0 %v2230_v14  ;;  %4534 = vmatprep.subr.mxu1 %v2232_v15 }
 0x827   : > { %4464 = vmatpush2.xpose.msra.mxu0 %v2229_v16  ;;  %4535 = vmatpush2.xpose.msra.mxu1 %v2231_v17 }
 0x828   : > { %4465 = vmatprep.subr.mxu0 %v2222_v20  ;;  %4536 = vmatprep.subr.mxu1 %v2224_v21 }
 0x82b   : > { %4466 = vmatpush2.xpose.msra.mxu0 %v2221_v22  ;;  %4537 = vmatpush2.xpose.msra.mxu1 %v2223_v23 }
 0x82c   : > { %4467 = vmatprep.subr.mxu0 %v2214_v46  ;;  %4538 = vmatprep.subr.mxu1 %v2216_v50 }
 0x82f   : > { %4468 = vmatpush2.xpose.msra.mxu0 %v2213_v24  ;;  %4539 = vmatpush2.xpose.msra.mxu1 %v2215_v25 }
 0x830   : > { %4469 = vmatprep.subr.mxu0 %v2206_v26  ;;  %4540 = vmatprep.subr.mxu1 %v2208_v27 }
 0x833   : > { %4470 = vmatpush2.xpose.msra.mxu0 %v2205_v28  ;;  %4541 = vmatpush2.xpose.msra.mxu1 %v2207_v29 }
 0x834   : > { %4471 = vmatprep.subr.mxu0 %v2198_v30  ;;  %4542 = vmatprep.subr.mxu1 %v2200_v31 }
 0x837   : > { %4472 = vmatpush2.xpose.msra.mxu0 %v2197_v32  ;;  %4543 = vmatpush2.xpose.msra.mxu1 %v2199_v33 }
 0x838   : > { %4473 = vmatprep.subr.mxu0 %v2190_v12  ;;  %4544 = vmatprep.subr.mxu1 %v2192_v13 }
 0x83b   : > { %4474 = vmatpush2.xpose.msra.mxu0 %v2189_v34  ;;  %4545 = vmatpush2.xpose.msra.mxu1 %v2191_v36 }
 0x83c   : > { %4475 = vmatprep.subr.mxu0 %v2182_v37  ;;  %4546 = vmatprep.subr.mxu1 %v2184_v38 }
 0x83f   : > { %4476 = vmatpush2.xpose.msra.mxu0 %v2181_v39  ;;  %4547 = vmatpush2.xpose.msra.mxu1 %v2183_v40 }
 0x840   : > { %4477 = vmatprep.subr.mxu0 %v2174_v41  ;;  %4548 = vmatprep.subr.mxu1 %v2176_v42 }
 0x843   : > { %4478 = vmatpush2.xpose.msra.mxu0 %v2173_v43  ;;  %4549 = vmatpush2.xpose.msra.mxu1 %v2175_v49 }
 0x844   : > { %4479 = vmatprep.subr.mxu0 %v2166_v53  ;;  %4550 = vmatprep.subr.mxu1 %v2168_v44 }
 0x847   : > { %4480 = vmatpush2.xpose.msra.mxu0 %v2165_v45  ;;  %4551 = vmatpush2.xpose.msra.mxu1 %v2167_v47 }
 0x848   : > { %4481 = vmatprep.subr.mxu0 %v2158_v48  ;;  %4552 = vmatprep.subr.mxu1 %v2160_v51 }
 0x84b   : > { %4482 = vmatpush2.xpose.msra.mxu0 %v2157_v52  ;;  %4553 = vmatpush2.xpose.msra.mxu1 %v2159_v18 }
 0x84c   : > { %4483 = vmatprep.subr.mxu0 %v2150_v19  ;;  %4554 = vmatprep.subr.mxu1 %v2152_v54 }
 0x84f   : > { %4484 = vmatpush2.xpose.msra.mxu0 %v2149_v55  ;;  %4555 = vmatpush2.xpose.msra.mxu1 %v2151_v56 }
 0x852   : > { %4486 = vmatmul.mubr.f32.vlgmr.msra.gmra.mxu0 %v4818_v57  ;;  %4557 = vmatmul.mubr.f32.vlgmr.msra.gmra.mxu1 %v4819_v58 }
 0x892   : > { %v4345_v59 = vpop.f32.mrf.mxu0  ;;  %v4416_v60 = vpop.f32.mrf.mxu1 }
 0x893   : > { %v4346_v62 = vadd.f32 %v4345_v59, %v5587_v35 }
 0x894   : > { %v4347_v61 = vpop.f32.mrf.mxu0  ;;  %v4418_v0 = vpop.f32.mrf.mxu1 }
 0x895   : > { %v4348_v63 = vadd.f32 %v4347_v61, %v5587_v35  ;;  %v4417_v1 = vadd.f32 %v4416_v60, %v4346_v62 }
 0x897   : > { %v4419_v4 = vadd.f32 %v4418_v0, %v4348_v63 }
 0x912   : > { %v4487_v2 = vpop.f32.mrf.mxu0  ;;  %v4558_v3 = vpop.f32.mrf.mxu1 }
 0x913   : > { %v4488_v5 = vadd.f32 %v4487_v2, %v4417_v1 }
 0x914   : > { %v4489_v6 = vpop.f32.mrf.mxu0  ;;  %v4560_v8 = vpop.f32.mrf.mxu1 }
 0x915   : > { %v4490_v7 = vadd.f32 %v4489_v6, %v4419_v4  ;;  %v4559_v9 = vadd.f32 %v4558_v3, %v4488_v5 }
 0x917   : > { %v4561_v10 = vadd.f32 %v4560_v8, %v4490_v7  ;;  %4610 = sbr.rel (!%p7304_p4) target bundleno = 2358 (0x936), region = 44 }
 0x919   : > { %v4586_v11 = vcombine.low %v4559_v9, %v4561_v10 }
 0x91b   : > { %4602 = vst [vmem:[%s5608_s11 + $0x38] sm:$0xff] %v4586_v11 }
 0x91c   : > { %s7314_s6 = smov (!%p4613_p13, %s4612_s6), 16 }
 0x91d   : > { %s7246_s7 = sshll.u32 %s7314_s6, 6 }
 0x91e   : > { %s4617_s8 = ssub.s32 1024, %s7246_s7 }
 0x91f   : > { %4618 = vsyncadd %s4604_s27, %s4617_s8  ;;  %p4724_p5 = scmp.ne.s32.totalorder %s7246_s7, 0  ;;  %s4733_s24 = sshll.u32 %s4989_s16, 10 }
 0x920   : > { %s4621_s19 = scalar_lea.hbm %s7295_s3, %s4733_s24  ;;  %s4624_s20 = sshll.u32 %s5608_s11, 4  ;;  %s4625_s20 = int_to_ptr.vmem [resolvable:$true] %s4624_s20 }
 0x921   : > { %s4872_s22 = scalar_lea.vmem %s4625_s20, %s7246_s7  ;;  %s4947_s30 = smov [#allocation7]  }
 0x922   : > { %p4873_p1 = scmp.ne.s32.totalorder %s4625_s20, %s4872_s22  ;;  %s4876_s4 = sshll.u32 %s4947_s30, 4  ;;  %s4877_s4 = int_to_ptr.vmem [resolvable:$false] %s4876_s4 }
 0x923   : > { %s4878_s5 = scalar_lea.vmem %s4877_s4, 2048  ;;  %p4879_p3 = scmp.lt.s32.totalorder %s4625_s20, %s4877_s4 }
 0x924   : > { %p4874_p0 = pnand %p4873_p1, %p4724_p5  ;;  %p4880_p8 = scmp.lt.s32.totalorder %s4878_s5, %s4872_s22 }
 0x926   : > { %p4875_p7 = pneg %p4874_p0  ;;  %p4881_p9 = por %p4880_p8, %p4879_p3 }
 0x928   : > { %p4882_p6 = pnand %p4881_p9, %p4875_p7 }
 0x92a   : > { %4885 = shalt.err (!%p4882_p6)
}
 0x92b   : > { %s4886_s16 = scalar_lea.hbm %s4621_s19, %s7246_s7  ;;  %s4890_s9 = scalar_lea.hbm %s7295_s3, 1344 }
 0x92c   : > { %p4887_p11 = scmp.ne.s32.totalorder %s4621_s19, %s4886_s16  ;;  %p4891_p10 = scmp.lt.s32.totalorder %s4621_s19, %s7295_s3 }
 0x92d   : > { %p4892_p4 = scmp.lt.s32.totalorder %s4890_s9, %s4886_s16 }
 0x92e   : > { %p4888_p12 = pnand %p4887_p11, %p4724_p5 }
 0x92f   : > { %p4893_p13 = por %p4892_p4, %p4891_p10 }
 0x930   : > { %p4889_p2 = pneg %p4888_p12 }
 0x932   : > { %p4894_p1 = pnand %p4893_p13, %p4889_p2 }
 0x934   : > { %4897 = shalt.err (!%p4894_p1)
}
 0x935   : > { %4627 = dma.vmem_to_hbm [thread:$0]  (%p4724_p5), %s4625_s20, %s7246_s7, %s4621_s19, %s4604_s27  }
 0x936 PF: > { %s4636_s6 = sand.u32 1, %s4928_s12   ;;  %p7305_p0 = scmp.ne.s32.totalorder %s7301_s25, 0 }
 0x937   : > { %p7306_p7 = scmp.ge.s32.totalorder %s4940_s15, 2  ;;  %s4637_s8 = scalar_lea.sflag [#allocation4], %s4636_s6 }
 0x939   : > { %p4745_p3 = pnand %p7306_p7, %p7305_p0 }
 0x93b   : > { %p4746_p8 = pneg %p4745_p3 }
 0x93d   : > { %4923 = dma.done.wait (%p4746_p8), %s4637_s8, 1024  }
 0x93e   : > { %4925 = vsyncadd (%p4746_p8), %s4637_s8, 4294966272  ;;  %p17_p9 = scmp.ge.s32.totalorder %s4993_s18, 4   ;;  %s7307_s12 = smov %s4932_s13 }
 0x93f   : > { %s7308_s13 = smov %s4936_s14  ;;  %s7309_s14 = smov %s5005_s21 }
 0x940   : > { %s7310_s15 = smov %s4993_s18  ;;  %19 = sbr.rel (!%p17_p9) target bundleno = 6 (0x6), region = 81 }
 0x945   :  { %4642 = vsyncpa [#allocation3], 1 }
 0x946   :  { %4644 = vsyncpa [#allocation3 + $0x1], 1 }
 0x947   :  { %4645 = vsyncpa [#allocation6], 1 }
 0x948   :  { %4646 = vsyncpa [#allocation4], 1 }
 0x949   :  { %4648 = vsyncpa [#allocation4 + $0x1], 1 }

</bundles_post_ra>
